<compile_context>
chip_gen: v7x
topology: tpu7x:2x2x1
jax: 0.10.0
libtpu: 0.0.40
codegen_flags: <defaults>
</compile_context>

<pallas_src>
import jax
import jax.numpy as jnp
from jax.experimental import pallas as pl
from jax.experimental.pallas import tpu as pltpu


# ---------------------------------------------------------------------------
# Module layout (matches the PyTorch InceptionC definition)
# ---------------------------------------------------------------------------

_CONV_ORDER = [
    "branch1x1",
    "branch7x7_1", "branch7x7_2", "branch7x7_3",
    "branch7x7dbl_1", "branch7x7dbl_2", "branch7x7dbl_3",
    "branch7x7dbl_4", "branch7x7dbl_5",
    "branch_pool",
]


def _conv_defs(in_channels, c7):
    # (name, cin, cout, kh, kw)
    return [
        ("branch1x1",      in_channels, 192, 1, 1),
        ("branch7x7_1",    in_channels, c7,  1, 1),
        ("branch7x7_2",    c7,          c7,  1, 7),
        ("branch7x7_3",    c7,          192, 7, 1),
        ("branch7x7dbl_1", in_channels, c7,  1, 1),
        ("branch7x7dbl_2", c7,          c7,  7, 1),
        ("branch7x7dbl_3", c7,          c7,  1, 7),
        ("branch7x7dbl_4", c7,          c7,  7, 1),
        ("branch7x7dbl_5", c7,          192, 1, 7),
        ("branch_pool",    in_channels, 192, 1, 1),
    ]


# ---------------------------------------------------------------------------
# Fused Pallas kernel: the entire InceptionC block for one batch element
# ---------------------------------------------------------------------------

def _inception_c_kernel(
        x_ref,
        w_stem, s_stem,                       # fused [b7_1 | dbl_1 | b1x1] 1x1s
        w_b7_2, s_b7_2, w_b7_3, s_b7_3,
        w_dbl_2, s_dbl_2, w_dbl_3, s_dbl_3,
        w_dbl_4, s_dbl_4, w_dbl_5, s_dbl_5,
        w_pool, s_pool,
        o_ref):
    n, H, W, Cin = x_ref.shape                 # block: (1, H, W, Cin)
    M = n * H * W
    c7 = w_b7_2.shape[-1]                      # channels_7x7

    x = x_ref[...]                             # f32, stays VMEM/vreg resident
    x_bf = x.astype(jnp.bfloat16)              # cast once

    def dot_bn_relu(lhs4, w_ref, s_ref, out_dtype):
        # Single im2col matmul on the MXU; the BN scale is already folded into
        # the bf16 weights, so the f32 epilogue is just +shift and ReLU.
        K = lhs4.shape[-1]
        cout = w_ref.shape[-1]
        y = jnp.dot(lhs4.reshape(M, K).astype(jnp.bfloat16), w_ref[...],
                    preferred_element_type=jnp.float32)
        y = jnp.maximum(y + s_ref[...], 0.0)                 # (M, cout) f32
        return y.reshape(n, H, W, cout).astype(out_dtype)

    def conv1x7(v, w_ref, s_ref, out_dtype):
        # kernel (1,7), padding (0,3): pad W in-kernel (zero concat), build an
        # im2col LHS with K = 7*C by concatenating 7 shifted windows on lanes.
        C = v.shape[-1]
        z = jnp.zeros((n, H, 3, C), v.dtype)
        vp = jnp.concatenate([z, v, z], axis=2)              # (n, H, W+6, C)
        lhs = jnp.concatenate(
            [vp[:, :, dw:dw + W, :] for dw in range(7)], axis=-1)   # (n,H,W,7C)
        return dot_bn_relu(lhs, w_ref, s_ref, out_dtype)

    def conv7x1(v, w_ref, s_ref, out_dtype):
        # kernel (7,1), padding (3,0): pad H in-kernel.
        C = v.shape[-1]
        z = jnp.zeros((n, 3, W, C), v.dtype)
        vp = jnp.concatenate([z, v, z], axis=1)              # (n, H+6, W, C)
        lhs = jnp.concatenate(
            [vp[:, dh:dh + H, :, :] for dh in range(7)], axis=-1)   # (n,H,W,7C)
        return dot_bn_relu(lhs, w_ref, s_ref, out_dtype)

    # --- fused 1x1 stem: [branch7x7_1 | branch7x7dbl_1 | branch1x1] --------
    stem = dot_bn_relu(x_bf, w_stem, s_stem, jnp.float32)    # (n,H,W, 2*c7+192)
    b7_in = stem[..., 0:c7].astype(jnp.bfloat16)             # 128-aligned slices
    bd_in = stem[..., c7:2 * c7].astype(jnp.bfloat16)
    b1 = stem[..., 2 * c7:]                                  # (n,H,W,192) f32

    # --- branch 7x7 ---------------------------------------------------------
    b7 = conv1x7(b7_in, w_b7_2, s_b7_2, jnp.bfloat16)
    b7 = conv7x1(b7, w_b7_3, s_b7_3, jnp.float32)            # (n,H,W,192)

    # --- branch 7x7 double --------------------------------------------------
    bd = conv7x1(bd_in, w_dbl_2, s_dbl_2, jnp.bfloat16)
    bd = conv1x7(bd, w_dbl_3, s_dbl_3, jnp.bfloat16)
    bd = conv7x1(bd, w_dbl_4, s_dbl_4, jnp.bfloat16)
    bd = conv1x7(bd, w_dbl_5, s_dbl_5, jnp.float32)          # (n,H,W,192)

    # --- branch pool: 3x3/s1/p1 avg pool (count_include_pad) + 1x1 conv ----
    zh = jnp.zeros((n, 1, W, Cin), x.dtype)
    xp = jnp.concatenate([zh, x, zh], axis=1)                # pad H by 1
    zw = jnp.zeros((n, H + 2, 1, Cin), x.dtype)
    xp = jnp.concatenate([zw, xp, zw], axis=2)               # pad W by 1
    pool = xp[:, 0:H, 0:W, :]                                # tap (0,0): no zero init
    for dh in range(3):
        for dw in range(3):
            if dh == 0 and dw == 0:
                continue
            pool = pool + xp[:, dh:dh + H, dw:dw + W, :]
    pool = pool * (1.0 / 9.0)                                # f32
    bp = dot_bn_relu(pool, w_pool, s_pool, jnp.float32)      # (n,H,W,192)

    # --- channel concat + single lane-dense store (768 = 6 * 128 lanes) ----
    out = jnp.concatenate([b1, b7, bd, bp], axis=-1)         # (n,H,W,768) f32
    o_ref[...] = out.astype(o_ref.dtype)


# ---------------------------------------------------------------------------
# Wrapper: one pallas_call for the whole block, grid over the batch
# ---------------------------------------------------------------------------

def inception_c_forward(x, params):
    """x: (N, H, W, Cin) f32 NHWC; params[name] = (w2d_bf16, shift_f32)."""
    N, H, W, Cin = x.shape

    # Host-side packing: fuse the three 1x1 convs that read x directly into a
    # single (Cin, c7 + c7 + 192) matrix so the kernel does one MXU matmul.
    w_b1, s_b1 = params["branch1x1"]
    w_71, s_71 = params["branch7x7_1"]
    w_d1, s_d1 = params["branch7x7dbl_1"]
    w_stem = jnp.concatenate([w_71, w_d1, w_b1], axis=1)
    s_stem = jnp.concatenate([s_71, s_d1, s_b1], axis=1)

    weight_args = [w_stem, s_stem]
    for name in ["branch7x7_2", "branch7x7_3",
                 "branch7x7dbl_2", "branch7x7dbl_3",
                 "branch7x7dbl_4", "branch7x7dbl_5",
                 "branch_pool"]:
        w2d, shift = params[name]
        weight_args += [w2d, shift]

    in_specs = [pl.BlockSpec((1, H, W, Cin), lambda i: (i, 0, 0, 0))]
    for a in weight_args:
        in_specs.append(pl.BlockSpec(a.shape, lambda i: (0, 0)))

    # NOTE: at real Inception-v3 sizes (e.g. 17x17 spatial, large batch) the
    # batch grid axis would be augmented by row tiles over N*H*W so the
    # working set still fits v7x's 64 MiB VMEM; at these shapes the per-image
    # problem (<1 MiB activations + ~2.5 MiB bf16 weights) fits comfortably.
    return pl.pallas_call(
        _inception_c_kernel,
        grid=(N,),
        out_shape=jax.ShapeDtypeStruct((N, H, W, 768), jnp.float32),
        in_specs=in_specs,
        out_specs=pl.BlockSpec((1, H, W, 768), lambda i: (i, 0, 0, 0)),
        compiler_params=pltpu.CompilerParams(
            dimension_semantics=("parallel",),       # v7x: one image per TC
            vmem_limit_bytes=32 * 1024 * 1024,
        ),
    )(x, *weight_args)


# ---------------------------------------------------------------------------
# Parameter construction (deterministic, synthetic; BN folded for inference)
# ---------------------------------------------------------------------------

def make_basic_conv2d(key, cin, cout, kh, kw):
    k1, k2, k3, k4, k5 = jax.random.split(key, 5)
    w = jax.random.normal(k1, (kh, kw, cin, cout), jnp.float32) * 0.05   # HWIO
    gamma = jax.random.uniform(k2, (cout,), jnp.float32, 0.5, 1.5)
    beta = jax.random.normal(k3, (cout,), jnp.float32) * 0.1
    mean = jax.random.normal(k4, (cout,), jnp.float32) * 0.1
    var = jax.random.uniform(k5, (cout,), jnp.float32, 0.5, 1.5)
    eps = 1e-3                                     # BatchNorm2d(eps=0.001)
    scale = gamma / jnp.sqrt(var + eps)
    shift = (beta - mean * scale).reshape(1, cout)           # f32 epilogue
    # Fold BN scale into the conv weight, pre-reshape to im2col layout
    # (kh*kw*cin, cout) and cast to bf16 for the MXU.
    w2d = (w * scale).reshape(kh * kw * cin, cout).astype(jnp.bfloat16)
    return w2d, shift


def make_inception_c_params(key, in_channels, channels_7x7):
    defs = _conv_defs(in_channels, channels_7x7)
    keys = jax.random.split(key, len(defs))
    return {name: make_basic_conv2d(k, cin, cout, kh, kw)
            for k, (name, cin, cout, kh, kw) in zip(keys, defs)}


# ---------------------------------------------------------------------------
# Pure-JAX reference (same folded bf16 weights, f32 accumulation)
# ---------------------------------------------------------------------------

def _ref_conv_bn_relu(v, w2d, shift, kh, kw, cin, cout):
    w4 = w2d.reshape(kh, kw, cin, cout)            # bf16, BN-scale folded
    ph, pw = (kh - 1) // 2, (kw - 1) // 2
    y = jax.lax.conv_general_dilated(
        v.astype(jnp.bfloat16), w4,
        window_strides=(1, 1), padding=((ph, ph), (pw, pw)),
        dimension_numbers=("NHWC", "HWIO", "NHWC"),
        preferred_element_type=jnp.float32)
    return jnp.maximum(y + shift.reshape(1, 1, 1, cout), 0.0)


def inception_c_ref(x, params, in_channels, channels_7x7):
    defs = {name: (cin, cout, kh, kw)
            for (name, cin, cout, kh, kw) in _conv_defs(in_channels, channels_7x7)}

    def conv(name, v):
        cin, cout, kh, kw = defs[name]
        w2d, shift = params[name]
        return _ref_conv_bn_relu(v, w2d, shift, kh, kw, cin, cout)

    b1 = conv("branch1x1", x)

    b7 = conv("branch7x7_1", x)
    b7 = conv("branch7x7_2", b7)
    b7 = conv("branch7x7_3", b7)

    bd = conv("branch7x7dbl_1", x)
    bd = conv("branch7x7dbl_2", bd)
    bd = conv("branch7x7dbl_3", bd)
    bd = conv("branch7x7dbl_4", bd)
    bd = conv("branch7x7dbl_5", bd)

    pooled = jax.lax.reduce_window(
        x, 0.0, jax.lax.add, (1, 3, 3, 1), (1, 1, 1, 1),
        padding=((0, 0), (1, 1), (1, 1), (0, 0))) / 9.0
    bp = conv("branch_pool", pooled)

    return jnp.concatenate([b1, b7, bd, bp], axis=-1)


# ---------------------------------------------------------------------------

if __name__ == "__main__":
    key = jax.random.PRNGKey(0)
    k_x, k_p = jax.random.split(key)

    # InceptionC(736, channels_7x7=128) -- the actual channel config used by
    # InceptionChessClassifier_2path -- on a small (chess-board-sized) map.
    N, H, W = 2, 8, 8
    in_channels, channels_7x7 = 736, 128

    x = jax.random.normal(k_x, (N, H, W, in_channels), jnp.float32)   # NHWC
    params = make_inception_c_params(k_p, in_channels, channels_7x7)

    fwd = jax.jit(inception_c_forward)
    out = jax.block_until_ready(fwd(x, params))
    assert out.shape == (N, H, W, 768), out.shape     # 192 * 4 channels

    ref = jax.block_until_ready(
        inception_c_ref(x, params, in_channels, channels_7x7))
    max_err = float(jnp.max(jnp.abs(out - ref)))
    # Both paths use the same folded bf16 weights with f32 accumulation, so
    # only reduction-order differences remain -> tight tolerance is safe.
    assert max_err < 1e-2, f"mismatch vs reference: max abs err {max_err}"

    print("KERNEL_OK")
</pallas_src>

<mosaic_0001>
module attributes {stable_mosaic.version = 11 : i64} {
  func.func @_inception_c_kernel(%arg0: i32, %arg1: memref<1x8x8x736xf32, #tpu.memory_space<vmem>>, %arg2: memref<736x448xbf16, #tpu.memory_space<vmem>>, %arg3: memref<1x448xf32, #tpu.memory_space<vmem>>, %arg4: memref<896x128xbf16, #tpu.memory_space<vmem>>, %arg5: memref<1x128xf32, #tpu.memory_space<vmem>>, %arg6: memref<896x192xbf16, #tpu.memory_space<vmem>>, %arg7: memref<1x192xf32, #tpu.memory_space<vmem>>, %arg8: memref<896x128xbf16, #tpu.memory_space<vmem>>, %arg9: memref<1x128xf32, #tpu.memory_space<vmem>>, %arg10: memref<896x128xbf16, #tpu.memory_space<vmem>>, %arg11: memref<1x128xf32, #tpu.memory_space<vmem>>, %arg12: memref<896x128xbf16, #tpu.memory_space<vmem>>, %arg13: memref<1x128xf32, #tpu.memory_space<vmem>>, %arg14: memref<896x192xbf16, #tpu.memory_space<vmem>>, %arg15: memref<1x192xf32, #tpu.memory_space<vmem>>, %arg16: memref<736x192xbf16, #tpu.memory_space<vmem>>, %arg17: memref<1x192xf32, #tpu.memory_space<vmem>>, %arg18: memref<1x8x8x768xf32, #tpu.memory_space<vmem>>) attributes {dimension_semantics = [#tpu.dimension_semantics<parallel>], iteration_bounds = array<i64: 2>, scalar_prefetch = 0 : i64, scratch_operands = 0 : i64, tpu.core_type = #tpu.core_type<tc>, window_params = [{transform_indices = @transform_0, window_bounds = array<i64: 1, 8, 8, 736>}, {pipeline_mode = #tpu.pipeline_mode<synchronous>, transform_indices = @transform_1, window_bounds = array<i64: 736, 448>}, {pipeline_mode = #tpu.pipeline_mode<synchronous>, transform_indices = @transform_2, window_bounds = array<i64: 1, 448>}, {pipeline_mode = #tpu.pipeline_mode<synchronous>, transform_indices = @transform_3, window_bounds = array<i64: 896, 128>}, {pipeline_mode = #tpu.pipeline_mode<synchronous>, transform_indices = @transform_4, window_bounds = array<i64: 1, 128>}, {pipeline_mode = #tpu.pipeline_mode<synchronous>, transform_indices = @transform_5, window_bounds = array<i64: 896, 192>}, {pipeline_mode = #tpu.pipeline_mode<synchronous>, transform_indices = @transform_6, window_bounds = array<i64: 1, 192>}, {pipeline_mode = #tpu.pipeline_mode<synchronous>, transform_indices = @transform_7, window_bounds = array<i64: 896, 128>}, {pipeline_mode = #tpu.pipeline_mode<synchronous>, transform_indices = @transform_8, window_bounds = array<i64: 1, 128>}, {pipeline_mode = #tpu.pipeline_mode<synchronous>, transform_indices = @transform_9, window_bounds = array<i64: 896, 128>}, {pipeline_mode = #tpu.pipeline_mode<synchronous>, transform_indices = @transform_10, window_bounds = array<i64: 1, 128>}, {pipeline_mode = #tpu.pipeline_mode<synchronous>, transform_indices = @transform_11, window_bounds = array<i64: 896, 128>}, {pipeline_mode = #tpu.pipeline_mode<synchronous>, transform_indices = @transform_12, window_bounds = array<i64: 1, 128>}, {pipeline_mode = #tpu.pipeline_mode<synchronous>, transform_indices = @transform_13, window_bounds = array<i64: 896, 192>}, {pipeline_mode = #tpu.pipeline_mode<synchronous>, transform_indices = @transform_14, window_bounds = array<i64: 1, 192>}, {pipeline_mode = #tpu.pipeline_mode<synchronous>, transform_indices = @transform_15, window_bounds = array<i64: 736, 192>}, {pipeline_mode = #tpu.pipeline_mode<synchronous>, transform_indices = @transform_16, window_bounds = array<i64: 1, 192>}, {transform_indices = @transform_17, window_bounds = array<i64: 1, 8, 8, 768>}]} {
    %c0 = arith.constant 0 : index
    %c0_0 = arith.constant 0 : index
    %c0_1 = arith.constant 0 : index
    %c0_2 = arith.constant 0 : index
    %0 = vector.load %arg1[%c0, %c0_0, %c0_1, %c0_2] : memref<1x8x8x736xf32, #tpu.memory_space<vmem>>, vector<1x8x8x736xf32>
    %1 = arith.truncf %0 : vector<1x8x8x736xf32> to vector<1x8x8x736xbf16>
    %2 = vector.shape_cast %1 : vector<1x8x8x736xbf16> to vector<64x736xbf16>
    %c0_3 = arith.constant 0 : index
    %c0_4 = arith.constant 0 : index
    %3 = vector.load %arg2[%c0_3, %c0_4] : memref<736x448xbf16, #tpu.memory_space<vmem>>, vector<736x448xbf16>
    %cst = arith.constant dense<0.000000e+00> : vector<64x448xf32>
    %4 = tpu.matmul %2, %3, %cst {dimension_numbers = #tpu.dot_dimension_numbers<[1], [0], [0], [1], [0, 0, 1, 1], [], []>} : vector<64x736xbf16>, vector<736x448xbf16>, vector<64x448xf32> -> vector<64x448xf32>
    %c0_5 = arith.constant 0 : index
    %c0_6 = arith.constant 0 : index
    %5 = vector.load %arg3[%c0_5, %c0_6] : memref<1x448xf32, #tpu.memory_space<vmem>>, vector<1x448xf32>
    %6 = vector.broadcast %5 : vector<1x448xf32> to vector<64x448xf32>
    %7 = arith.addf %4, %6 : vector<64x448xf32>
    %cst_7 = arith.constant 0.000000e+00 : f32
    %8 = vector.broadcast %cst_7 : f32 to vector<64x448xf32>
    %9 = arith.maximumf %7, %8 : vector<64x448xf32>
    %10 = vector.shape_cast %9 : vector<64x448xf32> to vector<1x8x8x448xf32>
    %11 = vector.extract_strided_slice %10 {offsets = [0, 0, 0, 0], sizes = [1, 8, 8, 128], strides = [1, 1, 1, 1]} : vector<1x8x8x448xf32> to vector<1x8x8x128xf32>
    %12 = arith.truncf %11 : vector<1x8x8x128xf32> to vector<1x8x8x128xbf16>
    %13 = vector.extract_strided_slice %10 {offsets = [0, 0, 0, 128], sizes = [1, 8, 8, 128], strides = [1, 1, 1, 1]} : vector<1x8x8x448xf32> to vector<1x8x8x128xf32>
    %14 = arith.truncf %13 : vector<1x8x8x128xf32> to vector<1x8x8x128xbf16>
    %15 = vector.extract_strided_slice %10 {offsets = [0, 0, 0, 256], sizes = [1, 8, 8, 192], strides = [1, 1, 1, 1]} : vector<1x8x8x448xf32> to vector<1x8x8x192xf32>
    %cst_8 = arith.constant 0.000000e+00 : bf16
    %16 = vector.broadcast %cst_8 : bf16 to vector<1x8x3x128xbf16>
    %17 = tpu.concatenate %16, %12, %16 in 2 : vector<1x8x3x128xbf16>, vector<1x8x8x128xbf16>, vector<1x8x3x128xbf16> -> vector<1x8x14x128xbf16>
    %18 = vector.extract_strided_slice %17 {offsets = [0, 0, 0, 0], sizes = [1, 8, 8, 128], strides = [1, 1, 1, 1]} : vector<1x8x14x128xbf16> to vector<1x8x8x128xbf16>
    %19 = vector.extract_strided_slice %17 {offsets = [0, 0, 1, 0], sizes = [1, 8, 8, 128], strides = [1, 1, 1, 1]} : vector<1x8x14x128xbf16> to vector<1x8x8x128xbf16>
    %20 = vector.extract_strided_slice %17 {offsets = [0, 0, 2, 0], sizes = [1, 8, 8, 128], strides = [1, 1, 1, 1]} : vector<1x8x14x128xbf16> to vector<1x8x8x128xbf16>
    %21 = vector.extract_strided_slice %17 {offsets = [0, 0, 3, 0], sizes = [1, 8, 8, 128], strides = [1, 1, 1, 1]} : vector<1x8x14x128xbf16> to vector<1x8x8x128xbf16>
    %22 = vector.extract_strided_slice %17 {offsets = [0, 0, 4, 0], sizes = [1, 8, 8, 128], strides = [1, 1, 1, 1]} : vector<1x8x14x128xbf16> to vector<1x8x8x128xbf16>
    %23 = vector.extract_strided_slice %17 {offsets = [0, 0, 5, 0], sizes = [1, 8, 8, 128], strides = [1, 1, 1, 1]} : vector<1x8x14x128xbf16> to vector<1x8x8x128xbf16>
    %24 = vector.extract_strided_slice %17 {offsets = [0, 0, 6, 0], sizes = [1, 8, 8, 128], strides = [1, 1, 1, 1]} : vector<1x8x14x128xbf16> to vector<1x8x8x128xbf16>
    %25 = tpu.concatenate %18, %19, %20, %21, %22, %23, %24 in 3 : vector<1x8x8x128xbf16>, vector<1x8x8x128xbf16>, vector<1x8x8x128xbf16>, vector<1x8x8x128xbf16>, vector<1x8x8x128xbf16>, vector<1x8x8x128xbf16>, vector<1x8x8x128xbf16> -> vector<1x8x8x896xbf16>
    %26 = vector.shape_cast %25 : vector<1x8x8x896xbf16> to vector<64x896xbf16>
    %c0_9 = arith.constant 0 : index
    %c0_10 = arith.constant 0 : index
    %27 = vector.load %arg4[%c0_9, %c0_10] : memref<896x128xbf16, #tpu.memory_space<vmem>>, vector<896x128xbf16>
    %cst_11 = arith.constant dense<0.000000e+00> : vector<64x128xf32>
    %28 = tpu.matmul %26, %27, %cst_11 {dimension_numbers = #tpu.dot_dimension_numbers<[1], [0], [0], [1], [0, 0, 1, 1], [], []>} : vector<64x896xbf16>, vector<896x128xbf16>, vector<64x128xf32> -> vector<64x128xf32>
    %c0_12 = arith.constant 0 : index
    %c0_13 = arith.constant 0 : index
    %29 = vector.load %arg5[%c0_12, %c0_13] : memref<1x128xf32, #tpu.memory_space<vmem>>, vector<1x128xf32>
    %30 = vector.broadcast %29 : vector<1x128xf32> to vector<64x128xf32>
    %31 = arith.addf %28, %30 : vector<64x128xf32>
    %cst_14 = arith.constant 0.000000e+00 : f32
    %32 = vector.broadcast %cst_14 : f32 to vector<64x128xf32>
    %33 = arith.maximumf %31, %32 : vector<64x128xf32>
    %34 = vector.shape_cast %33 : vector<64x128xf32> to vector<1x8x8x128xf32>
    %35 = arith.truncf %34 : vector<1x8x8x128xf32> to vector<1x8x8x128xbf16>
    %cst_15 = arith.constant 0.000000e+00 : bf16
    %36 = vector.broadcast %cst_15 : bf16 to vector<1x3x8x128xbf16>
    %37 = tpu.concatenate %36, %35, %36 in 1 : vector<1x3x8x128xbf16>, vector<1x8x8x128xbf16>, vector<1x3x8x128xbf16> -> vector<1x14x8x128xbf16>
    %38 = vector.extract_strided_slice %37 {offsets = [0, 0, 0, 0], sizes = [1, 8, 8, 128], strides = [1, 1, 1, 1]} : vector<1x14x8x128xbf16> to vector<1x8x8x128xbf16>
    %39 = vector.extract_strided_slice %37 {offsets = [0, 1, 0, 0], sizes = [1, 8, 8, 128], strides = [1, 1, 1, 1]} : vector<1x14x8x128xbf16> to vector<1x8x8x128xbf16>
    %40 = vector.extract_strided_slice %37 {offsets = [0, 2, 0, 0], sizes = [1, 8, 8, 128], strides = [1, 1, 1, 1]} : vector<1x14x8x128xbf16> to vector<1x8x8x128xbf16>
    %41 = vector.extract_strided_slice %37 {offsets = [0, 3, 0, 0], sizes = [1, 8, 8, 128], strides = [1, 1, 1, 1]} : vector<1x14x8x128xbf16> to vector<1x8x8x128xbf16>
    %42 = vector.extract_strided_slice %37 {offsets = [0, 4, 0, 0], sizes = [1, 8, 8, 128], strides = [1, 1, 1, 1]} : vector<1x14x8x128xbf16> to vector<1x8x8x128xbf16>
    %43 = vector.extract_strided_slice %37 {offsets = [0, 5, 0, 0], sizes = [1, 8, 8, 128], strides = [1, 1, 1, 1]} : vector<1x14x8x128xbf16> to vector<1x8x8x128xbf16>
    %44 = vector.extract_strided_slice %37 {offsets = [0, 6, 0, 0], sizes = [1, 8, 8, 128], strides = [1, 1, 1, 1]} : vector<1x14x8x128xbf16> to vector<1x8x8x128xbf16>
    %45 = tpu.concatenate %38, %39, %40, %41, %42, %43, %44 in 3 : vector<1x8x8x128xbf16>, vector<1x8x8x128xbf16>, vector<1x8x8x128xbf16>, vector<1x8x8x128xbf16>, vector<1x8x8x128xbf16>, vector<1x8x8x128xbf16>, vector<1x8x8x128xbf16> -> vector<1x8x8x896xbf16>
    %46 = vector.shape_cast %45 : vector<1x8x8x896xbf16> to vector<64x896xbf16>
    %c0_16 = arith.constant 0 : index
    %c0_17 = arith.constant 0 : index
    %47 = vector.load %arg6[%c0_16, %c0_17] : memref<896x192xbf16, #tpu.memory_space<vmem>>, vector<896x192xbf16>
    %cst_18 = arith.constant dense<0.000000e+00> : vector<64x192xf32>
    %48 = tpu.matmul %46, %47, %cst_18 {dimension_numbers = #tpu.dot_dimension_numbers<[1], [0], [0], [1], [0, 0, 1, 1], [], []>} : vector<64x896xbf16>, vector<896x192xbf16>, vector<64x192xf32> -> vector<64x192xf32>
    %c0_19 = arith.constant 0 : index
    %c0_20 = arith.constant 0 : index
    %49 = vector.load %arg7[%c0_19, %c0_20] : memref<1x192xf32, #tpu.memory_space<vmem>>, vector<1x192xf32>
    %50 = vector.broadcast %49 : vector<1x192xf32> to vector<64x192xf32>
    %51 = arith.addf %48, %50 : vector<64x192xf32>
    %cst_21 = arith.constant 0.000000e+00 : f32
    %52 = vector.broadcast %cst_21 : f32 to vector<64x192xf32>
    %53 = arith.maximumf %51, %52 : vector<64x192xf32>
    %54 = vector.shape_cast %53 : vector<64x192xf32> to vector<1x8x8x192xf32>
    %cst_22 = arith.constant 0.000000e+00 : bf16
    %55 = vector.broadcast %cst_22 : bf16 to vector<1x3x8x128xbf16>
    %56 = tpu.concatenate %55, %14, %55 in 1 : vector<1x3x8x128xbf16>, vector<1x8x8x128xbf16>, vector<1x3x8x128xbf16> -> vector<1x14x8x128xbf16>
    %57 = vector.extract_strided_slice %56 {offsets = [0, 0, 0, 0], sizes = [1, 8, 8, 128], strides = [1, 1, 1, 1]} : vector<1x14x8x128xbf16> to vector<1x8x8x128xbf16>
    %58 = vector.extract_strided_slice %56 {offsets = [0, 1, 0, 0], sizes = [1, 8, 8, 128], strides = [1, 1, 1, 1]} : vector<1x14x8x128xbf16> to vector<1x8x8x128xbf16>
    %59 = vector.extract_strided_slice %56 {offsets = [0, 2, 0, 0], sizes = [1, 8, 8, 128], strides = [1, 1, 1, 1]} : vector<1x14x8x128xbf16> to vector<1x8x8x128xbf16>
    %60 = vector.extract_strided_slice %56 {offsets = [0, 3, 0, 0], sizes = [1, 8, 8, 128], strides = [1, 1, 1, 1]} : vector<1x14x8x128xbf16> to vector<1x8x8x128xbf16>
    %61 = vector.extract_strided_slice %56 {offsets = [0, 4, 0, 0], sizes = [1, 8, 8, 128], strides = [1, 1, 1, 1]} : vector<1x14x8x128xbf16> to vector<1x8x8x128xbf16>
    %62 = vector.extract_strided_slice %56 {offsets = [0, 5, 0, 0], sizes = [1, 8, 8, 128], strides = [1, 1, 1, 1]} : vector<1x14x8x128xbf16> to vector<1x8x8x128xbf16>
    %63 = vector.extract_strided_slice %56 {offsets = [0, 6, 0, 0], sizes = [1, 8, 8, 128], strides = [1, 1, 1, 1]} : vector<1x14x8x128xbf16> to vector<1x8x8x128xbf16>
    %64 = tpu.concatenate %57, %58, %59, %60, %61, %62, %63 in 3 : vector<1x8x8x128xbf16>, vector<1x8x8x128xbf16>, vector<1x8x8x128xbf16>, vector<1x8x8x128xbf16>, vector<1x8x8x128xbf16>, vector<1x8x8x128xbf16>, vector<1x8x8x128xbf16> -> vector<1x8x8x896xbf16>
    %65 = vector.shape_cast %64 : vector<1x8x8x896xbf16> to vector<64x896xbf16>
    %c0_23 = arith.constant 0 : index
    %c0_24 = arith.constant 0 : index
    %66 = vector.load %arg8[%c0_23, %c0_24] : memref<896x128xbf16, #tpu.memory_space<vmem>>, vector<896x128xbf16>
    %cst_25 = arith.constant dense<0.000000e+00> : vector<64x128xf32>
    %67 = tpu.matmul %65, %66, %cst_25 {dimension_numbers = #tpu.dot_dimension_numbers<[1], [0], [0], [1], [0, 0, 1, 1], [], []>} : vector<64x896xbf16>, vector<896x128xbf16>, vector<64x128xf32> -> vector<64x128xf32>
    %c0_26 = arith.constant 0 : index
    %c0_27 = arith.constant 0 : index
    %68 = vector.load %arg9[%c0_26, %c0_27] : memref<1x128xf32, #tpu.memory_space<vmem>>, vector<1x128xf32>
    %69 = vector.broadcast %68 : vector<1x128xf32> to vector<64x128xf32>
    %70 = arith.addf %67, %69 : vector<64x128xf32>
    %cst_28 = arith.constant 0.000000e+00 : f32
    %71 = vector.broadcast %cst_28 : f32 to vector<64x128xf32>
    %72 = arith.maximumf %70, %71 : vector<64x128xf32>
    %73 = vector.shape_cast %72 : vector<64x128xf32> to vector<1x8x8x128xf32>
    %74 = arith.truncf %73 : vector<1x8x8x128xf32> to vector<1x8x8x128xbf16>
    %cst_29 = arith.constant 0.000000e+00 : bf16
    %75 = vector.broadcast %cst_29 : bf16 to vector<1x8x3x128xbf16>
    %76 = tpu.concatenate %75, %74, %75 in 2 : vector<1x8x3x128xbf16>, vector<1x8x8x128xbf16>, vector<1x8x3x128xbf16> -> vector<1x8x14x128xbf16>
    %77 = vector.extract_strided_slice %76 {offsets = [0, 0, 0, 0], sizes = [1, 8, 8, 128], strides = [1, 1, 1, 1]} : vector<1x8x14x128xbf16> to vector<1x8x8x128xbf16>
    %78 = vector.extract_strided_slice %76 {offsets = [0, 0, 1, 0], sizes = [1, 8, 8, 128], strides = [1, 1, 1, 1]} : vector<1x8x14x128xbf16> to vector<1x8x8x128xbf16>
    %79 = vector.extract_strided_slice %76 {offsets = [0, 0, 2, 0], sizes = [1, 8, 8, 128], strides = [1, 1, 1, 1]} : vector<1x8x14x128xbf16> to vector<1x8x8x128xbf16>
    %80 = vector.extract_strided_slice %76 {offsets = [0, 0, 3, 0], sizes = [1, 8, 8, 128], strides = [1, 1, 1, 1]} : vector<1x8x14x128xbf16> to vector<1x8x8x128xbf16>
    %81 = vector.extract_strided_slice %76 {offsets = [0, 0, 4, 0], sizes = [1, 8, 8, 128], strides = [1, 1, 1, 1]} : vector<1x8x14x128xbf16> to vector<1x8x8x128xbf16>
    %82 = vector.extract_strided_slice %76 {offsets = [0, 0, 5, 0], sizes = [1, 8, 8, 128], strides = [1, 1, 1, 1]} : vector<1x8x14x128xbf16> to vector<1x8x8x128xbf16>
    %83 = vector.extract_strided_slice %76 {offsets = [0, 0, 6, 0], sizes = [1, 8, 8, 128], strides = [1, 1, 1, 1]} : vector<1x8x14x128xbf16> to vector<1x8x8x128xbf16>
    %84 = tpu.concatenate %77, %78, %79, %80, %81, %82, %83 in 3 : vector<1x8x8x128xbf16>, vector<1x8x8x128xbf16>, vector<1x8x8x128xbf16>, vector<1x8x8x128xbf16>, vector<1x8x8x128xbf16>, vector<1x8x8x128xbf16>, vector<1x8x8x128xbf16> -> vector<1x8x8x896xbf16>
    %85 = vector.shape_cast %84 : vector<1x8x8x896xbf16> to vector<64x896xbf16>
    %c0_30 = arith.constant 0 : index
    %c0_31 = arith.constant 0 : index
    %86 = vector.load %arg10[%c0_30, %c0_31] : memref<896x128xbf16, #tpu.memory_space<vmem>>, vector<896x128xbf16>
    %cst_32 = arith.constant dense<0.000000e+00> : vector<64x128xf32>
    %87 = tpu.matmul %85, %86, %cst_32 {dimension_numbers = #tpu.dot_dimension_numbers<[1], [0], [0], [1], [0, 0, 1, 1], [], []>} : vector<64x896xbf16>, vector<896x128xbf16>, vector<64x128xf32> -> vector<64x128xf32>
    %c0_33 = arith.constant 0 : index
    %c0_34 = arith.constant 0 : index
    %88 = vector.load %arg11[%c0_33, %c0_34] : memref<1x128xf32, #tpu.memory_space<vmem>>, vector<1x128xf32>
    %89 = vector.broadcast %88 : vector<1x128xf32> to vector<64x128xf32>
    %90 = arith.addf %87, %89 : vector<64x128xf32>
    %cst_35 = arith.constant 0.000000e+00 : f32
    %91 = vector.broadcast %cst_35 : f32 to vector<64x128xf32>
    %92 = arith.maximumf %90, %91 : vector<64x128xf32>
    %93 = vector.shape_cast %92 : vector<64x128xf32> to vector<1x8x8x128xf32>
    %94 = arith.truncf %93 : vector<1x8x8x128xf32> to vector<1x8x8x128xbf16>
    %cst_36 = arith.constant 0.000000e+00 : bf16
    %95 = vector.broadcast %cst_36 : bf16 to vector<1x3x8x128xbf16>
    %96 = tpu.concatenate %95, %94, %95 in 1 : vector<1x3x8x128xbf16>, vector<1x8x8x128xbf16>, vector<1x3x8x128xbf16> -> vector<1x14x8x128xbf16>
    %97 = vector.extract_strided_slice %96 {offsets = [0, 0, 0, 0], sizes = [1, 8, 8, 128], strides = [1, 1, 1, 1]} : vector<1x14x8x128xbf16> to vector<1x8x8x128xbf16>
    %98 = vector.extract_strided_slice %96 {offsets = [0, 1, 0, 0], sizes = [1, 8, 8, 128], strides = [1, 1, 1, 1]} : vector<1x14x8x128xbf16> to vector<1x8x8x128xbf16>
    %99 = vector.extract_strided_slice %96 {offsets = [0, 2, 0, 0], sizes = [1, 8, 8, 128], strides = [1, 1, 1, 1]} : vector<1x14x8x128xbf16> to vector<1x8x8x128xbf16>
    %100 = vector.extract_strided_slice %96 {offsets = [0, 3, 0, 0], sizes = [1, 8, 8, 128], strides = [1, 1, 1, 1]} : vector<1x14x8x128xbf16> to vector<1x8x8x128xbf16>
    %101 = vector.extract_strided_slice %96 {offsets = [0, 4, 0, 0], sizes = [1, 8, 8, 128], strides = [1, 1, 1, 1]} : vector<1x14x8x128xbf16> to vector<1x8x8x128xbf16>
    %102 = vector.extract_strided_slice %96 {offsets = [0, 5, 0, 0], sizes = [1, 8, 8, 128], strides = [1, 1, 1, 1]} : vector<1x14x8x128xbf16> to vector<1x8x8x128xbf16>
    %103 = vector.extract_strided_slice %96 {offsets = [0, 6, 0, 0], sizes = [1, 8, 8, 128], strides = [1, 1, 1, 1]} : vector<1x14x8x128xbf16> to vector<1x8x8x128xbf16>
    %104 = tpu.concatenate %97, %98, %99, %100, %101, %102, %103 in 3 : vector<1x8x8x128xbf16>, vector<1x8x8x128xbf16>, vector<1x8x8x128xbf16>, vector<1x8x8x128xbf16>, vector<1x8x8x128xbf16>, vector<1x8x8x128xbf16>, vector<1x8x8x128xbf16> -> vector<1x8x8x896xbf16>
    %105 = vector.shape_cast %104 : vector<1x8x8x896xbf16> to vector<64x896xbf16>
    %c0_37 = arith.constant 0 : index
    %c0_38 = arith.constant 0 : index
    %106 = vector.load %arg12[%c0_37, %c0_38] : memref<896x128xbf16, #tpu.memory_space<vmem>>, vector<896x128xbf16>
    %cst_39 = arith.constant dense<0.000000e+00> : vector<64x128xf32>
    %107 = tpu.matmul %105, %106, %cst_39 {dimension_numbers = #tpu.dot_dimension_numbers<[1], [0], [0], [1], [0, 0, 1, 1], [], []>} : vector<64x896xbf16>, vector<896x128xbf16>, vector<64x128xf32> -> vector<64x128xf32>
    %c0_40 = arith.constant 0 : index
    %c0_41 = arith.constant 0 : index
    %108 = vector.load %arg13[%c0_40, %c0_41] : memref<1x128xf32, #tpu.memory_space<vmem>>, vector<1x128xf32>
    %109 = vector.broadcast %108 : vector<1x128xf32> to vector<64x128xf32>
    %110 = arith.addf %107, %109 : vector<64x128xf32>
    %cst_42 = arith.constant 0.000000e+00 : f32
    %111 = vector.broadcast %cst_42 : f32 to vector<64x128xf32>
    %112 = arith.maximumf %110, %111 : vector<64x128xf32>
    %113 = vector.shape_cast %112 : vector<64x128xf32> to vector<1x8x8x128xf32>
    %114 = arith.truncf %113 : vector<1x8x8x128xf32> to vector<1x8x8x128xbf16>
    %cst_43 = arith.constant 0.000000e+00 : bf16
    %115 = vector.broadcast %cst_43 : bf16 to vector<1x8x3x128xbf16>
    %116 = tpu.concatenate %115, %114, %115 in 2 : vector<1x8x3x128xbf16>, vector<1x8x8x128xbf16>, vector<1x8x3x128xbf16> -> vector<1x8x14x128xbf16>
    %117 = vector.extract_strided_slice %116 {offsets = [0, 0, 0, 0], sizes = [1, 8, 8, 128], strides = [1, 1, 1, 1]} : vector<1x8x14x128xbf16> to vector<1x8x8x128xbf16>
    %118 = vector.extract_strided_slice %116 {offsets = [0, 0, 1, 0], sizes = [1, 8, 8, 128], strides = [1, 1, 1, 1]} : vector<1x8x14x128xbf16> to vector<1x8x8x128xbf16>
    %119 = vector.extract_strided_slice %116 {offsets = [0, 0, 2, 0], sizes = [1, 8, 8, 128], strides = [1, 1, 1, 1]} : vector<1x8x14x128xbf16> to vector<1x8x8x128xbf16>
    %120 = vector.extract_strided_slice %116 {offsets = [0, 0, 3, 0], sizes = [1, 8, 8, 128], strides = [1, 1, 1, 1]} : vector<1x8x14x128xbf16> to vector<1x8x8x128xbf16>
    %121 = vector.extract_strided_slice %116 {offsets = [0, 0, 4, 0], sizes = [1, 8, 8, 128], strides = [1, 1, 1, 1]} : vector<1x8x14x128xbf16> to vector<1x8x8x128xbf16>
    %122 = vector.extract_strided_slice %116 {offsets = [0, 0, 5, 0], sizes = [1, 8, 8, 128], strides = [1, 1, 1, 1]} : vector<1x8x14x128xbf16> to vector<1x8x8x128xbf16>
    %123 = vector.extract_strided_slice %116 {offsets = [0, 0, 6, 0], sizes = [1, 8, 8, 128], strides = [1, 1, 1, 1]} : vector<1x8x14x128xbf16> to vector<1x8x8x128xbf16>
    %124 = tpu.concatenate %117, %118, %119, %120, %121, %122, %123 in 3 : vector<1x8x8x128xbf16>, vector<1x8x8x128xbf16>, vector<1x8x8x128xbf16>, vector<1x8x8x128xbf16>, vector<1x8x8x128xbf16>, vector<1x8x8x128xbf16>, vector<1x8x8x128xbf16> -> vector<1x8x8x896xbf16>
    %125 = vector.shape_cast %124 : vector<1x8x8x896xbf16> to vector<64x896xbf16>
    %c0_44 = arith.constant 0 : index
    %c0_45 = arith.constant 0 : index
    %126 = vector.load %arg14[%c0_44, %c0_45] : memref<896x192xbf16, #tpu.memory_space<vmem>>, vector<896x192xbf16>
    %cst_46 = arith.constant dense<0.000000e+00> : vector<64x192xf32>
    %127 = tpu.matmul %125, %126, %cst_46 {dimension_numbers = #tpu.dot_dimension_numbers<[1], [0], [0], [1], [0, 0, 1, 1], [], []>} : vector<64x896xbf16>, vector<896x192xbf16>, vector<64x192xf32> -> vector<64x192xf32>
    %c0_47 = arith.constant 0 : index
    %c0_48 = arith.constant 0 : index
    %128 = vector.load %arg15[%c0_47, %c0_48] : memref<1x192xf32, #tpu.memory_space<vmem>>, vector<1x192xf32>
    %129 = vector.broadcast %128 : vector<1x192xf32> to vector<64x192xf32>
    %130 = arith.addf %127, %129 : vector<64x192xf32>
    %cst_49 = arith.constant 0.000000e+00 : f32
    %131 = vector.broadcast %cst_49 : f32 to vector<64x192xf32>
    %132 = arith.maximumf %130, %131 : vector<64x192xf32>
    %133 = vector.shape_cast %132 : vector<64x192xf32> to vector<1x8x8x192xf32>
    %cst_50 = arith.constant 0.000000e+00 : f32
    %134 = vector.broadcast %cst_50 : f32 to vector<1x1x8x736xf32>
    %135 = tpu.concatenate %134, %0, %134 in 1 : vector<1x1x8x736xf32>, vector<1x8x8x736xf32>, vector<1x1x8x736xf32> -> vector<1x10x8x736xf32>
    %cst_51 = arith.constant 0.000000e+00 : f32
    %136 = vector.broadcast %cst_51 : f32 to vector<1x10x1x736xf32>
    %137 = tpu.concatenate %136, %135, %136 in 2 : vector<1x10x1x736xf32>, vector<1x10x8x736xf32>, vector<1x10x1x736xf32> -> vector<1x10x10x736xf32>
    %138 = vector.extract_strided_slice %137 {offsets = [0, 0, 0, 0], sizes = [1, 8, 8, 736], strides = [1, 1, 1, 1]} : vector<1x10x10x736xf32> to vector<1x8x8x736xf32>
    %139 = vector.extract_strided_slice %137 {offsets = [0, 0, 1, 0], sizes = [1, 8, 8, 736], strides = [1, 1, 1, 1]} : vector<1x10x10x736xf32> to vector<1x8x8x736xf32>
    %140 = arith.addf %138, %139 : vector<1x8x8x736xf32>
    %141 = vector.extract_strided_slice %137 {offsets = [0, 0, 2, 0], sizes = [1, 8, 8, 736], strides = [1, 1, 1, 1]} : vector<1x10x10x736xf32> to vector<1x8x8x736xf32>
    %142 = arith.addf %140, %141 : vector<1x8x8x736xf32>
    %143 = vector.extract_strided_slice %137 {offsets = [0, 1, 0, 0], sizes = [1, 8, 8, 736], strides = [1, 1, 1, 1]} : vector<1x10x10x736xf32> to vector<1x8x8x736xf32>
    %144 = arith.addf %142, %143 : vector<1x8x8x736xf32>
    %145 = vector.extract_strided_slice %137 {offsets = [0, 1, 1, 0], sizes = [1, 8, 8, 736], strides = [1, 1, 1, 1]} : vector<1x10x10x736xf32> to vector<1x8x8x736xf32>
    %146 = arith.addf %144, %145 : vector<1x8x8x736xf32>
    %147 = vector.extract_strided_slice %137 {offsets = [0, 1, 2, 0], sizes = [1, 8, 8, 736], strides = [1, 1, 1, 1]} : vector<1x10x10x736xf32> to vector<1x8x8x736xf32>
    %148 = arith.addf %146, %147 : vector<1x8x8x736xf32>
    %149 = vector.extract_strided_slice %137 {offsets = [0, 2, 0, 0], sizes = [1, 8, 8, 736], strides = [1, 1, 1, 1]} : vector<1x10x10x736xf32> to vector<1x8x8x736xf32>
    %150 = arith.addf %148, %149 : vector<1x8x8x736xf32>
    %151 = vector.extract_strided_slice %137 {offsets = [0, 2, 1, 0], sizes = [1, 8, 8, 736], strides = [1, 1, 1, 1]} : vector<1x10x10x736xf32> to vector<1x8x8x736xf32>
    %152 = arith.addf %150, %151 : vector<1x8x8x736xf32>
    %153 = vector.extract_strided_slice %137 {offsets = [0, 2, 2, 0], sizes = [1, 8, 8, 736], strides = [1, 1, 1, 1]} : vector<1x10x10x736xf32> to vector<1x8x8x736xf32>
    %154 = arith.addf %152, %153 : vector<1x8x8x736xf32>
    %cst_52 = arith.constant 0.111111112 : f32
    %155 = vector.broadcast %cst_52 : f32 to vector<1x8x8x736xf32>
    %156 = arith.mulf %154, %155 : vector<1x8x8x736xf32>
    %157 = vector.shape_cast %156 : vector<1x8x8x736xf32> to vector<64x736xf32>
    %158 = arith.truncf %157 : vector<64x736xf32> to vector<64x736xbf16>
    %c0_53 = arith.constant 0 : index
    %c0_54 = arith.constant 0 : index
    %159 = vector.load %arg16[%c0_53, %c0_54] : memref<736x192xbf16, #tpu.memory_space<vmem>>, vector<736x192xbf16>
    %cst_55 = arith.constant dense<0.000000e+00> : vector<64x192xf32>
    %160 = tpu.matmul %158, %159, %cst_55 {dimension_numbers = #tpu.dot_dimension_numbers<[1], [0], [0], [1], [0, 0, 1, 1], [], []>} : vector<64x736xbf16>, vector<736x192xbf16>, vector<64x192xf32> -> vector<64x192xf32>
    %c0_56 = arith.constant 0 : index
    %c0_57 = arith.constant 0 : index
    %161 = vector.load %arg17[%c0_56, %c0_57] : memref<1x192xf32, #tpu.memory_space<vmem>>, vector<1x192xf32>
    %162 = vector.broadcast %161 : vector<1x192xf32> to vector<64x192xf32>
    %163 = arith.addf %160, %162 : vector<64x192xf32>
    %cst_58 = arith.constant 0.000000e+00 : f32
    %164 = vector.broadcast %cst_58 : f32 to vector<64x192xf32>
    %165 = arith.maximumf %163, %164 : vector<64x192xf32>
    %166 = vector.shape_cast %165 : vector<64x192xf32> to vector<1x8x8x192xf32>
    %167 = tpu.concatenate %15, %54, %133, %166 in 3 : vector<1x8x8x192xf32>, vector<1x8x8x192xf32>, vector<1x8x8x192xf32>, vector<1x8x8x192xf32> -> vector<1x8x8x768xf32>
    %c0_59 = arith.constant 0 : index
    %c0_60 = arith.constant 0 : index
    %c0_61 = arith.constant 0 : index
    %c0_62 = arith.constant 0 : index
    %168 = vector.load %arg18[%c0_59, %c0_60, %c0_61, %c0_62] : memref<1x8x8x768xf32, #tpu.memory_space<vmem>>, vector<1x8x8x768xf32>
    tpu.vector_store %arg18[%c0_59, %c0_60, %c0_61, %c0_62], %167 {strides = array<i32>} : memref<1x8x8x768xf32, #tpu.memory_space<vmem>>, vector<1x8x8x768xf32>,
    return
  }
  func.func @transform_0(%arg0: i32) -> (i32, i32, i32, i32) {
    %c0_i32 = arith.constant 0 : i32
    %c0_i32_0 = arith.constant 0 : i32
    %c0_i32_1 = arith.constant 0 : i32
    %c0_i32_2 = arith.constant 0 : i32
    return %arg0, %c0_i32, %c0_i32_0, %c0_i32_1 : i32, i32, i32, i32
  }
  func.func @transform_1(%arg0: i32) -> (i32, i32) {
    %c0_i32 = arith.constant 0 : i32
    %c0_i32_0 = arith.constant 0 : i32
    %c0_i32_1 = arith.constant 0 : i32
    return %c0_i32, %c0_i32_0 : i32, i32
  }
  func.func @transform_2(%arg0: i32) -> (i32, i32) {
    %c0_i32 = arith.constant 0 : i32
    %c0_i32_0 = arith.constant 0 : i32
    %c0_i32_1 = arith.constant 0 : i32
    return %c0_i32, %c0_i32_0 : i32, i32
  }
  func.func @transform_3(%arg0: i32) -> (i32, i32) {
    %c0_i32 = arith.constant 0 : i32
    %c0_i32_0 = arith.constant 0 : i32
    %c0_i32_1 = arith.constant 0 : i32
    return %c0_i32, %c0_i32_0 : i32, i32
  }
  func.func @transform_4(%arg0: i32) -> (i32, i32) {
    %c0_i32 = arith.constant 0 : i32
    %c0_i32_0 = arith.constant 0 : i32
    %c0_i32_1 = arith.constant 0 : i32
    return %c0_i32, %c0_i32_0 : i32, i32
  }
  func.func @transform_5(%arg0: i32) -> (i32, i32) {
    %c0_i32 = arith.constant 0 : i32
    %c0_i32_0 = arith.constant 0 : i32
    %c0_i32_1 = arith.constant 0 : i32
    return %c0_i32, %c0_i32_0 : i32, i32
  }
  func.func @transform_6(%arg0: i32) -> (i32, i32) {
    %c0_i32 = arith.constant 0 : i32
    %c0_i32_0 = arith.constant 0 : i32
    %c0_i32_1 = arith.constant 0 : i32
    return %c0_i32, %c0_i32_0 : i32, i32
  }
  func.func @transform_7(%arg0: i32) -> (i32, i32) {
    %c0_i32 = arith.constant 0 : i32
    %c0_i32_0 = arith.constant 0 : i32
    %c0_i32_1 = arith.constant 0 : i32
    return %c0_i32, %c0_i32_0 : i32, i32
  }
  func.func @transform_8(%arg0: i32) -> (i32, i32) {
    %c0_i32 = arith.constant 0 : i32
    %c0_i32_0 = arith.constant 0 : i32
    %c0_i32_1 = arith.constant 0 : i32
    return %c0_i32, %c0_i32_0 : i32, i32
  }
  func.func @transform_9(%arg0: i32) -> (i32, i32) {
    %c0_i32 = arith.constant 0 : i32
    %c0_i32_0 = arith.constant 0 : i32
    %c0_i32_1 = arith.constant 0 : i32
    return %c0_i32, %c0_i32_0 : i32, i32
  }
  func.func @transform_10(%arg0: i32) -> (i32, i32) {
    %c0_i32 = arith.constant 0 : i32
    %c0_i32_0 = arith.constant 0 : i32
    %c0_i32_1 = arith.constant 0 : i32
    return %c0_i32, %c0_i32_0 : i32, i32
  }
  func.func @transform_11(%arg0: i32) -> (i32, i32) {
    %c0_i32 = arith.constant 0 : i32
    %c0_i32_0 = arith.constant 0 : i32
    %c0_i32_1 = arith.constant 0 : i32
    return %c0_i32, %c0_i32_0 : i32, i32
  }
  func.func @transform_12(%arg0: i32) -> (i32, i32) {
    %c0_i32 = arith.constant 0 : i32
    %c0_i32_0 = arith.constant 0 : i32
    %c0_i32_1 = arith.constant 0 : i32
    return %c0_i32, %c0_i32_0 : i32, i32
  }
  func.func @transform_13(%arg0: i32) -> (i32, i32) {
    %c0_i32 = arith.constant 0 : i32
    %c0_i32_0 = arith.constant 0 : i32
    %c0_i32_1 = arith.constant 0 : i32
    return %c0_i32, %c0_i32_0 : i32, i32
  }
  func.func @transform_14(%arg0: i32) -> (i32, i32) {
    %c0_i32 = arith.constant 0 : i32
    %c0_i32_0 = arith.constant 0 : i32
    %c0_i32_1 = arith.constant 0 : i32
    return %c0_i32, %c0_i32_0 : i32, i32
  }
  func.func @transform_15(%arg0: i32) -> (i32, i32) {
    %c0_i32 = arith.constant 0 : i32
    %c0_i32_0 = arith.constant 0 : i32
    %c0_i32_1 = arith.constant 0 : i32
    return %c0_i32, %c0_i32_0 : i32, i32
  }
  func.func @transform_16(%arg0: i32) -> (i32, i32) {
    %c0_i32 = arith.constant 0 : i32
    %c0_i32_0 = arith.constant 0 : i32
    %c0_i32_1 = arith.constant 0 : i32
    return %c0_i32, %c0_i32_0 : i32, i32
  }
  func.func @transform_17(%arg0: i32) -> (i32, i32, i32, i32) {
    %c0_i32 = arith.constant 0 : i32
    %c0_i32_0 = arith.constant 0 : i32
    %c0_i32_1 = arith.constant 0 : i32
    %c0_i32_2 = arith.constant 0 : i32
    return %arg0, %c0_i32, %c0_i32_0, %c0_i32_1 : i32, i32, i32, i32
  }
}

</mosaic_0001>

<bundles_post_ra>
// kernel: inception_c_forward.1
= control target key start
LH: loop header
LB: loop body
LE: loop exit
PB: predicated region body
PF: predicated region fallthrough
CT: control target
= control target key end

     0   :  { %s19104_s0 = inlined_call_operand.vmem [shape: f32[2,8,8,736], index: 0, kind: input, shape index: {}]   ;;  %s19105_s1 = inlined_call_operand.vmem [shape: bf16[736,448], index: 1, kind: input, shape index: {}]   ;;  %s19106_s2 = inlined_call_operand.vmem [shape: f32[1,448], index: 2, kind: input, shape index: {}]   ;;  %s19107_s3 = inlined_call_operand.vmem [shape: bf16[896,128], index: 3, kind: input, shape index: {}]   ;;  %s19108_s4 = inlined_call_operand.vmem [shape: f32[1,128], index: 4, kind: input, shape index: {}]   ;;  %s19109_s5 = inlined_call_operand.vmem [shape: bf16[896,192], index: 5, kind: input, shape index: {}]   ;;  %s19110_s6 = inlined_call_operand.vmem [shape: f32[1,192], index: 6, kind: input, shape index: {}]   ;;  %s19111_s7 = inlined_call_operand.vmem [shape: bf16[896,128], index: 7, kind: input, shape index: {}]   ;;  %s19112_s8 = inlined_call_operand.vmem [shape: f32[1,128], index: 8, kind: input, shape index: {}]   ;;  %s19113_s9 = inlined_call_operand.vmem [shape: bf16[896,128], index: 9, kind: input, shape index: {}]   ;;  %s19114_s10 = inlined_call_operand.vmem [shape: f32[1,128], index: 10, kind: input, shape index: {}]   ;;  %s19115_s11 = inlined_call_operand.vmem [shape: bf16[896,128], index: 11, kind: input, shape index: {}]   ;;  %s19116_s12 = inlined_call_operand.vmem [shape: f32[1,128], index: 12, kind: input, shape index: {}]   ;;  %s19117_s13 = inlined_call_operand.vmem [shape: bf16[896,192], index: 13, kind: input, shape index: {}]   ;;  %s19118_s14 = inlined_call_operand.vmem [shape: f32[1,192], index: 14, kind: input, shape index: {}]   ;;  %s19119_s15 = inlined_call_operand.vmem [shape: bf16[736,192], index: 15, kind: input, shape index: {}]   ;;  %s19120_s16 = inlined_call_operand.vmem [shape: f32[1,192], index: 16, kind: input, shape index: {}]   ;;  %s19121_s17 = inlined_call_operand.hbm [shape: f32[2,8,8,768], index: 17, kind: output, shape index: {}]  }
   0x1   :  { %19289 = sst [smem:[#allocation99_spill]] %s19104_s0 }
   0x2   :  { %19290 = sst [smem:[#allocation100_spill]] %s19105_s1 }
   0x3   :  { %19291 = sst [smem:[#allocation101_spill]] %s19107_s3 }
   0x4   :  { %19292 = sst [smem:[#allocation102_spill]] %s19108_s4 }
   0x5   :  { %22 = vsyncpa [#allocation3], 0 }
   0x6   :  { %24 = vsyncpa [#allocation3 + $0x1], 0  ;;  %s13758_s24 = smov 0   ;;  %s13760_s25 = smov 0  }
   0x7   :  { %s13762_s26 = smov 0   ;;  %s13764_s27 = smov 0  }
   0x8 LB: > { %19293 = sst [smem:[#allocation5_spill]] %s13648_s24  ;;  %s13779_s28 = sadd.s32 4294967295, %s13660_s27   ;;  %s13660_s27 = sphi %s13764_s27, %s19702_s27   ;;  %s13656_s26 = sphi %s13762_s26, %s19707_s26   ;;  %s13652_s25 = sphi %s13760_s25, %s19706_s25   ;;  %s13648_s24 = sphi %s13758_s24, %s19705_s24  }
   0x9   : > { %19294 = sst [smem:[#allocation6_spill]] %s13656_s26  ;;  %s10717_s29 = sadd.s32 4294967294, %s13660_s27  }
   0xa   : > { %19295 = sst [smem:[#allocation7_spill]] %s13660_s27  ;;  %s13783_s0 = sadd.s32 1, %s13660_s27  }
   0xb   : > { %19296 = sst [smem:[#allocation8_spill]] %s13783_s0  ;;  %s399_s30 = sadd.s32 1, %s13656_s26 }
   0xc   : > { %s396_s18 = ssub.s32 %s13660_s27, %s13783_s0  ;;  %p409_p0 = scmp.ne.s32.totalorder %s13656_s26, %s13652_s25 }
   0xd   : > { %p397_p1 = scmp.eq.s32.totalorder %s396_s18, 0  ;;  %p410_p2 = scmp.eq.s32.totalorder %s13779_s28, 1 }
   0xe   : > { %p415_p3 = scmp.ne.s32.totalorder %s13652_s25, %s13648_s24  ;;  %p416_p4 = scmp.eq.s32.totalorder %s10717_s29, 1 }
   0xf   : > { %s13794_s19 = scalar_select %p397_p1, %s13656_s26, %s399_s30  }
  0x10   : > { %p13796_p5 = por %p410_p2, %p409_p0  ;;  %p13800_p6 = por %p416_p4, %p415_p3 }
  0x11   : > { %19297 = sst [smem:[#allocation9_spill]] %s13794_s19  ;;  %p10720_p7 = scmp.ge.s32.totalorder %s13660_s27, 1 }
  0x12   : > { %s19299_s20 = scalar_select %p13800_p6, 1, 0 }
  0x13   : > { %p490_p8 = scmp.lt.s32.totalorder %s13660_s27, 3 }
  0x14   : > { %19300 = sst [smem:[#allocation10_spill]] %s19299_s20 }
  0x15   : > { %p491_p9 = pnand %p10720_p7, %p490_p8 }
  0x17   : > { %494 = sbr.rel (%p491_p9) target bundleno = 1868 (0x74c), region = 88 }
  0x1e   : > { %s19301_s23 = sld [smem:[#allocation100_spill]]  ;;  %p542_p10 = scmp.lt.s32.totalorder %s13779_s28, 1  ;;  %v13662_v8 = vmov 0.0   ;;  %vm8584_vm0 = vcmask 1040384   ;;  %vm8769_vm1 = vcmask 1046528   ;;  %vm2492_vm2 = vcmask 1045504  }
  0x1f   : > { %v8486_v9 = vrot.slane %v13662_v8, 7  ;;  %s19303_s20 = sld [smem:[#allocation99_spill]]  ;;  %vm1910_vm3 = vcmask 785408   ;;  %s19349_s3 = sld [smem:[#allocation101_spill]]  ;;  %vm2481_vm4 = vcmask 1041408   ;;  %vm10480_vm9 = vcmask 523264  }
  0x20   : > { %s543_s18 = scalar_select %p542_p10, %s13779_s28, 1  ;;  %vm2482_vm5 = vsmask.f32 1280  ;;  %vm2493_vm6 = vsmask.f32 5376 }
  0x21   : > { %v13839_v12 = vsel %vm8584_vm0, 0.0, %v8486_v9  ;;  %v8634_v13 = vsel %vm8584_vm0, %v8486_v9, 0.0  ;;  %vm14867_vm7 = vmand %vm2481_vm4, %vm2482_vm5  ;;  %s19184_s29 = sand.u32 1, %s13652_s25   ;;  %s19367_s4 = sld [smem:[#allocation102_spill]] }
  0x22   : > { %s12543_s22 = smul.u32 384, %s543_s18  ;;  %19302 = vst [vmem:[#allocation11_spill] sm:$0xff] %v13839_v12  ;;  %v8770_v15 = vrot.slane %v13839_v12, 1  ;;  %v8771_v16 = vrot.slane %v8634_v13, 1  ;;  %v8986_v21 = vrot.slane %v13839_v12, 2  ;;  %v8987_v25 = vrot.slane %v8634_v13, 2  ;;  %vm14875_vm8 = vmand %vm2492_vm2, %vm2493_vm6 }
  0x23   : > { %s15154_s0 = smul.u32 384, %s19184_s29  ;;  %s13664_s27 = smov 64  }
  0x24   : > { %v12589_v0 = vld [vmem:[%s19301_s23 + $0x4] ss:$16 sps:$4 sm:$0xff]   ;;  %v12591_v1 = vld [vmem:[%s19301_s23] ss:$16 sps:$4 sm:$0xff]   ;;  %v13864_v24 = vsel %vm8769_vm1, %v8770_v15, %v8771_v16  ;;  %v13884_v35 = vsel %vm2492_vm2, %v8986_v21, %v8987_v25  ;;  %v12658_v9 = vld [vmem:[%s19301_s23 + $0x2c] ss:$16 sps:$4 sm:$0xff]  }
  0x25   : > { %1923 = vmatprep.subr.bf16.mxu0 %v12589_v0  ;;  %v12592_v2 = vld [vmem:[%s19301_s23 + $0x24] ss:$16 sps:$4 sm:$0xff]   ;;  %v12594_v3 = vld [vmem:[%s19301_s23 + $0x20] ss:$16 sps:$4 sm:$0xff]   ;;  %s13848_s21 = scalar_lea.vmem %s19303_s20, %s12543_s22  ;;  %19305 = vst [vmem:[#allocation13_spill] sm:$0xff] %v13864_v24  ;;  %v8942_v33 = vadd.f32 %v13864_v24, %v13839_v12  ;;  %19307 = vst [vmem:[#allocation15_spill] sm:$0xff] %v13884_v35 }
  0x26   : > { %1924 = vmatpush1.bf16.msra.mxu0 %v12591_v1  ;;  %v12595_v4 = vld [vmem:[%s19301_s23 + $0x44] ss:$16 sps:$4 sm:$0xff]   ;;  %v12597_v5 = vld [vmem:[%s19301_s23 + $0x40] ss:$16 sps:$4 sm:$0xff]   ;;  %v549_v19 = vld [vmem:[%s13848_s21 + $0x8] sm:$0xff]  ;;  %s15244_s19 = scalar_lea.vmem [#allocation2], %s15154_s0 }
  0x27   : > { %1925 = vmatprep.subr.bf16.mxu0 %v12592_v2  ;;  %v12598_v6 = vld [vmem:[%s19301_s23 + $0x64] ss:$16 sps:$4 sm:$0xff]   ;;  %v12600_v7 = vld [vmem:[%s19301_s23 + $0x60] ss:$16 sps:$4 sm:$0xff]   ;;  %v13859_v20 = vld [vmem:[%s13848_s21 + $0x38] sm:$0xff]  ;;  %v8488_v23 = vrot.slane %v549_v19, 7  ;;  %v13912_v47 = vadd.f32 %v13884_v35, %v8942_v33 }
  0x28   : > { %v12601_v10 = vld [vmem:[%s19301_s23 + $0x84] ss:$16 sps:$4 sm:$0xff]   ;;  %v12603_v11 = vld [vmem:[%s19301_s23 + $0x80] ss:$16 sps:$4 sm:$0xff]   ;;  %19304 = vst [vmem:[#allocation12_spill] sm:$0xff] %v13859_v20  ;;  %v11602_v22 = vpack.c.bf16 %v13859_v20, %v549_v19  ;;  %v19131_v30 = vrot.slane %v13859_v20, 7 }
  0x29   : > { %v12604_v14 = vld [vmem:[%s19301_s23 + $0xa4] ss:$16 sps:$4 sm:$0xff]   ;;  %v12606_v17 = vld [vmem:[%s19301_s23 + $0xa0] ss:$16 sps:$4 sm:$0xff]   ;;  %v13873_v28 = vsel %vm8584_vm0, 0.0, %v8488_v23  ;;  %v8636_v29 = vsel %vm8584_vm0, %v8488_v23, 0.0 }
  0x2a   : > { %1926 = vmatpush1.bf16.msra.mxu0 %v12594_v3  ;;  %v12607_v18 = vld [vmem:[%s19301_s23 + $0xc4] ss:$16 sps:$4 sm:$0xff]   ;;  %v12609_v26 = vld [vmem:[%s19301_s23 + $0xc0] ss:$16 sps:$4 sm:$0xff]   ;;  %1955 = vmatprep.mubr.bf16.mxu0 %v11602_v22  ;;  %19306 = vst [vmem:[#allocation14_spill] sm:$0xff] %v13873_v28  ;;  %v8776_v31 = vrot.slane %v13873_v28, 1 }
  0x2b   : > { %1927 = vmatprep.subr.bf16.mxu0 %v12595_v4  ;;  %v12610_v27 = vld [vmem:[%s19301_s23 + $0xe4] ss:$16 sps:$4 sm:$0xff]   ;;  %v8777_v32 = vrot.slane %v8636_v29, 1  ;;  %2174 = vmatprep.mubr.bf16.mxu1 %v11602_v22  ;;  %v12612_v34 = vld [vmem:[%s19301_s23 + $0xe0] ss:$16 sps:$4 sm:$0xff]   ;;  %v8992_v36 = vrot.slane %v13873_v28, 2 }
  0x2c   : > { %v8993_v37 = vrot.slane %v8636_v29, 2  ;;  %v13888_v38 = vld [vmem:[%s13848_s21] sm:$0xff]  ;;  %v13894_v40 = vld [vmem:[%s13848_s21 + $0x30] sm:$0xff]  ;;  %v13909_v46 = vsel %vm8584_vm0, 0.0, %v19131_v30  ;;  %19311 = vst [vmem:[#allocation19_spill] sm:$0xff] %v13912_v47  ;;  %s10655_s20 = sshll.u32 %s15244_s19, 4  ;;  %s19056_s20 = int_to_ptr.vmem [resolvable:$true] %s10655_s20 }
  0x2d   : > { %v13891_v39 = vsel %vm8769_vm1, %v8776_v31, %v8777_v32  ;;  %v8487_v41 = vrot.slane %v13888_v38, 7  ;;  %v12613_v42 = vld [vmem:[%s19301_s23 + $0x104] ss:$16 sps:$4 sm:$0xff]   ;;  %v8493_v45 = vrot.slane %v13894_v40, 7  ;;  %19310 = vst [vmem:[#allocation18_spill] sm:$0xff] %v13909_v46  ;;  %s19698_s18 = sand.u32 1, %s13652_s25  }
  0x2e   : > { %1928 = vmatpush1.bf16.msra.mxu0 %v12597_v5  ;;  %19308 = vst [vmem:[#allocation16_spill] sm:$0xff] %v13891_v39  ;;  %v8944_v43 = vadd.f32 %v13891_v39, %v13873_v28  ;;  %v13903_v44 = vsel %vm2492_vm2, %v8992_v36, %v8993_v37  ;;  %v12615_v54 = vld [vmem:[%s19301_s23 + $0x100] ss:$16 sps:$4 sm:$0xff]   ;;  %v12616_v56 = vld [vmem:[%s19301_s23 + $0x124] ss:$16 sps:$4 sm:$0xff]   ;;  %s19063_s30 = scalar_lea.sflag [#allocation3], %s19698_s18 }
  0x2f   : > { %1929 = vmatprep.subr.bf16.mxu0 %v12598_v6  ;;  %19309 = vst [vmem:[#allocation17_spill] sm:$0xff] %v13903_v44  ;;  %v8586_v48 = vsel %vm8584_vm0, 0.0, %v8487_v41  ;;  %v8635_v49 = vsel %vm8584_vm0, %v8487_v41, 0.0  ;;  %v8592_v51 = vsel %vm8584_vm0, 0.0, %v8493_v45  ;;  %v8641_v52 = vsel %vm8584_vm0, %v8493_v45, 0.0  ;;  %v14495_v30 = vld [vmem:[%s13848_s21 + $0xb0] sm:$0xff] }
  0x30   : > { %v9160_v50 = vadd.f32 %v13903_v44, %v8944_v43  ;;  %v8773_v53 = vrot.slane %v8586_v48, 1  ;;  %v8774_v55 = vrot.slane %v8635_v49, 1  ;;  %v8791_v58 = vrot.slane %v8592_v51, 1  ;;  %v12652_v0 = vld [vmem:[%s19301_s23 + $0xc] ss:$16 sps:$4 sm:$0xff]   ;;  %19340 = vst [vmem:[#allocation48_spill] sm:$0xff] %v14495_v30 }
  0x31   : > { %v8989_v59 = vrot.slane %v8586_v48, 2  ;;  %v8990_v60 = vrot.slane %v8635_v49, 2  ;;  %v8792_v62 = vrot.slane %v8641_v52, 1  ;;  %v9201_v63 = vadd.f32 %v13912_v47, %v8586_v48  ;;  %v12654_v1 = vld [vmem:[%s19301_s23 + $0x8] ss:$16 sps:$4 sm:$0xff]   ;;  %2142 = vmatprep.subr.bf16.mxu1 %v12652_v0  ;;  %s13598_s22 = scalar_lea.vmem %s19056_s20, 6144 }
  0x32   : > { %1930 = vmatpush1.bf16.msra.mxu0 %v12600_v7  ;;  %v13926_v57 = vadd.f32 %v9160_v50, %v13909_v46  ;;  %v8775_v61 = vsel %vm8769_vm1, %v8773_v53, %v8774_v55  ;;  %v12618_v2 = vld [vmem:[%s19301_s23 + $0x120] ss:$16 sps:$4 sm:$0xff]   ;;  %v12619_v3 = vld [vmem:[%s19301_s23 + $0x144] ss:$16 sps:$4 sm:$0xff]   ;;  %v9007_v6 = vrot.slane %v8592_v51, 2  ;;  %v9008_v7 = vrot.slane %v8641_v52, 2  ;;  %2143 = vmatpush1.bf16.msra.mxu1 %v12654_v1  ;;  %p13599_p11 = scmp.ne.s32.totalorder %s19056_s20, %s13598_s22 }
  0x33   : > { %1931 = vmatprep.subr.bf16.mxu0 %v12601_v10  ;;  %v8943_v4 = vadd.f32 %v8775_v61, %v8586_v48  ;;  %v8991_v5 = vsel %vm2492_vm2, %v8989_v59, %v8990_v60  ;;  %v9285_v8 = vadd.f32 %v9201_v63, %v8775_v61  ;;  %v8793_v13 = vsel %vm8769_vm1, %v8791_v58, %v8792_v62  ;;  %v12664_v16 = vld [vmem:[%s19301_s23 + $0x4c] ss:$16 sps:$4 sm:$0xff]   ;;  %v12666_v23 = vld [vmem:[%s19301_s23 + $0x48] ss:$16 sps:$4 sm:$0xff]   ;;  %v12624_v29 = vld [vmem:[%s19301_s23 + $0x160] ss:$16 sps:$4 sm:$0xff]  }
  0x34   : > { %19312 = vst [vmem:[#allocation20_spill] sm:$0xff] %v13926_v57  ;;  %2144 = vmatprep.subr.bf16.mxu1 %v12658_v9  ;;  %v13960_v19 = vsel %vm2492_vm2, %v9007_v6, %v9008_v7  ;;  %v12625_v31 = vld [vmem:[%s19301_s23 + $0x184] ss:$16 sps:$4 sm:$0xff]   ;;  %v12672_v32 = vld [vmem:[%s19301_s23 + $0x68] ss:$16 sps:$4 sm:$0xff]   ;;  %p13600_p12 = pnand %p13599_p11, %p13796_p5 }
  0x35   : > { %v9159_v10 = vadd.f32 %v8991_v5, %v8943_v4  ;;  %19313 = vst [vmem:[#allocation21_spill] sm:$0xff] %v13960_v19  ;;  %v12676_v33 = vld [vmem:[%s19301_s23 + $0x8c] ss:$16 sps:$4 sm:$0xff]   ;;  %v12627_v36 = vld [vmem:[%s19301_s23 + $0x180] ss:$16 sps:$4 sm:$0xff]  }
  0x36   : > { %1932 = vmatpush1.bf16.msra.mxu0 %v12603_v11  ;;  %v12660_v11 = vld [vmem:[%s19301_s23 + $0x28] ss:$16 sps:$4 sm:$0xff]   ;;  %v12628_v37 = vld [vmem:[%s19301_s23 + $0x1a4] ss:$16 sps:$4 sm:$0xff]   ;;  %v12682_v43 = vld [vmem:[%s19301_s23 + $0xac] ss:$16 sps:$4 sm:$0xff]   ;;  %p13601_p13 = pneg %p13600_p12 }
  0x37   : > { %1933 = vmatprep.subr.bf16.mxu0 %v12604_v14  ;;  %v9357_v14 = vadd.f32 %v9285_v8, %v8991_v5  ;;  %v9207_v15 = vadd.f32 %v9159_v10, %v8592_v51  ;;  %2145 = vmatpush1.bf16.msra.mxu1 %v12660_v11  ;;  %v12678_v41 = vld [vmem:[%s19301_s23 + $0x88] ss:$16 sps:$4 sm:$0xff]   ;;  %v12630_v48 = vld [vmem:[%s19301_s23 + $0x1a0] ss:$16 sps:$4 sm:$0xff]   ;;  %v12631_v50 = vld [vmem:[%s19301_s23 + $0x1c4] ss:$16 sps:$4 sm:$0xff]  }
  0x38   : > { %2146 = vmatprep.subr.bf16.mxu1 %v12664_v16  ;;  %v14010_v52 = vld [vmem:[%s13848_s21 + $0x90] sm:$0xff]  ;;  %v12688_v61 = vld [vmem:[%s19301_s23 + $0xcc] ss:$16 sps:$4 sm:$0xff]   ;;  %v12690_v5 = vld [vmem:[%s19301_s23 + $0xc8] ss:$16 sps:$4 sm:$0xff]  }
  0x39   : > { %v9405_v21 = vadd.f32 %v9357_v14, %v8592_v51  ;;  %v9291_v22 = vadd.f32 %v9207_v15, %v8793_v13  ;;  %19315 = vst [vmem:[#allocation23_spill] sm:$0xff] %v14010_v52  ;;  %v19130_v53 = vrot.slane %v14010_v52, 7  ;;  %v12633_v0 = vld [vmem:[%s19301_s23 + $0x1c0] ss:$16 sps:$4 sm:$0xff]   ;;  %v12634_v1 = vld [vmem:[%s19301_s23 + $0x1e4] ss:$16 sps:$4 sm:$0xff]  }
  0x3a   : > { %1934 = vmatpush1.bf16.msra.mxu0 %v12606_v17  ;;  %v12621_v17 = vld [vmem:[%s19301_s23 + $0x140] ss:$16 sps:$4 sm:$0xff]   ;;  %v12694_v8 = vld [vmem:[%s19301_s23 + $0xec] ss:$16 sps:$4 sm:$0xff]   ;;  %v12639_v11 = vld [vmem:[%s19301_s23 + $0x204] ss:$16 sps:$4 sm:$0xff]  }
  0x3b   : > { %1935 = vmatprep.subr.bf16.mxu0 %v12607_v18  ;;  %v12622_v18 = vld [vmem:[%s19301_s23 + $0x164] ss:$16 sps:$4 sm:$0xff]   ;;  %v13965_v25 = vadd.f32 %v9405_v21, %v8793_v13  ;;  %2147 = vmatpush1.bf16.msra.mxu1 %v12666_v23  ;;  %v14039_v6 = vsel %vm8584_vm0, 0.0, %v19130_v53  ;;  %v12636_v10 = vld [vmem:[%s19301_s23 + $0x1e0] ss:$16 sps:$4 sm:$0xff]   ;;  %v567_v14 = vld [vmem:[%s13848_s21 + $0x98] sm:$0xff] }
  0x3c   : > { %19319 = vst [vmem:[#allocation27_spill] sm:$0xff] %v14039_v6  ;;  %v12696_v16 = vld [vmem:[%s19301_s23 + $0xe8] ss:$16 sps:$4 sm:$0xff]   ;;  %v12637_v21 = vld [vmem:[%s19301_s23 + $0x200] ss:$16 sps:$4 sm:$0xff]  }
  0x3d   : > { %19314 = vst [vmem:[#allocation22_spill] sm:$0xff] %v13965_v25  ;;  %v12642_v23 = vld [vmem:[%s19301_s23 + $0x224] ss:$16 sps:$4 sm:$0xff]  }
  0x3e   : > { %1936 = vmatpush1.bf16.msra.mxu0 %v12609_v26  ;;  %v12670_v26 = vld [vmem:[%s19301_s23 + $0x6c] ss:$16 sps:$4 sm:$0xff]  }
  0x3f   : > { %1937 = vmatprep.subr.bf16.mxu0 %v12610_v27  ;;  %v9363_v27 = vadd.f32 %v9291_v22, %v13960_v19  ;;  %2148 = vmatprep.subr.bf16.mxu1 %v12670_v26  ;;  %v12640_v26 = vld [vmem:[%s19301_s23 + $0x220] ss:$16 sps:$4 sm:$0xff]  }
  0x40   : > { %2149 = vmatpush1.bf16.msra.mxu1 %v12672_v32  ;;  %v12708_v32 = vld [vmem:[%s19301_s23 + $0x128] ss:$16 sps:$4 sm:$0xff]  }
  0x41   : > { %2150 = vmatprep.subr.bf16.mxu1 %v12676_v33  ;;  %v12712_v33 = vld [vmem:[%s19301_s23 + $0x14c] ss:$16 sps:$4 sm:$0xff]  }
  0x42   : > { %1938 = vmatpush1.bf16.msra.mxu0 %v12612_v34  ;;  %v8949_v34 = vadd.f32 %v8793_v13, %v8592_v51  ;;  %v12684_v51 = vld [vmem:[%s19301_s23 + $0xa8] ss:$16 sps:$4 sm:$0xff]  }
  0x43   : > { %1939 = vmatprep.subr.bf16.mxu0 %v12613_v42  ;;  %v13993_v42 = vld [vmem:[%s13848_s21 + $0x60] sm:$0xff]  ;;  %v561_v13 = vld [vmem:[%s13848_s21 + $0x68] sm:$0xff] }
  0x44   : > { %v8499_v45 = vrot.slane %v13993_v42, 7  ;;  %v9165_v49 = vadd.f32 %v13960_v19, %v8949_v34  ;;  %2151 = vmatpush1.bf16.msra.mxu1 %v12678_v41  ;;  %v14072_v22 = vpack.c.bf16 %v567_v14, %v561_v13  ;;  %v14101_v34 = vpack.c.bf16 %v14010_v52, %v13993_v42  ;;  %v12648_v41 = vld [vmem:[%s19301_s23 + $0x264] ss:$16 sps:$4 sm:$0xff]   ;;  %v12714_v42 = vld [vmem:[%s19301_s23 + $0x148] ss:$16 sps:$4 sm:$0xff]  }
  0x45   : > { %2152 = vmatprep.subr.bf16.mxu1 %v12682_v43  ;;  %v12646_v43 = vld [vmem:[%s19301_s23 + $0x260] ss:$16 sps:$4 sm:$0xff]  }
  0x46   : > { %1940 = vmatpush1.bf16.msra.mxu0 %v12615_v54  ;;  %v8598_v54 = vsel %vm8584_vm0, 0.0, %v8499_v45  ;;  %v8647_v55 = vsel %vm8584_vm0, %v8499_v45, 0.0  ;;  %v572_v45 = vld [vmem:[%s13848_s21 + $0xc0] sm:$0xff] }
  0x47   : > { %1941 = vmatprep.subr.bf16.mxu0 %v12616_v56  ;;  %v8809_v56 = vrot.slane %v8598_v54, 1  ;;  %v8810_v58 = vrot.slane %v8647_v55, 1  ;;  %v9025_v59 = vrot.slane %v8598_v54, 2  ;;  %v9026_v60 = vrot.slane %v8647_v55, 2  ;;  %v14130_v55 = vld [vmem:[%s13848_s21 + $0x10] sm:$0xff] }
  0x48   : > { %v14018_v62 = vadd.f32 %v9165_v49, %v8598_v54  ;;  %v9411_v63 = vadd.f32 %v9363_v27, %v8598_v54  ;;  %2153 = vmatpush1.bf16.msra.mxu1 %v12684_v51  ;;  %v12645_v27 = vld [vmem:[%s19301_s23 + $0x244] ss:$16 sps:$4 sm:$0xff]   ;;  %v585_v51 = vld [vmem:[%s13848_s21 + $0x128] sm:$0xff] }
  0x49   : > { %v14042_v7 = vsel %vm2492_vm2, %v9025_v59, %v9026_v60  ;;  %2154 = vmatprep.subr.bf16.mxu1 %v12688_v61  ;;  %v12651_v49 = vld [vmem:[%s19301_s23 + $0x284] ss:$16 sps:$4 sm:$0xff]   ;;  %v12724_v59 = vld [vmem:[%s19301_s23 + $0x18c] ss:$16 sps:$4 sm:$0xff]   ;;  %v12649_v60 = vld [vmem:[%s19301_s23 + $0x280] ss:$16 sps:$4 sm:$0xff]  }
  0x4a   : > { %1942 = vmatpush1.bf16.msra.mxu0 %v12618_v2  ;;  %19316 = vst [vmem:[#allocation24_spill] sm:$0xff] %v14018_v62  ;;  %v14027_v2 = vsel %vm8769_vm1, %v8809_v56, %v8810_v58  ;;  %19320 = vst [vmem:[#allocation28_spill] sm:$0xff] %v14042_v7  ;;  %v12720_v56 = vld [vmem:[%s19301_s23 + $0x168] ss:$16 sps:$4 sm:$0xff]   ;;  %v8489_v58 = vrot.slane %v14130_v55, 7 }
  0x4b   : > { %1943 = vmatprep.subr.bf16.mxu0 %v12619_v3  ;;  %19317 = vst [vmem:[#allocation25_spill] sm:$0xff] %v14027_v2  ;;  %v8955_v3 = vadd.f32 %v14027_v2, %v8598_v54  ;;  %v14031_v4 = vadd.f32 %v9411_v63, %v14027_v2  ;;  %v591_v54 = vld [vmem:[%s13848_s21 + $0x158] sm:$0xff]  ;;  %v12657_v61 = vld [vmem:[%s19301_s23 + $0x2a4] ss:$16 sps:$4 sm:$0xff]  }
  0x4c   : > { %2155 = vmatpush1.bf16.msra.mxu1 %v12690_v5  ;;  %v14154_v5 = vsel %vm8584_vm0, 0.0, %v8489_v58 }
  0x4d   : > { %19318 = vst [vmem:[#allocation26_spill] sm:$0xff] %v14031_v4  ;;  %v9171_v9 = vadd.f32 %v14042_v7, %v8955_v3  ;;  %2156 = vmatprep.subr.bf16.mxu1 %v12694_v8  ;;  %19322 = vst [vmem:[#allocation30_spill] sm:$0xff] %v14154_v5  ;;  %v8637_v8 = vsel %vm8584_vm0, %v8489_v58, 0.0  ;;  %v8995_v14 = vrot.slane %v14154_v5, 2 }
  0x4e   : > { %1944 = vmatpush1.bf16.msra.mxu0 %v12621_v17  ;;  %v12700_v17 = vld [vmem:[%s19301_s23 + $0x10c] ss:$16 sps:$4 sm:$0xff]   ;;  %v8780_v13 = vrot.slane %v8637_v8, 1 }
  0x4f   : > { %1945 = vmatprep.subr.bf16.mxu0 %v12622_v18  ;;  %v14057_v15 = vadd.f32 %v9171_v9, %v14039_v6  ;;  %v14067_v18 = vpack.c.bf16 %v13894_v40, %v13888_v38  ;;  %v12702_v38 = vld [vmem:[%s19301_s23 + $0x108] ss:$16 sps:$4 sm:$0xff]   ;;  %v12706_v40 = vld [vmem:[%s19301_s23 + $0x12c] ss:$16 sps:$4 sm:$0xff]  }
  0x50   : > { %2157 = vmatpush1.bf16.msra.mxu1 %v12696_v16  ;;  %v12726_v9 = vld [vmem:[%s19301_s23 + $0x188] ss:$16 sps:$4 sm:$0xff]   ;;  %v12730_v16 = vld [vmem:[%s19301_s23 + $0x1ac] ss:$16 sps:$4 sm:$0xff]  }
  0x51   : > { %19321 = vst [vmem:[#allocation29_spill] sm:$0xff] %v14057_v15  ;;  %2158 = vmatprep.subr.bf16.mxu1 %v12700_v17  ;;  %v12663_v17 = vld [vmem:[%s19301_s23 + $0x2c4] ss:$16 sps:$4 sm:$0xff]  }
  0x52   : > { %1946 = vmatpush1.bf16.msra.mxu0 %v12624_v29  ;;  %v573_v29 = vld [vmem:[%s13848_s21 + $0xc8] sm:$0xff] }
  0x53   : > { %1947 = vmatprep.subr.bf16.mxu0 %v12625_v31  ;;  %v579_v31 = vld [vmem:[%s13848_s21 + $0xf8] sm:$0xff] }
  0x54   : > { %2159 = vmatpush1.bf16.msra.mxu1 %v12702_v38 }
  0x55   : > { %2160 = vmatprep.subr.bf16.mxu1 %v12706_v40 }
  0x56   : > { %1948 = vmatpush1.bf16.msra.mxu0 %v12627_v36  ;;  %v12643_v36 = vld [vmem:[%s19301_s23 + $0x240] ss:$16 sps:$4 sm:$0xff]  }
  0x57   : > { %1949 = vmatprep.subr.bf16.mxu0 %v12628_v37  ;;  %v14106_v37 = vpack.c.bf16 %v579_v31, %v573_v29  ;;  %v557_v29 = vld [vmem:[%s13848_s21 + $0x48] sm:$0xff] }
  0x58   : > { %2161 = vmatpush1.bf16.msra.mxu1 %v12708_v32 }
  0x59   : > { %2162 = vmatprep.subr.bf16.mxu1 %v12712_v33 }
  0x5a   : > { %1950 = vmatpush1.bf16.msra.mxu0 %v12630_v48  ;;  %v12718_v48 = vld [vmem:[%s19301_s23 + $0x16c] ss:$16 sps:$4 sm:$0xff]  }
  0x5b   : > { %1951 = vmatprep.subr.bf16.mxu0 %v12631_v50  ;;  %v578_v50 = vld [vmem:[%s13848_s21 + $0xf0] sm:$0xff] }
  0x5c   : > { %2163 = vmatpush1.bf16.msra.mxu1 %v12714_v42  ;;  %v14145_v63 = vpack.c.bf16 %v578_v50, %v572_v45  ;;  %v12732_v42 = vld [vmem:[%s19301_s23 + $0x1a8] ss:$16 sps:$4 sm:$0xff]  }
  0x5d   : > { %2164 = vmatprep.subr.bf16.mxu1 %v12718_v48  ;;  %v12736_v48 = vld [vmem:[%s19301_s23 + $0x1cc] ss:$16 sps:$4 sm:$0xff]  }
  0x5e   : > { %1952 = vmatpush1.bf16.msra.mxu0 %v12633_v0  ;;  %v14147_v0 = vpack.c.bf16 %v591_v54, %v585_v51  ;;  %v12669_v54 = vld [vmem:[%s19301_s23 + $0x2e4] ss:$16 sps:$4 sm:$0xff]  }
  0x5f   : > { %1953 = vmatprep.subr.bf16.mxu0 %v12634_v1  ;;  %v14150_v1 = vld [vmem:[%s13848_s21 + $0x40] sm:$0xff] }
  0x60   : > { %2165 = vmatpush1.bf16.msra.mxu1 %v12720_v56  ;;  %v8495_v3 = vrot.slane %v14150_v1, 7 }
  0x61   : > { %2166 = vmatprep.subr.bf16.mxu1 %v12724_v59  ;;  %v12738_v59 = vld [vmem:[%s19301_s23 + $0x1c8] ss:$16 sps:$4 sm:$0xff]  }
  0x62   : > { %1954 = vmatpush1.bf16.msra.mxu0 %v12636_v10  ;;  %v12655_v10 = vld [vmem:[%s19301_s23 + $0x2a0] ss:$16 sps:$4 sm:$0xff]   ;;  %v14175_v38 = vsel %vm8584_vm0, 0.0, %v8495_v3  ;;  %v8643_v40 = vsel %vm8584_vm0, %v8495_v3, 0.0 }
  0x63   : > { %1996 = vmatprep.subr.bf16.mxu0 %v12639_v11  ;;  %v8779_v11 = vrot.slane %v14154_v5, 1  ;;  %19323 = vst [vmem:[#allocation31_spill] sm:$0xff] %v14175_v38  ;;  %v8797_v32 = vrot.slane %v14175_v38, 1  ;;  %v8798_v33 = vrot.slane %v8643_v40, 1  ;;  %v9014_v45 = vrot.slane %v8643_v40, 2 }
  0x64   : > { %2167 = vmatpush1.bf16.msra.mxu1 %v12726_v9  ;;  %v12679_v40 = vld [vmem:[%s19301_s23 + $0x320] ss:$16 sps:$4 sm:$0xff]  }
  0x65   : > { %1956 = vmatmul.mubr.bf16.vlgmr.msra.gmra.mrb[0].mxu0 %v14067_v18  ;;  %v14182_v31 = vsel %vm8769_vm1, %v8779_v11, %v8780_v13  ;;  %2168 = vmatprep.subr.bf16.mxu1 %v12730_v16  ;;  %v14209_v58 = vsel %vm8769_vm1, %v8797_v32, %v8798_v33  ;;  %v12744_v11 = vld [vmem:[%s19301_s23 + $0x1e8] ss:$16 sps:$4 sm:$0xff]   ;;  %v12673_v16 = vld [vmem:[%s19301_s23 + $0x300] ss:$16 sps:$4 sm:$0xff]  }
  0x66   : > { %1997 = vmatpush1.bf16.msra.mxu0 %v12637_v21  ;;  %1965 = vmatprep.mubr.bf16.mxu0 %v14072_v22  ;;  %v584_v21 = vld [vmem:[%s13848_s21 + $0x120] sm:$0xff]  ;;  %19324 = vst [vmem:[#allocation32_spill] sm:$0xff] %v14182_v31  ;;  %19326 = vst [vmem:[#allocation34_spill] sm:$0xff] %v14209_v58  ;;  %v12754_v32 = vld [vmem:[%s19301_s23 + $0x228] ss:$16 sps:$4 sm:$0xff]  }
  0x67   : > { %1998 = vmatprep.subr.bf16.mxu0 %v12642_v23  ;;  %v590_v23 = vld [vmem:[%s13848_s21 + $0x150] sm:$0xff] }
  0x68   : > { %v14200_v50 = vpack.c.bf16 %v590_v23, %v584_v21  ;;  %2169 = vmatpush1.bf16.msra.mxu1 %v12732_v42  ;;  %v12748_v21 = vld [vmem:[%s19301_s23 + $0x208] ss:$16 sps:$4 sm:$0xff]   ;;  %v12756_v23 = vld [vmem:[%s19301_s23 + $0x22c] ss:$16 sps:$4 sm:$0xff]   ;;  %v12693_v42 = vld [vmem:[%s19301_s23 + $0x364] ss:$16 sps:$4 sm:$0xff]  }
  0x69   : > { %2170 = vmatprep.subr.bf16.mxu1 %v12736_v48 }
  0x6a   : > { %1999 = vmatpush1.bf16.msra.mxu0 %v12640_v26  ;;  %v8996_v26 = vrot.slane %v8637_v8, 2  ;;  %v12667_v8 = vld [vmem:[%s19301_s23 + $0x2e0] ss:$16 sps:$4 sm:$0xff]  }
  0x6b   : > { %2000 = vmatprep.subr.bf16.mxu0 %v12645_v27  ;;  %v551_v27 = vld [vmem:[%s13848_s21 + $0x18] sm:$0xff] }
  0x6c   : > { %v14206_v56 = vpack.c.bf16 %v557_v29, %v551_v27  ;;  %2171 = vmatpush1.bf16.msra.mxu1 %v12738_v59  ;;  %v14257_v27 = vld [vmem:[%s13848_s21 + $0x70] sm:$0xff]  ;;  %v8951_v29 = vadd.f32 %v14209_v58, %v14175_v38 }
  0x6d   : > { %1966 = vmatmul.mubr.bf16.gmra.mrb[4].mxu0 %v14101_v34  ;;  %v8501_v33 = vrot.slane %v14257_v27, 7 }
  0x6e   : > { %2001 = vmatpush1.bf16.msra.mxu0 %v12643_v36  ;;  %1975 = vmatprep.mubr.bf16.mxu0 %v14106_v37  ;;  %v8945_v36 = vadd.f32 %v14182_v31, %v14154_v5 }
  0x6f   : > { %2002 = vmatprep.subr.bf16.mxu0 %v12648_v41  ;;  %v14188_v41 = vsel %vm2492_vm2, %v8995_v14, %v8996_v26  ;;  %v12750_v14 = vld [vmem:[%s19301_s23 + $0x20c] ss:$16 sps:$4 sm:$0xff]   ;;  %v12687_v26 = vld [vmem:[%s19301_s23 + $0x344] ss:$16 sps:$4 sm:$0xff]   ;;  %v8600_v48 = vsel %vm8584_vm0, 0.0, %v8501_v33 }
  0x70   : > { %19325 = vst [vmem:[#allocation33_spill] sm:$0xff] %v14188_v41  ;;  %v9161_v51 = vadd.f32 %v14188_v41, %v8945_v36  ;;  %v12762_v36 = vld [vmem:[%s19301_s23 + $0x24c] ss:$16 sps:$4 sm:$0xff]  }
  0x72   : > { %2003 = vmatpush1.bf16.msra.mxu0 %v12646_v43  ;;  %v9013_v43 = vrot.slane %v14175_v38, 2 }
  0x73   : > { %2004 = vmatprep.subr.bf16.mxu0 %v12651_v49  ;;  %v12661_v49 = vld [vmem:[%s19301_s23 + $0x2c0] ss:$16 sps:$4 sm:$0xff]  }
  0x74   : > { %v14219_v3 = vsel %vm2492_vm2, %v9013_v43, %v9014_v45  ;;  %v12760_v45 = vld [vmem:[%s19301_s23 + $0x248] ss:$16 sps:$4 sm:$0xff]  }
  0x75   : > { %1976 = vmatmul.mubr.bf16.gmra.mrb[8].mxu0 %v14145_v63  ;;  %19327 = vst [vmem:[#allocation35_spill] sm:$0xff] %v14219_v3  ;;  %v9167_v43 = vadd.f32 %v14219_v3, %v8951_v29 }
  0x76   : > { %2005 = vmatpush1.bf16.msra.mxu0 %v12649_v60  ;;  %1985 = vmatprep.mubr.bf16.mxu0 %v14147_v0  ;;  %v9209_v60 = vadd.f32 %v9161_v51, %v14175_v38  ;;  %v8649_v51 = vsel %vm8584_vm0, %v8501_v33, 0.0 }
  0x77   : > { %2006 = vmatprep.subr.bf16.mxu0 %v12657_v61  ;;  %v12742_v61 = vld [vmem:[%s19301_s23 + $0x1ec] ss:$16 sps:$4 sm:$0xff]  }
  0x78   : > { %v9293_v9 = vadd.f32 %v9209_v60, %v14209_v58  ;;  %2172 = vmatprep.subr.bf16.mxu1 %v12742_v61  ;;  %v8816_v60 = vrot.slane %v8649_v51, 1  ;;  %v9031_v61 = vrot.slane %v8600_v48, 2 }
  0x79   : > { %2173 = vmatpush1.bf16.msra.mxu1 %v12744_v11 }
  0x7a   : > { %2007 = vmatpush1.bf16.msra.mxu0 %v12655_v10  ;;  %v12675_v10 = vld [vmem:[%s19301_s23 + $0x304] ss:$16 sps:$4 sm:$0xff]   ;;  %v9365_v13 = vadd.f32 %v9293_v9, %v14219_v3  ;;  %2215 = vmatprep.subr.bf16.mxu1 %v12750_v14  ;;  %v12691_v9 = vld [vmem:[%s19301_s23 + $0x360] ss:$16 sps:$4 sm:$0xff]   ;;  %v19344_v3 = vrot.slane %v14495_v30, 7 }
  0x7b   : > { %2008 = vmatprep.subr.bf16.mxu0 %v12663_v17  ;;  %v12681_v17 = vld [vmem:[%s19301_s23 + $0x324] ss:$16 sps:$4 sm:$0xff]  }
  0x7c   : > { %2175 = vmatmul.mubr.bf16.vlgmr.msra.gmra.mrb[0].mxu1 %v14067_v18  ;;  %v12685_v18 = vld [vmem:[%s19301_s23 + $0x340] ss:$16 sps:$4 sm:$0xff]   ;;  %v9413_v11 = vadd.f32 %v9365_v13, %v8600_v48  ;;  %v12699_v14 = vld [vmem:[%s19301_s23 + $0x384] ss:$16 sps:$4 sm:$0xff]  }
  0x7d   : > { %1986 = vmatmul.mubr.bf16.gmra.mrb[12].mxu0 %v14200_v50  ;;  %2216 = vmatpush1.bf16.msra.mxu1 %v12748_v21 }
  0x7e   : > { %2009 = vmatpush1.bf16.msra.mxu0 %v12661_v49  ;;  %2028 = vmatprep.mubr.bf16.mxu0 %v14206_v56  ;;  %v14284_v49 = vld [vmem:[%s13848_s21 + $0xa0] sm:$0xff] }
  0x7f   : > { %2010 = vmatprep.subr.bf16.mxu0 %v12669_v54  ;;  %2217 = vmatprep.subr.bf16.mxu1 %v12756_v23  ;;  %19328 = vst [vmem:[#allocation36_spill] sm:$0xff] %v14284_v49  ;;  %v8815_v54 = vrot.slane %v8600_v48, 1  ;;  %v19129_v59 = vrot.slane %v14284_v49, 7 }
  0x80   : > { %2184 = vmatprep.mubr.bf16.mxu1 %v14072_v22  ;;  %v12768_v22 = vld [vmem:[%s19301_s23 + $0x26c] ss:$16 sps:$4 sm:$0xff]  }
  0x81   : > { %2218 = vmatpush1.bf16.msra.mxu1 %v12754_v32  ;;  %v14314_v23 = vsel %vm8584_vm0, 0.0, %v19129_v59  ;;  %v12772_v32 = vld [vmem:[%s19301_s23 + $0x288] ss:$16 sps:$4 sm:$0xff]  }
  0x82   : > { %2011 = vmatpush1.bf16.msra.mxu0 %v12667_v8  ;;  %2219 = vmatprep.subr.bf16.mxu1 %v12762_v36  ;;  %v9032_v8 = vrot.slane %v8649_v51, 2  ;;  %19332 = vst [vmem:[#allocation40_spill] sm:$0xff] %v14314_v23  ;;  %v12780_v36 = vld [vmem:[%s19301_s23 + $0x2ac] ss:$16 sps:$4 sm:$0xff]   ;;  %v12715_v51 = vld [vmem:[%s19301_s23 + $0x3e0] ss:$16 sps:$4 sm:$0xff]  }
  0x83   : > { %2012 = vmatprep.subr.bf16.mxu0 %v12675_v10  ;;  %v14291_v10 = vadd.f32 %v9167_v43, %v8600_v48  ;;  %v12778_v43 = vld [vmem:[%s19301_s23 + $0x2a8] ss:$16 sps:$4 sm:$0xff]  }
  0x84   : > { %2185 = vmatmul.mubr.bf16.gmra.mrb[4].mxu1 %v14101_v34  ;;  %v12774_v34 = vld [vmem:[%s19301_s23 + $0x28c] ss:$16 sps:$4 sm:$0xff]  }
  0x85   : > { %19329 = vst [vmem:[#allocation37_spill] sm:$0xff] %v14291_v10  ;;  %2220 = vmatpush1.bf16.msra.mxu1 %v12760_v45  ;;  %2194 = vmatprep.mubr.bf16.mxu1 %v14106_v37  ;;  %v12705_v37 = vld [vmem:[%s19301_s23 + $0x3a4] ss:$16 sps:$4 sm:$0xff]   ;;  %v12786_v45 = vld [vmem:[%s19301_s23 + $0x2cc] ss:$16 sps:$4 sm:$0xff]  }
  0x86   : > { %2013 = vmatpush1.bf16.msra.mxu0 %v12673_v16  ;;  %v12766_v16 = vld [vmem:[%s19301_s23 + $0x268] ss:$16 sps:$4 sm:$0xff]   ;;  %2221 = vmatprep.subr.bf16.mxu1 %v12768_v22  ;;  %v12717_v22 = vld [vmem:[%s19301_s23 + $0x3e4] ss:$16 sps:$4 sm:$0xff]  }
  0x87   : > { %2014 = vmatprep.subr.bf16.mxu0 %v12681_v17  ;;  %v14301_v17 = vsel %vm8769_vm1, %v8815_v54, %v8816_v60  ;;  %v12723_v54 = vld [vmem:[%s19301_s23 + $0x404] ss:$16 sps:$4 sm:$0xff]   ;;  %v563_v60 = vld [vmem:[%s13848_s21 + $0x78] sm:$0xff] }
  0x88   : > { %19330 = vst [vmem:[#allocation38_spill] sm:$0xff] %v14301_v17  ;;  %v8957_v21 = vadd.f32 %v14301_v17, %v8600_v48  ;;  %v14305_v13 = vadd.f32 %v9413_v11, %v14301_v17  ;;  %v12784_v48 = vld [vmem:[%s19301_s23 + $0x2c8] ss:$16 sps:$4 sm:$0xff]   ;;  %v14379_v11 = vpack.c.bf16 %v14150_v1, %v14130_v55  ;;  %v14393_v55 = vld [vmem:[%s13848_s21 + $0x20] sm:$0xff]  ;;  %v12804_v1 = vld [vmem:[%s19301_s23 + $0x32c] ss:$16 sps:$4 sm:$0xff]  }
  0x89   : > { %2222 = vmatpush1.bf16.msra.mxu1 %v12766_v16 }
  0x8a   : > { %2015 = vmatpush1.bf16.msra.mxu0 %v12679_v40  ;;  %19331 = vst [vmem:[#allocation39_spill] sm:$0xff] %v14305_v13  ;;  %v14317_v40 = vsel %vm2492_vm2, %v9031_v61, %v9032_v8  ;;  %2223 = vmatprep.subr.bf16.mxu1 %v12774_v34  ;;  %v569_v61 = vld [vmem:[%s13848_s21 + $0xa8] sm:$0xff]  ;;  %v14401_v34 = vld [vmem:[%s13848_s21 + $0x50] sm:$0xff] }
  0x8b   : > { %2016 = vmatprep.subr.bf16.mxu0 %v12687_v26  ;;  %19333 = vst [vmem:[#allocation41_spill] sm:$0xff] %v14317_v40  ;;  %v12697_v26 = vld [vmem:[%s19301_s23 + $0x380] ss:$16 sps:$4 sm:$0xff]   ;;  %v9173_v29 = vadd.f32 %v14317_v40, %v8957_v21  ;;  %v12790_v8 = vld [vmem:[%s19301_s23 + $0x2e8] ss:$16 sps:$4 sm:$0xff]   ;;  %v14387_v16 = vpack.c.bf16 %v569_v61, %v563_v60  ;;  %v8491_v21 = vrot.slane %v14393_v55, 7 }
  0x8c   : > { %2195 = vmatmul.mubr.bf16.gmra.mrb[8].mxu1 %v14145_v63  ;;  %v12709_v63 = vld [vmem:[%s19301_s23 + $0x3c0] ss:$16 sps:$4 sm:$0xff]   ;;  %v12741_v61 = vld [vmem:[%s19301_s23 + $0x464] ss:$16 sps:$4 sm:$0xff]  }
  0x8d   : > { %v14330_v33 = vadd.f32 %v9173_v29, %v14314_v23  ;;  %2224 = vmatpush1.bf16.msra.mxu1 %v12772_v32  ;;  %2204 = vmatprep.mubr.bf16.mxu1 %v14147_v0  ;;  %v12792_v0 = vld [vmem:[%s19301_s23 + $0x2ec] ss:$16 sps:$4 sm:$0xff]   ;;  %v8497_v32 = vrot.slane %v14401_v34, 7 }
  0x8e   : > { %2017 = vmatpush1.bf16.msra.mxu0 %v12685_v18  ;;  %v12703_v18 = vld [vmem:[%s19301_s23 + $0x3a0] ss:$16 sps:$4 sm:$0xff]   ;;  %2225 = vmatprep.subr.bf16.mxu1 %v12780_v36  ;;  %v575_v29 = vld [vmem:[%s13848_s21 + $0xd8] sm:$0xff]  ;;  %v12735_v36 = vld [vmem:[%s19301_s23 + $0x444] ss:$16 sps:$4 sm:$0xff]  }
  0x8f   : > { %2018 = vmatprep.subr.bf16.mxu0 %v12693_v42  ;;  %19334 = vst [vmem:[#allocation42_spill] sm:$0xff] %v14330_v33  ;;  %v12711_v42 = vld [vmem:[%s19301_s23 + $0x3c4] ss:$16 sps:$4 sm:$0xff]  }
  0x91   : > { %2226 = vmatpush1.bf16.msra.mxu1 %v12778_v43  ;;  %v8639_v43 = vsel %vm8584_vm0, %v8491_v21, 0.0 }
  0x92   : > { %2019 = vmatpush1.bf16.msra.mxu0 %v12691_v9  ;;  %2227 = vmatprep.subr.bf16.mxu1 %v12786_v45  ;;  %v12798_v9 = vld [vmem:[%s19301_s23 + $0x30c] ss:$16 sps:$4 sm:$0xff]   ;;  %v8786_v60 = vrot.slane %v8639_v43, 1 }
  0x93   : > { %2020 = vmatprep.subr.bf16.mxu0 %v12699_v14  ;;  %v12729_v14 = vld [vmem:[%s19301_s23 + $0x424] ss:$16 sps:$4 sm:$0xff]   ;;  %v12807_v45 = vld [vmem:[%s19301_s23 + $0x34c] ss:$16 sps:$4 sm:$0xff]  }
  0x94   : > { %2205 = vmatmul.mubr.bf16.gmra.mrb[12].mxu1 %v14200_v50  ;;  %v12721_v50 = vld [vmem:[%s19301_s23 + $0x400] ss:$16 sps:$4 sm:$0xff]  }
  0x95   : > { %2228 = vmatpush1.bf16.msra.mxu1 %v12784_v48  ;;  %2247 = vmatprep.mubr.bf16.mxu1 %v14206_v56  ;;  %v12796_v56 = vld [vmem:[%s19301_s23 + $0x308] ss:$16 sps:$4 sm:$0xff]  }
  0x96   : > { %2021 = vmatpush1.bf16.msra.mxu0 %v12697_v26  ;;  %2229 = vmatprep.subr.bf16.mxu1 %v12792_v0  ;;  %v12727_v26 = vld [vmem:[%s19301_s23 + $0x420] ss:$16 sps:$4 sm:$0xff]  }
  0x97   : > { %2022 = vmatprep.subr.bf16.mxu0 %v12705_v37  ;;  %v581_v37 = vld [vmem:[%s13848_s21 + $0x108] sm:$0xff]  ;;  %v12733_v0 = vld [vmem:[%s19301_s23 + $0x440] ss:$16 sps:$4 sm:$0xff]  }
  0x99   : > { %2230 = vmatpush1.bf16.msra.mxu1 %v12790_v8  ;;  %v9002_v8 = vrot.slane %v8639_v43, 2  ;;  %v593_v43 = vld [vmem:[%s13848_s21 + $0x168] sm:$0xff] }
  0x9a   : > { %2023 = vmatpush1.bf16.msra.mxu0 %v12703_v18  ;;  %2231 = vmatprep.subr.bf16.mxu1 %v12798_v9  ;;  %v12802_v18 = vld [vmem:[%s19301_s23 + $0x328] ss:$16 sps:$4 sm:$0xff]  }
  0x9b   : > { %2024 = vmatprep.subr.bf16.mxu0 %v12711_v42  ;;  %v14417_v42 = vsel %vm8584_vm0, 0.0, %v8491_v21  ;;  %v12805_v9 = vld [vmem:[%s19301_s23 + $0x348] ss:$16 sps:$4 sm:$0xff]   ;;  %v12747_v21 = vld [vmem:[%s19301_s23 + $0x484] ss:$16 sps:$4 sm:$0xff]  }
  0x9c   : > { %19335 = vst [vmem:[#allocation43_spill] sm:$0xff] %v14417_v42  ;;  %v8785_v48 = vrot.slane %v14417_v42, 1 }
  0x9d   : > { %2232 = vmatpush1.bf16.msra.mxu1 %v12796_v56 }
  0x9e   : > { %2025 = vmatpush1.bf16.msra.mxu0 %v12709_v63  ;;  %2233 = vmatprep.subr.bf16.mxu1 %v12804_v1  ;;  %v14425_v63 = vpack.c.bf16 %v14284_v49, %v14257_v27  ;;  %v9001_v27 = vrot.slane %v14417_v42, 2  ;;  %v14449_v56 = vsel %vm8769_vm1, %v8785_v48, %v8786_v60  ;;  %v12810_v1 = vld [vmem:[%s19301_s23 + $0x36c] ss:$16 sps:$4 sm:$0xff]   ;;  %v12808_v48 = vld [vmem:[%s19301_s23 + $0x368] ss:$16 sps:$4 sm:$0xff]   ;;  %v14473_v60 = vld [vmem:[%s13848_s21 + $0x80] sm:$0xff] }
  0x9f   : > { %2026 = vmatprep.subr.bf16.mxu0 %v12717_v22  ;;  %v14427_v22 = vpack.c.bf16 %v581_v37, %v575_v29  ;;  %19337 = vst [vmem:[#allocation45_spill] sm:$0xff] %v14449_v56  ;;  %v587_v29 = vld [vmem:[%s13848_s21 + $0x138] sm:$0xff] }
  0xa1   : > { %2234 = vmatpush1.bf16.msra.mxu1 %v12802_v18  ;;  %v14464_v18 = vsel %vm2492_vm2, %v9001_v27, %v9002_v8  ;;  %v12813_v27 = vld [vmem:[%s19301_s23 + $0x38c] ss:$16 sps:$4 sm:$0xff]   ;;  %v12753_v8 = vld [vmem:[%s19301_s23 + $0x4a4] ss:$16 sps:$4 sm:$0xff]  }
  0xa2   : > { %2027 = vmatpush1.bf16.msra.mxu0 %v12715_v51  ;;  %v14434_v51 = vsel %vm8584_vm0, 0.0, %v8497_v32  ;;  %2235 = vmatprep.subr.bf16.mxu1 %v12807_v45  ;;  %19338 = vst [vmem:[#allocation46_spill] sm:$0xff] %v14464_v18 }
  0xa3   : > { %2069 = vmatprep.subr.bf16.mxu0 %v12723_v54  ;;  %19336 = vst [vmem:[#allocation44_spill] sm:$0xff] %v14434_v51  ;;  %v8645_v54 = vsel %vm8584_vm0, %v8497_v32, 0.0  ;;  %v8803_v37 = vrot.slane %v14434_v51, 1  ;;  %v9019_v59 = vrot.slane %v14434_v51, 2 }
  0xa4   : > { %v8804_v32 = vrot.slane %v8645_v54, 1  ;;  %v9020_v53 = vrot.slane %v8645_v54, 2 }
  0xa5   : > { %2029 = vmatmul.mubr.bf16.vlgmr.msra.gmra.mrb[0].mxu0 %v14379_v11  ;;  %2236 = vmatpush1.bf16.msra.mxu1 %v12805_v9 }
  0xa6   : > { %2070 = vmatpush1.bf16.msra.mxu0 %v12721_v50  ;;  %2038 = vmatprep.mubr.bf16.mxu0 %v14387_v16  ;;  %v12739_v50 = vld [vmem:[%s19301_s23 + $0x460] ss:$16 sps:$4 sm:$0xff]  }
  0xa7   : > { %2071 = vmatprep.subr.bf16.mxu0 %v12729_v14  ;;  %v574_v14 = vld [vmem:[%s13848_s21 + $0xd0] sm:$0xff]  ;;  %2237 = vmatprep.subr.bf16.mxu1 %v12810_v1  ;;  %v14492_v1 = vpack.c.bf16 %v593_v43, %v587_v29 }
  0xa9   : > { %2238 = vmatpush1.bf16.msra.mxu1 %v12808_v48  ;;  %v12759_v48 = vld [vmem:[%s19301_s23 + $0x4c4] ss:$16 sps:$4 sm:$0xff]  }
  0xaa   : > { %2072 = vmatpush1.bf16.msra.mxu0 %v12727_v26  ;;  %v580_v26 = vld [vmem:[%s13848_s21 + $0x100] sm:$0xff]  ;;  %2239 = vmatprep.subr.bf16.mxu1 %v12813_v27  ;;  %v553_v27 = vld [vmem:[%s13848_s21 + $0x28] sm:$0xff] }
  0xab   : > { %2073 = vmatprep.subr.bf16.mxu0 %v12735_v36  ;;  %v8947_v36 = vadd.f32 %v14449_v56, %v14417_v42  ;;  %v14486_v9 = vpack.c.bf16 %v580_v26, %v574_v14  ;;  %v12811_v14 = vld [vmem:[%s19301_s23 + $0x388] ss:$16 sps:$4 sm:$0xff]  }
  0xad   : > { %2039 = vmatmul.mubr.bf16.gmra.mrb[4].mxu0 %v14425_v63  ;;  %v9163_v45 = vadd.f32 %v14464_v18, %v8947_v36  ;;  %v14489_v36 = vsel %vm8769_vm1, %v8803_v37, %v8804_v32  ;;  %v12751_v37 = vld [vmem:[%s19301_s23 + $0x4a0] ss:$16 sps:$4 sm:$0xff]   ;;  %v14509_v32 = vsel %vm2492_vm2, %v9019_v59, %v9020_v53  ;;  %2240 = vmatpush1.bf16.msra.mxu1 %v12811_v14 }
  0xae   : > { %2074 = vmatpush1.bf16.msra.mxu0 %v12733_v0  ;;  %2048 = vmatprep.mubr.bf16.mxu0 %v14427_v22  ;;  %v8503_v0 = vrot.slane %v14473_v60, 7  ;;  %19339 = vst [vmem:[#allocation47_spill] sm:$0xff] %v14489_v36  ;;  %v8953_v10 = vadd.f32 %v14489_v36, %v14434_v51  ;;  %19341 = vst [vmem:[#allocation49_spill] sm:$0xff] %v14509_v32 }
  0xaf   : > { %2075 = vmatprep.subr.bf16.mxu0 %v12741_v61  ;;  %v12745_v61 = vld [vmem:[%s19301_s23 + $0x480] ss:$16 sps:$4 sm:$0xff]   ;;  %v9211_v54 = vadd.f32 %v9163_v45, %v14434_v51  ;;  %v559_v51 = vld [vmem:[%s13848_s21 + $0x58] sm:$0xff] }
  0xb0   : > { %v8602_v18 = vsel %vm8584_vm0, 0.0, %v8503_v0  ;;  %v8651_v33 = vsel %vm8584_vm0, %v8503_v0, 0.0  ;;  %v586_v0 = vld [vmem:[%s13848_s21 + $0x130] sm:$0xff]  ;;  %v9169_v53 = vadd.f32 %v14509_v32, %v8953_v10  ;;  %v14552_v14 = vpack.c.bf16 %v559_v51, %v553_v27  ;;  %v12822_v51 = vld [vmem:[%s19301_s23 + $0x3ec] ss:$16 sps:$4 sm:$0xff]  }
  0xb1   : > { %v8821_v26 = vrot.slane %v8602_v18, 1  ;;  %v8822_v29 = vrot.slane %v8651_v33, 1  ;;  %v9037_v43 = vrot.slane %v8602_v18, 2  ;;  %v9038_v45 = vrot.slane %v8651_v33, 2  ;;  %v592_v33 = vld [vmem:[%s13848_s21 + $0x160] sm:$0xff] }
  0xb2   : > { %2076 = vmatpush1.bf16.msra.mxu0 %v12739_v50  ;;  %v9295_v59 = vadd.f32 %v9211_v54, %v14489_v36  ;;  %v14537_v10 = vadd.f32 %v9169_v53, %v8602_v18  ;;  %v12814_v54 = vld [vmem:[%s19301_s23 + $0x3a8] ss:$16 sps:$4 sm:$0xff]   ;;  %v12777_v27 = vld [vmem:[%s19301_s23 + $0x524] ss:$16 sps:$4 sm:$0xff]  }
  0xb3   : > { %2077 = vmatprep.subr.bf16.mxu0 %v12747_v21  ;;  %v12816_v21 = vld [vmem:[%s19301_s23 + $0x3ac] ss:$16 sps:$4 sm:$0xff]   ;;  %v14520_v50 = vsel %vm8769_vm1, %v8821_v26, %v8822_v29  ;;  %v14530_v56 = vsel %vm2492_vm2, %v9037_v43, %v9038_v45  ;;  %v14535_v26 = vsel %vm8584_vm0, 0.0, %v19344_v3  ;;  %v14547_v43 = vpack.c.bf16 %v592_v33, %v586_v0  ;;  %v12757_v45 = vld [vmem:[%s19301_s23 + $0x4c0] ss:$16 sps:$4 sm:$0xff]  }
  0xb4   : > { %19342 = vst [vmem:[#allocation50_spill] sm:$0xff] %v14520_v50  ;;  %v8959_v17 = vadd.f32 %v14520_v50, %v8602_v18  ;;  %19343 = vst [vmem:[#allocation51_spill] sm:$0xff] %v14530_v56  ;;  %2241 = vmatprep.subr.bf16.mxu1 %v12816_v21  ;;  %v12820_v0 = vld [vmem:[%s19301_s23 + $0x3e8] ss:$16 sps:$4 sm:$0xff]   ;;  %v12769_v33 = vld [vmem:[%s19301_s23 + $0x500] ss:$16 sps:$4 sm:$0xff]  }
  0xb5   : > { %2049 = vmatmul.mubr.bf16.gmra.mrb[8].mxu0 %v14486_v9  ;;  %19345 = vst [vmem:[#allocation52_spill] sm:$0xff] %v14535_v26  ;;  %19346 = vst [vmem:[#allocation53_spill] sm:$0xff] %v14537_v10  ;;  %2242 = vmatpush1.bf16.msra.mxu1 %v12814_v54  ;;  %v12828_v54 = vld [vmem:[%s19301_s23 + $0x42c] ss:$16 sps:$4 sm:$0xff]  }
  0xb6   : > { %2078 = vmatpush1.bf16.msra.mxu0 %v12745_v61  ;;  %2058 = vmatprep.mubr.bf16.mxu0 %v14492_v1  ;;  %v9367_v61 = vadd.f32 %v9295_v59, %v14509_v32  ;;  %v9175_v29 = vadd.f32 %v14530_v56, %v8959_v17  ;;  %v12765_v17 = vld [vmem:[%s19301_s23 + $0x4e4] ss:$16 sps:$4 sm:$0xff]   ;;  %v12825_v59 = vld [vmem:[%s19301_s23 + $0x40c] ss:$16 sps:$4 sm:$0xff]  }
  0xb7   : > { %2079 = vmatprep.subr.bf16.mxu0 %v12753_v8  ;;  %v12819_v8 = vld [vmem:[%s19301_s23 + $0x3cc] ss:$16 sps:$4 sm:$0xff]  }
  0xb8   : > { %v9415_v3 = vadd.f32 %v9367_v61, %v8602_v18  ;;  %v14555_v53 = vadd.f32 %v9175_v29, %v14535_v26  ;;  %v12817_v18 = vld [vmem:[%s19301_s23 + $0x3c8] ss:$16 sps:$4 sm:$0xff]   ;;  %2243 = vmatprep.subr.bf16.mxu1 %v12819_v8  ;;  %v12775_v29 = vld [vmem:[%s19301_s23 + $0x520] ss:$16 sps:$4 sm:$0xff]   ;;  %v12783_v8 = vld [vmem:[%s19301_s23 + $0x544] ss:$16 sps:$4 sm:$0xff]  }
  0xb9   : > { %2244 = vmatpush1.bf16.msra.mxu1 %v12817_v18  ;;  %v12823_v61 = vld [vmem:[%s19301_s23 + $0x408] ss:$16 sps:$4 sm:$0xff]  }
  0xba   : > { %2080 = vmatpush1.bf16.msra.mxu0 %v12751_v37  ;;  %19347 = vst [vmem:[#allocation54_spill] sm:$0xff] %v14555_v53  ;;  %v14561_v21 = vadd.f32 %v9415_v3, %v14520_v50  ;;  %v12763_v37 = vld [vmem:[%s19301_s23 + $0x4e0] ss:$16 sps:$4 sm:$0xff]   ;;  %2245 = vmatprep.subr.bf16.mxu1 %v12822_v51  ;;  %v12826_v3 = vld [vmem:[%s19301_s23 + $0x428] ss:$16 sps:$4 sm:$0xff]  }
  0xbb   : > { %2081 = vmatprep.subr.bf16.mxu0 %v12759_v48  ;;  %v12771_v48 = vld [vmem:[%s19301_s23 + $0x504] ss:$16 sps:$4 sm:$0xff]   ;;  %v12829_v18 = vld [vmem:[%s19301_s23 + $0x448] ss:$16 sps:$4 sm:$0xff]   ;;  %v12787_v51 = vld [vmem:[%s19301_s23 + $0x560] ss:$16 sps:$4 sm:$0xff]  }
  0xbc   : > { %19348 = vst [vmem:[#allocation55_spill] sm:$0xff] %v14561_v21 }
  0xbd   : > { %2059 = vmatmul.mubr.bf16.gmra.mrb[12].mxu0 %v14547_v43  ;;  %2246 = vmatpush1.bf16.msra.mxu1 %v12820_v0  ;;  %v12837_v0 = vld [vmem:[%s19301_s23 + $0x48c] ss:$16 sps:$4 sm:$0xff]  }
  0xbe   : > { %2082 = vmatpush1.bf16.msra.mxu0 %v12757_v45  ;;  %10930 = vmatprep.mubr.msk.bf16.mxu0 %vm1910_vm3, %v14552_v14  ;;  %v12831_v45 = vld [vmem:[%s19301_s23 + $0x44c] ss:$16 sps:$4 sm:$0xff]  }
  0xbf   : > { %2083 = vmatprep.subr.bf16.mxu0 %v12765_v17  ;;  %2288 = vmatprep.subr.bf16.mxu1 %v12825_v59  ;;  %v12781_v17 = vld [vmem:[%s19301_s23 + $0x540] ss:$16 sps:$4 sm:$0xff]  }
  0xc0   : > { %2248 = vmatmul.mubr.bf16.vlgmr.msra.gmra.mrb[0].mxu1 %v14379_v11  ;;  %v12789_v11 = vld [vmem:[%s19301_s23 + $0x564] ss:$16 sps:$4 sm:$0xff]   ;;  %v12793_v59 = vld [vmem:[%s19301_s23 + $0x580] ss:$16 sps:$4 sm:$0xff]  }
  0xc1   : > { %2289 = vmatpush1.bf16.msra.mxu1 %v12823_v61  ;;  %2257 = vmatprep.mubr.bf16.mxu1 %v14387_v16  ;;  %v12834_v16 = vld [vmem:[%s19301_s23 + $0x46c] ss:$16 sps:$4 sm:$0xff]  }
  0xc2   : > { %2084 = vmatpush1.bf16.msra.mxu0 %v12763_v37  ;;  %2290 = vmatprep.subr.bf16.mxu1 %v12828_v54  ;;  %v12795_v37 = vld [vmem:[%s19301_s23 + $0x584] ss:$16 sps:$4 sm:$0xff]   ;;  %v565_v61 = vld [vmem:[%s13848_s21 + $0x88] sm:$0xff]  ;;  %v571_v54 = vld [vmem:[%s13848_s21 + $0xb8] sm:$0xff] }
  0xc3   : > { %2085 = vmatprep.subr.bf16.mxu0 %v12771_v48  ;;  %v12832_v48 = vld [vmem:[%s19301_s23 + $0x468] ss:$16 sps:$4 sm:$0xff]  }
  0xc5   : > { %2291 = vmatpush1.bf16.msra.mxu1 %v12826_v3  ;;  %v12843_v3 = vld [vmem:[%s19301_s23 + $0x4cc] ss:$16 sps:$4 sm:$0xff]  }
  0xc6   : > { %2086 = vmatpush1.bf16.msra.mxu0 %v12769_v33  ;;  %2292 = vmatprep.subr.bf16.mxu1 %v12831_v45  ;;  %v12835_v33 = vld [vmem:[%s19301_s23 + $0x488] ss:$16 sps:$4 sm:$0xff]   ;;  %v14666_v45 = vpack.c.bf16 %v14401_v34, %v14393_v55 }
  0xc7   : > { %2087 = vmatprep.subr.bf16.mxu0 %v12777_v27  ;;  %v12799_v27 = vld [vmem:[%s19301_s23 + $0x5a0] ss:$16 sps:$4 sm:$0xff]   ;;  %v12870_v55 = vld [vmem:[%s19349_s3 + $0x48] sm:$0xff]  }
  0xc8   : > { %2258 = vmatmul.mubr.bf16.gmra.mrb[4].mxu1 %v14425_v63  ;;  %v12801_v63 = vld [vmem:[%s19301_s23 + $0x5a4] ss:$16 sps:$4 sm:$0xff]   ;;  %v577_v34 = vld [vmem:[%s13848_s21 + $0xe8] sm:$0xff] }
  0xc9   : > { %2293 = vmatpush1.bf16.msra.mxu1 %v12829_v18  ;;  %2267 = vmatprep.mubr.bf16.mxu1 %v14427_v22  ;;  %v12840_v22 = vld [vmem:[%s19301_s23 + $0x4ac] ss:$16 sps:$4 sm:$0xff]   ;;  %v12868_v18 = vld [vmem:[%s19349_s3] sm:$0xff]  }
  0xca   : > { %2088 = vmatpush1.bf16.msra.mxu0 %v12775_v29  ;;  %2294 = vmatprep.subr.bf16.mxu1 %v12834_v16  ;;  %v12838_v29 = vld [vmem:[%s19301_s23 + $0x4a8] ss:$16 sps:$4 sm:$0xff]  }
  0xcb   : > { %2089 = vmatprep.subr.bf16.mxu0 %v12783_v8  ;;  %v12866_v8 = vld [vmem:[%s19349_s3 + $0x40] sm:$0xff]   ;;  %v12844_v16 = vld [vmem:[%s19301_s23 + $0x4e8] ss:$16 sps:$4 sm:$0xff]  }
  0xcd   : > { %2295 = vmatpush1.bf16.msra.mxu1 %v12832_v48  ;;  %v11611_v48 = vpack.c.bf16 %v14495_v30, %v14473_v60  ;;  %v595_v60 = vld [vmem:[%s13848_s21 + $0x178] sm:$0xff] }
  0xce   : > { %2090 = vmatpush1.bf16.msra.mxu0 %v12781_v17  ;;  %2296 = vmatprep.subr.bf16.mxu1 %v12837_v0  ;;  %v12841_v17 = vld [vmem:[%s19301_s23 + $0x4c8] ss:$16 sps:$4 sm:$0xff]  }
  0xcf   : > { %2091 = vmatprep.subr.bf16.mxu0 %v12789_v11  ;;  %v14671_v11 = vpack.c.bf16 %v571_v54, %v565_v61  ;;  %v12847_v0 = vld [vmem:[%s19301_s23 + $0x508] ss:$16 sps:$4 sm:$0xff]  }
  0xd0   : > { %2268 = vmatmul.mubr.bf16.gmra.mrb[8].mxu1 %v14486_v9  ;;  %v12846_v9 = vld [vmem:[%s19301_s23 + $0x4ec] ss:$16 sps:$4 sm:$0xff]   ;;  %v12853_v54 = vld [vmem:[%s19301_s23 + $0x548] ss:$16 sps:$4 sm:$0xff]  }
  0xd1   : > { %2297 = vmatpush1.bf16.msra.mxu1 %v12835_v33  ;;  %2277 = vmatprep.mubr.bf16.mxu1 %v14492_v1  ;;  %v583_v1 = vld [vmem:[%s13848_s21 + $0x118] sm:$0xff]  ;;  %v582_v33 = vld [vmem:[%s13848_s21 + $0x110] sm:$0xff] }
  0xd2   : > { %2092 = vmatpush1.bf16.msra.mxu0 %v12787_v51  ;;  %2298 = vmatprep.subr.bf16.mxu1 %v12840_v22  ;;  %v12849_v51 = vld [vmem:[%s19301_s23 + $0x50c] ss:$16 sps:$4 sm:$0xff]  }
  0xd3   : > { %2093 = vmatprep.subr.bf16.mxu0 %v12795_v37  ;;  %v12872_v37 = vld [vmem:[%s19349_s3 + $0x8] sm:$0xff]  }
  0xd4   : > { %v12855_v22 = vld [vmem:[%s19301_s23 + $0x54c] ss:$16 sps:$4 sm:$0xff]  }
  0xd5   : > { %2299 = vmatpush1.bf16.msra.mxu1 %v12838_v29 }
  0xd6   : > { %2094 = vmatpush1.bf16.msra.mxu0 %v12793_v59  ;;  %2300 = vmatprep.subr.bf16.mxu1 %v12843_v3  ;;  %v12852_v59 = vld [vmem:[%s19301_s23 + $0x52c] ss:$16 sps:$4 sm:$0xff]   ;;  %v588_v3 = vld [vmem:[%s13848_s21 + $0x140] sm:$0xff] }
  0xd7   : > { %2095 = vmatprep.subr.bf16.mxu0 %v12801_v63  ;;  %v576_v63 = vld [vmem:[%s13848_s21 + $0xe0] sm:$0xff] }
  0xd8   : > { %2278 = vmatmul.mubr.bf16.gmra.mrb[12].mxu1 %v14547_v43  ;;  %v11618_v43 = vpack.c.bf16 %v583_v1, %v577_v34  ;;  %v11617_v61 = vpack.c.bf16 %v582_v33, %v576_v63  ;;  %v12859_v34 = vld [vmem:[%s19301_s23 + $0x588] ss:$16 sps:$4 sm:$0xff]   ;;  %v12864_v1 = vld [vmem:[%s19301_s23 + $0x5ac] ss:$16 sps:$4 sm:$0xff]   ;;  %v12873_v63 = vld [vmem:[%s19349_s3 + $0xd0] sm:$0xff]  }
  0xd9   : > { %2301 = vmatpush1.bf16.msra.mxu1 %v12841_v17  ;;  %10934 = vmatprep.mubr.msk.bf16.mxu1 %vm1910_vm3, %v14552_v14  ;;  %v589_v14 = vld [vmem:[%s13848_s21 + $0x148] sm:$0xff]  ;;  %v594_v17 = vld [vmem:[%s13848_s21 + $0x170] sm:$0xff]  ;;  %v12878_v33 = vld [vmem:[%s19349_s3 + $0x58] sm:$0xff]  }
  0xda   : > { %2096 = vmatpush1.bf16.msra.mxu0 %v12799_v27  ;;  %2302 = vmatprep.subr.bf16.mxu1 %v12846_v9  ;;  %v12850_v27 = vld [vmem:[%s19301_s23 + $0x528] ss:$16 sps:$4 sm:$0xff]   ;;  %v11624_v29 = vpack.c.bf16 %v595_v60, %v589_v14 }
  0xdb   : > { %11646 = vmatprep.subr.bf16.mxu0 %v12866_v8  ;;  %v12858_v8 = vld [vmem:[%s19301_s23 + $0x56c] ss:$16 sps:$4 sm:$0xff]   ;;  %v12856_v9 = vld [vmem:[%s19301_s23 + $0x568] ss:$16 sps:$4 sm:$0xff]  }
  0xdc   : > { %v12879_v14 = vld [vmem:[%s19349_s3 + $0x98] sm:$0xff]  }
  0xdd   : > { %2102 = vmatmul.mubr.bf16.vlgmr.msra.gmra.mrb[0].mxu0 %v14666_v45  ;;  %2303 = vmatpush1.bf16.msra.mxu1 %v12844_v16  ;;  %v12862_v16 = vld [vmem:[%s19301_s23 + $0x5a8] ss:$16 sps:$4 sm:$0xff]  }
  0xde   : > { %10931 = vmatprep.mubr.msk.bf16.mxu0 %vm1910_vm3, %v14671_v11  ;;  %11647 = vmatpush3.bf16.msra.mxu0 %v12868_v18  ;;  %v12861_v18 = vld [vmem:[%s19301_s23 + $0x58c] ss:$16 sps:$4 sm:$0xff]  }
  0xdf   : > { %11648 = vmatprep.subr.bf16.mxu0 %v12870_v55  ;;  %2304 = vmatprep.subr.bf16.mxu1 %v12849_v51  ;;  %v11623_v55 = vpack.c.bf16 %v594_v17, %v588_v3  ;;  %v12865_v51 = vld [vmem:[%s19349_s3 + $0xc0] sm:$0xff]   ;;  %v12880_v60 = vld [vmem:[%s19349_s3 + $0x18] sm:$0xff]   ;;  %v12887_v3 = vld [vmem:[%s19349_s3 + $0xa8] sm:$0xff]  }
  0xe0   : > { %v12888_v17 = vld [vmem:[%s19349_s3 + $0x28] sm:$0xff]  }
  0xe1   : > { %2305 = vmatpush1.bf16.msra.mxu1 %v12847_v0  ;;  %v12869_v0 = vld [vmem:[%s19349_s3 + $0xc8] sm:$0xff]  }
  0xe2   : > { %11649 = vmatpush3.bf16.msra.mxu0 %v12872_v37  ;;  %2306 = vmatprep.subr.bf16.mxu1 %v12852_v59  ;;  %v12867_v37 = vld [vmem:[%s19349_s3 + $0x80] sm:$0xff]   ;;  %v12871_v59 = vld [vmem:[%s19349_s3 + $0x88] sm:$0xff]  }
  0xe5   : > { %2112 = vmatmul.mubr.bf16.gmra.mrb[4].mxu0 %v11611_v48  ;;  %2307 = vmatpush1.bf16.msra.mxu1 %v12850_v27  ;;  %v12881_v27 = vld [vmem:[%s19349_s3 + $0xe0] sm:$0xff]  }
  0xe6   : > { %10932 = vmatprep.mubr.msk.bf16.mxu0 %vm1910_vm3, %v11618_v43  ;;  %2308 = vmatprep.subr.bf16.mxu1 %v12855_v22  ;;  %v12882_v22 = vld [vmem:[%s19349_s3 + $0x60] sm:$0xff]  }
  0xe9   : > { %2309 = vmatpush1.bf16.msra.mxu1 %v12853_v54  ;;  %v12884_v54 = vld [vmem:[%s19349_s3 + $0x20] sm:$0xff]  }
  0xea   : > { %2310 = vmatprep.subr.bf16.mxu1 %v12858_v8  ;;  %v12886_v8 = vld [vmem:[%s19349_s3 + $0x68] sm:$0xff]  }
  0xed   : > { %2122 = vmatmul.mubr.bf16.gmra.mrb[8].mxu0 %v11617_v61  ;;  %2311 = vmatpush1.bf16.msra.mxu1 %v12856_v9  ;;  %v12889_v9 = vld [vmem:[%s19349_s3 + $0xf0] sm:$0xff]  }
  0xee   : > { %10933 = vmatprep.mubr.msk.bf16.mxu0 %vm1910_vm3, %v11624_v29  ;;  %2312 = vmatprep.subr.bf16.mxu1 %v12861_v18  ;;  %v12890_v18 = vld [vmem:[%s19349_s3 + $0x70] sm:$0xff]  }
  0xf1   : > { %2313 = vmatpush1.bf16.msra.mxu1 %v12859_v34  ;;  %v12892_v34 = vld [vmem:[%s19349_s3 + $0x30] sm:$0xff]  }
  0xf2   : > { %2314 = vmatprep.subr.bf16.mxu1 %v12864_v1  ;;  %v12893_v1 = vld [vmem:[%s19349_s3 + $0xf8] sm:$0xff]  }
  0xf5   : > { %2132 = vmatmul.mubr.bf16.gmra.mrb[12].mxu0 %v11623_v55  ;;  %2315 = vmatpush1.bf16.msra.mxu1 %v12862_v16  ;;  %v12894_v16 = vld [vmem:[%s19349_s3 + $0x78] sm:$0xff]  }
  0xf6   : > { %11686 = vmatprep.subr.bf16.mxu1 %v12865_v51  ;;  %v12895_v51 = vld [vmem:[%s19349_s3 + $0xb8] sm:$0xff]  }
  0xf8   : > { %2321 = vmatmul.mubr.bf16.vlgmr.msra.gmra.mrb[0].mxu1 %v14666_v45  ;;  %v12874_v45 = vld [vmem:[%s19349_s3 + $0x50] sm:$0xff]  }
  0xf9   : > { %10935 = vmatprep.mubr.msk.bf16.mxu1 %vm1910_vm3, %v14671_v11  ;;  %11687 = vmatpush3.bf16.msra.mxu1 %v12867_v37  ;;  %v12875_v11 = vld [vmem:[%s19349_s3 + $0x90] sm:$0xff]   ;;  %v12896_v37 = vld [vmem:[%s19349_s3 + $0x38] sm:$0xff]  }
  0xfa   : > { %11688 = vmatprep.subr.bf16.mxu1 %v12869_v0  ;;  %11650 = vmatprep.subr.bf16.mxu0 %v12874_v45  ;;  %v14834_v0 = vld [vmem:[%s19349_s3 + $0x180] sm:$0xff]  }
  0xfd   : > { %11689 = vmatpush3.bf16.msra.mxu1 %v12871_v59  ;;  %v12898_v59 = vld [vmem:[%s19349_s3 + $0x140] sm:$0xff]  }
  0xfe   : > { %11690 = vmatprep.subr.bf16.mxu1 %v12873_v63  ;;  %v926_v63 = vlaneseq }
 0x100   : > { %2331 = vmatmul.mubr.bf16.gmra.mrb[4].mxu1 %v11611_v48  ;;  %v12876_v48 = vld [vmem:[%s19349_s3 + $0x10] sm:$0xff]   ;;  %v14840_v45 = vshrl.u32 %v926_v63, 7 }
 0x101   : > { %10936 = vmatprep.mubr.msk.bf16.mxu1 %vm1910_vm3, %v11618_v43  ;;  %11691 = vmatpush3.bf16.msra.mxu1 %v12875_v11  ;;  %v12877_v43 = vld [vmem:[%s19349_s3 + $0xd8] sm:$0xff]   ;;  %v14845_v11 = vld [vmem:[%s19106_s2] sm:$0xf] }
 0x102   : > { %11651 = vmatpush3.bf16.msra.mxu0 %v12876_v48  ;;  %11692 = vmatprep.subr.bf16.mxu1 %v12877_v43  ;;  %19350 = vst [vmem:[#allocation56_spill] sm:$0xff] %v14840_v45  ;;  %v14848_v48 = vsub.s32 0, %v14840_v45  ;;  %v14851_v43 = vsub.s32 1, %v14840_v45 }
 0x103   : > { %11652 = vmatprep.subr.bf16.mxu0 %v12878_v33 }
 0x104   : > { %19351 = vst [vmem:[#allocation57_spill] sm:$0xff] %v14848_v48  ;;  %19352 = vst [vmem:[#allocation58_spill] sm:$0xff] %v14851_v43  ;;  %v14855_v33 = vrot.slane %v14845_v11, %v14848_v48 }
 0x105   : > { %11693 = vmatpush3.bf16.msra.mxu1 %v12879_v14  ;;  %v14859_v14 = vrot.slane %v14845_v11, %v14851_v43 }
 0x106   : > { %11653 = vmatpush3.bf16.msra.mxu0 %v12880_v60  ;;  %11694 = vmatprep.subr.bf16.mxu1 %v12881_v27 }
 0x107   : > { %11654 = vmatprep.subr.bf16.mxu0 %v12882_v22 }
 0x108   : > { %2341 = vmatmul.mubr.bf16.gmra.mrb[8].mxu1 %v11617_v61  ;;  %v12883_v61 = vld [vmem:[%s19349_s3 + $0xa0] sm:$0xff]  }
 0x109   : > { %10937 = vmatprep.mubr.msk.bf16.mxu1 %vm1910_vm3, %v11624_v29  ;;  %11695 = vmatpush3.bf16.msra.mxu1 %v12883_v61  ;;  %v12885_v29 = vld [vmem:[%s19349_s3 + $0xe8] sm:$0xff]  }
 0x10a   : > { %11655 = vmatpush3.bf16.msra.mxu0 %v12884_v54  ;;  %11696 = vmatprep.subr.bf16.mxu1 %v12885_v29 }
 0x10b   : > { %11656 = vmatprep.subr.bf16.mxu0 %v12886_v8 }
 0x10d   : > { %11697 = vmatpush3.bf16.msra.mxu1 %v12887_v3 }
 0x10e   : > { %11657 = vmatpush3.bf16.msra.mxu0 %v12888_v17  ;;  %11698 = vmatprep.subr.bf16.mxu1 %v12889_v9 }
 0x10f   : > { %11658 = vmatprep.subr.bf16.mxu0 %v12890_v18 }
 0x110   : > { %2351 = vmatmul.mubr.bf16.gmra.mrb[12].mxu1 %v11623_v55  ;;  %v12891_v55 = vld [vmem:[%s19349_s3 + $0xb0] sm:$0xff]  }
 0x111   : > { %11699 = vmatpush3.bf16.msra.mxu1 %v12891_v55 }
 0x112   : > { %11659 = vmatpush3.bf16.msra.mxu0 %v12892_v34  ;;  %11700 = vmatprep.subr.bf16.mxu1 %v12893_v1 }
 0x113   : > { %11660 = vmatprep.subr.bf16.mxu0 %v12894_v16 }
 0x115   : > { %11701 = vmatpush3.bf16.msra.mxu1 %v12895_v51 }
 0x116   : > { %11661 = vmatpush3.bf16.msra.mxu0 %v12896_v37  ;;  %12174 = vmatprep.subr.bf16.mxu1 %v14834_v0  ;;  %v19353_v37 = vmov 0 }
 0x117   : > { %11726 = vmatprep.subr.bf16.mxu0 %v12898_v59  ;;  %v19354_v37 = vsel %vm14867_vm7, 4294967295, %v19353_v37 }
 0x118   : > { %19355 = vst [vmem:[#allocation59_spill] sm:$0xff] %v19354_v37 }
 0x1b0   : > { %v2103_v60 = vpop.f32.mrb[0].mxu0 }
 0x1b1   : > { %v12270_v27 = vadd.f32 %v2103_v60, %v14855_v33  ;;  %v2105_v22 = vpop.f32.mrb[1].mxu0 }
 0x1b2   : > { %v12271_v61 = vadd.f32 %v2105_v22, %v14859_v14  ;;  %v2107_v54 = vpop.f32.mrb[2].mxu0  ;;  %v19356_v22 = vmov 0 }
 0x1b3   : > { %v2361_v29 = vmax.f32 %v12270_v27, 0.0  ;;  %v12272_v8 = vadd.f32 %v2107_v54, %v14855_v33  ;;  %v2109_v3 = vpop.f32.mrb[3].mxu0  ;;  %v19357_v22 = vsel %vm14875_vm8, 4294967295, %v19356_v22 }
 0x1b4   : > { %v12273_v17 = vadd.f32 %v2109_v3, %v14859_v14  ;;  %v14865_v55 = vmax.f32 %v12271_v61, 0.0  ;;  %19358 = vst [vmem:[#allocation60_spill] sm:$0xff] %v19357_v22 }
 0x1b5   : > { %v2393_v9 = vpack.c.bf16 %v2361_v29, %v2361_v29  ;;  %v2365_v18 = vmax.f32 %v12272_v8, 0.0 }
 0x1b6   : > { %v2366_v34 = vmax.f32 %v12273_v17, 0.0 }
 0x1b7   : > { %v2410_v1 = vshrl.u32 %v2393_v9, 16  ;;  %v2413_v16 = vshll.u32 %v2393_v9, 16  ;;  %v2394_v51 = vpack.c.bf16 %v2365_v18, %v2365_v18 }
 0x1b8   : > { %v14872_v59 = vpack.c.bf16 %v2366_v34, %v14865_v55  ;;  %v2113_v63 = vpop.f32.mrb[4].mxu0 }
 0x1b9   : > { %v2412_v60 = vrot.slane %v2410_v1, 6  ;;  %v2415_v27 = vrot.slane %v2413_v16, 7  ;;  %v2418_v61 = vshrl.u32 %v2394_v51, 16  ;;  %v2421_v54 = vshll.u32 %v2394_v51, 16  ;;  %v2115_v29 = vpop.f32.mrb[5].mxu0 }
 0x1ba   : > { %v12274_v8 = vadd.f32 %v2113_v63, %v14855_v33  ;;  %v12275_v3 = vadd.f32 %v2115_v29, %v14859_v14  ;;  %v2117_v17 = vpop.f32.mrb[6].mxu0 }
 0x1bb   : > { %v2416_v9 = vor.u32 %v2415_v27, %v2412_v60  ;;  %v2420_v18 = vrot.slane %v2418_v61, 6  ;;  %v2423_v53 = vrot.slane %v2421_v54, 7  ;;  %v12276_v10 = vadd.f32 %v2117_v17, %v14855_v33  ;;  %v2119_v1 = vpop.f32.mrb[7].mxu0 }
 0x1bc   : > { %v2369_v16 = vmax.f32 %v12274_v8, 0.0  ;;  %v2370_v50 = vmax.f32 %v12275_v3, 0.0  ;;  %v12277_v32 = vadd.f32 %v2119_v1, %v14859_v14 }
 0x1bd   : > { %v2484_v36 = vsel %vm14867_vm7, 0, %v2416_v9  ;;  %v2424_v51 = vor.u32 %v2423_v53, %v2420_v18  ;;  %v2373_v21 = vmax.f32 %v12276_v10, 0.0 }
 0x1be   : > { %v14888_v29 = vsel %vm14875_vm8, %v2484_v36, 0  ;;  %v2395_v60 = vpack.c.bf16 %v2369_v16, %v2369_v16  ;;  %v14890_v27 = vpack.c.bf16 %v2370_v50, %v2366_v34  ;;  %v2374_v61 = vmax.f32 %v12277_v32, 0.0 }
 0x1bf   : > { %v2485_v54 = vsel %vm14867_vm7, 0, %v2424_v51  ;;  %v2396_v8 = vpack.c.bf16 %v2373_v21, %v2373_v21  ;;  %v14895_v3 = vshrl.u32 %v14888_v29, 16  ;;  %v14898_v53 = vshll.u32 %v14888_v29, 16 }
 0x1c0   : > { %v14902_v10 = vsel %vm14875_vm8, %v2485_v54, 0  ;;  %v2426_v36 = vshrl.u32 %v2395_v60, 16  ;;  %v2429_v17 = vshll.u32 %v2395_v60, 16  ;;  %v14904_v9 = vpack.c.bf16 %v2374_v61, %v2370_v50  ;;  %v2123_v34 = vpop.f32.mrb[8].mxu0 }
 0x1c1   : > { %v2434_v32 = vshrl.u32 %v2396_v8, 16  ;;  %v2437_v18 = vshll.u32 %v2396_v8, 16  ;;  %v12278_v1 = vadd.f32 %v2123_v34, %v14855_v33  ;;  %v2125_v21 = vpop.f32.mrb[9].mxu0  ;;  %v2508_v16 = vrot.slane %v14898_v53, 1 }
 0x1c2   : > { %v2428_v51 = vrot.slane %v2426_v36, 6  ;;  %v2431_v63 = vrot.slane %v2429_v17, 7  ;;  %v12279_v56 = vadd.f32 %v2125_v21, %v14859_v14  ;;  %v2127_v58 = vpop.f32.mrb[10].mxu0  ;;  %v14910_v54 = vshrl.u32 %v14902_v10, 16 }
 0x1c3   : > { %v2436_v13 = vrot.slane %v2434_v32, 6  ;;  %v2439_v60 = vrot.slane %v2437_v18, 7  ;;  %v2377_v50 = vmax.f32 %v12278_v1, 0.0  ;;  %v12280_v40 = vadd.f32 %v2127_v58, %v14855_v33  ;;  %v2129_v38 = vpop.f32.mrb[11].mxu0 }
 0x1c4   : > { %v2432_v8 = vor.u32 %v2431_v63, %v2428_v51  ;;  %v2378_v41 = vmax.f32 %v12279_v56, 0.0  ;;  %v12281_v34 = vadd.f32 %v2129_v38, %v14859_v14  ;;  %v2509_v35 = vor.u32 %v2508_v16, %v14895_v3 }
 0x1c5   : > { %v2440_v36 = vor.u32 %v2439_v60, %v2436_v13  ;;  %v2397_v17 = vpack.c.bf16 %v2377_v50, %v2377_v50  ;;  %v2381_v24 = vmax.f32 %v12280_v40, 0.0  ;;  %v14916_v21 = vshll.u32 %v14902_v10, 16 }
 0x1c6   : > { %v2486_v32 = vsel %vm14867_vm7, 0, %v2432_v8  ;;  %v14920_v18 = vpack.c.bf16 %v2378_v41, %v2374_v61  ;;  %v2382_v1 = vmax.f32 %v12281_v34, 0.0  ;;  %v2575_v58 = vrot.slane %v14895_v3, 1 }
 0x1c7   : > { %v14925_v56 = vsel %vm14875_vm8, %v2486_v32, 0  ;;  %v2487_v38 = vsel %vm14867_vm7, 0, %v2440_v36  ;;  %v2442_v13 = vshrl.u32 %v2397_v17, 16  ;;  %v2445_v40 = vshll.u32 %v2397_v17, 16 }
 0x1c8   : > { %v14931_v63 = vsel %vm14875_vm8, %v2487_v38, 0  ;;  %v2398_v16 = vpack.c.bf16 %v2381_v24, %v2381_v24  ;;  %v14933_v51 = vpack.c.bf16 %v2382_v1, %v2378_v41  ;;  %v2133_v61 = vpop.f32.mrb[12].mxu0  ;;  %v2515_v60 = vrot.slane %v14916_v21, 1 }
 0x1c9   : > { %v2444_v50 = vrot.slane %v2442_v13, 6  ;;  %v2447_v8 = vrot.slane %v2445_v40, 7  ;;  %v12282_v34 = vadd.f32 %v2133_v61, %v14855_v33  ;;  %v2135_v32 = vpop.f32.mrb[13].mxu0  ;;  %v2576_v12 = vrot.slane %v14898_v53, 2  ;;  %v12899_v13 = vld [vmem:[%s19349_s3 + $0x100] sm:$0xff]  }
 0x1ca   : > { %v2450_v36 = vshrl.u32 %v2398_v16, 16  ;;  %v2453_v15 = vshll.u32 %v2398_v16, 16  ;;  %v12283_v17 = vadd.f32 %v2135_v32, %v14859_v14  ;;  %v2516_v38 = vor.u32 %v2515_v60, %v14910_v54  ;;  %v2137_v62 = vpop.f32.mrb[14].mxu0 }
 0x1cb   : > { %v2448_v24 = vor.u32 %v2447_v8, %v2444_v50  ;;  %v2385_v41 = vmax.f32 %v12282_v34, 0.0  ;;  %v2577_v2 = vor.u32 %v2576_v12, %v2575_v58  ;;  %v2578_v26 = vrot.slane %v14910_v54, 1  ;;  %v2139_v30 = vpop.f32.mrb[15].mxu0 }
 0x1cc   : > { %v2452_v40 = vrot.slane %v2450_v36, 6  ;;  %v2455_v61 = vrot.slane %v2453_v15, 7  ;;  %v2386_v42 = vmax.f32 %v12283_v17, 0.0  ;;  %v10940_v4 = vcombine.low %v2509_v35, %v2516_v38  ;;  %v12901_v35 = vld [vmem:[%s19349_s3 + $0x148] sm:$0xff]  }
 0x1cd   : > { %v2488_v16 = vsel %vm14867_vm7, 0, %v2448_v24  ;;  %v2399_v32 = vpack.c.bf16 %v2385_v41, %v2385_v41  ;;  %v2579_v60 = vrot.slane %v14916_v21, 2  ;;  %v12284_v50 = vadd.f32 %v2137_v62, %v14855_v33  ;;  %v12902_v62 = vld [vmem:[%s19349_s3 + $0x108] sm:$0xff]  }
 0x1ce   : > { %v14950_v12 = vsel %vm14875_vm8, %v2488_v16, 0  ;;  %v2456_v58 = vor.u32 %v2455_v61, %v2452_v40  ;;  %v14952_v8 = vpack.c.bf16 %v2386_v42, %v2382_v1  ;;  %3238 = vmatprep.mubr.bf16.mxu0 %v10940_v4  ;;  %v10939_v15 = vcombine.low %v14888_v29, %v14902_v10  ;;  %v12900_v41 = vld [vmem:[%s19349_s3 + $0x188] sm:$0xff]  }
 0x1cf   : > { %v2458_v34 = vshrl.u32 %v2399_v32, 16  ;;  %v2461_v36 = vshll.u32 %v2399_v32, 16  ;;  %v2580_v17 = vor.u32 %v2579_v60, %v2578_v26  ;;  %v2389_v38 = vmax.f32 %v12284_v50, 0.0  ;;  %v12904_v26 = vld [vmem:[%s19349_s3 + $0x150] sm:$0xff]   ;;  %v14977_v60 = vpop.f32.mrb[0].mxu1 }
 0x1d0   : > { %v2489_v33 = vsel %vm14867_vm7, 0, %v2456_v58  ;;  %3239 = vmatmul.mubr.bf16.vlgmr.msra.gmra.mrb[16].mxu0 %v10939_v15  ;;  %v2567_v4 = vrot.slane %v14888_v29, 1  ;;  %v2568_v1 = vrot.slane %v14902_v10, 1  ;;  %v12285_v24 = vadd.f32 %v2139_v30, %v14859_v14  ;;  %v14984_v15 = vpop.f32.mrb[1].mxu1 }
 0x1d1   : > { %v14975_v40 = vsel %vm14875_vm8, %v2489_v33, 0  ;;  %v2460_v61 = vrot.slane %v2458_v34, 6  ;;  %v2463_v16 = vrot.slane %v2461_v36, 7  ;;  %v10942_v32 = vcombine.low %v2577_v2, %v2580_v17  ;;  %11727 = vmatpush3.bf16.msra.mxu0 %v12899_v13  ;;  %19359 = vst [vmem:[#allocation61_spill] sm:$0xff] %v14984_v15  ;;  %v14998_v34 = vpop.f32.mrb[2].mxu1 }
 0x1d2   : > { %v2400_v50 = vpack.c.bf16 %v2389_v38, %v2389_v38  ;;  %v10941_v30 = vcombine.low %v2567_v4, %v2568_v1  ;;  %v14979_v14 = vmax.f32 %v12285_v24, 0.0  ;;  %11728 = vmatprep.subr.bf16.mxu0 %v12901_v35  ;;  %v14982_v58 = vshrl.u32 %v14925_v56, 16  ;;  %v12905_v35 = vld [vmem:[%s19349_s3 + $0x110] sm:$0xff]  }
 0x1d3   : > { %v2464_v7 = vor.u32 %v2463_v16, %v2460_v61  ;;  %3303 = vmatprep.mubr.bf16.mxu1 %v10942_v32  ;;  %v14987_v33 = vshll.u32 %v14925_v56, 16  ;;  %v14990_v2 = vshrl.u32 %v14931_v63, 16  ;;  %v14993_v13 = vshll.u32 %v14931_v63, 16  ;;  %v12903_v4 = vld [vmem:[%s19349_s3 + $0x190] sm:$0xff]   ;;  %v15011_v61 = vpop.f32.mrb[3].mxu1 }
 0x1d4   : > { %v2466_v36 = vshrl.u32 %v2400_v50, 16  ;;  %v2469_v17 = vshll.u32 %v2400_v50, 16  ;;  %3304 = vmatmul.mubr.bf16.vlgmr.msra.gmra.mrb[16].mxu1 %v10941_v30  ;;  %v15001_v38 = vpack.c.bf16 %v14979_v14, %v2386_v42  ;;  %v19360_v1 = vsub.s32 2, %v14840_v45  ;;  %19361 = vst [vmem:[#allocation62_spill] sm:$0xff] %v15011_v61 }
 0x1d5   : > { %v2490_v16 = vsel %vm14867_vm7, 0, %v2464_v7  ;;  %12175 = vmatpush3.bf16.msra.mxu1 %v14834_v0  ;;  %11729 = vmatpush3.bf16.msra.mxu0 %v12902_v62  ;;  %v2522_v42 = vrot.slane %v14987_v33, 1  ;;  %v2529_v32 = vrot.slane %v14993_v13, 1  ;;  %v2581_v50 = vrot.slane %v14982_v58, 1  ;;  %v12907_v7 = vld [vmem:[%s19349_s3 + $0x158] sm:$0xff]  }
 0x1d6   : > { %v15009_v24 = vrot.slane %v14845_v11, %v19360_v1  ;;  %v15021_v30 = vsel %vm14875_vm8, %v2490_v16, 0  ;;  %v2468_v11 = vrot.slane %v2466_v36, 6  ;;  %v2471_v1 = vrot.slane %v2469_v17, 7  ;;  %12176 = vmatprep.subr.bf16.mxu1 %v12900_v41  ;;  %11730 = vmatprep.subr.bf16.mxu0 %v12904_v26  ;;  %v12906_v26 = vld [vmem:[%s19349_s3 + $0x198] sm:$0xff]  }
 0x1d7   : > { %v2582_v61 = vrot.slane %v14987_v33, 2  ;;  %v2523_v0 = vor.u32 %v2522_v42, %v14982_v58  ;;  %v2530_v62 = vor.u32 %v2529_v32, %v14990_v2  ;;  %v2584_v15 = vrot.slane %v14990_v2, 1 }
 0x1d8   : > { %v2585_v45 = vrot.slane %v14993_v13, 2  ;;  %v2472_v16 = vor.u32 %v2471_v1, %v2468_v11  ;;  %v10946_v36 = vcombine.low %v14925_v56, %v14931_v63  ;;  %v2569_v17 = vrot.slane %v14925_v56, 1  ;;  %v12908_v11 = vld [vmem:[%s19349_s3 + $0x118] sm:$0xff]  }
 0x1d9   : > { %v2583_v25 = vor.u32 %v2582_v61, %v2581_v50  ;;  %12177 = vmatpush3.bf16.msra.mxu1 %v12900_v41  ;;  %v10947_v19 = vcombine.low %v2523_v0, %v2530_v62  ;;  %v2570_v32 = vrot.slane %v14931_v63, 1  ;;  %11731 = vmatpush3.bf16.msra.mxu0 %v12905_v35  ;;  %v15042_v61 = vshrl.u32 %v14950_v12, 16  ;;  %v15044_v50 = vpop.f32.mrb[4].mxu1  ;;  %v12910_v35 = vld [vmem:[%s19349_s3 + $0x160] sm:$0xff]  }
 0x1da   : > { %v2586_v42 = vor.u32 %v2585_v45, %v2584_v15  ;;  %v2491_v1 = vsel %vm14867_vm7, 0, %v2472_v16  ;;  %12178 = vmatprep.subr.bf16.mxu1 %v12903_v4  ;;  %11732 = vmatprep.subr.bf16.mxu0 %v12907_v7  ;;  %v15049_v41 = vshll.u32 %v14950_v12, 16  ;;  %v15052_v45 = vshrl.u32 %v14975_v40, 16  ;;  %v15060_v0 = vpop.f32.mrb[5].mxu1 }
 0x1db   : > { %v15055_v15 = vshll.u32 %v14975_v40, 16  ;;  %19362 = vst [vmem:[#allocation63_spill] sm:$0xff] %v15060_v0  ;;  %v15064_v62 = vsel %vm14875_vm8, %v2491_v1, 0  ;;  %3246 = vmatprep.mubr.bf16.mxu0 %v10947_v19  ;;  %v10948_v16 = vcombine.low %v2569_v17, %v2570_v32  ;;  %v2587_v57 = vrot.slane %v15042_v61, 1  ;;  %v15067_v23 = vpop.f32.mrb[6].mxu1  ;;  %v12909_v1 = vld [vmem:[%s19349_s3 + $0x1a0] sm:$0xff]  }
 0x1dc   : > { %v10949_v7 = vcombine.low %v2583_v25, %v2586_v42  ;;  %3247 = vmatmul.mubr.bf16.gmra.mrb[20].mxu0 %v10946_v36  ;;  %v2536_v49 = vrot.slane %v15049_v41, 1  ;;  %v2588_v5 = vrot.slane %v15049_v41, 2  ;;  %v2590_v0 = vrot.slane %v15052_v45, 1  ;;  %v15076_v19 = vpop.f32.mrb[7].mxu1 }
 0x1dd   : > { %v2543_v31 = vrot.slane %v15055_v15, 1  ;;  %19363 = vst [vmem:[#allocation64_spill] sm:$0xff] %v15076_v19  ;;  %12179 = vmatpush3.bf16.msra.mxu1 %v12903_v4  ;;  %v2591_v25 = vrot.slane %v15055_v15, 2  ;;  %v10953_v36 = vcombine.low %v14950_v12, %v14975_v40  ;;  %v2571_v17 = vrot.slane %v14950_v12, 1  ;;  %v12911_v4 = vld [vmem:[%s19349_s3 + $0x120] sm:$0xff]   ;;  %11733 = vmatpush3.bf16.msra.mxu0 %v12908_v11 }
 0x1de   : > { %3311 = vmatprep.mubr.bf16.mxu1 %v10949_v7  ;;  %v2572_v42 = vrot.slane %v14975_v40, 1  ;;  %12180 = vmatprep.subr.bf16.mxu1 %v12906_v26  ;;  %v2537_v32 = vor.u32 %v2536_v49, %v15042_v61  ;;  %v2589_v52 = vor.u32 %v2588_v5, %v2587_v57  ;;  %v15089_v7 = vshrl.u32 %v15021_v30, 16  ;;  %v12912_v5 = vld [vmem:[%s19349_s3 + $0x1a8] sm:$0xff]  }
 0x1df   : > { %3312 = vmatmul.mubr.bf16.gmra.mrb[20].mxu1 %v10948_v16  ;;  %v2544_v6 = vor.u32 %v2543_v31, %v15052_v45  ;;  %v2592_v19 = vor.u32 %v2591_v25, %v2590_v0  ;;  %v12913_v16 = vld [vmem:[%s19349_s3 + $0x168] sm:$0xff]   ;;  %v15095_v46 = vshll.u32 %v15021_v30, 16  ;;  %v15098_v31 = vshrl.u32 %v15064_v62, 16  ;;  %11734 = vmatprep.subr.bf16.mxu0 %v12910_v35 }
 0x1e0   : > { %v10955_v44 = vcombine.low %v2571_v17, %v2572_v42  ;;  %v15104_v49 = vshll.u32 %v15064_v62, 16  ;;  %v2593_v11 = vrot.slane %v15089_v7, 1  ;;  %v12914_v17 = vld [vmem:[%s19349_s3 + $0x128] sm:$0xff]   ;;  %v2607_v28 = vrot.slane %v14895_v3, 2 }
 0x1e1   : > { %v10954_v57 = vcombine.low %v2537_v32, %v2544_v6  ;;  %12181 = vmatpush3.bf16.msra.mxu1 %v12906_v26  ;;  %v10956_v25 = vcombine.low %v2589_v52, %v2592_v19  ;;  %v2550_v6 = vrot.slane %v15095_v46, 1  ;;  %v2594_v35 = vrot.slane %v15095_v46, 2  ;;  %v15115_v32 = vpop.f32.mrb[8].mxu1  ;;  %11735 = vmatpush3.bf16.msra.mxu0 %v12911_v4  ;;  %v12915_v4 = vld [vmem:[%s19349_s3 + $0x1b0] sm:$0xff]  }
 0x1e2   : > { %v2596_v42 = vrot.slane %v15098_v31, 1  ;;  %12182 = vmatprep.subr.bf16.mxu1 %v12909_v1  ;;  %v2557_v39 = vrot.slane %v15104_v49, 1  ;;  %v2597_v0 = vrot.slane %v15104_v49, 2  ;;  %v2573_v52 = vrot.slane %v15021_v30, 1  ;;  %v15121_v19 = vpop.f32.mrb[9].mxu1  ;;  %11736 = vmatprep.subr.bf16.mxu0 %v12913_v16 }
 0x1e3   : > { %3254 = vmatprep.mubr.bf16.mxu0 %v10954_v57  ;;  %v2574_v26 = vrot.slane %v15064_v62, 1  ;;  %19364 = vst [vmem:[#allocation65_spill] sm:$0xff] %v15121_v19  ;;  %3319 = vmatprep.mubr.bf16.mxu1 %v10956_v25  ;;  %v2551_v20 = vor.u32 %v2550_v6, %v15089_v7  ;;  %v2595_v47 = vor.u32 %v2594_v35, %v2593_v11  ;;  %v12916_v57 = vld [vmem:[%s19349_s3 + $0x170] sm:$0xff]   ;;  %v2608_v43 = vrot.slane %v14898_v53, 3  ;;  %v15129_v48 = vpop.f32.mrb[10].mxu1 }
 0x1e4   : > { %3255 = vmatmul.mubr.bf16.gmra.mrb[24].mxu0 %v10953_v36  ;;  %v2558_v19 = vor.u32 %v2557_v39, %v15098_v31  ;;  %v2598_v22 = vor.u32 %v2597_v0, %v2596_v42  ;;  %v2610_v25 = vrot.slane %v14910_v54, 2  ;;  %v15137_v6 = vpop.f32.mrb[11].mxu1  ;;  %v2611_v53 = vrot.slane %v14916_v21, 3  ;;  %v12917_v54 = vld [vmem:[%s19349_s3 + $0x130] sm:$0xff]   ;;  %v12919_v21 = vld [vmem:[%s19349_s3 + $0x178] sm:$0xff]  }
 0x1e5   : > { %v10962_v11 = vcombine.low %v2573_v52, %v2574_v26  ;;  %12183 = vmatpush3.bf16.msra.mxu1 %v12909_v1  ;;  %v2609_v3 = vor.u32 %v2608_v43, %v2607_v28  ;;  %v2631_v36 = vrot.slane %v14888_v29, 3  ;;  %v2632_v39 = vrot.slane %v14902_v10, 3  ;;  %11737 = vmatpush3.bf16.msra.mxu0 %v12914_v17  ;;  %v12920_v52 = vld [vmem:[%s19349_s3 + $0x138] sm:$0xff]  }
 0x1e6   : > { %12184 = vmatprep.subr.bf16.mxu1 %v12912_v5  ;;  %v10961_v16 = vcombine.low %v2551_v20, %v2558_v19  ;;  %v10963_v0 = vcombine.low %v2595_v47, %v2598_v22  ;;  %v2599_v35 = vrot.slane %v14888_v29, 2  ;;  %v2600_v1 = vrot.slane %v14902_v10, 2  ;;  %v12918_v47 = vld [vmem:[%s19349_s3 + $0x1b8] sm:$0xff]   ;;  %11738 = vmatprep.subr.bf16.mxu0 %v12916_v57  ;;  %s13665_s3 = smov [#allocation2]  }
 0x1e7   : > { %3320 = vmatmul.mubr.bf16.gmra.mrb[24].mxu1 %v10955_v44  ;;  %v2612_v28 = vor.u32 %v2611_v53, %v2610_v25  ;;  %v10945_v43 = vcombine.low %v2631_v36, %v2632_v39  ;;  %v2633_v44 = vrot.slane %v14925_v56, 3  ;;  %v2634_v20 = vrot.slane %v14931_v63, 3  ;;  %v15171_v53 = vpop.f32.mrb[12].mxu1 }
 0x1e8   : > { %3262 = vmatprep.mubr.bf16.mxu0 %v10961_v16  ;;  %3327 = vmatprep.mubr.bf16.mxu1 %v10963_v0  ;;  %v15159_v22 = vcombine.low %v2599_v35, %v2600_v1  ;;  %v2613_v29 = vrot.slane %v14982_v58, 2  ;;  %v2614_v10 = vrot.slane %v14987_v33, 3  ;;  %v2616_v17 = vrot.slane %v14990_v2, 2  ;;  %v15178_v57 = vpop.f32.mrb[13].mxu1 }
 0x1e9   : > { %12185 = vmatpush3.bf16.msra.mxu1 %v12912_v5  ;;  %v10944_v42 = vcombine.low %v2609_v3, %v2612_v28  ;;  %v15167_v26 = vcombine.low %v2633_v44, %v2634_v20  ;;  %v2617_v19 = vrot.slane %v14993_v13, 3  ;;  %v2635_v25 = vrot.slane %v14950_v12, 3  ;;  %11739 = vmatpush3.bf16.msra.mxu0 %v12917_v54  ;;  %v15183_v16 = vpop.f32.mrb[14].mxu1 }
 0x1ea   : > { %12186 = vmatprep.subr.bf16.mxu1 %v12915_v4  ;;  %v15173_v58 = vor.u32 %v2614_v10, %v2613_v29  ;;  %v2636_v33 = vrot.slane %v14975_v40, 3  ;;  %v2601_v2 = vrot.slane %v14925_v56, 2  ;;  %v2602_v5 = vrot.slane %v14931_v63, 2  ;;  %11740 = vmatprep.subr.bf16.mxu0 %v12919_v21  ;;  %v15192_v1 = vpop.f32.mrb[15].mxu1 }
 0x1eb   : > { %v2618_v3 = vor.u32 %v2617_v19, %v2616_v17  ;;  %v2637_v36 = vrot.slane %v15021_v30, 3  ;;  %v2638_v13 = vrot.slane %v15064_v62, 3  ;;  %v2619_v39 = vrot.slane %v15042_v61, 2  ;;  %v12978_v17 = vld [vmem:[%s19109_s5 + $0x4] ss:$8 sps:$4 sm:$0xff]  }
 0x1ec   : > { %v19365_v0 = vcombine.low %v15021_v30, %v15064_v62  ;;  %v10959_v56 = vcombine.low %v2635_v25, %v2636_v33  ;;  %v15188_v35 = vcombine.low %v2601_v2, %v2602_v5  ;;  %v2620_v63 = vrot.slane %v15049_v41, 3  ;;  %v12921_v41 = vld [vmem:[%s19111_s7 + $0x40] sm:$0xff]   ;;  %v12980_v33 = vld [vmem:[%s19109_s5 + $0x10] ss:$8 sps:$4 sm:$0xff]  }
 0x1ed   : > { %v2622_v54 = vrot.slane %v15052_v45, 2  ;;  %12187 = vmatpush3.bf16.msra.mxu1 %v12915_v4  ;;  %v10951_v61 = vcombine.low %v15173_v58, %v2618_v3  ;;  %v15195_v28 = vcombine.low %v2637_v36, %v2638_v13  ;;  %v2623_v44 = vrot.slane %v15055_v15, 3  ;;  %11741 = vmatpush3.bf16.msra.mxu0 %v12920_v52 }
 0x1ee   : > { %3263 = vmatmul.mubr.bf16.gmra.mrb[28].mxu0 %v19365_v0  ;;  %v2603_v20 = vrot.slane %v14950_v12, 2  ;;  %12188 = vmatprep.subr.bf16.mxu1 %v12918_v47  ;;  %v15202_v21 = vor.u32 %v2620_v63, %v2619_v39  ;;  %v2604_v45 = vrot.slane %v14975_v40, 2  ;;  %v2625_v4 = vrot.slane %v15089_v7, 2  ;;  %v12983_v0 = vld [vmem:[%s19109_s5 + $0x20] ss:$8 sps:$4 sm:$0xff]  }
 0x1ef   : > { %3368 = vmatprep.mubr.bf16.mxu0 %v10944_v42  ;;  %3328 = vmatmul.mubr.bf16.gmra.mrb[28].mxu1 %v10962_v11  ;;  %v2626_v29 = vrot.slane %v15095_v46, 3  ;;  %v15207_v10 = vor.u32 %v2623_v44, %v2622_v54  ;;  %v2628_v12 = vrot.slane %v15098_v31, 2  ;;  %v2629_v15 = vrot.slane %v15104_v49, 3  ;;  %v12976_v31 = vld [vmem:[%s19109_s5] ss:$8 sps:$4 sm:$0xff]  }
 0x1f0   : > { %12190 = vmatprep.mubr.bf16.mxu1 %v10945_v43  ;;  %v12286_v11 = vadd.f32 %v14977_v60, %v15009_v24  ;;  %v15216_v40 = vcombine.low %v2603_v20, %v2604_v45  ;;  %v2605_v7 = vrot.slane %v15021_v30, 2  ;;  %v2606_v46 = vrot.slane %v15064_v62, 2  ;;  %v12922_v60 = vld [vmem:[%s19111_s7] sm:$0xff]   ;;  %4204 = vmatprep.subr.bf16.mxu0 %v12978_v17  ;;  %v12923_v62 = vld [vmem:[%s19111_s7 + $0x48] sm:$0xff]   ;;  %v12986_v44 = vld [vmem:[%s19109_s5 + $0x30] ss:$8 sps:$4 sm:$0xff]  }
 0x1f1   : > { %12189 = vmatpush3.bf16.msra.mxu1 %v12918_v47  ;;  %v10958_v49 = vcombine.low %v15202_v21, %v15207_v10  ;;  %v15228_v43 = vor.u32 %v2626_v29, %v2625_v4  ;;  %v15230_v42 = vor.u32 %v2629_v15, %v2628_v12  ;;  %v12288_v47 = vadd.f32 %v14998_v34, %v15009_v24  ;;  %v12982_v34 = vld [vmem:[%s19109_s5 + $0x14] ss:$8 sps:$4 sm:$0xff]   ;;  %v12991_v20 = vld [vmem:[%s19109_s5 + $0x44] ss:$8 sps:$4 sm:$0xff]   ;;  %v12992_v29 = vld [vmem:[%s19109_s5 + $0x50] ss:$8 sps:$4 sm:$0xff]  }
 0x1f2   : > { %v2363_v30 = vmax.f32 %v12286_v11, 0.0  ;;  %11778 = vmatprep.subr.bf16.mxu1 %v12921_v41  ;;  %v15235_v52 = vcombine.low %v2605_v7, %v2606_v46  ;;  %v12290_v19 = vadd.f32 %v15044_v50, %v15009_v24  ;;  %v12292_v58 = vadd.f32 %v15067_v23, %v15009_v24  ;;  %v12929_v41 = vld [vmem:[%s19111_s7 + $0x60] sm:$0xff]   ;;  %v12994_v21 = vld [vmem:[%s19109_s5 + $0x54] ss:$8 sps:$4 sm:$0xff]   ;;  %v12931_v4 = vld [vmem:[%s19111_s7 + $0x68] sm:$0xff]  }
 0x1f3   : > { %v10965_v25 = vcombine.low %v15228_v43, %v15230_v42  ;;  %v2367_v50 = vmax.f32 %v12288_v47, 0.0  ;;  %v12294_v3 = vadd.f32 %v15115_v32, %v15009_v24  ;;  %v12296_v23 = vadd.f32 %v15129_v48, %v15009_v24  ;;  %v12924_v32 = vld [vmem:[%s19111_s7 + $0x8] sm:$0xff]   ;;  %v12930_v45 = vld [vmem:[%s19111_s7 + $0x20] sm:$0xff]   ;;  %v12933_v15 = vld [vmem:[%s19111_s7 + $0x70] sm:$0xff]  }
 0x1f4   : > { %10593 = vst [vmem:[%s15244_s19] sm:$0xff] %v2363_v30  ;;  %v2371_v2 = vmax.f32 %v12290_v19, 0.0  ;;  %v2375_v5 = vmax.f32 %v12292_v58, 0.0  ;;  %v12300_v36 = vadd.f32 %v15183_v16, %v15009_v24  ;;  %v12985_v48 = vld [vmem:[%s19109_s5 + $0x24] ss:$8 sps:$4 sm:$0xff]   ;;  %v19185_v63 = vmov 0   ;;  %v12935_v7 = vld [vmem:[%s19111_s7 + $0x78] sm:$0xff]  }
 0x1f5   : > { %10599 = vst [vmem:[%s15244_s19 + $0x30] sm:$0xff] %v2367_v50  ;;  %v2383_v13 = vmax.f32 %v12296_v23, 0.0  ;;  %v15291_v54 = vcombine.low %v19185_v63, %v19185_v63  ;;  %v12997_v10 = vld [vmem:[%s19109_s5 + $0x64] ss:$8 sps:$4 sm:$0xff]   ;;  %v12995_v11 = vld [vmem:[%s19109_s5 + $0x60] ss:$8 sps:$4 sm:$0xff]  }
 0x1f6   : > { %3369 = vmatmul.mubr.bf16.vlgmr.msra.gmra.mrb[32].mxu0 %v15159_v22  ;;  %10605 = vst [vmem:[%s15244_s19 + $0x60] sm:$0xff] %v2371_v2  ;;  %v12298_v22 = vadd.f32 %v15171_v53, %v15009_v24  ;;  %10611 = vst [vmem:[%s15244_s19 + $0x90] sm:$0xff] %v2375_v5  ;;  %v12925_v53 = vld [vmem:[%s19111_s7 + $0x50] sm:$0xff]   ;;  %v2391_v16 = vmax.f32 %v12300_v36, 0.0  ;;  %v12932_v12 = vld [vmem:[%s19111_s7 + $0x28] sm:$0xff]  }
 0x1f7   : > { %3376 = vmatprep.mubr.bf16.mxu0 %v10951_v61  ;;  %4205 = vmatpush1.bf16.msra.mxu0 %v12976_v31  ;;  %v12926_v24 = vld [vmem:[%s19111_s7 + $0x10] sm:$0xff]   ;;  %10623 = vst [vmem:[%s15244_s19 + $0xf0] sm:$0xff] %v2383_v13  ;;  %19366 = vst [vmem:[#allocation66_spill] sm:$0xff] %v15291_v54  ;;  %v12927_v61 = vld [vmem:[%s19111_s7 + $0x58] sm:$0xff]  }
 0x1f8   : > { %12191 = vmatmul.mubr.bf16.vlgmr.msra.gmra.mrb[32].mxu1 %v15167_v26  ;;  %4206 = vmatprep.subr.bf16.mxu0 %v12982_v34  ;;  %v2379_v26 = vmax.f32 %v12294_v3, 0.0  ;;  %v2387_v39 = vmax.f32 %v12298_v22, 0.0  ;;  %10635 = vst [vmem:[%s15244_s19 + $0x150] sm:$0xff] %v2391_v16  ;;  %v13000_v17 = vld [vmem:[%s19109_s5 + $0x74] ss:$8 sps:$4 sm:$0xff]   ;;  %v12938_v30 = vld [vmem:[%s19111_s7 + $0x80] sm:$0xff]  }
 0x1f9   : > { %11779 = vmatpush3.bf16.msra.mxu1 %v12922_v60  ;;  %12194 = vmatprep.mubr.bf16.mxu1 %v10959_v56  ;;  %v12988_v56 = vld [vmem:[%s19109_s5 + $0x34] ss:$8 sps:$4 sm:$0xff]   ;;  %v12998_v46 = vld [vmem:[%s19109_s5 + $0x70] ss:$8 sps:$4 sm:$0xff]   ;;  %v13003_v31 = vld [vmem:[%s19109_s5 + $0x84] ss:$8 sps:$4 sm:$0xff]  }
 0x1fa   : > { %11780 = vmatprep.subr.bf16.mxu1 %v12923_v62  ;;  %10617 = vst [vmem:[%s15244_s19 + $0xc0] sm:$0xff] %v2379_v26  ;;  %10629 = vst [vmem:[%s15244_s19 + $0x120] sm:$0xff] %v2387_v39  ;;  %v12936_v60 = vld [vmem:[%s19111_s7 + $0x38] sm:$0xff]   ;;  %v13001_v43 = vld [vmem:[%s19109_s5 + $0x80] ss:$8 sps:$4 sm:$0xff]  }
 0x1fb   : > { %4207 = vmatpush1.bf16.msra.mxu0 %v12980_v33  ;;  %v13006_v42 = vld [vmem:[%s19109_s5 + $0x94] ss:$8 sps:$4 sm:$0xff]   ;;  %v12939_v62 = vld [vmem:[%s19111_s7 + $0xc8] sm:$0xff]   ;;  %v13010_v5 = vld [vmem:[%s19109_s5 + $0xb0] ss:$8 sps:$4 sm:$0xff]  }
 0x1fc   : > { %4208 = vmatprep.subr.bf16.mxu0 %v12985_v48  ;;  %v13009_v47 = vld [vmem:[%s19109_s5 + $0xa4] ss:$8 sps:$4 sm:$0xff]   ;;  %v12941_v58 = vld [vmem:[%s19111_s7 + $0xd0] sm:$0xff]   ;;  %v13007_v33 = vld [vmem:[%s19109_s5 + $0xa0] ss:$8 sps:$4 sm:$0xff]  }
 0x1fd   : > { %11781 = vmatpush3.bf16.msra.mxu1 %v12924_v32  ;;  %v12940_v19 = vld [vmem:[%s19111_s7 + $0x88] sm:$0xff]   ;;  %v13012_v34 = vld [vmem:[%s19109_s5 + $0xb4] ss:$8 sps:$4 sm:$0xff]   ;;  %v12945_v22 = vld [vmem:[%s19111_s7 + $0xe0] sm:$0xff]  }
 0x1fe   : > { %11782 = vmatprep.subr.bf16.mxu1 %v12925_v53  ;;  %3377 = vmatmul.mubr.bf16.gmra.mrb[36].mxu0 %v15188_v35  ;;  %v12928_v35 = vld [vmem:[%s19111_s7 + $0x18] sm:$0xff]   ;;  %v13015_v3 = vld [vmem:[%s19109_s5 + $0xc4] ss:$8 sps:$4 sm:$0xff]   ;;  %v13013_v32 = vld [vmem:[%s19109_s5 + $0xc0] ss:$8 sps:$4 sm:$0xff]  }
 0x1ff   : > { %3384 = vmatprep.mubr.bf16.mxu0 %v10958_v49  ;;  %4209 = vmatpush1.bf16.msra.mxu0 %v12983_v0  ;;  %v12937_v49 = vld [vmem:[%s19111_s7 + $0xc0] sm:$0xff]   ;;  %v12943_v2 = vld [vmem:[%s19111_s7 + $0xd8] sm:$0xff]   ;;  %v12947_v48 = vld [vmem:[%s19111_s7 + $0xe8] sm:$0xff]  }
 0x200   : > { %12195 = vmatmul.mubr.bf16.gmra.mrb[36].mxu1 %v15195_v28  ;;  %4210 = vmatprep.subr.bf16.mxu0 %v12988_v56  ;;  %v12989_v28 = vld [vmem:[%s19109_s5 + $0x40] ss:$8 sps:$4 sm:$0xff]   ;;  %v12944_v23 = vld [vmem:[%s19111_s7 + $0x98] sm:$0xff]   ;;  %v13021_v13 = vld [vmem:[%s19109_s5 + $0xe4] ss:$8 sps:$4 sm:$0xff]  }
 0x201   : > { %11783 = vmatpush3.bf16.msra.mxu1 %v12926_v24  ;;  %5033 = vmatprep.mubr.bf16.mxu1 %v15291_v54  ;;  %v13018_v26 = vld [vmem:[%s19109_s5 + $0xd4] ss:$8 sps:$4 sm:$0xff]   ;;  %v12946_v36 = vld [vmem:[%s19111_s7 + $0xa0] sm:$0xff]   ;;  %v13016_v53 = vld [vmem:[%s19109_s5 + $0xd0] ss:$8 sps:$4 sm:$0xff]  }
 0x202   : > { %11784 = vmatprep.subr.bf16.mxu1 %v12927_v61  ;;  %v12948_v39 = vld [vmem:[%s19111_s7 + $0xa8] sm:$0xff]   ;;  %v12949_v0 = vld [vmem:[%s19111_s7 + $0xf0] sm:$0xff]   ;;  %v12951_v61 = vld [vmem:[%s19111_s7 + $0xf8] sm:$0xff]  }
 0x203   : > { %4211 = vmatpush1.bf16.msra.mxu0 %v12986_v44  ;;  %v13019_v24 = vld [vmem:[%s19109_s5 + $0xe0] ss:$8 sps:$4 sm:$0xff]   ;;  %v12950_v16 = vld [vmem:[%s19111_s7 + $0xb0] sm:$0xff]  }
 0x204   : > { %4212 = vmatprep.subr.bf16.mxu0 %v12991_v20  ;;  %v13024_v56 = vld [vmem:[%s19109_s5 + $0xf4] ss:$8 sps:$4 sm:$0xff]   ;;  %v13022_v44 = vld [vmem:[%s19109_s5 + $0xf0] ss:$8 sps:$4 sm:$0xff]   ;;  %v13027_v20 = vld [vmem:[%s19109_s5 + $0x104] ss:$8 sps:$4 sm:$0xff]  }
 0x205   : > { %11785 = vmatpush3.bf16.msra.mxu1 %v12928_v35  ;;  %v12952_v35 = vld [vmem:[%s19111_s7 + $0xb8] sm:$0xff]  }
 0x206   : > { %11786 = vmatprep.subr.bf16.mxu1 %v12929_v41  ;;  %3385 = vmatmul.mubr.bf16.gmra.mrb[40].mxu0 %v15216_v40  ;;  %v12934_v40 = vld [vmem:[%s19111_s7 + $0x30] sm:$0xff]   ;;  %v12953_v41 = vld [vmem:[%s19111_s7 + $0x140] sm:$0xff]  }
 0x207   : > { %3392 = vmatprep.mubr.bf16.mxu0 %v10965_v25  ;;  %4213 = vmatpush1.bf16.msra.mxu0 %v12989_v28  ;;  %v2401_v25 = vpack.c.bf16 %v14865_v55, %v14865_v55  ;;  %v12942_v55 = vld [vmem:[%s19111_s7 + $0x90] sm:$0xff]   ;;  %v13025_v28 = vld [vmem:[%s19109_s5 + $0x100] ss:$8 sps:$4 sm:$0xff]  }
 0x208   : > { %4214 = vmatprep.subr.bf16.mxu0 %v12994_v21  ;;  %v12955_v21 = vld [vmem:[%s19111_s7 + $0x148] sm:$0xff]  }
 0x209   : > { %11787 = vmatpush3.bf16.msra.mxu1 %v12930_v45  ;;  %v11146_v50 = vcombine.low %v19185_v63, %v2401_v25  ;;  %v13028_v45 = vld [vmem:[%s19109_s5 + $0x110] ss:$8 sps:$4 sm:$0xff]   ;;  %v13043_v25 = vld [vmem:[%s19109_s5 + $0x160] ss:$8 sps:$4 sm:$0xff]  }
 0x20a   : > { %11788 = vmatprep.subr.bf16.mxu1 %v12931_v4  ;;  %v13030_v4 = vld [vmem:[%s19109_s5 + $0x114] ss:$8 sps:$4 sm:$0xff]  }
 0x20b   : > { %4215 = vmatpush1.bf16.msra.mxu0 %v12992_v29  ;;  %v12956_v29 = vld [vmem:[%s19111_s7 + $0x108] sm:$0xff]  }
 0x20c   : > { %4216 = vmatprep.subr.bf16.mxu0 %v12997_v10  ;;  %v13033_v10 = vld [vmem:[%s19109_s5 + $0x124] ss:$8 sps:$4 sm:$0xff]  }
 0x20d   : > { %11789 = vmatpush3.bf16.msra.mxu1 %v12932_v12  ;;  %v12957_v12 = vld [vmem:[%s19111_s7 + $0x150] sm:$0xff]  }
 0x20e   : > { %11790 = vmatprep.subr.bf16.mxu1 %v12933_v15  ;;  %3393 = vmatmul.mubr.bf16.gmra.mrb[44].mxu0 %v15235_v52  ;;  %v13004_v52 = vld [vmem:[%s19109_s5 + $0x90] ss:$8 sps:$4 sm:$0xff]   ;;  %v13031_v15 = vld [vmem:[%s19109_s5 + $0x120] ss:$8 sps:$4 sm:$0xff]  }
 0x20f   : > { %4217 = vmatpush1.bf16.msra.mxu0 %v12995_v11  ;;  %4236 = vmatprep.mubr.bf16.mxu0 %v15291_v54  ;;  %v12958_v11 = vld [vmem:[%s19111_s7 + $0x110] sm:$0xff]  }
 0x210   : > { %4218 = vmatprep.subr.bf16.mxu0 %v13000_v17  ;;  %v12959_v17 = vld [vmem:[%s19111_s7 + $0x158] sm:$0xff]  }
 0x211   : > { %11791 = vmatpush3.bf16.msra.mxu1 %v12934_v40  ;;  %v13034_v40 = vld [vmem:[%s19109_s5 + $0x130] ss:$8 sps:$4 sm:$0xff]  }
 0x212   : > { %11792 = vmatprep.subr.bf16.mxu1 %v12935_v7  ;;  %v13036_v7 = vld [vmem:[%s19109_s5 + $0x134] ss:$8 sps:$4 sm:$0xff]  }
 0x213   : > { %4219 = vmatpush1.bf16.msra.mxu0 %v12998_v46  ;;  %v12960_v46 = vld [vmem:[%s19111_s7 + $0x118] sm:$0xff]  }
 0x214   : > { %4220 = vmatprep.subr.bf16.mxu0 %v13003_v31  ;;  %v13039_v31 = vld [vmem:[%s19109_s5 + $0x144] ss:$8 sps:$4 sm:$0xff]  }
 0x215   : > { %11793 = vmatpush3.bf16.msra.mxu1 %v12936_v60  ;;  %v12961_v60 = vld [vmem:[%s19111_s7 + $0x160] sm:$0xff]  }
 0x216   : > { %11818 = vmatprep.subr.bf16.mxu1 %v12937_v49  ;;  %v13037_v49 = vld [vmem:[%s19109_s5 + $0x140] ss:$8 sps:$4 sm:$0xff]  }
 0x217   : > { %4221 = vmatpush1.bf16.msra.mxu0 %v13001_v43  ;;  %v12962_v43 = vld [vmem:[%s19111_s7 + $0x120] sm:$0xff]  }
 0x218   : > { %5034 = vmatmul.mubr.bf16.vlgmr.msra.gmra.mrb[40].mxu1 %v15291_v54  ;;  %4222 = vmatprep.subr.bf16.mxu0 %v13006_v42  ;;  %v12963_v42 = vld [vmem:[%s19111_s7 + $0x168] sm:$0xff]  }
 0x219   : > { %5041 = vmatprep.mubr.bf16.mxu1 %v14872_v59  ;;  %11819 = vmatpush3.bf16.msra.mxu1 %v12938_v30  ;;  %v13040_v30 = vld [vmem:[%s19109_s5 + $0x150] ss:$8 sps:$4 sm:$0xff]  }
 0x21a   : > { %11820 = vmatprep.subr.bf16.mxu1 %v12939_v62  ;;  %v13042_v62 = vld [vmem:[%s19109_s5 + $0x154] ss:$8 sps:$4 sm:$0xff]  }
 0x21b   : > { %4223 = vmatpush1.bf16.msra.mxu0 %v13004_v52  ;;  %v12964_v52 = vld [vmem:[%s19111_s7 + $0x128] sm:$0xff]  }
 0x21c   : > { %4224 = vmatprep.subr.bf16.mxu0 %v13009_v47  ;;  %v13045_v47 = vld [vmem:[%s19109_s5 + $0x164] ss:$8 sps:$4 sm:$0xff]  }
 0x21d   : > { %11821 = vmatpush3.bf16.msra.mxu1 %v12940_v19  ;;  %v12965_v19 = vld [vmem:[%s19111_s7 + $0x170] sm:$0xff]  }
 0x21e   : > { %11822 = vmatprep.subr.bf16.mxu1 %v12941_v58  ;;  %v12966_v58 = vld [vmem:[%s19111_s7 + $0x130] sm:$0xff]  }
 0x21f   : > { %4225 = vmatpush1.bf16.msra.mxu0 %v13007_v33  ;;  %v12967_v33 = vld [vmem:[%s19111_s7 + $0x178] sm:$0xff]  }
 0x220   : > { %5042 = vmatmul.mubr.bf16.gmra.mrb[44].mxu1 %v11146_v50  ;;  %4226 = vmatprep.subr.bf16.mxu0 %v13012_v34  ;;  %v12968_v34 = vld [vmem:[%s19111_s7 + $0x138] sm:$0xff]  }
 0x221   : > { %5049 = vmatprep.mubr.bf16.mxu1 %v14904_v9  ;;  %11823 = vmatpush3.bf16.msra.mxu1 %v12942_v55  ;;  %v12969_v55 = vld [vmem:[%s19111_s7 + $0x180] sm:$0xff]  }
 0x222   : > { %11824 = vmatprep.subr.bf16.mxu1 %v12943_v2  ;;  %v13048_v2 = vld [vmem:[%s19109_s5 + $0x174] ss:$8 sps:$4 sm:$0xff]  }
 0x223   : > { %4227 = vmatpush1.bf16.msra.mxu0 %v13010_v5  ;;  %v12970_v5 = vld [vmem:[%s19111_s7 + $0x188] sm:$0xff]  }
 0x224   : > { %4228 = vmatprep.subr.bf16.mxu0 %v13015_v3  ;;  %v13049_v3 = vld [vmem:[%s19109_s5 + $0x180] ss:$8 sps:$4 sm:$0xff]  }
 0x225   : > { %11825 = vmatpush3.bf16.msra.mxu1 %v12944_v23  ;;  %v13054_v23 = vld [vmem:[%s19109_s5 + $0x194] ss:$8 sps:$4 sm:$0xff]  }
 0x226   : > { %11826 = vmatprep.subr.bf16.mxu1 %v12945_v22  ;;  %v12971_v22 = vld [vmem:[%s19111_s7 + $0x190] sm:$0xff]  }
 0x227   : > { %4229 = vmatpush1.bf16.msra.mxu0 %v13013_v32  ;;  %v13052_v32 = vld [vmem:[%s19109_s5 + $0x190] ss:$8 sps:$4 sm:$0xff]  }
 0x228   : > { %5050 = vmatmul.mubr.bf16.gmra.mrb[48].mxu1 %v14890_v27  ;;  %4230 = vmatprep.subr.bf16.mxu0 %v13018_v26  ;;  %v13055_v26 = vld [vmem:[%s19109_s5 + $0x1a0] ss:$8 sps:$4 sm:$0xff]  }
 0x229   : > { %5057 = vmatprep.mubr.bf16.mxu1 %v14933_v51  ;;  %11827 = vmatpush3.bf16.msra.mxu1 %v12946_v36  ;;  %v12973_v36 = vld [vmem:[%s19111_s7 + $0x1a0] sm:$0xff]  }
 0x22a   : > { %11828 = vmatprep.subr.bf16.mxu1 %v12947_v48  ;;  %v13058_v48 = vld [vmem:[%s19109_s5 + $0x1b0] ss:$8 sps:$4 sm:$0xff]  }
 0x22b   : > { %4231 = vmatpush1.bf16.msra.mxu0 %v13016_v53  ;;  %v13060_v53 = vld [vmem:[%s19109_s5 + $0x1b4] ss:$8 sps:$4 sm:$0xff]  }
 0x22c   : > { %4232 = vmatprep.subr.bf16.mxu0 %v13021_v13  ;;  %v13063_v13 = vld [vmem:[%s19109_s5 + $0x1c4] ss:$8 sps:$4 sm:$0xff]  }
 0x22d   : > { %11829 = vmatpush3.bf16.msra.mxu1 %v12948_v39  ;;  %v13061_v39 = vld [vmem:[%s19109_s5 + $0x1c0] ss:$8 sps:$4 sm:$0xff]  }
 0x22e   : > { %11830 = vmatprep.subr.bf16.mxu1 %v12949_v0  ;;  %v13066_v0 = vld [vmem:[%s19109_s5 + $0x1d4] ss:$8 sps:$4 sm:$0xff]  }
 0x22f   : > { %4233 = vmatpush1.bf16.msra.mxu0 %v13019_v24  ;;  %v2408_v24 = vpack.c.bf16 %v14979_v14, %v14979_v14  ;;  %v12979_v14 = vld [vmem:[%s19111_s7 + $0x1b8] sm:$0xff]  }
 0x230   : > { %5058 = vmatmul.mubr.bf16.gmra.mrb[52].mxu1 %v14920_v18  ;;  %4234 = vmatprep.subr.bf16.mxu0 %v13024_v56  ;;  %v13064_v56 = vld [vmem:[%s19109_s5 + $0x1d0] ss:$8 sps:$4 sm:$0xff]  }
 0x231   : > { %11831 = vmatpush3.bf16.msra.mxu1 %v12950_v16  ;;  %5098 = vmatprep.mubr.bf16.mxu1 %v14872_v59  ;;  %v12954_v59 = vld [vmem:[%s19111_s7 + $0x100] sm:$0xff]   ;;  %v12975_v16 = vld [vmem:[%s19111_s7 + $0x1b0] sm:$0xff]  }
 0x232   : > { %11832 = vmatprep.subr.bf16.mxu1 %v12951_v61  ;;  %v13069_v61 = vld [vmem:[%s19109_s5 + $0x1e4] ss:$8 sps:$4 sm:$0xff]  }
 0x233   : > { %4235 = vmatpush1.bf16.msra.mxu0 %v13022_v44  ;;  %v11154_v44 = vcombine.low %v2408_v24, %v19185_v63 }
 0x234   : > { %4277 = vmatprep.subr.bf16.mxu0 %v13027_v20  ;;  %v13067_v20 = vld [vmem:[%s19109_s5 + $0x1e0] ss:$8 sps:$4 sm:$0xff]  }
 0x235   : > { %11833 = vmatpush3.bf16.msra.mxu1 %v12952_v35  ;;  %v13072_v35 = vld [vmem:[%s19109_s5 + $0x1f4] ss:$8 sps:$4 sm:$0xff]  }
 0x236   : > { %11858 = vmatprep.subr.bf16.mxu1 %v12953_v41  ;;  %4237 = vmatmul.mubr.bf16.vlgmr.msra.gmra.mrb[48].mxu0 %v15291_v54  ;;  %v13070_v41 = vld [vmem:[%s19109_s5 + $0x1f0] ss:$8 sps:$4 sm:$0xff]  }
 0x237   : > { %4278 = vmatpush1.bf16.msra.mxu0 %v13025_v28  ;;  %v13075_v28 = vld [vmem:[%s19109_s5 + $0x204] ss:$8 sps:$4 sm:$0xff]  }
 0x238   : > { %5099 = vmatmul.mubr.bf16.vlgmr.msra.gmra.mrb[56].mxu1 %v11146_v50  ;;  %4279 = vmatprep.subr.bf16.mxu0 %v13030_v4  ;;  %v13046_v50 = vld [vmem:[%s19109_s5 + $0x170] ss:$8 sps:$4 sm:$0xff]  }
 0x239   : > { %5106 = vmatprep.mubr.bf16.mxu1 %v14904_v9  ;;  %11859 = vmatpush3.bf16.msra.mxu1 %v12954_v59  ;;  %v10938_v59 = vld [vmem:[%s19367_s4] ss:$0 sm:$0xff]  ;;  %s13602_s4 = sshll.u32 %s13665_s3, 4  ;;  %s13603_s4 = int_to_ptr.vmem [resolvable:$false] %s13602_s4 }
 0x23a   : > { %11860 = vmatprep.subr.bf16.mxu1 %v12955_v21  ;;  %s13604_s29 = scalar_lea.vmem %s13603_s4, 12288  ;;  %p13605_p0 = scmp.lt.s32.totalorder %s19056_s20, %s13603_s4 }
 0x23b   : > { %4280 = vmatpush1.bf16.msra.mxu0 %v13028_v45  ;;  %p13606_p1 = scmp.lt.s32.totalorder %s13604_s29, %s13598_s22 }
 0x23c   : > { %4281 = vmatprep.subr.bf16.mxu0 %v13033_v10 }
 0x23d   : > { %11861 = vmatpush3.bf16.msra.mxu1 %v12956_v29  ;;  %p13607_p2 = por %p13606_p1, %p13605_p0 }
 0x23e   : > { %11862 = vmatprep.subr.bf16.mxu1 %v12957_v12 }
 0x23f   : > { %4282 = vmatpush1.bf16.msra.mxu0 %v13031_v15  ;;  %p13608_p3 = pnand %p13607_p2, %p13601_p13 }
 0x240   : > { %5107 = vmatmul.mubr.bf16.gmra.mrb[60].mxu1 %v14890_v27  ;;  %4283 = vmatprep.subr.bf16.mxu0 %v13036_v7 }
 0x241   : > { %5114 = vmatprep.mubr.bf16.mxu1 %v14933_v51  ;;  %11863 = vmatpush3.bf16.msra.mxu1 %v12958_v11 }
 0x242   : > { %11864 = vmatprep.subr.bf16.mxu1 %v12959_v17 }
 0x243   : > { %4284 = vmatpush1.bf16.msra.mxu0 %v13034_v40 }
 0x244   : > { %4285 = vmatprep.subr.bf16.mxu0 %v13039_v31 }
 0x245   : > { %11865 = vmatpush3.bf16.msra.mxu1 %v12960_v46 }
 0x246   : > { %11866 = vmatprep.subr.bf16.mxu1 %v12961_v60 }
 0x247   : > { %4286 = vmatpush1.bf16.msra.mxu0 %v13037_v49 }
 0x248   : > { %5115 = vmatmul.mubr.bf16.gmra.mrb[64].mxu1 %v14920_v18  ;;  %4287 = vmatprep.subr.bf16.mxu0 %v13042_v62 }
 0x249   : > { %5122 = vmatprep.mubr.bf16.mxu1 %v15001_v38  ;;  %11867 = vmatpush3.bf16.msra.mxu1 %v12962_v43 }
 0x24a   : > { %11868 = vmatprep.subr.bf16.mxu1 %v12963_v42 }
 0x24b   : > { %4288 = vmatpush1.bf16.msra.mxu0 %v13040_v30 }
 0x24c   : > { %4289 = vmatprep.subr.bf16.mxu0 %v13045_v47 }
 0x24d   : > { %11869 = vmatpush3.bf16.msra.mxu1 %v12964_v52 }
 0x24e   : > { %11870 = vmatprep.subr.bf16.mxu1 %v12965_v19 }
 0x24f   : > { %4290 = vmatpush1.bf16.msra.mxu0 %v13043_v25 }
 0x250   : > { %5123 = vmatmul.mubr.bf16.gmra.mrb[68].mxu1 %v14952_v8  ;;  %4291 = vmatprep.subr.bf16.mxu0 %v13048_v2 }
 0x251   : > { %11871 = vmatpush3.bf16.msra.mxu1 %v12966_v58  ;;  %5163 = vmatprep.mubr.bf16.mxu1 %v14904_v9  ;;  %v13051_v9 = vld [vmem:[%s19109_s5 + $0x184] ss:$8 sps:$4 sm:$0xff]  }
 0x252   : > { %11872 = vmatprep.subr.bf16.mxu1 %v12967_v33 }
 0x253   : > { %4292 = vmatpush1.bf16.msra.mxu0 %v13046_v50 }
 0x254   : > { %4293 = vmatprep.subr.bf16.mxu0 %v13051_v9 }
 0x255   : > { %11873 = vmatpush3.bf16.msra.mxu1 %v12968_v34 }
 0x256   : > { %12198 = vmatprep.subr.bf16.mxu1 %v12969_v55 }
 0x257   : > { %4294 = vmatpush1.bf16.msra.mxu0 %v13049_v3 }
 0x258   : > { %5164 = vmatmul.mubr.bf16.vlgmr.msra.gmra.mrb[72].mxu1 %v14890_v27  ;;  %4295 = vmatprep.subr.bf16.mxu0 %v13054_v23  ;;  %v13057_v27 = vld [vmem:[%s19109_s5 + $0x1a4] ss:$8 sps:$4 sm:$0xff]  }
 0x259   : > { %5171 = vmatprep.mubr.bf16.mxu1 %v14933_v51  ;;  %12199 = vmatpush3.bf16.msra.mxu1 %v12969_v55  ;;  %v12972_v51 = vld [vmem:[%s19111_s7 + $0x198] sm:$0xff]  }
 0x25a   : > { %12200 = vmatprep.subr.bf16.mxu1 %v12970_v5 }
 0x25b   : > { %4296 = vmatpush1.bf16.msra.mxu0 %v13052_v32 }
 0x25c   : > { %4297 = vmatprep.subr.bf16.mxu0 %v13057_v27 }
 0x25d   : > { %12201 = vmatpush3.bf16.msra.mxu1 %v12970_v5 }
 0x25e   : > { %12202 = vmatprep.subr.bf16.mxu1 %v12971_v22 }
 0x25f   : > { %4298 = vmatpush1.bf16.msra.mxu0 %v13055_v26 }
 0x260   : > { %5172 = vmatmul.mubr.bf16.gmra.mrb[76].mxu1 %v14920_v18  ;;  %4299 = vmatprep.subr.bf16.mxu0 %v13060_v53 }
 0x261   : > { %5179 = vmatprep.mubr.bf16.mxu1 %v15001_v38  ;;  %12203 = vmatpush3.bf16.msra.mxu1 %v12971_v22  ;;  %v12974_v38 = vld [vmem:[%s19111_s7 + $0x1a8] sm:$0xff]  }
 0x262   : > { %12204 = vmatprep.subr.bf16.mxu1 %v12972_v51 }
 0x263   : > { %4300 = vmatpush1.bf16.msra.mxu0 %v13058_v48 }
 0x264   : > { %4301 = vmatprep.subr.bf16.mxu0 %v13063_v13 }
 0x265   : > { %12205 = vmatpush3.bf16.msra.mxu1 %v12972_v51 }
 0x266   : > { %12206 = vmatprep.subr.bf16.mxu1 %v12973_v36 }
 0x267   : > { %4302 = vmatpush1.bf16.msra.mxu0 %v13061_v39 }
 0x268   : > { %5180 = vmatmul.mubr.bf16.gmra.mrb[80].mxu1 %v14952_v8  ;;  %4303 = vmatprep.subr.bf16.mxu0 %v13066_v0 }
 0x269   : > { %12207 = vmatpush3.bf16.msra.mxu1 %v12973_v36  ;;  %5187 = vmatprep.mubr.bf16.mxu1 %v15291_v54 }
 0x26a   : > { %12208 = vmatprep.subr.bf16.mxu1 %v12974_v38 }
 0x26b   : > { %4304 = vmatpush1.bf16.msra.mxu0 %v13064_v56 }
 0x26c   : > { %4305 = vmatprep.subr.bf16.mxu0 %v13069_v61 }
 0x26d   : > { %12209 = vmatpush3.bf16.msra.mxu1 %v12974_v38 }
 0x26e   : > { %12210 = vmatprep.subr.bf16.mxu1 %v12975_v16 }
 0x26f   : > { %4306 = vmatpush1.bf16.msra.mxu0 %v13067_v20 }
 0x270   : > { %5188 = vmatmul.mubr.bf16.gmra.mrb[84].mxu1 %v11154_v44  ;;  %4307 = vmatprep.subr.bf16.mxu0 %v13072_v35 }
 0x271   : > { %12211 = vmatpush3.bf16.msra.mxu1 %v12975_v16  ;;  %12214 = vmatprep.mubr.bf16.mxu1 %v14920_v18 }
 0x272   : > { %12212 = vmatprep.subr.bf16.mxu1 %v12979_v14 }
 0x273   : > { %4308 = vmatpush1.bf16.msra.mxu0 %v13070_v41 }
 0x274   : > { %4350 = vmatprep.subr.bf16.mxu0 %v13075_v28 }
 0x275   : > { %12213 = vmatpush3.bf16.msra.mxu1 %v12979_v14 }
 0x278   : > { %12215 = vmatmul.mubr.bf16.vlgmr.msra.gmra.mrb[88].mxu1 %v14952_v8 }
 0x279   : > { %12218 = vmatprep.mubr.bf16.mxu1 %v11154_v44 }
 0x280   : > { %12219 = vmatmul.mubr.bf16.gmra.mrb[92].mxu1 %v15291_v54 }
 0x2a3   : > { %v11662_v18 = vpop.f32.mrb[16].mxu0 }
 0x2a4   : > { %v11663_v21 = vpop.f32.mrb[17].mxu0 }
 0x2a5   : > { %v11664_v45 = vadd.f32 %v11663_v21, %v11662_v18  ;;  %v11665_v4 = vpop.f32.mrb[18].mxu0 }
 0x2a6   : > { %v11666_v29 = vpop.f32.mrb[19].mxu0 }
 0x2a7   : > { %v11702_v10 = vpop.f32.mrb[16].mxu1  ;;  %v3241_v12 = vadd.f32 %v11664_v45, %v10938_v59  ;;  %v11667_v15 = vadd.f32 %v11666_v29, %v11665_v4 }
 0x2a8   : > { %v11703_v11 = vpop.f32.mrb[17].mxu1 }
 0x2a9   : > { %v11704_v17 = vadd.f32 %v11703_v11, %v11702_v10  ;;  %v11705_v40 = vpop.f32.mrb[18].mxu1  ;;  %v3244_v7 = vadd.f32 %v11667_v15, %v10938_v59  ;;  %v13140_v15 = vld [vmem:[%s19113_s9] sm:$0xff]   ;;  %v13144_v11 = vld [vmem:[%s19113_s9 + $0x48] sm:$0xff]  }
 0x2aa   : > { %v11706_v8 = vpop.f32.mrb[19].mxu1 }
 0x2ab   : > { %v15660_v46 = vadd.f32 %v11704_v17, %v3241_v12  ;;  %v11707_v31 = vadd.f32 %v11706_v8, %v11705_v40  ;;  %v13139_v12 = vld [vmem:[%s19113_s9 + $0x40] sm:$0xff]  }
 0x2ac   : > { %11910 = vmatprep.subr.bf16.mxu1 %v13139_v12 }
 0x2ad   : > { %v15662_v60 = vadd.f32 %v11707_v31, %v3244_v7  ;;  %11911 = vmatpush3.bf16.msra.mxu1 %v13140_v15 }
 0x2ae   : > { %11912 = vmatprep.subr.bf16.mxu1 %v13144_v11 }
 0x2af   : > { %v11668_v49 = vpop.f32.mrb[20].mxu0 }
 0x2b0   : > { %v11669_v43 = vpop.f32.mrb[21].mxu0 }
 0x2b1   : > { %v11670_v30 = vadd.f32 %v11669_v43, %v11668_v49  ;;  %v11671_v62 = vpop.f32.mrb[22].mxu0 }
 0x2b2   : > { %v11708_v42 = vpop.f32.mrb[20].mxu1  ;;  %v11672_v47 = vpop.f32.mrb[23].mxu0 }
 0x2b3   : > { %v11709_v52 = vpop.f32.mrb[21].mxu1  ;;  %v3249_v19 = vadd.f32 %v11670_v30, %v10938_v59  ;;  %v11673_v33 = vadd.f32 %v11672_v47, %v11671_v62 }
 0x2b4   : > { %v11710_v25 = vadd.f32 %v11709_v52, %v11708_v42  ;;  %v11711_v58 = vpop.f32.mrb[22].mxu1 }
 0x2b5   : > { %v11712_v34 = vpop.f32.mrb[23].mxu1  ;;  %v3252_v50 = vadd.f32 %v11673_v33, %v10938_v59 }
 0x2b6   : > { %v15664_v55 = vadd.f32 %v11710_v25, %v3249_v19  ;;  %v11713_v2 = vadd.f32 %v11712_v34, %v11711_v58 }
 0x2b7   : > { %v11674_v5 = vpop.f32.mrb[24].mxu0 }
 0x2b8   : > { %v15666_v9 = vadd.f32 %v11713_v2, %v3252_v50  ;;  %v11675_v3 = vpop.f32.mrb[25].mxu0 }
 0x2b9   : > { %v11676_v22 = vadd.f32 %v11675_v3, %v11674_v5  ;;  %v11677_v32 = vpop.f32.mrb[26].mxu0 }
 0x2ba   : > { %v11714_v23 = vpop.f32.mrb[24].mxu1  ;;  %v11678_v51 = vpop.f32.mrb[27].mxu0 }
 0x2bb   : > { %v11715_v27 = vpop.f32.mrb[25].mxu1  ;;  %v3257_v26 = vadd.f32 %v11676_v22, %v10938_v59  ;;  %v11679_v53 = vadd.f32 %v11678_v51, %v11677_v32 }
 0x2bc   : > { %v11716_v36 = vadd.f32 %v11715_v27, %v11714_v23  ;;  %v11717_v48 = vpop.f32.mrb[26].mxu1 }
 0x2bd   : > { %v11718_v13 = vpop.f32.mrb[27].mxu1  ;;  %v3260_v39 = vadd.f32 %v11679_v53, %v10938_v59 }
 0x2be   : > { %v15668_v38 = vadd.f32 %v11716_v36, %v3257_v26  ;;  %v11719_v0 = vadd.f32 %v11718_v13, %v11717_v48 }
 0x2c0   : > { %v15670_v24 = vadd.f32 %v11719_v0, %v3260_v39 }
 0x2c1   : > { %v11680_v16 = vpop.f32.mrb[28].mxu0 }
 0x2c2   : > { %v11681_v56 = vpop.f32.mrb[29].mxu0  ;;  %v11720_v61 = vpop.f32.mrb[28].mxu1 }
 0x2c3   : > { %v11682_v44 = vadd.f32 %v11681_v56, %v11680_v16  ;;  %v11683_v14 = vpop.f32.mrb[30].mxu0  ;;  %v11721_v20 = vpop.f32.mrb[29].mxu1  ;;  %v13145_v16 = vld [vmem:[%s19113_s9 + $0x8] sm:$0xff]  }
 0x2c4   : > { %v11684_v35 = vpop.f32.mrb[31].mxu0  ;;  %v11722_v28 = vadd.f32 %v11721_v20, %v11720_v61  ;;  %v11723_v18 = vpop.f32.mrb[30].mxu1  ;;  %11913 = vmatpush3.bf16.msra.mxu1 %v13145_v16  ;;  %v13079_v16 = vld [vmem:[%s19109_s5 + $0x220] ss:$8 sps:$4 sm:$0xff]  }
 0x2c5   : > { %v3265_v41 = vadd.f32 %v11682_v44, %v10938_v59  ;;  %v11685_v21 = vadd.f32 %v11684_v35, %v11683_v14  ;;  %v11724_v45 = vpop.f32.mrb[31].mxu1  ;;  %v13150_v35 = vld [vmem:[%s19113_s9 + $0x10] sm:$0xff]  }
 0x2c6   : > { %v11725_v10 = vadd.f32 %v11724_v45, %v11723_v18 }
 0x2c7   : > { %v15672_v4 = vadd.f32 %v11722_v28, %v3265_v41  ;;  %v3268_v29 = vadd.f32 %v11685_v21, %v10938_v59  ;;  %v13151_v41 = vld [vmem:[%s19113_s9 + $0x58] sm:$0xff]  }
 0x2c9   : > { %v15683_v17 = vadd.f32 %v11725_v10, %v3268_v29  ;;  %v11742_v40 = vpop.f32.mrb[32].mxu0 }
 0x2ca   : > { %v11743_v7 = vpop.f32.mrb[33].mxu0 }
 0x2cb   : > { %v12192_v59 = vpop.f32.mrb[32].mxu1  ;;  %v11744_v8 = vadd.f32 %v11743_v7, %v11742_v40  ;;  %v11745_v31 = vpop.f32.mrb[34].mxu0 }
 0x2cc   : > { %v3435_v49 = vpop.f32.mrb[33].mxu1  ;;  %v11746_v43 = vpop.f32.mrb[35].mxu0 }
 0x2cd   : > { %v3371_v42 = vadd.f32 %v11744_v8, %v15660_v46  ;;  %v12193_v30 = vpop.f32.mrb[34].mxu1  ;;  %v11747_v62 = vadd.f32 %v11746_v43, %v11745_v31  ;;  %v13153_v8 = vld [vmem:[%s19113_s9 + $0x18] sm:$0xff]  }
 0x2ce   : > { %v3438_v52 = vpop.f32.mrb[35].mxu1 }
 0x2cf   : > { %v3436_v47 = vadd.f32 %v3435_v49, %v3371_v42  ;;  %v3374_v19 = vadd.f32 %v11747_v62, %v15662_v60  ;;  %v13154_v62 = vld [vmem:[%s19113_s9 + $0x60] sm:$0xff]  }
 0x2d1   : > { %v3466_v25 = vmax.f32 %v3436_v47, 0.0  ;;  %v3439_v58 = vadd.f32 %v3438_v52, %v3374_v19  ;;  %v11748_v33 = vpop.f32.mrb[36].mxu0  ;;  %v13156_v52 = vld [vmem:[%s19113_s9 + $0x20] sm:$0xff]   ;;  %v13157_v19 = vld [vmem:[%s19113_s9 + $0x68] sm:$0xff]  }
 0x2d2   : > { %v11749_v34 = vpop.f32.mrb[37].mxu0 }
 0x2d3   : > { %v3474_v50 = vpack.c.bf16 %v3466_v25, %v3466_v25  ;;  %v3467_v2 = vmax.f32 %v3439_v58, 0.0  ;;  %v12196_v5 = vpop.f32.mrb[36].mxu1  ;;  %v11750_v3 = vadd.f32 %v11749_v34, %v11748_v33  ;;  %v11751_v23 = vpop.f32.mrb[38].mxu0  ;;  %v13159_v33 = vld [vmem:[%s19113_s9 + $0x28] sm:$0xff]  }
 0x2d4   : > { %v3451_v22 = vpop.f32.mrb[37].mxu1  ;;  %v11752_v32 = vpop.f32.mrb[39].mxu0 }
 0x2d5   : > { %v11625_v27 = vpack.c.bf16 %v3467_v2, %v3466_v25  ;;  %v3379_v46 = vadd.f32 %v11750_v3, %v15664_v55  ;;  %v12197_v51 = vpop.f32.mrb[38].mxu1  ;;  %v11753_v26 = vadd.f32 %v11752_v32, %v11751_v23  ;;  %v15689_v36 = vcombine.low %v19185_v63, %v3474_v50  ;;  %v13160_v50 = vld [vmem:[%s19113_s9 + $0x70] sm:$0xff]   ;;  %v13073_v3 = vld [vmem:[%s19109_s5 + $0x200] ss:$8 sps:$4 sm:$0xff]  }
 0x2d6   : > { %v3454_v60 = vpop.f32.mrb[39].mxu1  ;;  %v13078_v32 = vld [vmem:[%s19109_s5 + $0x214] ss:$8 sps:$4 sm:$0xff]  }
 0x2d7   : > { %v3444_v48 = vadd.f32 %v12192_v59, %v3379_v46  ;;  %v3382_v53 = vadd.f32 %v11753_v26, %v15666_v9  ;;  %4246 = vmatprep.mubr.bf16.mxu0 %v11625_v27  ;;  %v13149_v9 = vld [vmem:[%s19113_s9 + $0x50] sm:$0xff]  }
 0x2d8   : > { %4247 = vmatmul.mubr.bf16.gmra.mrb[52].mxu0 %v15689_v36  ;;  %11914 = vmatprep.subr.bf16.mxu1 %v13149_v9  ;;  %v13162_v46 = vld [vmem:[%s19113_s9 + $0x30] sm:$0xff]  }
 0x2d9   : > { %v3468_v13 = vmax.f32 %v3444_v48, 0.0  ;;  %v3447_v39 = vadd.f32 %v12193_v30, %v3382_v53  ;;  %v11754_v0 = vpop.f32.mrb[40].mxu0  ;;  %11915 = vmatpush3.bf16.msra.mxu1 %v13150_v35  ;;  %v13076_v26 = vld [vmem:[%s19109_s5 + $0x210] ss:$8 sps:$4 sm:$0xff]  }
 0x2da   : > { %v11755_v55 = vpop.f32.mrb[41].mxu0  ;;  %11916 = vmatprep.subr.bf16.mxu1 %v13151_v41 }
 0x2db   : > { %v3469_v56 = vmax.f32 %v3447_v39, 0.0  ;;  %v11756_v61 = vadd.f32 %v11755_v55, %v11754_v0  ;;  %v11757_v44 = vpop.f32.mrb[42].mxu0  ;;  %v15696_v14 = vpack.c.bf16 %v3468_v13, %v3467_v2 }
 0x2dc   : > { %v11758_v20 = vpop.f32.mrb[43].mxu0 }
 0x2dd   : > { %v3387_v28 = vadd.f32 %v11756_v61, %v15668_v38  ;;  %v11759_v18 = vadd.f32 %v11758_v20, %v11757_v44  ;;  %v15708_v21 = vpack.c.bf16 %v3469_v56, %v3468_v13  ;;  %11917 = vmatpush3.bf16.msra.mxu1 %v13153_v8  ;;  %v13166_v13 = vld [vmem:[%s19113_s9 + $0xc0] sm:$0xff]   ;;  %v13082_v44 = vld [vmem:[%s19109_s5 + $0x230] ss:$8 sps:$4 sm:$0xff]  }
 0x2de   : > { %11918 = vmatprep.subr.bf16.mxu1 %v13154_v62  ;;  %v13087_v20 = vld [vmem:[%s19109_s5 + $0x244] ss:$8 sps:$4 sm:$0xff]   ;;  %v13091_v8 = vld [vmem:[%s19109_s5 + $0x260] ss:$8 sps:$4 sm:$0xff]  }
 0x2df   : > { %v3452_v45 = vadd.f32 %v3451_v22, %v3387_v28  ;;  %v3390_v29 = vadd.f32 %v11759_v18, %v15670_v24  ;;  %4256 = vmatprep.mubr.bf16.mxu0 %v15708_v21  ;;  %v13085_v18 = vld [vmem:[%s19109_s5 + $0x240] ss:$8 sps:$4 sm:$0xff]   ;;  %v13099_v62 = vld [vmem:[%s19109_s5 + $0x284] ss:$8 sps:$4 sm:$0xff]  }
 0x2e0   : > { %4257 = vmatmul.mubr.bf16.gmra.mrb[56].mxu0 %v15696_v14 }
 0x2e1   : > { %v3470_v10 = vmax.f32 %v3452_v45, 0.0  ;;  %v3455_v12 = vadd.f32 %v3454_v60, %v3390_v29  ;;  %v11760_v15 = vpop.f32.mrb[44].mxu0  ;;  %11919 = vmatpush3.bf16.msra.mxu1 %v13156_v52  ;;  %v13081_v60 = vld [vmem:[%s19109_s5 + $0x224] ss:$8 sps:$4 sm:$0xff]   ;;  %v13090_v29 = vld [vmem:[%s19109_s5 + $0x254] ss:$8 sps:$4 sm:$0xff]  }
 0x2e2   : > { %v11761_v11 = vpop.f32.mrb[45].mxu0  ;;  %11920 = vmatprep.subr.bf16.mxu1 %v13157_v19 }
 0x2e3   : > { %v15713_v40 = vpack.c.bf16 %v3470_v10, %v3469_v56  ;;  %v3471_v38 = vmax.f32 %v3455_v12, 0.0  ;;  %v11762_v7 = vadd.f32 %v11761_v11, %v11760_v15  ;;  %v11763_v59 = vpop.f32.mrb[46].mxu0  ;;  %v13084_v56 = vld [vmem:[%s19109_s5 + $0x234] ss:$8 sps:$4 sm:$0xff]   ;;  %v13088_v12 = vld [vmem:[%s19109_s5 + $0x250] ss:$8 sps:$4 sm:$0xff]  }
 0x2e4   : > { %v11764_v24 = vpop.f32.mrb[47].mxu0  ;;  %v13093_v15 = vld [vmem:[%s19109_s5 + $0x264] ss:$8 sps:$4 sm:$0xff]  }
 0x2e5   : > { %v3395_v31 = vadd.f32 %v11762_v7, %v15672_v4  ;;  %v11765_v49 = vadd.f32 %v11764_v24, %v11763_v59  ;;  %v15719_v43 = vpack.c.bf16 %v3471_v38, %v3470_v10  ;;  %11921 = vmatpush3.bf16.msra.mxu1 %v13159_v33 }
 0x2e6   : > { %11922 = vmatprep.subr.bf16.mxu1 %v13160_v50 }
 0x2e7   : > { %v3460_v42 = vadd.f32 %v12196_v5, %v3395_v31  ;;  %v3398_v30 = vadd.f32 %v11765_v49, %v15683_v17  ;;  %4266 = vmatprep.mubr.bf16.mxu0 %v15719_v43  ;;  %v13096_v31 = vld [vmem:[%s19109_s5 + $0x274] ss:$8 sps:$4 sm:$0xff]  }
 0x2e8   : > { %4267 = vmatmul.mubr.bf16.gmra.mrb[60].mxu0 %v15713_v40 }
 0x2e9   : > { %v3472_v4 = vmax.f32 %v3460_v42, 0.0  ;;  %v3463_v47 = vadd.f32 %v12197_v51, %v3398_v30  ;;  %4309 = vmatprep.mubr.bf16.mxu0 %v11625_v27  ;;  %v13163_v51 = vld [vmem:[%s19113_s9 + $0x78] sm:$0xff]   ;;  %11923 = vmatpush3.bf16.msra.mxu1 %v13162_v46  ;;  %v15830_v30 = vld [vmem:[%s19112_s8] ss:$0 sm:$0xff] }
 0x2ea   : > { %11924 = vmatprep.subr.bf16.mxu1 %v13163_v51  ;;  %v13094_v42 = vld [vmem:[%s19109_s5 + $0x270] ss:$8 sps:$4 sm:$0xff]  }
 0x2eb   : > { %v15733_v17 = vmax.f32 %v3463_v47, 0.0  ;;  %v11794_v25 = vpop.f32.mrb[40].mxu1  ;;  %v15735_v58 = vpack.c.bf16 %v3472_v4, %v3471_v38 }
 0x2ec   : > { %v11795_v34 = vpop.f32.mrb[41].mxu1 }
 0x2ed   : > { %v15743_v2 = vadd.f32 %v11795_v34, %v11794_v25  ;;  %v11797_v5 = vpop.f32.mrb[42].mxu1  ;;  %v15749_v23 = vpack.c.bf16 %v15733_v17, %v3472_v4  ;;  %v13097_v25 = vld [vmem:[%s19109_s5 + $0x280] ss:$8 sps:$4 sm:$0xff]   ;;  %v13102_v34 = vld [vmem:[%s19109_s5 + $0x294] ss:$8 sps:$4 sm:$0xff]  }
 0x2ee   : > { %v11798_v22 = vpop.f32.mrb[43].mxu1 }
 0x2ef   : > { %v15754_v27 = vadd.f32 %v11798_v22, %v11797_v5  ;;  %v5036_v47 = vadd.f32 %v15743_v2, %v15830_v30  ;;  %v13100_v22 = vld [vmem:[%s19109_s5 + $0x290] ss:$8 sps:$4 sm:$0xff]  }
 0x2f0   : > { %4310 = vmatmul.mubr.bf16.vlgmr.msra.gmra.mrb[48].mxu0 %v15689_v36  ;;  %v13165_v36 = vld [vmem:[%s19113_s9 + $0x38] sm:$0xff]  }
 0x2f1   : > { %4351 = vmatpush1.bf16.msra.mxu0 %v13073_v3  ;;  %4319 = vmatprep.mubr.bf16.mxu0 %v15708_v21  ;;  %v5039_v50 = vadd.f32 %v15754_v27, %v15830_v30 }
 0x2f2   : > { %4352 = vmatprep.subr.bf16.mxu0 %v13078_v32  ;;  %11925 = vmatpush3.bf16.msra.mxu1 %v13165_v36  ;;  %v13105_v32 = vld [vmem:[%s19109_s5 + $0x2a4] ss:$8 sps:$4 sm:$0xff]  }
 0x2f3   : > { %v11800_v48 = vpop.f32.mrb[44].mxu1  ;;  %11950 = vmatprep.subr.bf16.mxu1 %v13166_v13 }
 0x2f4   : > { %v11801_v53 = vpop.f32.mrb[45].mxu1 }
 0x2f5   : > { %v15776_v39 = vadd.f32 %v11801_v53, %v11800_v48  ;;  %v11803_v0 = vpop.f32.mrb[46].mxu1  ;;  %4353 = vmatpush1.bf16.msra.mxu0 %v13076_v26  ;;  %v13103_v48 = vld [vmem:[%s19109_s5 + $0x2a0] ss:$8 sps:$4 sm:$0xff]   ;;  %v13108_v53 = vld [vmem:[%s19109_s5 + $0x2b4] ss:$8 sps:$4 sm:$0xff]  }
 0x2f6   : > { %v11804_v55 = vpop.f32.mrb[47].mxu1  ;;  %4354 = vmatprep.subr.bf16.mxu0 %v13081_v60 }
 0x2f7   : > { %v15784_v61 = vadd.f32 %v11804_v55, %v11803_v0  ;;  %v5044_v27 = vadd.f32 %v15776_v39, %v15830_v30  ;;  %v13106_v55 = vld [vmem:[%s19109_s5 + $0x2b0] ss:$8 sps:$4 sm:$0xff]  }
 0x2f8   : > { %4320 = vmatmul.mubr.bf16.gmra.mrb[52].mxu0 %v15696_v14 }
 0x2f9   : > { %4355 = vmatpush1.bf16.msra.mxu0 %v13079_v16  ;;  %4329 = vmatprep.mubr.bf16.mxu0 %v15719_v43  ;;  %v5047_v13 = vadd.f32 %v15784_v61, %v15830_v30 }
 0x2fa   : > { %4356 = vmatprep.subr.bf16.mxu0 %v13084_v56  ;;  %v13111_v56 = vld [vmem:[%s19109_s5 + $0x2c4] ss:$8 sps:$4 sm:$0xff]  }
 0x2fb   : > { %v11806_v9 = vpop.f32.mrb[48].mxu1 }
 0x2fc   : > { %v11807_v35 = vpop.f32.mrb[49].mxu1 }
 0x2fd   : > { %v15794_v41 = vadd.f32 %v11807_v35, %v11806_v9  ;;  %v11809_v28 = vpop.f32.mrb[50].mxu1  ;;  %4357 = vmatpush1.bf16.msra.mxu0 %v13082_v44 }
 0x2fe   : > { %v11810_v45 = vpop.f32.mrb[51].mxu1  ;;  %4358 = vmatprep.subr.bf16.mxu0 %v13087_v20 }
 0x2ff   : > { %v15802_v10 = vadd.f32 %v11810_v45, %v11809_v28  ;;  %v5052_v61 = vadd.f32 %v15794_v41, %v15830_v30  ;;  %v13109_v28 = vld [vmem:[%s19109_s5 + $0x2c0] ss:$8 sps:$4 sm:$0xff]   ;;  %v13114_v45 = vld [vmem:[%s19109_s5 + $0x2d4] ss:$8 sps:$4 sm:$0xff]  }
 0x300   : > { %4330 = vmatmul.mubr.bf16.gmra.mrb[56].mxu0 %v15713_v40 }
 0x301   : > { %4359 = vmatpush1.bf16.msra.mxu0 %v13085_v18  ;;  %4339 = vmatprep.mubr.bf16.mxu0 %v15749_v23 }
 0x302   : > { %4360 = vmatprep.subr.bf16.mxu0 %v13090_v29  ;;  %v5055_v29 = vadd.f32 %v15802_v10, %v15830_v30 }
 0x303   : > { %v11812_v11 = vpop.f32.mrb[52].mxu1 }
 0x304   : > { %v11813_v38 = vpop.f32.mrb[53].mxu1 }
 0x305   : > { %v15812_v7 = vadd.f32 %v11813_v38, %v11812_v11  ;;  %v11815_v59 = vpop.f32.mrb[54].mxu1  ;;  %4361 = vmatpush1.bf16.msra.mxu0 %v13088_v12  ;;  %v13112_v11 = vld [vmem:[%s19109_s5 + $0x2d0] ss:$8 sps:$4 sm:$0xff]   ;;  %v13117_v38 = vld [vmem:[%s19109_s5 + $0x2e4] ss:$8 sps:$4 sm:$0xff]  }
 0x306   : > { %v11816_v24 = vpop.f32.mrb[55].mxu1  ;;  %4362 = vmatprep.subr.bf16.mxu0 %v13093_v15 }
 0x307   : > { %v15820_v49 = vadd.f32 %v11816_v24, %v11815_v59  ;;  %v5060_v10 = vadd.f32 %v15812_v7, %v15830_v30 }
 0x308   : > { %4340 = vmatmul.mubr.bf16.gmra.mrb[60].mxu0 %v15735_v58 }
 0x309   : > { %4363 = vmatpush1.bf16.msra.mxu0 %v13091_v8  ;;  %4382 = vmatprep.mubr.bf16.mxu0 %v15708_v21 }
 0x30a   : > { %4364 = vmatprep.subr.bf16.mxu0 %v13096_v31 }
 0x30b   : > { %v11834_v52 = vpop.f32.mrb[56].mxu1 }
 0x30c   : > { %v11835_v4 = vpop.f32.mrb[57].mxu1 }
 0x30d   : > { %v11836_v21 = vadd.f32 %v11835_v4, %v11834_v52  ;;  %v11837_v19 = vpop.f32.mrb[58].mxu1  ;;  %4365 = vmatpush1.bf16.msra.mxu0 %v13094_v42  ;;  %v13115_v42 = vld [vmem:[%s19109_s5 + $0x2e0] ss:$8 sps:$4 sm:$0xff]   ;;  %v13120_v52 = vld [vmem:[%s19109_s5 + $0x2f4] ss:$8 sps:$4 sm:$0xff]   ;;  %v5063_v4 = vadd.f32 %v15820_v49, %v15830_v30 }
 0x30e   : > { %v11838_v33 = vpop.f32.mrb[59].mxu1  ;;  %4366 = vmatprep.subr.bf16.mxu0 %v13099_v62  ;;  %v13121_v49 = vld [vmem:[%s19109_s5 + $0x300] ss:$8 sps:$4 sm:$0xff]  }
 0x30f   : > { %v15845_v5 = vadd.f32 %v11836_v21, %v5036_v47  ;;  %v11839_v3 = vadd.f32 %v11838_v33, %v11837_v19  ;;  %v13118_v19 = vld [vmem:[%s19109_s5 + $0x2f0] ss:$8 sps:$4 sm:$0xff]  }
 0x311   : > { %v15847_v2 = vadd.f32 %v11839_v3, %v5039_v50  ;;  %4367 = vmatpush1.bf16.msra.mxu0 %v13097_v25  ;;  %v13123_v25 = vld [vmem:[%s19109_s5 + $0x304] ss:$8 sps:$4 sm:$0xff]  }
 0x312   : > { %4368 = vmatprep.subr.bf16.mxu0 %v13102_v34 }
 0x313   : > { %v11840_v46 = vpop.f32.mrb[60].mxu1 }
 0x314   : > { %v11841_v51 = vpop.f32.mrb[61].mxu1 }
 0x315   : > { %v11842_v26 = vadd.f32 %v11841_v51, %v11840_v46  ;;  %v11843_v60 = vpop.f32.mrb[62].mxu1  ;;  %4369 = vmatpush1.bf16.msra.mxu0 %v13100_v22  ;;  %v13126_v22 = vld [vmem:[%s19109_s5 + $0x314] ss:$8 sps:$4 sm:$0xff]   ;;  %v13124_v51 = vld [vmem:[%s19109_s5 + $0x310] ss:$8 sps:$4 sm:$0xff]  }
 0x316   : > { %v11844_v36 = vpop.f32.mrb[63].mxu1  ;;  %4370 = vmatprep.subr.bf16.mxu0 %v13105_v32 }
 0x317   : > { %v15865_v0 = vadd.f32 %v11842_v26, %v5044_v27  ;;  %v11845_v16 = vadd.f32 %v11844_v36, %v11843_v60  ;;  %v13129_v26 = vld [vmem:[%s19109_s5 + $0x324] ss:$8 sps:$4 sm:$0xff]  }
 0x319   : > { %v15867_v39 = vadd.f32 %v11845_v16, %v5047_v13  ;;  %4371 = vmatpush1.bf16.msra.mxu0 %v13103_v48  ;;  %v13130_v16 = vld [vmem:[%s19109_s5 + $0x330] ss:$8 sps:$4 sm:$0xff]  }
 0x31a   : > { %4372 = vmatprep.subr.bf16.mxu0 %v13108_v53 }
 0x31b   : > { %v11846_v44 = vpop.f32.mrb[64].mxu1 }
 0x31c   : > { %v11847_v20 = vpop.f32.mrb[65].mxu1 }
 0x31d   : > { %v11848_v9 = vadd.f32 %v11847_v20, %v11846_v44  ;;  %v11849_v35 = vpop.f32.mrb[66].mxu1  ;;  %4373 = vmatpush1.bf16.msra.mxu0 %v13106_v55 }
 0x31e   : > { %v11850_v18 = vpop.f32.mrb[67].mxu1  ;;  %4374 = vmatprep.subr.bf16.mxu0 %v13111_v56  ;;  %v13135_v56 = vld [vmem:[%s19109_s5 + $0x344] ss:$8 sps:$4 sm:$0xff]  }
 0x31f   : > { %v15885_v12 = vadd.f32 %v11848_v9, %v5052_v61  ;;  %v11851_v15 = vadd.f32 %v11850_v18, %v11849_v35  ;;  %v13136_v18 = vld [vmem:[%s19109_s5 + $0x350] ss:$8 sps:$4 sm:$0xff]  }
 0x321   : > { %v15887_v41 = vadd.f32 %v11851_v15, %v5055_v29  ;;  %4375 = vmatpush1.bf16.msra.mxu0 %v13109_v28  ;;  %v3481_v29 = vpack.c.bf16 %v15733_v17, %v15733_v17  ;;  %v13148_v17 = vld [vmem:[%s19109_s5 + $0x374] ss:$8 sps:$4 sm:$0xff]  }
 0x322   : > { %4376 = vmatprep.subr.bf16.mxu0 %v13114_v45 }
 0x323   : > { %v11852_v59 = vpop.f32.mrb[68].mxu1 }
 0x324   : > { %v11853_v8 = vpop.f32.mrb[69].mxu1 }
 0x325   : > { %v11854_v24 = vadd.f32 %v11853_v8, %v11852_v59  ;;  %v11855_v31 = vpop.f32.mrb[70].mxu1  ;;  %4377 = vmatpush1.bf16.msra.mxu0 %v13112_v11  ;;  %v13141_v8 = vld [vmem:[%s19109_s5 + $0x360] ss:$8 sps:$4 sm:$0xff]  }
 0x326   : > { %v11856_v62 = vpop.f32.mrb[71].mxu1  ;;  %4378 = vmatprep.subr.bf16.mxu0 %v13117_v38 }
 0x327   : > { %v15905_v47 = vadd.f32 %v11854_v24, %v5060_v10  ;;  %v11857_v21 = vadd.f32 %v11856_v62, %v11855_v31 }
 0x329   : > { %v15907_v7 = vadd.f32 %v11857_v21, %v5063_v4  ;;  %4379 = vmatpush1.bf16.msra.mxu0 %v13115_v42  ;;  %v13146_v42 = vld [vmem:[%s19109_s5 + $0x370] ss:$8 sps:$4 sm:$0xff]  }
 0x32a   : > { %4380 = vmatprep.subr.bf16.mxu0 %v13120_v52  ;;  %v13152_v52 = vld [vmem:[%s19113_s9 + $0x180] sm:$0xff]  }
 0x32b   : > { %v11874_v33 = vpop.f32.mrb[72].mxu1 }
 0x32c   : > { %v11875_v34 = vpop.f32.mrb[73].mxu1 }
 0x32d   : > { %v11876_v50 = vadd.f32 %v11875_v34, %v11874_v33  ;;  %v11877_v3 = vpop.f32.mrb[74].mxu1  ;;  %4381 = vmatpush1.bf16.msra.mxu0 %v13118_v19 }
 0x32e   : > { %v11878_v30 = vpop.f32.mrb[75].mxu1  ;;  %4423 = vmatprep.subr.bf16.mxu0 %v13123_v25 }
 0x32f   : > { %v11879_v32 = vadd.f32 %v11878_v30, %v11877_v3  ;;  %v15922_v46 = vadd.f32 %v11876_v50, %v15845_v5 }
 0x330   : > { %4383 = vmatmul.mubr.bf16.vlgmr.msra.gmra.mrb[48].mxu0 %v15696_v14  ;;  %v13127_v14 = vld [vmem:[%s19109_s5 + $0x320] ss:$8 sps:$4 sm:$0xff]  }
 0x331   : > { %4392 = vmatprep.mubr.bf16.mxu0 %v15719_v43  ;;  %4424 = vmatpush1.bf16.msra.mxu0 %v13121_v49  ;;  %v15930_v27 = vadd.f32 %v11879_v32, %v15847_v2  ;;  %v13132_v2 = vld [vmem:[%s19109_s5 + $0x334] ss:$8 sps:$4 sm:$0xff]  }
 0x332   : > { %4425 = vmatprep.subr.bf16.mxu0 %v13126_v22 }
 0x333   : > { %v11880_v60 = vpop.f32.mrb[76].mxu1 }
 0x334   : > { %v11881_v5 = vpop.f32.mrb[77].mxu1 }
 0x335   : > { %v11882_v48 = vadd.f32 %v11881_v5, %v11880_v60  ;;  %v11883_v36 = vpop.f32.mrb[78].mxu1  ;;  %4426 = vmatpush1.bf16.msra.mxu0 %v13124_v51  ;;  %v13158_v5 = vld [vmem:[%s19113_s9 + $0x190] sm:$0xff]  }
 0x336   : > { %v11884_v43 = vpop.f32.mrb[79].mxu1  ;;  %4427 = vmatprep.subr.bf16.mxu0 %v13129_v26 }
 0x337   : > { %v11885_v53 = vadd.f32 %v11884_v43, %v11883_v36  ;;  %v5174_v13 = vadd.f32 %v11882_v48, %v15865_v0 }
 0x338   : > { %4393 = vmatmul.mubr.bf16.gmra.mrb[52].mxu0 %v15713_v40 }
 0x339   : > { %4402 = vmatprep.mubr.bf16.mxu0 %v15749_v23  ;;  %4428 = vmatpush1.bf16.msra.mxu0 %v13127_v14  ;;  %v5177_v55 = vadd.f32 %v11885_v53, %v15867_v39  ;;  %v13133_v23 = vld [vmem:[%s19109_s5 + $0x340] ss:$8 sps:$4 sm:$0xff]   ;;  %v13138_v39 = vld [vmem:[%s19109_s5 + $0x354] ss:$8 sps:$4 sm:$0xff]  }
 0x33a   : > { %4429 = vmatprep.subr.bf16.mxu0 %v13132_v2 }
 0x33b   : > { %v11886_v44 = vpop.f32.mrb[80].mxu1 }
 0x33c   : > { %v11887_v20 = vpop.f32.mrb[81].mxu1 }
 0x33d   : > { %v11888_v61 = vadd.f32 %v11887_v20, %v11886_v44  ;;  %v11889_v0 = vpop.f32.mrb[82].mxu1  ;;  %4430 = vmatpush1.bf16.msra.mxu0 %v13130_v16 }
 0x33e   : > { %v11890_v9 = vpop.f32.mrb[83].mxu1  ;;  %4431 = vmatprep.subr.bf16.mxu0 %v13135_v56 }
 0x33f   : > { %v11891_v35 = vadd.f32 %v11890_v9, %v11889_v0  ;;  %v15958_v28 = vadd.f32 %v11888_v61, %v15885_v12  ;;  %v13143_v12 = vld [vmem:[%s19109_s5 + $0x364] ss:$8 sps:$4 sm:$0xff]  }
 0x340   : > { %4403 = vmatmul.mubr.bf16.gmra.mrb[56].mxu0 %v15735_v58 }
 0x341   : > { %4432 = vmatpush1.bf16.msra.mxu0 %v13133_v23  ;;  %4412 = vmatprep.mubr.bf16.mxu0 %v15291_v54  ;;  %v15966_v45 = vadd.f32 %v11891_v35, %v15887_v41  ;;  %v15977_v41 = vcombine.low %v3481_v29, %v19185_v63  ;;  %v13161_v35 = vld [vmem:[%s19113_s9 + $0x198] sm:$0xff]  }
 0x342   : > { %4433 = vmatprep.subr.bf16.mxu0 %v13138_v39 }
 0x343   : > { %v11892_v15 = vpop.f32.mrb[84].mxu1 }
 0x344   : > { %v11893_v11 = vpop.f32.mrb[85].mxu1 }
 0x345   : > { %v11894_v38 = vadd.f32 %v11893_v11, %v11892_v15  ;;  %v11895_v59 = vpop.f32.mrb[86].mxu1  ;;  %4434 = vmatpush1.bf16.msra.mxu0 %v13136_v18 }
 0x346   : > { %v11896_v10 = vpop.f32.mrb[87].mxu1  ;;  %4435 = vmatprep.subr.bf16.mxu0 %v13143_v12 }
 0x347   : > { %v11897_v24 = vadd.f32 %v11896_v10, %v11895_v59  ;;  %v5190_v31 = vadd.f32 %v11894_v38, %v15905_v47 }
 0x348   : > { %4413 = vmatmul.mubr.bf16.gmra.mrb[60].mxu0 %v15977_v41 }
 0x349   : > { %4436 = vmatpush1.bf16.msra.mxu0 %v13141_v8  ;;  %4455 = vmatprep.mubr.bf16.mxu0 %v19185_v63  ;;  %v5193_v62 = vadd.f32 %v11897_v24, %v15907_v7  ;;  %v13155_v7 = vld [vmem:[%s19113_s9 + $0x188] sm:$0xff]  }
 0x34a   : > { %4437 = vmatprep.subr.bf16.mxu0 %v13148_v17 }
 0x34b   : > { %v12216_v4 = vpop.f32.mrb[88].mxu1 }
 0x34c   : > { %v5239_v21 = vadd.f32 %v12216_v4, %v5174_v13  ;;  %v5230_v19 = vpop.f32.mrb[89].mxu1  ;;  %v13164_v4 = vld [vmem:[%s19113_s9 + $0x1a0] sm:$0xff]  }
 0x34d   : > { %v5231_v47 = vadd.f32 %v5230_v19, %v15922_v46  ;;  %v12217_v25 = vpop.f32.mrb[90].mxu1  ;;  %4438 = vmatpush1.bf16.msra.mxu0 %v13146_v42 }
 0x34e   : > { %v5263_v33 = vmax.f32 %v5239_v21, 0.0  ;;  %v5242_v34 = vadd.f32 %v12217_v25, %v5177_v55  ;;  %v5233_v50 = vpop.f32.mrb[91].mxu1  ;;  %12222 = vmatprep.subr.bf16.mxu0 %v13152_v52 }
 0x34f   : > { %v5261_v3 = vmax.f32 %v5231_v47, 0.0  ;;  %v5234_v49 = vadd.f32 %v5233_v50, %v15930_v27 }
 0x350   : > { %v5271_v30 = vpack.c.bf16 %v5263_v33, %v5263_v33  ;;  %v5264_v22 = vmax.f32 %v5242_v34, 0.0  ;;  %4456 = vmatmul.mubr.bf16.vlgmr.msra.gmra.mrb[48].mxu0 %v15713_v40 }
 0x351   : > { %v5269_v32 = vpack.c.bf16 %v5261_v3, %v5261_v3  ;;  %v5262_v51 = vmax.f32 %v5234_v49, 0.0  ;;  %12223 = vmatpush3.bf16.msra.mxu0 %v13152_v52  ;;  %4465 = vmatprep.mubr.bf16.mxu0 %v19185_v63 }
 0x352   : > { %v5294_v46 = vshrl.u32 %v5271_v30, 16  ;;  %v5297_v26 = vshll.u32 %v5271_v30, 16  ;;  %v5272_v60 = vpack.c.bf16 %v5264_v22, %v5264_v22  ;;  %12224 = vmatprep.subr.bf16.mxu0 %v13155_v7 }
 0x353   : > { %v5278_v48 = vshrl.u32 %v5269_v32, 16  ;;  %v5281_v36 = vshll.u32 %v5269_v32, 16  ;;  %v5270_v27 = vpack.c.bf16 %v5262_v51, %v5262_v51  ;;  %v12220_v14 = vpop.f32.mrb[92].mxu1 }
 0x354   : > { %v5296_v43 = vrot.slane %v5294_v46, 6  ;;  %v5299_v2 = vrot.slane %v5297_v26, 7  ;;  %v5302_v40 = vshrl.u32 %v5272_v60, 16  ;;  %v5305_v53 = vshll.u32 %v5272_v60, 16  ;;  %v5246_v13 = vpop.f32.mrb[93].mxu1 }
 0x355   : > { %v5280_v16 = vrot.slane %v5278_v48, 6  ;;  %v5283_v55 = vrot.slane %v5281_v36, 7  ;;  %v5286_v56 = vshrl.u32 %v5270_v27, 16  ;;  %v5289_v44 = vshll.u32 %v5270_v27, 16  ;;  %v12221_v20 = vpop.f32.mrb[94].mxu1  ;;  %12225 = vmatpush3.bf16.msra.mxu0 %v13155_v7 }
 0x356   : > { %v5300_v61 = vor.u32 %v5299_v2, %v5296_v43  ;;  %v5304_v0 = vrot.slane %v5302_v40, 6  ;;  %v5307_v23 = vrot.slane %v5305_v53, 7  ;;  %v5255_v9 = vadd.f32 %v12220_v14, %v5190_v31  ;;  %v5249_v39 = vpop.f32.mrb[95].mxu1  ;;  %12226 = vmatprep.subr.bf16.mxu0 %v13158_v5 }
 0x357   : > { %v5284_v18 = vor.u32 %v5283_v55, %v5280_v16  ;;  %v5288_v29 = vrot.slane %v5286_v56, 6  ;;  %v5291_v12 = vrot.slane %v5289_v44, 7  ;;  %v5247_v15 = vadd.f32 %v5246_v13, %v15958_v28 }
 0x358   : > { %v5351_v11 = vsel %vm14867_vm7, 0, %v5300_v61  ;;  %v5308_v38 = vor.u32 %v5307_v23, %v5304_v0  ;;  %v5267_v59 = vmax.f32 %v5255_v9, 0.0  ;;  %v5258_v8 = vadd.f32 %v12221_v20, %v5193_v62  ;;  %4466 = vmatmul.mubr.bf16.gmra.mrb[52].mxu0 %v15735_v58  ;;  %v13170_v20 = vld [vmem:[%s19113_s9 + $0x1b0] sm:$0xff]  }
 0x359   : > { %v16011_v17 = vsel %vm14875_vm8, %v5351_v11, 0  ;;  %v5349_v24 = vsel %vm14867_vm7, 0, %v5284_v18  ;;  %v5292_v31 = vor.u32 %v5291_v12, %v5288_v29  ;;  %v5265_v42 = vmax.f32 %v5247_v15, 0.0  ;;  %12227 = vmatpush3.bf16.msra.mxu0 %v13158_v5  ;;  %4475 = vmatprep.mubr.bf16.mxu0 %v19185_v63 }
 0x35a   : > { %v16018_v28 = vsel %vm14875_vm8, %v5349_v24, 0  ;;  %v5352_v62 = vsel %vm14867_vm7, 0, %v5308_v38  ;;  %v5275_v58 = vpack.c.bf16 %v5267_v59, %v5267_v59  ;;  %v5268_v52 = vmax.f32 %v5258_v8, 0.0  ;;  %12228 = vmatprep.subr.bf16.mxu0 %v13161_v35 }
 0x35b   : > { %v16027_v21 = vsel %vm14875_vm8, %v5352_v62, 0  ;;  %v5350_v19 = vsel %vm14867_vm7, 0, %v5292_v31  ;;  %v5273_v47 = vpack.c.bf16 %v5265_v42, %v5265_v42  ;;  %v5250_v25 = vadd.f32 %v5249_v39, %v15966_v45  ;;  %v13167_v45 = vld [vmem:[%s19113_s9 + $0x1a8] sm:$0xff]   ;;  %v13173_v42 = vld [vmem:[%s19113_s9 + $0x1b8] sm:$0xff]  }
 0x35c   : > { %v16034_v33 = vsel %vm14875_vm8, %v5350_v19, 0  ;;  %v5326_v34 = vshrl.u32 %v5275_v58, 16  ;;  %v5329_v50 = vshll.u32 %v5275_v58, 16  ;;  %v5276_v7 = vpack.c.bf16 %v5268_v52, %v5268_v52 }
 0x35d   : > { %v5310_v3 = vshrl.u32 %v5273_v47, 16  ;;  %v5313_v49 = vshll.u32 %v5273_v47, 16  ;;  %v5266_v30 = vmax.f32 %v5250_v25, 0.0  ;;  %12229 = vmatpush3.bf16.msra.mxu0 %v13161_v35  ;;  %v16037_v22 = vshrl.u32 %v16018_v28, 16 }
 0x35e   : > { %v5328_v32 = vrot.slane %v5326_v34, 6  ;;  %v5331_v51 = vrot.slane %v5329_v50, 7  ;;  %v5334_v46 = vshrl.u32 %v5276_v7, 16  ;;  %v5337_v26 = vshll.u32 %v5276_v7, 16  ;;  %12230 = vmatprep.subr.bf16.mxu0 %v13164_v4  ;;  %v13168_v34 = vld [vmem:[%s19113_s9 + $0x80] sm:$0xff]  }
 0x35f   : > { %v5312_v60 = vrot.slane %v5310_v3, 6  ;;  %v5315_v5 = vrot.slane %v5313_v49, 7  ;;  %v5274_v48 = vpack.c.bf16 %v5266_v30, %v5266_v30  ;;  %v16043_v36 = vshll.u32 %v16018_v28, 16  ;;  %v13169_v3 = vld [vmem:[%s19113_s9 + $0xc8] sm:$0xff]  }
 0x360   : > { %v5332_v27 = vor.u32 %v5331_v51, %v5328_v32  ;;  %v5336_v14 = vrot.slane %v5334_v46, 6  ;;  %v5339_v43 = vrot.slane %v5337_v26, 7  ;;  %4476 = vmatmul.mubr.bf16.gmra.mrb[56].mxu0 %v15977_v41  ;;  %v16047_v2 = vshrl.u32 %v16034_v33, 16 }
 0x361   : > { %v5316_v40 = vor.u32 %v5315_v5, %v5312_v60  ;;  %v5318_v53 = vshrl.u32 %v5274_v48, 16  ;;  %v5321_v13 = vshll.u32 %v5274_v48, 16  ;;  %12231 = vmatpush3.bf16.msra.mxu0 %v13164_v4  ;;  %v5370_v16 = vrot.slane %v16043_v36, 1  ;;  %4485 = vmatprep.mubr.bf16.mxu0 %v19185_v63 }
 0x362   : > { %v5355_v55 = vsel %vm14867_vm7, 0, %v5332_v27  ;;  %v5340_v56 = vor.u32 %v5339_v43, %v5336_v14  ;;  %v16054_v44 = vshll.u32 %v16034_v33, 16  ;;  %v11212_v41 = vcombine.low %v16018_v28, %v16034_v33  ;;  %12232 = vmatprep.subr.bf16.mxu0 %v13167_v45  ;;  %v13171_v43 = vld [vmem:[%s19113_s9 + $0x88] sm:$0xff]  }
 0x363   : > { %v16063_v61 = vsel %vm14875_vm8, %v5355_v55, 0  ;;  %v5353_v0 = vsel %vm14867_vm7, 0, %v5316_v40  ;;  %v5320_v23 = vrot.slane %v5318_v53, 6  ;;  %v5323_v9 = vrot.slane %v5321_v13, 7 }
 0x364   : > { %v16069_v39 = vsel %vm14875_vm8, %v5353_v0, 0  ;;  %v5356_v35 = vsel %vm14867_vm7, 0, %v5340_v56  ;;  %v5371_v18 = vor.u32 %v5370_v16, %v16037_v22  ;;  %v5377_v29 = vrot.slane %v16054_v44, 1  ;;  %v13172_v16 = vld [vmem:[%s19113_s9 + $0xd0] sm:$0xff]  }
 0x365   : > { %v16077_v12 = vsel %vm14875_vm8, %v5356_v35, 0  ;;  %v5324_v15 = vor.u32 %v5323_v9, %v5320_v23  ;;  %v16080_v11 = vshrl.u32 %v16011_v17, 16  ;;  %v16083_v38 = vshll.u32 %v16011_v17, 16  ;;  %12233 = vmatpush3.bf16.msra.mxu0 %v13167_v45 }
 0x366   : > { %v5378_v59 = vor.u32 %v5377_v29, %v16047_v2  ;;  %v16087_v8 = vshrl.u32 %v16027_v21, 16  ;;  %v16090_v24 = vshll.u32 %v16027_v21, 16  ;;  %12234 = vmatprep.subr.bf16.mxu0 %v13170_v20  ;;  %v5493_v31 = vrot.slane %v16018_v28, 3 }
 0x367   : > { %v5354_v62 = vsel %vm14867_vm7, 0, %v5324_v15  ;;  %v5384_v58 = vrot.slane %v16083_v38, 1  ;;  %v5494_v52 = vrot.slane %v16034_v33, 3  ;;  %v11219_v4 = vcombine.low %v16011_v17, %v16027_v21 }
 0x368   : > { %v16104_v19 = vsel %vm14875_vm8, %v5354_v62, 0  ;;  %v11213_v47 = vcombine.low %v5371_v18, %v5378_v59  ;;  %v5391_v25 = vrot.slane %v16090_v24, 1  ;;  %4486 = vmatmul.mubr.bf16.gmra.mrb[60].mxu0 %v15291_v54  ;;  %v16112_v50 = vshrl.u32 %v16069_v39, 16 }
 0x369   : > { %v5385_v7 = vor.u32 %v5384_v58, %v16080_v11  ;;  %12235 = vmatpush3.bf16.msra.mxu0 %v13170_v20  ;;  %v11218_v49 = vcombine.low %v5493_v31, %v5494_v52  ;;  %v16119_v30 = vshll.u32 %v16069_v39, 16  ;;  %v16122_v32 = vshrl.u32 %v16104_v19, 16 }
 0x36a   : > { %6100 = vmatprep.mubr.bf16.mxu1 %v11213_v47  ;;  %v5392_v51 = vor.u32 %v5391_v25, %v16087_v8  ;;  %12236 = vmatprep.subr.bf16.mxu0 %v13173_v42  ;;  %v16126_v46 = vshll.u32 %v16104_v19, 16  ;;  %v5495_v26 = vrot.slane %v16011_v17, 3  ;;  %v5496_v45 = vrot.slane %v16027_v21, 3  ;;  %v13175_v47 = vld [vmem:[%s19113_s9 + $0xd8] sm:$0xff]  }
 0x36b   : > { %6101 = vmatmul.mubr.bf16.vlgmr.msra.gmra.mrb[96].mxu1 %v11212_v41  ;;  %12238 = vmatprep.mubr.bf16.mxu0 %v11218_v49  ;;  %v5398_v60 = vrot.slane %v16119_v30, 1  ;;  %v5497_v5 = vrot.slane %v16069_v39, 3  ;;  %v5498_v48 = vrot.slane %v16104_v19, 3  ;;  %v11226_v27 = vcombine.low %v16069_v39, %v16104_v19 }
 0x36c   : > { %v11220_v14 = vcombine.low %v5385_v7, %v5392_v51  ;;  %11951 = vmatpush3.bf16.msra.mxu1 %v13168_v34  ;;  %v5405_v40 = vrot.slane %v16126_v46, 1  ;;  %v11225_v53 = vcombine.low %v5495_v26, %v5496_v45  ;;  %v16140_v13 = vshrl.u32 %v16063_v61, 16 }
 0x36d   : > { %11952 = vmatprep.subr.bf16.mxu1 %v13169_v3  ;;  %v5399_v55 = vor.u32 %v5398_v60, %v16112_v50  ;;  %12237 = vmatpush3.bf16.msra.mxu0 %v13173_v42  ;;  %v11232_v56 = vcombine.low %v5497_v5, %v5498_v48  ;;  %v16147_v41 = vshll.u32 %v16063_v61, 16  ;;  %v16150_v20 = vshrl.u32 %v16077_v12, 16  ;;  %v13174_v42 = vld [vmem:[%s19113_s9 + $0x90] sm:$0xff]  }
 0x36e   : > { %6108 = vmatprep.mubr.bf16.mxu1 %v11220_v14  ;;  %v5406_v0 = vor.u32 %v5405_v40, %v16122_v32  ;;  %v16154_v23 = vshll.u32 %v16077_v12, 16  ;;  %v5499_v9 = vrot.slane %v16063_v61, 3  ;;  %v5500_v35 = vrot.slane %v16077_v12, 3 }
 0x36f   : > { %v5412_v18 = vrot.slane %v16147_v41, 1  ;;  %v11233_v29 = vcombine.low %v16063_v61, %v16077_v12  ;;  %v5437_v15 = vrot.slane %v16037_v22, 1  ;;  %v5438_v59 = vrot.slane %v16043_v36, 2 }
 0x370   : > { %11953 = vmatpush3.bf16.msra.mxu1 %v13171_v43  ;;  %v11227_v31 = vcombine.low %v5399_v55, %v5406_v0  ;;  %12239 = vmatmul.mubr.bf16.vlgmr.msra.gmra.mrb[64].mxu0 %v11225_v53  ;;  %v5419_v62 = vrot.slane %v16154_v23, 1  ;;  %v11239_v58 = vcombine.low %v5499_v9, %v5500_v35  ;;  %v5440_v52 = vrot.slane %v16047_v2, 1  ;;  %v13176_v43 = vld [vmem:[%s19113_s9 + $0x98] sm:$0xff]   ;;  %v13177_v55 = vld [vmem:[%s19113_s9 + $0xe0] sm:$0xff]  }
 0x371   : > { %11954 = vmatprep.subr.bf16.mxu1 %v13172_v16  ;;  %12242 = vmatprep.mubr.bf16.mxu0 %v11232_v56  ;;  %v5413_v25 = vor.u32 %v5412_v18, %v16140_v13  ;;  %v16172_v34 = vor.u32 %v5438_v59, %v5437_v15  ;;  %v5441_v7 = vrot.slane %v16054_v44, 2  ;;  %v5429_v3 = vrot.slane %v16018_v28, 1 }
 0x372   : > { %v5420_v49 = vor.u32 %v5419_v62, %v16150_v20  ;;  %v5430_v51 = vrot.slane %v16034_v33, 1  ;;  %v5443_v26 = vrot.slane %v16080_v11, 1  ;;  %v5444_v45 = vrot.slane %v16083_v38, 2 }
 0x373   : > { %6109 = vmatmul.mubr.bf16.gmra.mrb[100].mxu1 %v11219_v4  ;;  %v16183_v60 = vor.u32 %v5441_v7, %v5440_v52  ;;  %v5446_v5 = vrot.slane %v16087_v8, 1  ;;  %v5447_v48 = vrot.slane %v16090_v24, 2  ;;  %v5431_v14 = vrot.slane %v16011_v17, 1 }
 0x374   : > { %6116 = vmatprep.mubr.bf16.mxu1 %v11227_v31  ;;  %11955 = vmatpush3.bf16.msra.mxu1 %v13174_v42  ;;  %v11234_v40 = vcombine.low %v5413_v25, %v5420_v49  ;;  %v16191_v53 = vcombine.low %v5429_v3, %v5430_v51  ;;  %v16193_v16 = vor.u32 %v5444_v45, %v5443_v26  ;;  %v5432_v4 = vrot.slane %v16027_v21, 1  ;;  %v13178_v25 = vld [vmem:[%s19113_s9 + $0xa0] sm:$0xff]   ;;  %v13179_v26 = vld [vmem:[%s19113_s9 + $0xe8] sm:$0xff]  }
 0x375   : > { %11956 = vmatprep.subr.bf16.mxu1 %v13175_v47  ;;  %v11215_v56 = vcombine.low %v16172_v34, %v16183_v60  ;;  %v16201_v0 = vor.u32 %v5447_v48, %v5446_v5  ;;  %v5449_v9 = vrot.slane %v16112_v50, 1  ;;  %v5450_v35 = vrot.slane %v16119_v30, 2  ;;  %v13187_v34 = vld [vmem:[%s19113_s9 + $0x148] sm:$0xff]  }
 0x376   : > { %v16205_v18 = vcombine.low %v5431_v14, %v5432_v4  ;;  %v5452_v15 = vrot.slane %v16122_v32, 1  ;;  %v5453_v59 = vrot.slane %v16126_v46, 2  ;;  %v5433_v31 = vrot.slane %v16069_v39, 1  ;;  %v13188_v60 = vld [vmem:[%s19113_s9 + $0x108] sm:$0xff]  }
 0x377   : > { %v11222_v42 = vcombine.low %v16193_v16, %v16201_v0  ;;  %v16212_v62 = vor.u32 %v5450_v35, %v5449_v9  ;;  %v5434_v52 = vrot.slane %v16104_v19, 1  ;;  %v5455_v47 = vrot.slane %v16140_v13, 1  ;;  %v13192_v16 = vld [vmem:[%s19113_s9 + $0x118] sm:$0xff]   ;;  %v13193_v0 = vld [vmem:[%s19113_s9 + $0x160] sm:$0xff]  }
 0x378   : > { %11957 = vmatpush3.bf16.msra.mxu1 %v13176_v43  ;;  %12243 = vmatmul.mubr.bf16.gmra.mrb[68].mxu0 %v11239_v58  ;;  %v16219_v7 = vor.u32 %v5453_v59, %v5452_v15  ;;  %v5456_v3 = vrot.slane %v16147_v41, 2  ;;  %v5458_v49 = vrot.slane %v16150_v20, 1  ;;  %v5459_v51 = vrot.slane %v16154_v23, 2  ;;  %v13180_v59 = vld [vmem:[%s19113_s9 + $0xa8] sm:$0xff]  }
 0x379   : > { %11958 = vmatprep.subr.bf16.mxu1 %v13177_v55  ;;  %v16227_v45 = vcombine.low %v5433_v31, %v5434_v52  ;;  %v5435_v5 = vrot.slane %v16063_v61, 1  ;;  %v5436_v48 = vrot.slane %v16077_v12, 1  ;;  %v5469_v58 = vrot.slane %v16037_v22, 2 }
 0x37a   : > { %v11229_v14 = vcombine.low %v16212_v62, %v16219_v7  ;;  %v16234_v43 = vor.u32 %v5456_v3, %v5455_v47  ;;  %v16236_v4 = vor.u32 %v5459_v51, %v5458_v49  ;;  %v5470_v55 = vrot.slane %v16043_v36, 3  ;;  %v13196_v62 = vld [vmem:[%s19113_s9 + $0x128] sm:$0xff]   ;;  %v13197_v7 = vld [vmem:[%s19113_s9 + $0x170] sm:$0xff]  }
 0x37b   : > { %6117 = vmatmul.mubr.bf16.gmra.mrb[104].mxu1 %v11226_v27  ;;  %v16242_v9 = vcombine.low %v5435_v5, %v5436_v48  ;;  %v5472_v35 = vrot.slane %v16047_v2, 2  ;;  %v5473_v15 = vrot.slane %v16054_v44, 3  ;;  %v5461_v22 = vrot.slane %v16018_v28, 2  ;;  %v13181_v28 = vld [vmem:[%s19113_s9 + $0xf0] sm:$0xff]   ;;  %v13183_v5 = vld [vmem:[%s19113_s9 + $0xf8] sm:$0xff]  }
 0x37c   : > { %6124 = vmatprep.mubr.bf16.mxu1 %v11234_v40  ;;  %11959 = vmatpush3.bf16.msra.mxu1 %v13178_v25  ;;  %v11236_v36 = vcombine.low %v16234_v43, %v16236_v4  ;;  %v16252_v31 = vor.u32 %v5470_v55, %v5469_v58  ;;  %v5462_v27 = vrot.slane %v16034_v33, 2  ;;  %v5475_v52 = vrot.slane %v16080_v11, 2  ;;  %v13200_v43 = vld [vmem:[%s19113_s9 + $0x138] sm:$0xff]   ;;  %v13201_v4 = vld [vmem:[%s19115_s11 + $0x40] sm:$0xff]  }
 0x37d   : > { %11960 = vmatprep.subr.bf16.mxu1 %v13179_v26  ;;  %v16259_v2 = vor.u32 %v5473_v15, %v5472_v35  ;;  %v5476_v44 = vrot.slane %v16083_v38, 3  ;;  %v5478_v40 = vrot.slane %v16087_v8, 2  ;;  %v5479_v47 = vrot.slane %v16090_v24, 3  ;;  %v13182_v8 = vld [vmem:[%s19113_s9 + $0xb0] sm:$0xff]  }
 0x37e   : > { %v16264_v25 = vcombine.low %v5461_v22, %v5462_v27  ;;  %v5463_v3 = vrot.slane %v16011_v17, 2  ;;  %v5464_v33 = vrot.slane %v16027_v21, 2  ;;  %v5481_v11 = vrot.slane %v16112_v50, 2  ;;  %v13190_v27 = vld [vmem:[%s19113_s9 + $0x110] sm:$0xff]  }
 0x37f   : > { %v11217_v49 = vcombine.low %v16252_v31, %v16259_v2  ;;  %v16271_v51 = vor.u32 %v5476_v44, %v5475_v52  ;;  %v16273_v26 = vor.u32 %v5479_v47, %v5478_v40  ;;  %v5482_v38 = vrot.slane %v16119_v30, 3  ;;  %v13204_v31 = vld [vmem:[%s19115_s11 + $0x8] sm:$0xff]   ;;  %v13205_v52 = vld [vmem:[%s19115_s11 + $0xc0] sm:$0xff]   ;;  %v13208_v44 = vld [vmem:[%s19115_s11 + $0x10] sm:$0xff]  }
 0x380   : > { %11961 = vmatpush3.bf16.msra.mxu1 %v13180_v59  ;;  %v16279_v24 = vcombine.low %v5463_v3, %v5464_v33  ;;  %v5484_v17 = vrot.slane %v16122_v32, 2  ;;  %v5485_v21 = vrot.slane %v16126_v46, 3  ;;  %v5465_v50 = vrot.slane %v16069_v39, 2  ;;  %v13207_v2 = vld [vmem:[%s19115_s11 + $0x80] sm:$0xff]   ;;  %12082 = vmatprep.subr.bf16.mxu0 %v13205_v52  ;;  %v13209_v40 = vld [vmem:[%s19115_s11 + $0xc8] sm:$0xff]   ;;  %v13210_v47 = vld [vmem:[%s19115_s11 + $0x58] sm:$0xff]  }
 0x381   : > { %11962 = vmatprep.subr.bf16.mxu1 %v13181_v28  ;;  %v11224_v30 = vcombine.low %v16271_v51, %v16273_v26  ;;  %v16289_v48 = vor.u32 %v5482_v38, %v5481_v11  ;;  %v5466_v58 = vrot.slane %v16104_v19, 2  ;;  %v5487_v55 = vrot.slane %v16140_v13, 2  ;;  %v13184_v19 = vld [vmem:[%s19113_s9 + $0xb8] sm:$0xff]   ;;  %v13206_v28 = vld [vmem:[%s19115_s11 + $0x50] sm:$0xff]   ;;  %12083 = vmatpush3.bf16.msra.mxu0 %v13207_v2  ;;  %v13214_v11 = vld [vmem:[%s19115_s11 + $0x60] sm:$0xff]  }
 0x382   : > { %v5486_v35 = vor.u32 %v5485_v21, %v5484_v17  ;;  %v5488_v32 = vrot.slane %v16147_v41, 3  ;;  %v5490_v46 = vrot.slane %v16150_v20, 2  ;;  %v5491_v39 = vrot.slane %v16154_v23, 3  ;;  %12084 = vmatprep.subr.bf16.mxu0 %v13209_v40  ;;  %v13212_v3 = vld [vmem:[%s19115_s11 + $0x18] sm:$0xff]   ;;  %v13213_v33 = vld [vmem:[%s19115_s11 + $0xd0] sm:$0xff]   ;;  %v13216_v51 = vld [vmem:[%s19115_s11 + $0x20] sm:$0xff]  }
 0x383   : > { %6125 = vmatmul.mubr.bf16.gmra.mrb[108].mxu1 %v11233_v29  ;;  %v11230_v15 = vcombine.low %v5465_v50, %v5466_v58  ;;  %v5467_v22 = vrot.slane %v16063_v61, 2  ;;  %v5468_v59 = vrot.slane %v16077_v12, 2  ;;  %v13185_v61 = vld [vmem:[%s19113_s9 + $0x140] sm:$0xff]   ;;  %v13217_v26 = vld [vmem:[%s19115_s11 + $0xd8] sm:$0xff]   ;;  %v13218_v38 = vld [vmem:[%s19115_s11 + $0x68] sm:$0xff]  }
 0x384   : > { %11963 = vmatpush3.bf16.msra.mxu1 %v13182_v8  ;;  %6165 = vmatprep.mubr.bf16.mxu1 %v11215_v56  ;;  %v11231_v13 = vcombine.low %v16289_v48, %v5486_v35  ;;  %v5489_v41 = vor.u32 %v5488_v32, %v5487_v55  ;;  %v5492_v20 = vor.u32 %v5491_v39, %v5490_v46  ;;  %v13186_v29 = vld [vmem:[%s19113_s9 + $0x100] sm:$0xff]   ;;  %v13189_v56 = vld [vmem:[%s19113_s9 + $0x150] sm:$0xff]   ;;  %v13219_v8 = vld [vmem:[%s19115_s11 + $0x98] sm:$0xff]  }
 0x385   : > { %11964 = vmatprep.subr.bf16.mxu1 %v13183_v5  ;;  %v11237_v23 = vcombine.low %v5467_v22, %v5468_v59  ;;  %v13221_v17 = vld [vmem:[%s19115_s11 + $0xe0] sm:$0xff]   ;;  %v13222_v21 = vld [vmem:[%s19115_s11 + $0x70] sm:$0xff]   ;;  %v13226_v48 = vld [vmem:[%s19115_s11 + $0x78] sm:$0xff]  }
 0x386   : > { %v11238_v12 = vcombine.low %v5489_v41, %v5492_v20  ;;  %v13223_v50 = vld [vmem:[%s19115_s11 + $0xa0] sm:$0xff]   ;;  %v13224_v5 = vld [vmem:[%s19115_s11 + $0x30] sm:$0xff]   ;;  %v13227_v58 = vld [vmem:[%s19115_s11 + $0xa8] sm:$0xff]  }
 0x387   : > { %v13228_v55 = vld [vmem:[%s19115_s11 + $0x38] sm:$0xff]   ;;  %v13229_v35 = vld [vmem:[%s19115_s11 + $0xf0] sm:$0xff]   ;;  %v13231_v32 = vld [vmem:[%s19115_s11 + $0x140] sm:$0xff]  }
 0x388   : > { %11965 = vmatpush3.bf16.msra.mxu1 %v13184_v19  ;;  %v13230_v46 = vld [vmem:[%s19115_s11 + $0xb0] sm:$0xff]   ;;  %v13232_v39 = vld [vmem:[%s19115_s11 + $0x100] sm:$0xff]   ;;  %v13234_v22 = vld [vmem:[%s19115_s11 + $0xb8] sm:$0xff]  }
 0x389   : > { %11990 = vmatprep.subr.bf16.mxu1 %v13185_v61  ;;  %v13235_v59 = vld [vmem:[%s19115_s11 + $0x148] sm:$0xff]   ;;  %v13238_v41 = vld [vmem:[%s19115_s11 + $0x150] sm:$0xff]   ;;  %v13241_v61 = vld [vmem:[%s19115_s11 + $0x158] sm:$0xff]  }
 0x38a   : > { %v13236_v19 = vld [vmem:[%s19115_s11 + $0x108] sm:$0xff]   ;;  %v13239_v20 = vld [vmem:[%s19115_s11 + $0x110] sm:$0xff]   ;;  %v13254_v52 = vld [vmem:[%s19115_s11 + $0x138] sm:$0xff]  }
 0x38b   : > { %6166 = vmatmul.mubr.bf16.vlgmr.msra.gmra.mrb[112].mxu1 %v16191_v53  ;;  %v13191_v53 = vld [vmem:[%s19113_s9 + $0x158] sm:$0xff]  }
 0x38c   : > { %6173 = vmatprep.mubr.bf16.mxu1 %v11222_v42  ;;  %11991 = vmatpush3.bf16.msra.mxu1 %v13186_v29  ;;  %v13194_v42 = vld [vmem:[%s19113_s9 + $0x120] sm:$0xff]  }
 0x38d   : > { %11992 = vmatprep.subr.bf16.mxu1 %v13187_v34  ;;  %v13245_v29 = vld [vmem:[%s19115_s11 + $0x120] sm:$0xff]  }
 0x38e   : > { %v3612_v34 = vld [vmem:[%s19110_s6] sm:$0x3] }
 0x390   : > { %11993 = vmatpush3.bf16.msra.mxu1 %v13188_v60  ;;  %v19369_v60 = vld [vmem:[#allocation57_spill] sm:$0xff] }
 0x391   : > { %11994 = vmatprep.subr.bf16.mxu1 %v13189_v56  ;;  %v16512_v56 = vrot.slane %v3612_v34, %v19369_v60 }
 0x393   : > { %6174 = vmatmul.mubr.bf16.gmra.mrb[116].mxu1 %v16205_v18  ;;  %v13195_v18 = vld [vmem:[%s19113_s9 + $0x168] sm:$0xff]  }
 0x394   : > { %6181 = vmatprep.mubr.bf16.mxu1 %v11229_v14  ;;  %11995 = vmatpush3.bf16.msra.mxu1 %v13190_v27  ;;  %v13198_v14 = vld [vmem:[%s19113_s9 + $0x130] sm:$0xff]   ;;  %v13247_v27 = vld [vmem:[%s19115_s11 + $0x168] sm:$0xff]  }
 0x395   : > { %11996 = vmatprep.subr.bf16.mxu1 %v13191_v53  ;;  %v13248_v53 = vld [vmem:[%s19115_s11 + $0x128] sm:$0xff]  }
 0x398   : > { %11997 = vmatpush3.bf16.msra.mxu1 %v13192_v16  ;;  %v13250_v16 = vld [vmem:[%s19115_s11 + $0x170] sm:$0xff]  }
 0x399   : > { %11998 = vmatprep.subr.bf16.mxu1 %v13193_v0  ;;  %v19370_v0 = vld [vmem:[#allocation58_spill] sm:$0xff] }
 0x39b   : > { %6182 = vmatmul.mubr.bf16.gmra.mrb[120].mxu1 %v16227_v45  ;;  %v13199_v45 = vld [vmem:[%s19113_s9 + $0x178] sm:$0xff]  }
 0x39c   : > { %6189 = vmatprep.mubr.bf16.mxu1 %v11236_v36  ;;  %11999 = vmatpush3.bf16.msra.mxu1 %v13194_v42  ;;  %v13203_v36 = vld [vmem:[%s19115_s11 + $0x48] sm:$0xff]   ;;  %v16524_v42 = vrot.slane %v3612_v34, %v19370_v0 }
 0x39d   : > { %12000 = vmatprep.subr.bf16.mxu1 %v13195_v18 }
 0x3a0   : > { %12001 = vmatpush3.bf16.msra.mxu1 %v13196_v62  ;;  %v13251_v62 = vld [vmem:[%s19115_s11 + $0x130] sm:$0xff]  }
 0x3a1   : > { %12002 = vmatprep.subr.bf16.mxu1 %v13197_v7 }
 0x3a3   : > { %6190 = vmatmul.mubr.bf16.gmra.mrb[124].mxu1 %v16242_v9  ;;  %v13202_v9 = vld [vmem:[%s19115_s11] sm:$0xff]  }
 0x3a4   : > { %12003 = vmatpush3.bf16.msra.mxu1 %v13198_v14  ;;  %6230 = vmatprep.mubr.bf16.mxu1 %v11217_v49  ;;  %v13215_v49 = vld [vmem:[%s19115_s11 + $0x90] sm:$0xff]  }
 0x3a5   : > { %12004 = vmatprep.subr.bf16.mxu1 %v13199_v45  ;;  %v13253_v45 = vld [vmem:[%s19115_s11 + $0x178] sm:$0xff]  }
 0x3a8   : > { %12005 = vmatpush3.bf16.msra.mxu1 %v13200_v43 }
 0x3a9   : > { %12042 = vmatprep.subr.bf16.mxu1 %v13201_v4 }
 0x3ab   : > { %6231 = vmatmul.mubr.bf16.vlgmr.msra.gmra.mrb[128].mxu1 %v16264_v25  ;;  %v13211_v25 = vld [vmem:[%s19115_s11 + $0x88] sm:$0xff]  }
 0x3ac   : > { %6238 = vmatprep.mubr.bf16.mxu1 %v11224_v30  ;;  %12043 = vmatpush3.bf16.msra.mxu1 %v13202_v9  ;;  %v13225_v30 = vld [vmem:[%s19115_s11 + $0xe8] sm:$0xff]  }
 0x3ad   : > { %12044 = vmatprep.subr.bf16.mxu1 %v13203_v36  ;;  %12085 = vmatpush3.bf16.msra.mxu0 %v13211_v25 }
 0x3ae   : > { %12086 = vmatprep.subr.bf16.mxu0 %v13213_v33 }
 0x3b0   : > { %12045 = vmatpush3.bf16.msra.mxu1 %v13204_v31 }
 0x3b1   : > { %12046 = vmatprep.subr.bf16.mxu1 %v13206_v28  ;;  %12087 = vmatpush3.bf16.msra.mxu0 %v13215_v49 }
 0x3b2   : > { %12088 = vmatprep.subr.bf16.mxu0 %v13217_v26 }
 0x3b3   : > { %6239 = vmatmul.mubr.bf16.gmra.mrb[132].mxu1 %v16279_v24  ;;  %v13220_v24 = vld [vmem:[%s19115_s11 + $0x28] sm:$0xff]  }
 0x3b4   : > { %6246 = vmatprep.mubr.bf16.mxu1 %v11231_v13  ;;  %12047 = vmatpush3.bf16.msra.mxu1 %v13208_v44  ;;  %v16487_v13 = vld [vmem:[%s19115_s11 + $0x180] sm:$0xff]  }
 0x3b5   : > { %12048 = vmatprep.subr.bf16.mxu1 %v13210_v47  ;;  %12089 = vmatpush3.bf16.msra.mxu0 %v13219_v8 }
 0x3b6   : > { %12090 = vmatprep.subr.bf16.mxu0 %v13221_v17 }
 0x3b8   : > { %12049 = vmatpush3.bf16.msra.mxu1 %v13212_v3 }
 0x3b9   : > { %12050 = vmatprep.subr.bf16.mxu1 %v13214_v11  ;;  %12091 = vmatpush3.bf16.msra.mxu0 %v13223_v50 }
 0x3ba   : > { %12092 = vmatprep.subr.bf16.mxu0 %v13225_v30 }
 0x3bb   : > { %6247 = vmatmul.mubr.bf16.gmra.mrb[136].mxu1 %v11230_v15  ;;  %v13233_v15 = vld [vmem:[%s19115_s11 + $0xf8] sm:$0xff]  }
 0x3bc   : > { %6254 = vmatprep.mubr.bf16.mxu1 %v11238_v12  ;;  %12051 = vmatpush3.bf16.msra.mxu1 %v13216_v51  ;;  %v13244_v12 = vld [vmem:[%s19115_s11 + $0x160] sm:$0xff]  }
 0x3bd   : > { %12052 = vmatprep.subr.bf16.mxu1 %v13218_v38  ;;  %12093 = vmatpush3.bf16.msra.mxu0 %v13227_v58 }
 0x3be   : > { %12094 = vmatprep.subr.bf16.mxu0 %v13229_v35 }
 0x3c0   : > { %12053 = vmatpush3.bf16.msra.mxu1 %v13220_v24 }
 0x3c1   : > { %12054 = vmatprep.subr.bf16.mxu1 %v13222_v21  ;;  %12095 = vmatpush3.bf16.msra.mxu0 %v13230_v46 }
 0x3c2   : > { %12096 = vmatprep.subr.bf16.mxu0 %v13233_v15 }
 0x3c3   : > { %6255 = vmatmul.mubr.bf16.gmra.mrb[140].mxu1 %v11237_v23  ;;  %v13242_v23 = vld [vmem:[%s19115_s11 + $0x118] sm:$0xff]  }
 0x3c4   : > { %6865 = vmatprep.mubr.bf16.mxu1 %v15291_v54  ;;  %12055 = vmatpush3.bf16.msra.mxu1 %v13224_v5 }
 0x3c5   : > { %12056 = vmatprep.subr.bf16.mxu1 %v13226_v48  ;;  %12097 = vmatpush3.bf16.msra.mxu0 %v13234_v22 }
 0x3c6   : > { %12246 = vmatprep.subr.bf16.mxu0 %v16487_v13 }
 0x3c8   : > { %12057 = vmatpush3.bf16.msra.mxu1 %v13228_v55 }
 0x3c9   : > { %12122 = vmatprep.subr.bf16.mxu1 %v13231_v32 }
 0x3cb   : > { %6866 = vmatmul.mubr.bf16.vlgmr.msra.gmra.mrb[144].mxu1 %v15291_v54  ;;  %v19393_v54 = vld [vmem:[#allocation30_spill] sm:$0xff] }
 0x3cc   : > { %12123 = vmatpush3.bf16.msra.mxu1 %v13232_v39 }
 0x3cd   : > { %12124 = vmatprep.subr.bf16.mxu1 %v13235_v59 }
 0x3d0   : > { %12125 = vmatpush3.bf16.msra.mxu1 %v13236_v19 }
 0x3d1   : > { %12126 = vmatprep.subr.bf16.mxu1 %v13238_v41 }
 0x3d4   : > { %12127 = vmatpush3.bf16.msra.mxu1 %v13239_v20 }
 0x3d5   : > { %12128 = vmatprep.subr.bf16.mxu1 %v13241_v61 }
 0x3d8   : > { %12129 = vmatpush3.bf16.msra.mxu1 %v13242_v23 }
 0x3d9   : > { %12130 = vmatprep.subr.bf16.mxu1 %v13244_v12 }
 0x3dc   : > { %12131 = vmatpush3.bf16.msra.mxu1 %v13245_v29 }
 0x3dd   : > { %12132 = vmatprep.subr.bf16.mxu1 %v13247_v27 }
 0x3e0   : > { %12133 = vmatpush3.bf16.msra.mxu1 %v13248_v53 }
 0x3e1   : > { %12134 = vmatprep.subr.bf16.mxu1 %v13250_v16 }
 0x3e4   : > { %12135 = vmatpush3.bf16.msra.mxu1 %v13251_v62 }
 0x3e5   : > { %12136 = vmatprep.subr.bf16.mxu1 %v13253_v45 }
 0x3e8   : > { %12137 = vmatpush3.bf16.msra.mxu1 %v13254_v52 }
 0x423   : > { %v4457_v18 = vpop.f32.mrb[48].mxu0 }
 0x424   : > { %v12302_v7 = vadd.f32 %v4457_v18, %v16512_v56  ;;  %v4459_v14 = vpop.f32.mrb[49].mxu0 }
 0x425   : > { %v4461_v43 = vpop.f32.mrb[50].mxu0  ;;  %v12303_v9 = vadd.f32 %v4459_v14, %v16524_v42  ;;  %v19372_v14 = vld [vmem:[#allocation19_spill] sm:$0xff] }
 0x426   : > { %v4496_v4 = vmax.f32 %v12302_v7, 0.0  ;;  %v12304_v36 = vadd.f32 %v4461_v43, %v16512_v56  ;;  %v4463_v31 = vpop.f32.mrb[51].mxu0  ;;  %v19371_v7 = vld [vmem:[#allocation14_spill] sm:$0xff] }
 0x427   : > { %v12305_v2 = vadd.f32 %v4463_v31, %v16524_v42  ;;  %v4497_v44 = vmax.f32 %v12303_v9, 0.0  ;;  %v9202_v45 = vadd.f32 %v19372_v14, %v19371_v7  ;;  %v13568_v7 = vld [vmem:[%s13848_s21 + $0xf0] sm:$0xff] }
 0x428   : > { %v4498_v28 = vmax.f32 %v12304_v36, 0.0  ;;  %10448 = vrot.lane.b32.xlu0 %v4496_v4, %s13664_s27  ;;  %v13563_v4 = vld [vmem:[%s13848_s21 + $0x68] sm:$0xff] }
 0x429   : > { %v4499_v47 = vmax.f32 %v12305_v2, 0.0  ;;  %v8500_v9 = vrot.slane %v13563_v4, 7 }
 0x42a   : > { %10452 = vrot.lane.b32.xlu1 %v4498_v28, %s13664_s27 }
 0x42b   : > { %v4467_v40 = vpop.f32.mrb[52].mxu0 }
 0x42c   : > { %v12306_v25 = vadd.f32 %v4467_v40, %v16512_v56  ;;  %v4469_v3 = vpop.f32.mrb[53].mxu0  ;;  %10450 = vrot.lane.b32.xlu0 %v4497_v44, %s13664_s27  ;;  %v13564_v44 = vld [vmem:[%s13848_s21 + $0x98] sm:$0xff] }
 0x42d   : > { %v12307_v33 = vadd.f32 %v4469_v3, %v16524_v42  ;;  %v4471_v11 = vpop.f32.mrb[54].mxu0  ;;  %v8506_v40 = vrot.slane %v13564_v44, 7 }
 0x42e   : > { %v4500_v49 = vmax.f32 %v12306_v25, 0.0  ;;  %v12308_v51 = vadd.f32 %v4471_v11, %v16512_v56  ;;  %v4473_v26 = vpop.f32.mrb[55].mxu0  ;;  %10454 = vrot.lane.b32.xlu1 %v4499_v47, %s13664_s27  ;;  %v19375_v25 = vld [vmem:[#allocation16_spill] sm:$0xff] }
 0x42f   : > { %v4501_v38 = vmax.f32 %v12307_v33, 0.0  ;;  %v12309_v8 = vadd.f32 %v4473_v26, %v16524_v42  ;;  %v9286_v3 = vadd.f32 %v9202_v45, %v19375_v25  ;;  %v16591_v26 = vsel %vm8584_vm0, 0.0, %v8500_v9 }
 0x430   : > { %10456 = vrot.lane.b32.xlu0 %v4500_v49, %s13664_s27  ;;  %v4502_v24 = vmax.f32 %v12308_v51, 0.0  ;;  %v19376_v49 = vld [vmem:[#allocation18_spill] sm:$0xff]  ;;  %v8517_v45 = vrot.slane %v13568_v7, 7 }
 0x431   : > { %v4503_v21 = vmax.f32 %v12309_v8, 0.0  ;;  %v13571_v7 = vld [vmem:[%s13848_s21 + $0x18] sm:$0xff] }
 0x432   : > { %10458 = vrot.lane.b32.xlu1 %v4501_v38, %s13664_s27  ;;  %v13565_v38 = vld [vmem:[%s13848_s21 + $0xc8] sm:$0xff] }
 0x433   : > { %v4477_v17 = vpop.f32.mrb[56].mxu0  ;;  %v8512_v8 = vrot.slane %v13565_v38, 7 }
 0x434   : > { %v12310_v50 = vadd.f32 %v4477_v17, %v16512_v56  ;;  %v4479_v5 = vpop.f32.mrb[57].mxu0  ;;  %10460 = vrot.lane.b32.xlu0 %v4502_v24, %s13664_s27  ;;  %v13575_v17 = vld [vmem:[%s13848_s21 + $0x78] sm:$0xff] }
 0x435   : > { %v12311_v30 = vadd.f32 %v4479_v5, %v16524_v42  ;;  %v4481_v48 = vpop.f32.mrb[58].mxu0  ;;  %v8502_v0 = vrot.slane %v13575_v17, 7  ;;  %v9203_v17 = vadd.f32 %v19372_v14, %v19393_v54  ;;  %v16755_v54 = vld [vmem:[%s19114_s10] ss:$0 sm:$0xff] }
 0x436   : > { %v4504_v58 = vmax.f32 %v12310_v50, 0.0  ;;  %v12312_v55 = vadd.f32 %v4481_v48, %v16512_v56  ;;  %v4483_v35 = vpop.f32.mrb[59].mxu0  ;;  %10462 = vrot.lane.b32.xlu1 %v4503_v21, %s13664_s27  ;;  %v16596_v21 = vsel %vm8584_vm0, %v8500_v9, 0.0  ;;  %v13566_v50 = vld [vmem:[%s13848_s21 + $0xf8] sm:$0xff] }
 0x437   : > { %v4505_v32 = vmax.f32 %v12311_v30, 0.0  ;;  %v12313_v46 = vadd.f32 %v4483_v35, %v16524_v42  ;;  %v8518_v5 = vrot.slane %v13566_v50, 7  ;;  %v16604_v35 = vsel %vm8584_vm0, 0.0, %v8506_v40 }
 0x438   : > { %10464 = vrot.lane.b32.xlu0 %v4504_v58, %s13664_s27  ;;  %v4506_v39 = vmax.f32 %v12312_v55, 0.0 }
 0x439   : > { %v4507_v22 = vmax.f32 %v12313_v46, 0.0  ;;  %v16646_v25 = vsel %vm8584_vm0, %v8518_v5, 0.0 }
 0x43a   : > { %10466 = vrot.lane.b32.xlu1 %v4505_v32, %s13664_s27  ;;  %v16607_v32 = vsel %vm8584_vm0, %v8506_v40, 0.0  ;;  %v8490_v40 = vrot.slane %v13571_v7, 7  ;;  %v13573_v7 = vld [vmem:[%s13848_s21 + $0x150] sm:$0xff] }
 0x43b   : > { %v4487_v15 = vpop.f32.mrb[60].mxu0 }
 0x43c   : > { %v12314_v59 = vadd.f32 %v4487_v15, %v16512_v56  ;;  %v4489_v19 = vpop.f32.mrb[61].mxu0  ;;  %10468 = vrot.lane.b32.xlu0 %v4506_v39, %s13664_s27  ;;  %v19377_v39 = vld [vmem:[#allocation17_spill] sm:$0xff] }
 0x43d   : > { %v12315_v41 = vadd.f32 %v4489_v19, %v16524_v42  ;;  %v4491_v20 = vpop.f32.mrb[62].mxu0  ;;  %v16610_v15 = vadd.f32 %v9286_v3, %v19377_v39  ;;  %v13572_v3 = vld [vmem:[%s13848_s21 + $0x120] sm:$0xff] }
 0x43e   : > { %v11926_v61 = vpop.f32.mrb[96].mxu1  ;;  %v4508_v23 = vmax.f32 %v12314_v59, 0.0  ;;  %v12316_v12 = vadd.f32 %v4491_v20, %v16512_v56  ;;  %v4493_v29 = vpop.f32.mrb[63].mxu0  ;;  %10470 = vrot.lane.b32.xlu1 %v4507_v22, %s13664_s27  ;;  %v19378_v59 = vld [vmem:[#allocation23_spill] sm:$0xff] }
 0x43f   : > { %v11927_v34 = vpop.f32.mrb[97].mxu1  ;;  %v4509_v27 = vmax.f32 %v12315_v41, 0.0  ;;  %v12317_v18 = vadd.f32 %v4493_v29, %v16524_v42  ;;  %v19373_v42 = vld [vmem:[#allocation12_spill] sm:$0xff]  ;;  %v19379_v19 = vrot.slane %v19378_v59, 7  ;;  %v13567_v29 = vld [vmem:[%s13848_s21 + $0xc0] sm:$0xff]  ;;  %v16661_v59 = vsel %vm8584_vm0, 0.0, %v8517_v45 }
 0x440   : > { %v16562_v53 = vadd.f32 %v11927_v34, %v11926_v61  ;;  %v11929_v16 = vpop.f32.mrb[98].mxu1  ;;  %10472 = vrot.lane.b32.xlu0 %v4508_v23, %s13664_s27  ;;  %v4510_v56 = vmax.f32 %v12316_v12, 0.0  ;;  %v19374_v28 = vrot.slane %v19373_v42, 7  ;;  %v16622_v23 = vsel %vm8584_vm0, 0.0, %v8512_v8 }
 0x441   : > { %v11930_v62 = vpop.f32.mrb[99].mxu1  ;;  %v4511_v31 = vmax.f32 %v12317_v18, 0.0  ;;  %v16616_v41 = vsel %vm8584_vm0, %v19379_v19, 0.0  ;;  %v16625_v12 = vsel %vm8584_vm0, %v8512_v8, 0.0  ;;  %v8511_v34 = vrot.slane %v13567_v29, 7  ;;  %v13570_v19 = vld [vmem:[%s13848_s21 + $0x158] sm:$0xff] }
 0x442   : > { %v16568_v43 = vadd.f32 %v11930_v62, %v11929_v16  ;;  %10474 = vrot.lane.b32.xlu1 %v4509_v27, %s13664_s27  ;;  %v16580_v2 = vsel %vm8584_vm0, %v19374_v28, 0.0  ;;  %v16633_v62 = vsel %vm8584_vm0, 0.0, %v8518_v5  ;;  %v8530_v29 = vrot.slane %v13570_v19, 7 }
 0x443   : > { %v16572_v36 = vpop.f32.mrb[64].mxu0  ;;  %v16654_v50 = vsel %vm8584_vm0, 0.0, %v8511_v34  ;;  %v16691_v19 = vsel %vm8584_vm0, 0.0, %v8490_v40  ;;  %v8529_v28 = vrot.slane %v13573_v7, 7 }
 0x444   : > { %v16574_v52 = vpop.f32.mrb[65].mxu0  ;;  %10476 = vrot.lane.b32.xlu0 %v4510_v56, %s13664_s27  ;;  %v16688_v16 = vsel %vm8584_vm0, 0.0, %v8530_v29  ;;  %19384 = vst [vmem:[#allocation16_spill] sm:$0xff] %v16691_v19  ;;  %v8782_v7 = vrot.slane %v16691_v19, 1  ;;  %v9204_v37 = vadd.f32 %v19372_v14, %v16691_v19 }
 0x445   : > { %v16583_v47 = vpop.f32.mrb[66].mxu0  ;;  %19383 = vst [vmem:[#allocation12_spill] sm:$0xff] %v16688_v16 }
 0x446   : > { %v11932_v33 = vpop.f32.mrb[100].mxu1  ;;  %v16586_v11 = vpop.f32.mrb[67].mxu0  ;;  %10478 = vrot.lane.b32.xlu1 %v4511_v31, %s13664_s27  ;;  %v19380_v31 = vld [vmem:[#allocation27_spill] sm:$0xff] }
 0x447   : > { %v11933_v24 = vpop.f32.mrb[101].mxu1 }
 0x448   : > { %v16599_v30 = vadd.f32 %v11933_v24, %v11932_v33  ;;  %v11935_v48 = vpop.f32.mrb[102].mxu1 }
 0x449   : > { %v11936_v46 = vpop.f32.mrb[103].mxu1 }
 0x44a   : > { %v16618_v20 = vadd.f32 %v11936_v46, %v11935_v48  ;;  %v16657_v48 = vsel %vm8584_vm0, %v8511_v34, 0.0  ;;  %v13569_v46 = vld [vmem:[%s13848_s21 + $0x128] sm:$0xff]  ;;  %v16670_v34 = vsel %vm8584_vm0, %v8517_v45, 0.0 }
 0x44b   : > { %v16628_v27 = vpop.f32.mrb[68].mxu0  ;;  %v8524_v39 = vrot.slane %v13569_v46, 7  ;;  %19381 = vst [vmem:[#allocation14_spill] sm:$0xff] %v16670_v34  ;;  %v8523_v46 = vrot.slane %v13572_v3, 7  ;;  %v19399_v3 = vld [vmem:[#allocation32_spill] sm:$0xff] }
 0x44c   : > { %v16636_v56 = vpop.f32.mrb[69].mxu0  ;;  %v16770_v10 = vadd.f32 %v9203_v17, %v19399_v3  ;;  %v19402_v17 = vld [vmem:[#allocation36_spill] sm:$0xff] }
 0x44d   : > { %v16642_v44 = vpop.f32.mrb[70].mxu0  ;;  %v16681_v45 = vsel %vm8584_vm0, 0.0, %v8524_v39  ;;  %v16684_v9 = vsel %vm8584_vm0, %v8524_v39, 0.0  ;;  %v13574_v39 = vld [vmem:[%s13848_s21 + $0x48] sm:$0xff]  ;;  %v16710_v55 = vsel %vm8584_vm0, %v8523_v46, 0.0 }
 0x44e   : > { %v11938_v38 = vpop.f32.mrb[104].mxu1  ;;  %v16650_v8 = vpop.f32.mrb[71].mxu0  ;;  %19382 = vst [vmem:[#allocation19_spill] sm:$0xff] %v16681_v45  ;;  %v8496_v18 = vrot.slane %v13574_v39, 7  ;;  %19388 = vst [vmem:[#allocation27_spill] sm:$0xff] %v16710_v55  ;;  %v19425_v55 = vld [vmem:[#allocation26_spill] sm:$0xff] }
 0x44f   : > { %v11939_v5 = vpop.f32.mrb[105].mxu1  ;;  %19400 = vst [vmem:[#allocation32_spill] sm:$0xff] %v16770_v10 }
 0x450   : > { %v16665_v42 = vadd.f32 %v11939_v5, %v11938_v38  ;;  %v11941_v24 = vpop.f32.mrb[106].mxu1  ;;  %v16701_v38 = vsel %vm8584_vm0, 0.0, %v8523_v46  ;;  %v16723_v46 = vsel %vm8584_vm0, %v8529_v28, 0.0  ;;  %v16726_v51 = vsel %vm8584_vm0, 0.0, %v8496_v18 }
 0x451   : > { %v11942_v33 = vpop.f32.mrb[107].mxu1  ;;  %19387 = vst [vmem:[#allocation23_spill] sm:$0xff] %v16701_v38  ;;  %19390 = vst [vmem:[#allocation68_spill] sm:$0xff] %v16723_v46  ;;  %v16731_v63 = vsel %vm8584_vm0, %v8496_v18, 0.0 }
 0x452   : > { %v16676_v5 = vadd.f32 %v11942_v33, %v11941_v24  ;;  %v16694_v33 = vsel %vm8584_vm0, %v8490_v40, 0.0  ;;  %v16697_v24 = vsel %vm8584_vm0, %v8530_v29, 0.0  ;;  %v16720_v29 = vsel %vm8584_vm0, 0.0, %v8529_v28  ;;  %19391 = vst [vmem:[#allocation69_spill] sm:$0xff] %v16726_v51  ;;  %19392 = vst [vmem:[#allocation70_spill] sm:$0xff] %v16731_v63  ;;  %v13578_v51 = vld [vmem:[%s13848_s21 + $0x108] sm:$0xff] }
 0x453   : > { %19385 = vst [vmem:[#allocation18_spill] sm:$0xff] %v16694_v33  ;;  %19386 = vst [vmem:[#allocation17_spill] sm:$0xff] %v16697_v24  ;;  %v8783_v39 = vrot.slane %v16694_v33, 1  ;;  %v8520_v46 = vrot.slane %v13578_v51, 7  ;;  %v13580_v63 = vld [vmem:[%s13848_s21 + $0x100] sm:$0xff]  ;;  %v6106_v51 = vadd.f32 %v16568_v43, %v16755_v54 }
 0x454   : > { %19389 = vst [vmem:[#allocation67_spill] sm:$0xff] %v16720_v29 }
 0x455   : > { %v8784_v28 = vsel %vm8769_vm1, %v8782_v7, %v8783_v39  ;;  %v16750_v39 = vsel %vm8584_vm0, 0.0, %v8502_v0  ;;  %v16806_v43 = vsel %vm8584_vm0, %v8520_v46, 0.0 }
 0x456   : > { %v11944_v58 = vpop.f32.mrb[108].mxu1  ;;  %19394 = vst [vmem:[#allocation30_spill] sm:$0xff] %v16750_v39  ;;  %v16758_v24 = vadd.f32 %v8784_v28, %v16691_v19  ;;  %v16767_v18 = vadd.f32 %v9204_v37, %v8784_v28  ;;  %v8519_v39 = vrot.slane %v13580_v63, 7  ;;  %19408 = vst [vmem:[#allocation79_spill] sm:$0xff] %v16806_v43  ;;  %v19422_v43 = vld [vmem:[#allocation22_spill] sm:$0xff] }
 0x457   : > { %v11945_v22 = vpop.f32.mrb[109].mxu1 }
 0x458   : > { %v16717_v61 = vadd.f32 %v11945_v22, %v11944_v58  ;;  %v11947_v40 = vpop.f32.mrb[110].mxu1  ;;  %v13576_v58 = vld [vmem:[%s13848_s21 + $0xa8] sm:$0xff]  ;;  %19395 = vst [vmem:[#allocation71_spill] sm:$0xff] %v16758_v24  ;;  %19398 = vst [vmem:[#allocation74_spill] sm:$0xff] %v16767_v18  ;;  %v13577_v24 = vld [vmem:[%s13848_s21 + $0xd8] sm:$0xff]  ;;  %v16818_v28 = vsel %vm8584_vm0, 0.0, %v8519_v39 }
 0x459   : > { %v11948_v60 = vpop.f32.mrb[111].mxu1  ;;  %v8508_v22 = vrot.slane %v13576_v58, 7  ;;  %v16765_v58 = vsel %vm8584_vm0, %v8502_v0, 0.0  ;;  %v8514_v19 = vrot.slane %v13577_v24, 7  ;;  %v6103_v0 = vadd.f32 %v16562_v53, %v16755_v54  ;;  %v13579_v24 = vld [vmem:[%s13848_s21 + $0xd0] sm:$0xff]  ;;  %19411 = vst [vmem:[#allocation81_spill] sm:$0xff] %v16818_v28 }
 0x45a   : > { %v16734_v4 = vadd.f32 %v11948_v60, %v11947_v40  ;;  %19397 = vst [vmem:[#allocation73_spill] sm:$0xff] %v16765_v58  ;;  %v8513_v18 = vrot.slane %v13579_v24, 7  ;;  %v16800_v24 = vsel %vm8584_vm0, 0.0, %v8520_v46  ;;  %v16824_v46 = vsel %vm8584_vm0, %v8519_v39, 0.0 }
 0x45b   : > { %v16762_v40 = vsel %vm8584_vm0, 0.0, %v8508_v22  ;;  %v16773_v33 = vsel %vm8584_vm0, %v8508_v22, 0.0  ;;  %v19403_v22 = vrot.slane %v19402_v17, 7  ;;  %19406 = vst [vmem:[#allocation77_spill] sm:$0xff] %v16800_v24  ;;  %v16803_v63 = vsel %vm8584_vm0, %v8514_v19, 0.0  ;;  %19413 = vst [vmem:[#allocation83_spill] sm:$0xff] %v16824_v46 }
 0x45c   : > { %19396 = vst [vmem:[#allocation72_spill] sm:$0xff] %v16762_v40  ;;  %19401 = vst [vmem:[#allocation75_spill] sm:$0xff] %v16773_v33  ;;  %v6114_v17 = vadd.f32 %v16618_v20, %v16755_v54 }
 0x45d   : > { %v16785_v10 = vsel %vm8584_vm0, %v19403_v22, 0.0  ;;  %v16797_v22 = vsel %vm8584_vm0, 0.0, %v8514_v19  ;;  %19407 = vst [vmem:[#allocation78_spill] sm:$0xff] %v16803_v63  ;;  %v16821_v19 = vsel %vm8584_vm0, %v8513_v18, 0.0  ;;  %v13581_v63 = vld [vmem:[%s13848_s21 + $0x138] sm:$0xff] }
 0x45e   : > { %v11966_v7 = vpop.f32.mrb[112].mxu1  ;;  %19404 = vst [vmem:[#allocation36_spill] sm:$0xff] %v16785_v10  ;;  %19405 = vst [vmem:[#allocation76_spill] sm:$0xff] %v16797_v22  ;;  %v19414_v10 = vrot.slane %v16580_v2, 1  ;;  %v8526_v40 = vrot.slane %v13581_v63, 7  ;;  %v6119_v63 = vadd.f32 %v16665_v42, %v16755_v54 }
 0x45f   : > { %v11967_v60 = vpop.f32.mrb[113].mxu1  ;;  %19412 = vst [vmem:[#allocation82_spill] sm:$0xff] %v16821_v19 }
 0x460   : > { %v11968_v29 = vadd.f32 %v11967_v60, %v11966_v7  ;;  %v11969_v37 = vpop.f32.mrb[114].mxu1  ;;  %v16814_v7 = vsel %vm8584_vm0, 0.0, %v8513_v18  ;;  %v6111_v18 = vadd.f32 %v16599_v30, %v16755_v54  ;;  %v19415_v30 = vrot.slane %v19376_v49, 1 }
 0x461   : > { %v11970_v16 = vpop.f32.mrb[115].mxu1  ;;  %19410 = vst [vmem:[#allocation80_spill] sm:$0xff] %v16814_v7 }
 0x462   : > { %v16791_v53 = vadd.f32 %v11968_v29, %v6103_v0  ;;  %v11971_v60 = vadd.f32 %v11970_v16, %v11969_v37 }
 0x464   : > { %v16808_v29 = vadd.f32 %v11971_v60, %v6106_v51  ;;  %v19417_v60 = vrot.slane %v16591_v26, 1 }
 0x466   : > { %v11972_v51 = vpop.f32.mrb[116].mxu1 }
 0x467   : > { %v11973_v16 = vpop.f32.mrb[117].mxu1 }
 0x468   : > { %v11974_v22 = vadd.f32 %v11973_v16, %v11972_v51  ;;  %v11975_v39 = vpop.f32.mrb[118].mxu1  ;;  %v8796_v16 = vsel %vm8769_vm1, %v19415_v30, %v19414_v10  ;;  %v19416_v51 = vrot.slane %v16596_v21, 1  ;;  %v19420_v30 = vld [vmem:[#allocation20_spill] sm:$0xff] }
 0x469   : > { %v11976_v37 = vpop.f32.mrb[119].mxu1  ;;  %v8950_v0 = vadd.f32 %v8796_v16, %v19376_v49  ;;  %v9292_v28 = vadd.f32 %v19420_v30, %v8796_v16 }
 0x46a   : > { %v16839_v24 = vadd.f32 %v11974_v22, %v6111_v18  ;;  %v11977_v3 = vadd.f32 %v11976_v37, %v11975_v39  ;;  %v8814_v33 = vsel %vm8769_vm1, %v19417_v60, %v19416_v51  ;;  %v19418_v22 = vrot.slane %v16580_v2, 2  ;;  %v19421_v51 = vld [vmem:[#allocation21_spill] sm:$0xff] }
 0x46b   : > { %v8956_v20 = vadd.f32 %v8814_v33, %v16591_v26  ;;  %v19419_v37 = vrot.slane %v19376_v49, 2  ;;  %v9028_v39 = vrot.slane %v16591_v26, 2  ;;  %v9406_v60 = vadd.f32 %v16610_v15, %v19376_v49  ;;  %v13582_v49 = vld [vmem:[%s13848_s21 + $0x168] sm:$0xff] }
 0x46c   : > { %v16859_v10 = vadd.f32 %v11977_v3, %v6114_v17  ;;  %v9501_v7 = vadd.f32 %v19422_v43, %v19421_v51  ;;  %v19423_v2 = vrot.slane %v16596_v21, 2  ;;  %v8532_v15 = vrot.slane %v13582_v49, 7 }
 0x46d   : > { %v9012_v18 = vsel %vm2492_vm2, %v19419_v37, %v19418_v22  ;;  %v19424_v37 = vld [vmem:[#allocation28_spill] sm:$0xff]  ;;  %v9454_v38 = vadd.f32 %v9406_v60, %v8796_v16  ;;  %v16885_v16 = vsel %vm8584_vm0, 0.0, %v8526_v40 }
 0x46e   : > { %v9030_v58 = vsel %vm2492_vm2, %v9028_v39, %v19423_v2  ;;  %v9166_v22 = vadd.f32 %v9012_v18, %v8950_v0  ;;  %v9507_v34 = vadd.f32 %v19425_v55, %v19424_v37  ;;  %v11978_v3 = vpop.f32.mrb[120].mxu1  ;;  %v9364_v30 = vadd.f32 %v9292_v28, %v9012_v18  ;;  %19428 = vst [vmem:[#allocation22_spill] sm:$0xff] %v16885_v16  ;;  %v13590_v16 = vld [vmem:[%s13848_s21 + $0x118] sm:$0xff] }
 0x46f   : > { %v9172_v17 = vadd.f32 %v9030_v58, %v8956_v20  ;;  %v16872_v45 = vmul.f32 0.11111111, %v9501_v7  ;;  %v11979_v43 = vpop.f32.mrb[121].mxu1  ;;  %v9502_v7 = vadd.f32 %v9454_v38, %v9012_v18  ;;  %v13583_v20 = vld [vmem:[%s13848_s21 + $0x28] sm:$0xff]  ;;  %v16898_v38 = vsel %vm8584_vm0, %v8526_v40, 0.0  ;;  %v13584_v18 = vld [vmem:[%s13848_s21 + $0x130] sm:$0xff] }
 0x470   : > { %v9214_v21 = vadd.f32 %v9166_v22, %v16591_v26  ;;  %v16878_v39 = vmul.f32 0.11111111, %v9507_v34  ;;  %v11980_v0 = vadd.f32 %v11979_v43, %v11978_v3  ;;  %v11981_v51 = vpop.f32.mrb[122].mxu1  ;;  %v9412_v28 = vadd.f32 %v9364_v30, %v16591_v26  ;;  %19430 = vst [vmem:[#allocation26_spill] sm:$0xff] %v16898_v38  ;;  %v13588_v38 = vld [vmem:[%s13848_s21 + $0xb8] sm:$0xff] }
 0x471   : > { %19426 = vst [vmem:[#allocation20_spill] sm:$0xff] %v16872_v45  ;;  %v16881_v55 = vadd.f32 %v9172_v17, %v16604_v35  ;;  %v8492_v60 = vrot.slane %v13583_v20, 7  ;;  %v11982_v42 = vpop.f32.mrb[123].mxu1  ;;  %v6122_v22 = vadd.f32 %v16676_v5, %v16755_v54  ;;  %v16895_v26 = vsel %vm8584_vm0, 0.0, %v8532_v15 }
 0x472   : > { %19427 = vst [vmem:[#allocation21_spill] sm:$0xff] %v16878_v39  ;;  %v9298_v2 = vadd.f32 %v9214_v21, %v8814_v33  ;;  %v16892_v3 = vadd.f32 %v11980_v0, %v6119_v63  ;;  %v11983_v17 = vadd.f32 %v11982_v42, %v11981_v51  ;;  %v9460_v49 = vadd.f32 %v9412_v28, %v8814_v33  ;;  %v13585_v28 = vld [vmem:[%s13848_s21 + $0x160] sm:$0xff] }
 0x473   : > { %19429 = vst [vmem:[#allocation28_spill] sm:$0xff] %v16895_v26  ;;  %v8525_v30 = vrot.slane %v13584_v18, 7  ;;  %v16904_v21 = vsel %vm8584_vm0, %v8532_v15, 0.0  ;;  %v16908_v0 = vmul.f32 0.11111111, %v9502_v7  ;;  %v8531_v20 = vrot.slane %v13585_v28, 7 }
 0x474   : > { %v16901_v43 = vadd.f32 %v9298_v2, %v9030_v58  ;;  %19431 = vst [vmem:[#allocation84_spill] sm:$0xff] %v16904_v21  ;;  %v16906_v5 = vadd.f32 %v11983_v17, %v6122_v22  ;;  %v9508_v63 = vadd.f32 %v9460_v49, %v9030_v58  ;;  %v16917_v15 = vsel %vm8584_vm0, 0.0, %v8492_v60  ;;  %v13586_v49 = vld [vmem:[%s13848_s21 + $0x58] sm:$0xff] }
 0x475   : > { %19432 = vst [vmem:[#allocation85_spill] sm:$0xff] %v16917_v15  ;;  %v8498_v18 = vrot.slane %v13586_v49, 7  ;;  %v16925_v34 = vsel %vm8584_vm0, %v8492_v60, 0.0  ;;  %v16928_v51 = vsel %vm8584_vm0, 0.0, %v8525_v30  ;;  %v6127_v2 = vadd.f32 %v16717_v61, %v16755_v54 }
 0x476   : > { %v11984_v22 = vpop.f32.mrb[124].mxu1  ;;  %v16919_v17 = vmul.f32 0.11111111, %v9508_v63  ;;  %19433 = vst [vmem:[#allocation86_spill] sm:$0xff] %v16925_v34  ;;  %v16935_v7 = vsel %vm8584_vm0, 0.0, %v8531_v20  ;;  %v16938_v60 = vsel %vm8584_vm0, %v8525_v30, 0.0 }
 0x477   : > { %v11985_v28 = vpop.f32.mrb[125].mxu1  ;;  %19434 = vst [vmem:[#allocation87_spill] sm:$0xff] %v16935_v7  ;;  %v16941_v49 = vsel %vm8584_vm0, %v8531_v20, 0.0  ;;  %v8788_v42 = vrot.slane %v16917_v15, 1  ;;  %v8789_v61 = vrot.slane %v16925_v34, 1  ;;  %v16951_v39 = vsel %vm8584_vm0, 0.0, %v8498_v18 }
 0x478   : > { %v11986_v40 = vadd.f32 %v11985_v28, %v11984_v22  ;;  %v11987_v63 = vpop.f32.mrb[126].mxu1  ;;  %19435 = vst [vmem:[#allocation88_spill] sm:$0xff] %v16941_v49  ;;  %v6130_v22 = vadd.f32 %v16734_v4, %v16755_v54  ;;  %19436 = vst [vmem:[#allocation89_spill] sm:$0xff] %v16951_v39  ;;  %v16954_v30 = vsel %vm8584_vm0, %v8498_v18, 0.0  ;;  %v13587_v20 = vld [vmem:[%s13848_s21 + $0x88] sm:$0xff]  ;;  %v8510_v19 = vrot.slane %v13588_v38, 7 }
 0x479   : > { %v11988_v33 = vpop.f32.mrb[127].mxu1  ;;  %19437 = vst [vmem:[#allocation90_spill] sm:$0xff] %v16954_v30  ;;  %v8504_v26 = vrot.slane %v13587_v20, 7  ;;  %v8522_v34 = vrot.slane %v13590_v16, 7  ;;  %v19444_v30 = vld [vmem:[#allocation43_spill] sm:$0xff] }
 0x47a   : > { %v16947_v28 = vadd.f32 %v11986_v40, %v6127_v2  ;;  %v11989_v58 = vadd.f32 %v11988_v33, %v11987_v63  ;;  %v9206_v2 = vadd.f32 %v19372_v14, %v16917_v15  ;;  %v8790_v63 = vsel %vm8769_vm1, %v8788_v42, %v8789_v61  ;;  %v13589_v40 = vld [vmem:[%s13848_s21 + $0xe8] sm:$0xff]  ;;  %v13592_v16 = vld [vmem:[%s19106_s2] sm:$0xf] }
 0x47b   : > { %v16975_v45 = vsel %vm8584_vm0, 0.0, %v8504_v26  ;;  %v16978_v18 = vsel %vm8584_vm0, 0.0, %v8510_v19  ;;  %v16981_v42 = vsel %vm8584_vm0, %v8504_v26, 0.0  ;;  %v16984_v61 = vsel %vm8584_vm0, %v8510_v19, 0.0 }
 0x47c   : > { %v16960_v4 = vadd.f32 %v11989_v58, %v6130_v22  ;;  %19438 = vst [vmem:[#allocation91_spill] sm:$0xff] %v16975_v45  ;;  %19439 = vst [vmem:[#allocation92_spill] sm:$0xff] %v16978_v18  ;;  %v16987_v22 = vadd.f32 %v8790_v63, %v16917_v15  ;;  %v16989_v33 = vadd.f32 %v9206_v2, %v8790_v63  ;;  %v8516_v46 = vrot.slane %v13589_v40, 7  ;;  %v19445_v63 = vld [vmem:[#allocation56_spill] sm:$0xff] }
 0x47d   : > { %19440 = vst [vmem:[#allocation93_spill] sm:$0xff] %v16981_v42  ;;  %19441 = vst [vmem:[#allocation94_spill] sm:$0xff] %v16984_v61  ;;  %v16995_v49 = vadd.f32 %v19372_v14, %v19444_v30  ;;  %v940_v40 = vsub.s32 3, %v19445_v63  ;;  %v17017_v63 = vsel %vm8584_vm0, 0.0, %v8522_v34  ;;  %v19454_v18 = vmov 0  }
 0x47e   : > { %v12006_v58 = vpop.f32.mrb[128].mxu1  ;;  %19442 = vst [vmem:[#allocation95_spill] sm:$0xff] %v16987_v22  ;;  %19443 = vst [vmem:[#allocation96_spill] sm:$0xff] %v16989_v33  ;;  %v19446_v33 = vld [vmem:[#allocation48_spill] sm:$0xff]  ;;  %v17014_v22 = vsel %vm8584_vm0, 0.0, %v8516_v46  ;;  %v17020_v2 = vsel %vm8584_vm0, %v8516_v46, 0.0 }
 0x47f   : > { %v12007_v54 = vpop.f32.mrb[129].mxu1  ;;  %v19447_v15 = vrot.slane %v19446_v33, 7  ;;  %19450 = vst [vmem:[#allocation56_spill] sm:$0xff] %v17014_v22  ;;  %19451 = vst [vmem:[#allocation48_spill] sm:$0xff] %v17017_v63  ;;  %v941_v26 = vrot.slane %v13592_v16, %v940_v40 }
 0x480   : > { %v12008_v20 = vadd.f32 %v12007_v54, %v12006_v58  ;;  %v12009_v38 = vpop.f32.mrb[130].mxu1  ;;  %19452 = vst [vmem:[#allocation97_spill] sm:$0xff] %v17020_v2 }
 0x481   : > { %v12010_v39 = vpop.f32.mrb[131].mxu1  ;;  %v17007_v14 = vsel %vm8584_vm0, %v19447_v15, 0.0  ;;  %v17023_v15 = vsel %vm8584_vm0, %v8522_v34, 0.0 }
 0x482   : > { %v6233_v19 = vadd.f32 %v12008_v20, %v16791_v53  ;;  %v12011_v54 = vadd.f32 %v12010_v39, %v12009_v38  ;;  %19448 = vst [vmem:[#allocation43_spill] sm:$0xff] %v17007_v14  ;;  %19453 = vst [vmem:[#allocation98_spill] sm:$0xff] %v17023_v15  ;;  %v13591_v38 = vld [vmem:[%s13848_s21 + $0xe0] sm:$0xff] }
 0x483   : > { %v8515_v39 = vrot.slane %v13591_v38, 7 }
 0x484   : > { %v6298_v30 = vadd.f32 %v16574_v52, %v6233_v19  ;;  %v6236_v53 = vadd.f32 %v12011_v54, %v16808_v29  ;;  %v19458_v54 = vld [vmem:[#allocation64_spill] sm:$0xff] }
 0x485   : > { %v17049_v63 = vadd.f32 %v19458_v54, %v941_v26  ;;  %v19463_v54 = vrot.slane %v16622_v23, 1 }
 0x486   : > { %v6328_v33 = vmax.f32 %v6298_v30, 0.0  ;;  %v6301_v52 = vadd.f32 %v16586_v11, %v6236_v53  ;;  %v12012_v29 = vpop.f32.mrb[132].mxu1  ;;  %v19457_v11 = vld [vmem:[#allocation63_spill] sm:$0xff] }
 0x487   : > { %v12013_v46 = vpop.f32.mrb[133].mxu1  ;;  %v17046_v53 = vadd.f32 %v19457_v11, %v941_v26  ;;  %v17061_v11 = vld [vmem:[%s13848_s21 + $0x110] sm:$0xff] }
 0x488   : > { %v6329_v34 = vmax.f32 %v6301_v52, 0.0  ;;  %v12014_v20 = vadd.f32 %v12013_v46, %v12012_v29  ;;  %v12015_v30 = vpop.f32.mrb[134].mxu1  ;;  %v6336_v61 = vpack.c.bf16 %v6328_v33, %v6328_v33  ;;  %v19455_v52 = vld [vmem:[#allocation61_spill] sm:$0xff]  ;;  %v19456_v46 = vld [vmem:[#allocation62_spill] sm:$0xff] }
 0x489   : > { %v12016_v19 = vpop.f32.mrb[135].mxu1  ;;  %v17040_v29 = vadd.f32 %v19455_v52, %v941_v26  ;;  %v17043_v22 = vadd.f32 %v19456_v46, %v941_v26  ;;  %v17065_v52 = vadd.f32 %v15137_v6, %v941_v26  ;;  %v17068_v46 = vadd.f32 %v15178_v57, %v941_v26 }
 0x48a   : > { %v6241_v14 = vadd.f32 %v12014_v20, %v16839_v24  ;;  %v12017_v40 = vadd.f32 %v12016_v19, %v12015_v30  ;;  %v11639_v16 = vpack.c.bf16 %v6329_v34, %v6328_v33  ;;  %v11297_v58 = vcombine.low %v19454_v18, %v6336_v61  ;;  %v13240_v24 = vld [vmem:[%s19115_s11 + $0x188] sm:$0xff]   ;;  %v19459_v33 = vld [vmem:[#allocation65_spill] sm:$0xff] }
 0x48b   : > { %v17056_v61 = vadd.f32 %v19459_v33, %v941_v26  ;;  %v17071_v20 = vadd.f32 %v15192_v1, %v941_v26  ;;  %v19462_v1 = vrot.slane %v16625_v12, 1 }
 0x48c   : > { %v6306_v19 = vadd.f32 %v16572_v36, %v6241_v14  ;;  %v6244_v30 = vadd.f32 %v12017_v40, %v16859_v10  ;;  %6873 = vmatprep.mubr.bf16.mxu1 %v11639_v16  ;;  %6930 = vmatprep.mubr.bf16.mxu0 %v11639_v16  ;;  %v17074_v36 = vsel %vm8584_vm0, 0.0, %v8515_v39  ;;  %v17077_v10 = vsel %vm8584_vm0, %v8515_v39, 0.0  ;;  %v13243_v39 = vld [vmem:[%s19115_s11 + $0x190] sm:$0xff]  }
 0x48d   : > { %6874 = vmatmul.mubr.bf16.gmra.mrb[148].mxu1 %v11297_v58  ;;  %6931 = vmatmul.mubr.bf16.vlgmr.msra.gmra.mrb[72].mxu0 %v11297_v58 }
 0x48e   : > { %v6330_v14 = vmax.f32 %v6306_v19, 0.0  ;;  %v6309_v40 = vadd.f32 %v16583_v47, %v6244_v30  ;;  %12247 = vmatpush3.bf16.msra.mxu0 %v16487_v13  ;;  %v12018_v6 = vpop.f32.mrb[136].mxu1 }
 0x48f   : > { %v12019_v58 = vpop.f32.mrb[137].mxu1  ;;  %12248 = vmatprep.subr.bf16.mxu0 %v13240_v24 }
 0x490   : > { %v6331_v47 = vmax.f32 %v6309_v40, 0.0  ;;  %v12020_v19 = vadd.f32 %v12019_v58, %v12018_v6  ;;  %v12021_v13 = vpop.f32.mrb[138].mxu1  ;;  %v17089_v30 = vpack.c.bf16 %v6330_v14, %v6329_v34  ;;  %v19460_v40 = vrot.slane %v16607_v32, 1  ;;  %v13246_v58 = vld [vmem:[%s19115_s11 + $0x198] sm:$0xff]  }
 0x491   : > { %v12022_v26 = vpop.f32.mrb[139].mxu1  ;;  %v19461_v6 = vrot.slane %v16604_v35, 1 }
 0x492   : > { %v6249_v16 = vadd.f32 %v12020_v19, %v16892_v3  ;;  %v12023_v57 = vadd.f32 %v12022_v26, %v12021_v13  ;;  %12249 = vmatpush3.bf16.msra.mxu0 %v13240_v24  ;;  %v17095_v15 = vpack.c.bf16 %v6331_v47, %v6330_v14  ;;  %v8850_v3 = vsel %vm8769_vm1, %v19463_v54, %v19462_v1 }
 0x493   : > { %v8832_v34 = vsel %vm8769_vm1, %v19461_v6, %v19460_v40  ;;  %12250 = vmatprep.subr.bf16.mxu0 %v13243_v39  ;;  %v9046_v14 = vrot.slane %v16604_v35, 2  ;;  %v9064_v26 = vrot.slane %v16622_v23, 2  ;;  %v8968_v40 = vadd.f32 %v8850_v3, %v16622_v23 }
 0x494   : > { %v8962_v24 = vadd.f32 %v8832_v34, %v16604_v35  ;;  %v6314_v19 = vadd.f32 %v16636_v56, %v6249_v16  ;;  %v6252_v13 = vadd.f32 %v12023_v57, %v16906_v5  ;;  %6881 = vmatprep.mubr.bf16.mxu1 %v17095_v15  ;;  %6938 = vmatprep.mubr.bf16.mxu0 %v17095_v15  ;;  %v9043_v6 = vrot.slane %v19380_v31, 2 }
 0x495   : > { %6882 = vmatmul.mubr.bf16.gmra.mrb[152].mxu1 %v17089_v30  ;;  %6939 = vmatmul.mubr.bf16.gmra.mrb[76].mxu0 %v17089_v30  ;;  %v19464_v54 = vrot.slane %v16607_v32, 2  ;;  %v19465_v56 = vrot.slane %v16625_v12, 2  ;;  %v9304_v57 = vadd.f32 %v16881_v55, %v8832_v34  ;;  %v9061_v16 = vrot.slane %v16654_v50, 2  ;;  %v13249_v32 = vld [vmem:[%s19115_s11 + $0x1a0] sm:$0xff]  }
 0x496   : > { %v6332_v38 = vmax.f32 %v6314_v19, 0.0  ;;  %v17130_v33 = vadd.f32 %v16650_v8, %v6252_v13  ;;  %12251 = vmatpush3.bf16.msra.mxu0 %v13243_v39  ;;  %v12024_v2 = vpop.f32.mrb[140].mxu1  ;;  %v9418_v55 = vadd.f32 %v16901_v43, %v16604_v35  ;;  %v19468_v39 = vrot.slane %v16657_v48, 1 }
 0x497   : > { %v9048_v1 = vsel %vm2492_vm2, %v9046_v14, %v19464_v54  ;;  %v9066_v5 = vsel %vm2492_vm2, %v9064_v26, %v19465_v56  ;;  %v12025_v7 = vpop.f32.mrb[141].mxu1  ;;  %12252 = vmatprep.subr.bf16.mxu0 %v13246_v58  ;;  %v19466_v14 = vrot.slane %v16616_v41, 1  ;;  %v19467_v26 = vrot.slane %v19380_v31, 1 }
 0x498   : > { %v9178_v45 = vadd.f32 %v9048_v1, %v8962_v24  ;;  %v9184_v42 = vadd.f32 %v9066_v5, %v8968_v40  ;;  %v9376_v12 = vadd.f32 %v9304_v57, %v9048_v1  ;;  %v19469_v24 = vrot.slane %v16654_v50, 1  ;;  %v12027_v35 = vpop.f32.mrb[142].mxu1 }
 0x499   : > { %v17142_v8 = vsel %vm8769_vm1, %v19467_v26, %v19466_v14  ;;  %v17151_v13 = vpack.c.bf16 %v6332_v38, %v6331_v47  ;;  %v6333_v40 = vmax.f32 %v17130_v33, 0.0  ;;  %v12026_v54 = vadd.f32 %v12025_v7, %v12024_v2  ;;  %v12028_v56 = vpop.f32.mrb[143].mxu1 }
 0x49a   : > { %v17149_v19 = vsel %vm8769_vm1, %v19469_v24, %v19468_v39  ;;  %v9226_v43 = vadd.f32 %v9178_v45, %v16622_v23  ;;  %v17156_v57 = vadd.f32 %v9184_v42, %v16633_v62  ;;  %v9424_v14 = vadd.f32 %v9376_v12, %v16622_v23  ;;  %12253 = vmatpush3.bf16.msra.mxu0 %v13246_v58  ;;  %v10449_v7 = vpop.permute.xlu0 %10448  ;;  %v13252_v45 = vld [vmem:[%s19115_s11 + $0x1a8] sm:$0xff]  }
 0x49b   : > { %v9466_v26 = vadd.f32 %v9418_v55, %v8832_v34  ;;  %v8961_v21 = vadd.f32 %v17142_v8, %v19380_v31  ;;  %v6257_v39 = vadd.f32 %v12026_v54, %v16947_v28  ;;  %v12029_v47 = vadd.f32 %v12028_v56, %v12027_v35  ;;  %12254 = vmatprep.subr.bf16.mxu0 %v13249_v32 }
 0x49c   : > { %v17162_v33 = vpack.c.bf16 %v6333_v40, %v6332_v38  ;;  %v9310_v2 = vadd.f32 %v9226_v43, %v8850_v3  ;;  %v19470_v23 = vmax.f32 %v17040_v29, 0.0  ;;  %v9472_v34 = vadd.f32 %v9424_v14, %v8850_v3  ;;  %v10453_v55 = vpop.permute.xlu1 %10452 }
 0x49d   : > { %v9514_v12 = vadd.f32 %v9466_v26, %v9048_v1  ;;  %v8967_v28 = vadd.f32 %v17149_v19, %v16654_v50  ;;  %v6322_v58 = vadd.f32 %v16628_v27, %v6257_v39  ;;  %v6260_v38 = vadd.f32 %v12029_v47, %v16960_v4  ;;  %v19475_v39 = vld [vmem:[#allocation24_spill] sm:$0xff] }
 0x49e   : > { %v10577_v42 = vsel %vm10480_vm9, %v19470_v23, %v10449_v7  ;;  %6889 = vmatprep.mubr.bf16.mxu1 %v17162_v33  ;;  %6946 = vmatprep.mubr.bf16.mxu0 %v17162_v33  ;;  %v17177_v24 = vadd.f32 %v9310_v2, %v9066_v5  ;;  %v9082_v29 = vrot.slane %v16633_v62, 2  ;;  %v19471_v3 = vmax.f32 %v17043_v22, 0.0  ;;  %v10451_v14 = vpop.permute.xlu0 %10450  ;;  %v19476_v23 = vld [vmem:[#allocation29_spill] sm:$0xff] }
 0x49f   : > { %10594 = vst [vmem:[%s15244_s19 + $0x8] sm:$0xff] %v10577_v42  ;;  %6890 = vmatmul.mubr.bf16.gmra.mrb[156].mxu1 %v17151_v13  ;;  %6947 = vmatmul.mubr.bf16.gmra.mrb[80].mxu0 %v17151_v13  ;;  %v9520_v4 = vadd.f32 %v9472_v34, %v9066_v5  ;;  %v17185_v1 = vmul.f32 0.11111111, %v9514_v12  ;;  %v19472_v54 = vrot.slane %v16616_v41, 2  ;;  %v6334_v43 = vmax.f32 %v6322_v58, 0.0  ;;  %v13255_v41 = vld [vmem:[%s19115_s11 + $0x1b0] sm:$0xff]  }
 0x4a0   : > { %v10578_v27 = vsel %vm10480_vm9, %v19471_v3, %v10453_v55  ;;  %v6325_v56 = vadd.f32 %v16642_v44, %v6260_v38  ;;  %12255 = vmatpush3.bf16.msra.mxu0 %v13249_v32  ;;  %6995 = vmatprep.mubr.bf16.mxu1 %v17095_v15  ;;  %v19473_v22 = vrot.slane %v16657_v48, 2  ;;  %v19474_v15 = vld [vmem:[#allocation25_spill] sm:$0xff]  ;;  %v9303_v42 = vadd.f32 %v19476_v23, %v17142_v8 }
 0x4a1   : > { %v17190_v35 = vsel %vm2492_vm2, %v9043_v6, %v19472_v54  ;;  %10600 = vst [vmem:[%s15244_s19 + $0x38] sm:$0xff] %v10578_v27  ;;  %12256 = vmatprep.subr.bf16.mxu0 %v13252_v45  ;;  %v10481_v6 = vsel %vm10480_vm9, %v10449_v7, %v10451_v14  ;;  %v17203_v44 = vmul.f32 0.11111111, %v9520_v4  ;;  %v9297_v47 = vadd.f32 %v19475_v39, %v19474_v15 }
 0x4a2   : > { %v9063_v5 = vsel %vm2492_vm2, %v9061_v16, %v19473_v22  ;;  %v9177_v26 = vadd.f32 %v17190_v35, %v8961_v21  ;;  %v6335_v2 = vmax.f32 %v6325_v56, 0.0  ;;  %v17207_v48 = vpack.c.bf16 %v6334_v43, %v6333_v40  ;;  %10595 = vst [vmem:[%s15244_s19 + $0x10] sm:$0xff] %v10481_v6  ;;  %v10455_v16 = vpop.permute.xlu1 %10454  ;;  %v10457_v58 = vpop.permute.xlu0 %10456  ;;  %v19481_v22 = vld [vmem:[#allocation19_spill] sm:$0xff] }
 0x4a3   : > { %v9183_v32 = vadd.f32 %v9063_v5, %v8967_v28  ;;  %v10482_v34 = vsel %vm10480_vm9, %v10453_v55, %v10455_v16  ;;  %v9369_v28 = vadd.f32 %v9297_v47, %v19424_v37  ;;  %v9375_v27 = vadd.f32 %v9303_v42, %v17190_v35  ;;  %v13256_v55 = vld [vmem:[%s19115_s11 + $0x1b8] sm:$0xff]  }
 0x4a4   : > { %v9225_v21 = vadd.f32 %v9177_v26, %v16654_v50  ;;  %12257 = vmatpush3.bf16.msra.mxu0 %v13252_v45  ;;  %v17220_v40 = vpack.c.bf16 %v6335_v2, %v6334_v43  ;;  %10601 = vst [vmem:[%s15244_s19 + $0x40] sm:$0xff] %v10482_v34  ;;  %v6343_v38 = vpack.c.bf16 %v6335_v2, %v6335_v2  ;;  %v19477_v4 = vmax.f32 %v17046_v53, 0.0 }
 0x4a5   : > { %v17217_v12 = vadd.f32 %v9183_v32, %v16661_v59  ;;  %12258 = vmatprep.subr.bf16.mxu0 %v13255_v41  ;;  %v9417_v37 = vadd.f32 %v9369_v28, %v19380_v31  ;;  %v19478_v45 = vrot.slane %v16646_v25, 1  ;;  %v19479_v43 = vrot.slane %v16633_v62, 1  ;;  %v19486_v28 = vld [vmem:[#allocation23_spill] sm:$0xff] }
 0x4a6   : > { %v9309_v3 = vadd.f32 %v9225_v21, %v17149_v19  ;;  %v10579_v54 = vsel %vm10480_vm9, %v19477_v4, %v10457_v58  ;;  %v19480_v14 = vrot.slane %v16684_v9, 1  ;;  %v19482_v26 = vrot.slane %v19481_v22, 1  ;;  %6954 = vmatprep.mubr.bf16.mxu0 %v17220_v40  ;;  %v10459_v53 = vpop.permute.xlu1 %10458 }
 0x4a7   : > { %v8868_v56 = vsel %vm8769_vm1, %v19479_v43, %v19478_v45  ;;  %10606 = vst [vmem:[%s15244_s19 + $0x68] sm:$0xff] %v10579_v54  ;;  %v17245_v32 = vcombine.low %v6343_v38, %v19454_v18  ;;  %v9423_v15 = vadd.f32 %v9375_v27, %v16654_v50  ;;  %6955 = vmatmul.mubr.bf16.gmra.mrb[84].mxu0 %v17207_v48  ;;  %v9100_v21 = vrot.slane %v19481_v22, 2  ;;  %v10461_v50 = vpop.permute.xlu0 %10460 }
 0x4a8   : > { %v8886_v6 = vsel %vm8769_vm1, %v19482_v26, %v19480_v14  ;;  %v17247_v31 = vadd.f32 %v9309_v3, %v9063_v5  ;;  %v8974_v39 = vadd.f32 %v8868_v56, %v16633_v62  ;;  %6996 = vmatmul.mubr.bf16.vlgmr.msra.gmra.mrb[160].mxu1 %v17089_v30  ;;  %v10483_v47 = vsel %vm10480_vm9, %v10457_v58, %v10459_v53 }
 0x4a9   : > { %v9465_v2 = vadd.f32 %v9417_v37, %v17142_v8  ;;  %v8980_v16 = vadd.f32 %v8886_v6, %v19481_v22  ;;  %12259 = vmatpush3.bf16.msra.mxu0 %v13255_v41  ;;  %7003 = vmatprep.mubr.bf16.mxu1 %v17162_v33  ;;  %10607 = vst [vmem:[%s15244_s19 + $0x70] sm:$0xff] %v10483_v47  ;;  %v19483_v42 = vrot.slane %v16646_v25, 2  ;;  %v9079_v34 = vrot.slane %v16661_v59, 2  ;;  %v13259_v33 = vld [vmem:[%s19119_s15 + $0x4] ss:$8 sps:$4 sm:$0xff]  }
 0x4aa   : > { %v9471_v23 = vadd.f32 %v9423_v15, %v17149_v19  ;;  %v9316_v8 = vadd.f32 %v17156_v57, %v8868_v56  ;;  %12262 = vmatprep.mubr.bf16.mxu0 %v17151_v13  ;;  %12260 = vmatprep.subr.bf16.mxu0 %v13256_v55  ;;  %v19484_v41 = vmax.f32 %v17049_v63, 0.0  ;;  %v9097_v58 = vrot.slane %v19486_v28, 2  ;;  %v10463_v38 = vpop.permute.xlu1 %10462 }
 0x4ab   : > { %v9084_v30 = vsel %vm2492_vm2, %v9082_v29, %v19483_v42  ;;  %v9513_v25 = vadd.f32 %v9465_v2, %v17190_v35  ;;  %v19485_v29 = vrot.slane %v16684_v9, 2  ;;  %v10484_v37 = vsel %vm10480_vm9, %v10461_v50, %v10463_v38  ;;  %v19487_v35 = vld [vmem:[#allocation14_spill] sm:$0xff]  ;;  %v10465_v26 = vpop.permute.xlu0 %10464 }
 0x4ac   : > { %v10580_v19 = vsel %vm10480_vm9, %v19484_v41, %v10461_v50  ;;  %v9519_v3 = vadd.f32 %v9471_v23, %v9063_v5  ;;  %v9190_v27 = vadd.f32 %v9084_v30, %v8974_v39  ;;  %v9388_v54 = vadd.f32 %v9316_v8, %v9084_v30  ;;  %v13257_v5 = vld [vmem:[%s19119_s15] ss:$8 sps:$4 sm:$0xff]   ;;  %10613 = vst [vmem:[%s15244_s19 + $0xa0] sm:$0xff] %v10484_v37  ;;  %v19566_v8 = vld [vmem:[#allocation37_spill] sm:$0xff] }
 0x4ad   : > { %v9102_v57 = vsel %vm2492_vm2, %v9100_v21, %v19485_v29  ;;  %10612 = vst [vmem:[%s15244_s19 + $0x98] sm:$0xff] %v10580_v19  ;;  %v17281_v63 = vmul.f32 0.11111111, %v9513_v25  ;;  %v9430_v45 = vadd.f32 %v17177_v24, %v16633_v62  ;;  %v19488_v43 = vrot.slane %v19487_v35, 1  ;;  %12261 = vmatpush3.bf16.msra.mxu0 %v13256_v55  ;;  %v19490_v24 = vld [vmem:[#allocation27_spill] sm:$0xff] }
 0x4ae   : > { %v9196_v4 = vadd.f32 %v9102_v57, %v8980_v16  ;;  %v19489_v9 = vrot.slane %v16661_v59, 1  ;;  %v17294_v53 = vmul.f32 0.11111111, %v9519_v3  ;;  %v9238_v15 = vadd.f32 %v9190_v27, %v19481_v22  ;;  %10197 = vmatprep.subr.bf16.mxu0 %v13259_v33  ;;  %v13262_v55 = vld [vmem:[%s19119_s15 + $0x14] ss:$8 sps:$4 sm:$0xff]   ;;  %v10467_v42 = vpop.permute.xlu1 %10466  ;;  %v19496_v3 = vld [vmem:[#allocation12_spill] sm:$0xff] }
 0x4af   : > { %v9436_v62 = vadd.f32 %v9388_v54, %v19481_v22  ;;  %v19491_v39 = vrot.slane %v19490_v24, 1  ;;  %v19492_v47 = vrot.slane %v19486_v28, 1  ;;  %v19493_v16 = vmax.f32 %v17056_v61, 0.0  ;;  %v19497_v37 = vld [vmem:[#allocation67_spill] sm:$0xff] }
 0x4b0   : > { %v8865_v14 = vsel %vm8769_vm1, %v19489_v9, %v19488_v43  ;;  %v9478_v50 = vadd.f32 %v9430_v45, %v8868_v56  ;;  %v9322_v33 = vadd.f32 %v9238_v15, %v8886_v6  ;;  %v19494_v19 = vrot.slane %v19487_v35, 2  ;;  %7004 = vmatmul.mubr.bf16.gmra.mrb[164].mxu1 %v17151_v13  ;;  %12263 = vmatmul.mubr.bf16.vlgmr.msra.gmra.mrb[88].mxu0 %v17207_v48  ;;  %v13260_v13 = vld [vmem:[%s19119_s15 + $0x10] ss:$8 sps:$4 sm:$0xff]  }
 0x4b1   : > { %v17303_v2 = vsel %vm8769_vm1, %v19492_v47, %v19491_v39  ;;  %v10581_v21 = vsel %vm10480_vm9, %v19493_v16, %v10465_v26  ;;  %v8973_v23 = vadd.f32 %v8865_v14, %v16661_v59  ;;  %v9484_v41 = vadd.f32 %v9436_v62, %v8886_v6  ;;  %10198 = vmatpush1.bf16.msra.mxu0 %v13257_v5  ;;  %v10469_v6 = vpop.permute.xlu0 %10468  ;;  %v19499_v47 = vld [vmem:[#allocation17_spill] sm:$0xff] }
 0x4b2   : > { %v8979_v22 = vadd.f32 %v17303_v2, %v19486_v28  ;;  %10618 = vst [vmem:[%s15244_s19 + $0xc8] sm:$0xff] %v10581_v21  ;;  %v9081_v61 = vsel %vm2492_vm2, %v9079_v34, %v19494_v19  ;;  %v10485_v56 = vsel %vm10480_vm9, %v10465_v26, %v10467_v42  ;;  %v9526_v25 = vadd.f32 %v9478_v50, %v9084_v30  ;;  %v10471_v5 = vpop.permute.xlu1 %10470 }
 0x4b3   : > { %v19495_v29 = vrot.slane %v19490_v24, 2  ;;  %v9336_v27 = vrot.slane %v19496_v3, 2  ;;  %7011 = vmatprep.mubr.bf16.mxu1 %v17220_v40  ;;  %10619 = vst [vmem:[%s15244_s19 + $0xd0] sm:$0xff] %v10485_v56  ;;  %v9394_v34 = vadd.f32 %v9322_v33, %v9102_v57  ;;  %v9532_v54 = vadd.f32 %v9484_v41, %v9102_v57  ;;  %12266 = vmatprep.mubr.bf16.mxu0 %v17245_v32  ;;  %v13268_v33 = vld [vmem:[%s19119_s15 + $0x34] ss:$8 sps:$4 sm:$0xff]  }
 0x4b4   : > { %v9189_v30 = vadd.f32 %v9081_v61, %v8973_v23  ;;  %v9333_v45 = vrot.slane %v19497_v37, 2  ;;  %10199 = vmatprep.subr.bf16.mxu0 %v13262_v55  ;;  %v19498_v40 = vmax.f32 %v17065_v52, 0.0  ;;  %v17342_v43 = vmul.f32 0.11111111, %v9526_v25 }
 0x4b5   : > { %v17326_v38 = vsel %vm2492_vm2, %v9097_v58, %v19495_v29  ;;  %v13265_v58 = vld [vmem:[%s19119_s15 + $0x24] ss:$8 sps:$4 sm:$0xff]   ;;  %v9315_v57 = vadd.f32 %v17217_v12, %v8865_v14  ;;  %v17347_v26 = vmul.f32 0.11111111, %v9532_v54  ;;  %v9429_v62 = vadd.f32 %v17247_v31, %v16661_v59  ;;  %10200 = vmatpush1.bf16.msra.mxu0 %v13260_v13  ;;  %v13263_v59 = vld [vmem:[%s19119_s15 + $0x20] ss:$8 sps:$4 sm:$0xff]   ;;  %v10473_v31 = vpop.permute.xlu0 %10472 }
 0x4b6   : > { %v10582_v35 = vsel %vm10480_vm9, %v19498_v40, %v10469_v6  ;;  %v9195_v9 = vadd.f32 %v17326_v38, %v8979_v22  ;;  %v9237_v15 = vadd.f32 %v9189_v30, %v19486_v28  ;;  %v9244_v52 = vadd.f32 %v9196_v4, %v19496_v3  ;;  %10201 = vmatprep.subr.bf16.mxu0 %v13265_v58  ;;  %v19504_v54 = vld [vmem:[#allocation68_spill] sm:$0xff] }
 0x4b7   : > { %10624 = vst [vmem:[%s15244_s19 + $0xf8] sm:$0xff] %v10582_v35  ;;  %v10486_v24 = vsel %vm10480_vm9, %v10469_v6, %v10471_v5  ;;  %v9387_v39 = vadd.f32 %v9315_v57, %v9081_v61  ;;  %v19500_v55 = vrot.slane %v19499_v47, 1  ;;  %v19501_v16 = vrot.slane %v19496_v3, 1  ;;  %v19508_v35 = vld [vmem:[#allocation69_spill] sm:$0xff]  ;;  %v19509_v5 = vld [vmem:[#allocation11_spill] sm:$0xff] }
 0x4b8   : > { %v19502_v21 = vrot.slane %v19499_v47, 2  ;;  %10625 = vst [vmem:[%s15244_s19 + $0x100] sm:$0xff] %v10486_v24  ;;  %v9321_v23 = vadd.f32 %v9237_v15, %v17303_v2  ;;  %v9477_v22 = vadd.f32 %v9429_v62, %v8865_v14  ;;  %v19503_v41 = vmax.f32 %v17068_v46, 0.0  ;;  %7012 = vmatmul.mubr.bf16.gmra.mrb[168].mxu1 %v17207_v48  ;;  %v13271_v24 = vld [vmem:[%s19119_s15 + $0x44] ss:$8 sps:$4 sm:$0xff]  }
 0x4b9   : > { %v9266_v12 = vsel %vm8769_vm1, %v19501_v16, %v19500_v55  ;;  %v9435_v56 = vadd.f32 %v9387_v39, %v19486_v28  ;;  %v9442_v25 = vadd.f32 %v9394_v34, %v19496_v3  ;;  %v9243_v29 = vadd.f32 %v9195_v9, %v19497_v37  ;;  %v19507_v28 = vld [vmem:[#allocation66_spill] sm:$0xff]  ;;  %10202 = vmatpush1.bf16.msra.mxu0 %v13263_v59  ;;  %v10477_v57 = vpop.permute.xlu0 %10476 }
 0x4ba   : > { %v9338_v50 = vsel %vm2492_vm2, %v9336_v27, %v19502_v21  ;;  %v9328_v42 = vadd.f32 %v9266_v12, %v9244_v52  ;;  %v10583_v19 = vsel %vm10480_vm9, %v19503_v41, %v10473_v31  ;;  %v10475_v27 = vpop.permute.xlu1 %10474  ;;  %v9393_v14 = vadd.f32 %v9321_v23, %v17326_v38  ;;  %12267 = vmatmul.mubr.bf16.gmra.mrb[92].mxu0 %v19507_v28  ;;  %v19513_v21 = vld [vmem:[#allocation30_spill] sm:$0xff] }
 0x4bb   : > { %10630 = vst [vmem:[%s15244_s19 + $0x128] sm:$0xff] %v10583_v19  ;;  %v9525_v13 = vadd.f32 %v9477_v22, %v9081_v61  ;;  %v19505_v30 = vrot.slane %v19504_v54, 1  ;;  %v19506_v58 = vrot.slane %v19497_v37, 1  ;;  %v10487_v3 = vsel %vm10480_vm9, %v10473_v31, %v10475_v27  ;;  %v13266_v61 = vld [vmem:[%s19119_s15 + $0x30] ss:$8 sps:$4 sm:$0xff]   ;;  %7019 = vmatprep.mubr.bf16.mxu1 %v19507_v28  ;;  %10203 = vmatprep.subr.bf16.mxu0 %v13268_v33  ;;  %v19521_v27 = vld [vmem:[#allocation15_spill] sm:$0xff] }
 0x4bc   : > { %v9400_v6 = vadd.f32 %v9338_v50, %v9328_v42  ;;  %v9483_v34 = vadd.f32 %v9435_v56, %v17303_v2  ;;  %v9490_v40 = vadd.f32 %v9442_v25, %v9266_v12  ;;  %v9016_v9 = vrot.slane %v19508_v35, 2  ;;  %10631 = vst [vmem:[%s15244_s19 + $0x130] sm:$0xff] %v10487_v3  ;;  %v19514_v31 = vld [vmem:[#allocation13_spill] sm:$0xff]  ;;  %v19522_v3 = vld [vmem:[#allocation18_spill] sm:$0xff] }
 0x4bd   : > { %v9263_v46 = vsel %vm8769_vm1, %v19506_v58, %v19505_v30  ;;  %v17395_v48 = vmul.f32 0.11111111, %v9525_v13  ;;  %v19510_v2 = vrot.slane %v19504_v54, 2  ;;  %v19511_v39 = vmax.f32 %v17071_v20, 0.0  ;;  %v19515_v20 = vld [vmem:[#allocation70_spill] sm:$0xff]  ;;  %10204 = vmatpush1.bf16.msra.mxu0 %v13266_v61 }
 0x4be   : > { %v9448_v15 = vadd.f32 %v9400_v6, %v19509_v5  ;;  %v9327_v62 = vadd.f32 %v9263_v46, %v9243_v29  ;;  %v19512_v55 = vpack.c.bf16 %v16919_v17, %v16908_v0  ;;  %v9531_v16 = vadd.f32 %v9483_v34, %v17326_v38  ;;  %10205 = vmatprep.subr.bf16.mxu0 %v13271_v24  ;;  %v13274_v30 = vld [vmem:[%s19119_s15 + $0x54] ss:$8 sps:$4 sm:$0xff]  }
 0x4bf   : > { %v9335_v52 = vsel %vm2492_vm2, %v9333_v45, %v19510_v2  ;;  %v10584_v47 = vsel %vm10480_vm9, %v19511_v39, %v10477_v57  ;;  %v9538_v12 = vadd.f32 %v9490_v40, %v9338_v50  ;;  %v9034_v59 = vrot.slane %v19513_v21, 2  ;;  %v10479_v45 = vpop.permute.xlu1 %10478  ;;  %v19518_v50 = vld [vmem:[#allocation73_spill] sm:$0xff]  ;;  %v19524_v40 = vld [vmem:[#allocation16_spill] sm:$0xff] }
 0x4c0   : > { %10229 = vmatprep.mubr.bf16.mxu0 %v19512_v55  ;;  %10636 = vst [vmem:[%s15244_s19 + $0x158] sm:$0xff] %v10584_v47  ;;  %v9496_v23 = vadd.f32 %v9448_v15, %v19514_v31  ;;  %v9399_v22 = vadd.f32 %v9335_v52, %v9327_v62  ;;  %v9441_v42 = vadd.f32 %v9393_v14, %v19497_v37  ;;  %v19516_v33 = vrot.slane %v19515_v20, 1  ;;  %v13269_v37 = vld [vmem:[%s19119_s15 + $0x40] ss:$8 sps:$4 sm:$0xff]  }
 0x4c1   : > { %v19517_v41 = vrot.slane %v19508_v35, 1  ;;  %v10488_v17 = vsel %vm10480_vm9, %v10477_v57, %v10479_v45  ;;  %v17421_v19 = vmul.f32 0.11111111, %v9531_v16  ;;  %v17423_v38 = vmul.f32 0.11111111, %v9538_v12  ;;  %7020 = vmatmul.mubr.bf16.gmra.mrb[172].mxu1 %v17245_v32  ;;  %v19528_v55 = vld [vmem:[#allocation71_spill] sm:$0xff]  ;;  %10206 = vmatpush1.bf16.msra.mxu0 %v13269_v37 }
 0x4c2   : > { %v19519_v56 = vrot.slane %v19518_v50, 1  ;;  %v19520_v25 = vrot.slane %v19513_v21, 1  ;;  %10637 = vst [vmem:[%s15244_s19 + $0x160] sm:$0xff] %v10488_v17  ;;  %v9544_v14 = vadd.f32 %v9496_v23, %v19521_v27  ;;  %v9447_v13 = vadd.f32 %v9399_v22, %v19509_v5  ;;  %v19529_v23 = vld [vmem:[#allocation74_spill] sm:$0xff]  ;;  %v19530_v32 = vld [vmem:[#allocation33_spill] sm:$0xff]  ;;  %10207 = vmatprep.subr.bf16.mxu0 %v13274_v30 }
 0x4c3   : > { %v8802_v0 = vsel %vm8769_vm1, %v19517_v41, %v19516_v33  ;;  %v9489_v6 = vadd.f32 %v9441_v42, %v9263_v46  ;;  %v19523_v34 = vrot.slane %v19522_v3, 2  ;;  %v19525_v61 = vrot.slane %v19524_v40, 2  ;;  %v13277_v41 = vld [vmem:[%s19119_s15 + $0x64] ss:$8 sps:$4 sm:$0xff]   ;;  %v19534_v30 = vld [vmem:[#allocation41_spill] sm:$0xff] }
 0x4c4   : > { %v17430_v29 = vsel %vm8769_vm1, %v19520_v25, %v19519_v56  ;;  %v8952_v54 = vadd.f32 %v8802_v0, %v19508_v35  ;;  %v19526_v46 = vrot.slane %v19515_v20, 2  ;;  %v17454_v62 = vmul.f32 0.11111111, %v9544_v14  ;;  %v19531_v20 = vld [vmem:[#allocation32_spill] sm:$0xff] }
 0x4c5   : > { %v8958_v28 = vadd.f32 %v17430_v29, %v19513_v21  ;;  %v9000_v57 = vsel %vm2492_vm2, %v19525_v61, %v19523_v34  ;;  %v9495_v2 = vadd.f32 %v9447_v13, %v19514_v31  ;;  %v9537_v24 = vadd.f32 %v9489_v6, %v9335_v52  ;;  %v19532_v56 = vld [vmem:[#allocation72_spill] sm:$0xff]  ;;  %v19533_v6 = vld [vmem:[#allocation31_spill] sm:$0xff] }
 0x4c6   : > { %v9018_v15 = vsel %vm2492_vm2, %v9016_v9, %v19526_v46  ;;  %v19527_v39 = vrot.slane %v19518_v50, 2  ;;  %v9162_v16 = vadd.f32 %v9000_v57, %v19528_v55  ;;  %v9360_v22 = vadd.f32 %v19529_v23, %v9000_v57  ;;  %v13272_v9 = vld [vmem:[%s19119_s15 + $0x50] ss:$8 sps:$4 sm:$0xff]   ;;  %v13594_v34 = vld [vmem:[%s13848_s21 + $0x148] sm:$0xff] }
 0x4c7   : > { %v9168_v12 = vadd.f32 %v9018_v15, %v8952_v54  ;;  %v17472_v42 = vmul.f32 0.11111111, %v9537_v24  ;;  %v9359_v33 = vadd.f32 %v19531_v20, %v19530_v32  ;;  %v8528_v40 = vrot.slane %v13594_v34, 7  ;;  %10208 = vmatpush1.bf16.msra.mxu0 %v13272_v9  ;;  %v13275_v55 = vld [vmem:[%s19119_s15 + $0x60] ss:$8 sps:$4 sm:$0xff]  }
 0x4c8   : > { %v17460_v47 = vsel %vm2492_vm2, %v9034_v59, %v19527_v39  ;;  %v9543_v59 = vadd.f32 %v9495_v2, %v19521_v27  ;;  %v9210_v17 = vadd.f32 %v9162_v16, %v19508_v35  ;;  %v9408_v37 = vadd.f32 %v9360_v22, %v19508_v35  ;;  %v13595_v35 = vld [vmem:[%s13848_s21 + $0x178] sm:$0xff]  ;;  %10209 = vmatprep.subr.bf16.mxu0 %v13277_v41 }
 0x4c9   : > { %v9174_v45 = vadd.f32 %v17460_v47, %v8958_v28  ;;  %v9216_v50 = vadd.f32 %v9168_v12, %v19513_v21  ;;  %v9407_v54 = vadd.f32 %v9359_v33, %v19533_v6  ;;  %v19535_v28 = vld [vmem:[#allocation39_spill] sm:$0xff]  ;;  %v19536_v2 = vrot.slane %v17061_v11, 7  ;;  %v19537_v12 = vld [vmem:[#allocation34_spill] sm:$0xff] }
 0x4ca   : > { %v17486_v13 = vmul.f32 0.11111111, %v9543_v59  ;;  %v9509_v3 = vadd.f32 %v19535_v28, %v19534_v30  ;;  %v9294_v61 = vadd.f32 %v9210_v17, %v8802_v0  ;;  %v9456_v46 = vadd.f32 %v9408_v37, %v8802_v0  ;;  %v13280_v22 = vld [vmem:[%s19119_s15 + $0x74] ss:$8 sps:$4 sm:$0xff]   ;;  %v19539_v17 = vld [vmem:[#allocation35_spill] sm:$0xff] }
 0x4cb   : > { %v17482_v25 = vadd.f32 %v9174_v45, %v19532_v56  ;;  %v9300_v57 = vadd.f32 %v9216_v50, %v17430_v29  ;;  %v17496_v24 = vsel %vm8584_vm0, 0.0, %v19536_v2  ;;  %v8534_v39 = vrot.slane %v13595_v35, 7  ;;  %10210 = vmatpush1.bf16.msra.mxu0 %v13275_v55  ;;  %v19555_v55 = vld [vmem:[#allocation36_spill] sm:$0xff] }
 0x4cc   : > { %v9455_v45 = vadd.f32 %v9407_v54, %v19537_v12  ;;  %v19538_v23 = vmov %v19536_v2  ;;  %v9366_v9 = vadd.f32 %v9294_v61, %v9018_v15  ;;  %v9504_v32 = vadd.f32 %v9456_v46, %v9018_v15  ;;  %v19541_v15 = vld [vmem:[#allocation45_spill] sm:$0xff]  ;;  %v17545_v46 = vld [vmem:[%s13848_s21 + $0x140] sm:$0xff]  ;;  %10211 = vmatprep.subr.bf16.mxu0 %v13280_v22 }
 0x4cd   : > { %v17508_v0 = vsel %vm8584_vm0, %v19538_v23, 0.0  ;;  %v9372_v59 = vadd.f32 %v9300_v57, %v17460_v47  ;;  %v17517_v11 = vmul.f32 0.11111111, %v9509_v3  ;;  %v17521_v41 = vsel %vm8584_vm0, 0.0, %v8528_v40  ;;  %v13278_v61 = vld [vmem:[%s19119_s15 + $0x70] ss:$8 sps:$4 sm:$0xff]  }
 0x4ce   : > { %v9503_v50 = vadd.f32 %v9455_v45, %v19539_v17  ;;  %v17524_v6 = vsel %vm8584_vm0, %v8528_v40, 0.0  ;;  %v9414_v54 = vadd.f32 %v9366_v9, %v19513_v21  ;;  %v17529_v28 = vadd.f32 %v16995_v49, %v19541_v15  ;;  %v13283_v2 = vld [vmem:[%s19119_s15 + $0x84] ss:$8 sps:$4 sm:$0xff]   ;;  %v19549_v45 = vld [vmem:[#allocation78_spill] sm:$0xff] }
 0x4cf   : > { %19540 = vst [vmem:[#allocation61_spill] sm:$0xff] %v17517_v11  ;;  %v17532_v34 = vsel %vm8584_vm0, 0.0, %v8534_v39  ;;  %v17535_v3 = vsel %vm8584_vm0, %v8534_v39, 0.0  ;;  %v17560_v17 = vmul.f32 0.11111111, %v9504_v32  ;;  %10212 = vmatpush1.bf16.msra.mxu0 %v13278_v61  ;;  %v19548_v15 = vrot.slane %v19532_v56, 1 }
 0x4d0   : > { %19542 = vst [vmem:[#allocation62_spill] sm:$0xff] %v17532_v34  ;;  %19543 = vst [vmem:[#allocation63_spill] sm:$0xff] %v17535_v3  ;;  %v17540_v57 = vmul.f32 0.11111111, %v9503_v50  ;;  %v9462_v35 = vadd.f32 %v9414_v54, %v17430_v29  ;;  %v13281_v29 = vld [vmem:[%s19119_s15 + $0x80] ss:$8 sps:$4 sm:$0xff]   ;;  %10213 = vmatprep.subr.bf16.mxu0 %v13283_v2  ;;  %v9420_v39 = vadd.f32 %v9372_v59, %v19532_v56 }
 0x4d1   : > { %19545 = vst [vmem:[#allocation65_spill] sm:$0xff] %v17560_v17  ;;  %v19546_v50 = vld [vmem:[#allocation75_spill] sm:$0xff]  ;;  %v19550_v12 = vrot.slane %v19549_v45, 1  ;;  %v19551_v23 = vld [vmem:[#allocation76_spill] sm:$0xff]  ;;  %v13286_v61 = vld [vmem:[%s19119_s15 + $0x94] ss:$8 sps:$4 sm:$0xff]  }
 0x4d2   : > { %19544 = vst [vmem:[#allocation64_spill] sm:$0xff] %v17540_v57  ;;  %v9510_v22 = vadd.f32 %v9462_v35, %v17460_v47  ;;  %v19547_v54 = vrot.slane %v19546_v50, 1  ;;  %v19552_v37 = vrot.slane %v19551_v23, 1  ;;  %v9052_v47 = vrot.slane %v19532_v56, 2  ;;  %v19561_v59 = vld [vmem:[#allocation80_spill] sm:$0xff] }
 0x4d3   : > { %v9070_v32 = vrot.slane %v19551_v23, 2  ;;  %v19553_v16 = vrot.slane %v19546_v50, 2  ;;  %v19556_v33 = vrot.slane %v19555_v55, 1  ;;  %10214 = vmatpush1.bf16.msra.mxu0 %v13281_v29  ;;  %v9067_v4 = vrot.slane %v19561_v59, 2 }
 0x4d4   : > { %v8838_v21 = vsel %vm8769_vm1, %v19548_v15, %v19547_v54  ;;  %v8856_v9 = vsel %vm8769_vm1, %v19552_v37, %v19550_v12  ;;  %v17580_v35 = vmul.f32 0.11111111, %v9510_v22  ;;  %v19554_v12 = vrot.slane %v19549_v45, 2  ;;  %v19557_v22 = vld [vmem:[#allocation40_spill] sm:$0xff]  ;;  %10215 = vmatprep.subr.bf16.mxu0 %v13286_v61  ;;  %v19565_v61 = vld [vmem:[#allocation38_spill] sm:$0xff] }
 0x4d5   : > { %v8964_v40 = vadd.f32 %v8838_v21, %v19532_v56  ;;  %v8970_v54 = vadd.f32 %v8856_v9, %v19551_v23  ;;  %v9306_v15 = vadd.f32 %v17482_v25, %v8838_v21  ;;  %v9054_v37 = vsel %vm2492_vm2, %v9052_v47, %v19553_v16  ;;  %v13284_v16 = vld [vmem:[%s19119_s15 + $0x90] ss:$8 sps:$4 sm:$0xff]  }
 0x4d6   : > { %v9072_v2 = vsel %vm2492_vm2, %v9070_v32, %v19554_v12  ;;  %v19558_v52 = vrot.slane %v19557_v22, 1  ;;  %v9468_v45 = vadd.f32 %v9420_v39, %v8838_v21  ;;  %v19559_v47 = vld [vmem:[#allocation82_spill] sm:$0xff]  ;;  %v19562_v32 = vrot.slane %v19561_v59, 1 }
 0x4d7   : > { %v9180_v25 = vadd.f32 %v9054_v37, %v8964_v40  ;;  %v9186_v20 = vadd.f32 %v9072_v2, %v8970_v54  ;;  %v9378_v50 = vadd.f32 %v9306_v15, %v9054_v37  ;;  %v19560_v56 = vrot.slane %v19559_v47, 1  ;;  %v13289_v40 = vld [vmem:[%s19119_s15 + $0xa4] ss:$8 sps:$4 sm:$0xff]   ;;  %v19563_v54 = vld [vmem:[#allocation77_spill] sm:$0xff]  ;;  %10216 = vmatpush1.bf16.msra.mxu0 %v13284_v16 }
 0x4d8   : > { %v8835_v58 = vsel %vm8769_vm1, %v19558_v52, %v19556_v33  ;;  %v9049_v33 = vrot.slane %v19557_v22, 2  ;;  %v9516_v14 = vadd.f32 %v9468_v45, %v9054_v37  ;;  %v9299_v7 = vadd.f32 %v19566_v8, %v19565_v61  ;;  %v19569_v45 = vld [vmem:[#allocation79_spill] sm:$0xff]  ;;  %10217 = vmatprep.subr.bf16.mxu0 %v13289_v40  ;;  %v13292_v16 = vld [vmem:[%s19119_s15 + $0xb4] ss:$8 sps:$4 sm:$0xff]  }
 0x4d9   : > { %v8853_v12 = vsel %vm8769_vm1, %v19562_v32, %v19560_v56  ;;  %v8963_v52 = vadd.f32 %v8835_v58, %v19557_v22  ;;  %v9228_v29 = vadd.f32 %v9180_v25, %v19551_v23  ;;  %v9234_v15 = vadd.f32 %v9186_v20, %v19563_v54  ;;  %v19567_v25 = vld [vmem:[#allocation42_spill] sm:$0xff]  ;;  %v13287_v20 = vld [vmem:[%s19119_s15 + $0xa0] ss:$8 sps:$4 sm:$0xff]  }
 0x4da   : > { %v9426_v21 = vadd.f32 %v9378_v50, %v19551_v23  ;;  %v8969_v39 = vadd.f32 %v8853_v12, %v19561_v59  ;;  %v19564_v56 = vrot.slane %v19555_v55, 2  ;;  %v9305_v11 = vadd.f32 %v19567_v25, %v8835_v58 }
 0x4db   : > { %v9312_v49 = vadd.f32 %v9228_v29, %v8856_v9  ;;  %v17626_v23 = vmul.f32 0.11111111, %v9516_v14  ;;  %v19568_v55 = vrot.slane %v19559_v47, 2  ;;  %v9371_v50 = vadd.f32 %v9299_v7, %v19534_v30  ;;  %v19572_v7 = vld [vmem:[#allocation26_spill] sm:$0xff]  ;;  %10218 = vmatpush1.bf16.msra.mxu0 %v13287_v20 }
 0x4dc   : > { %v9051_v32 = vsel %vm2492_vm2, %v9049_v33, %v19564_v56  ;;  %v9474_v18 = vadd.f32 %v9426_v21, %v8856_v9  ;;  %v19570_v8 = vrot.slane %v19569_v45, 1  ;;  %v19571_v9 = vrot.slane %v19563_v54, 1  ;;  %v19574_v56 = vld [vmem:[#allocation22_spill] sm:$0xff]  ;;  %10219 = vmatprep.subr.bf16.mxu0 %v13292_v16 }
 0x4dd   : > { %v9179_v57 = vadd.f32 %v9051_v32, %v8963_v52  ;;  %v9069_v37 = vsel %vm2492_vm2, %v9067_v4, %v19568_v55  ;;  %v9384_v33 = vadd.f32 %v9312_v49, %v9072_v2  ;;  %v9377_v21 = vadd.f32 %v9305_v11, %v9051_v32  ;;  %v13290_v11 = vld [vmem:[%s19119_s15 + $0xb0] ss:$8 sps:$4 sm:$0xff]  }
 0x4de   : > { %v8874_v52 = vsel %vm8769_vm1, %v19571_v9, %v19570_v8  ;;  %v9522_v14 = vadd.f32 %v9474_v18, %v9072_v2  ;;  %v9185_v29 = vadd.f32 %v9069_v37, %v8969_v39  ;;  %v9419_v4 = vadd.f32 %v9371_v50, %v19557_v22  ;;  %v19576_v8 = vld [vmem:[#allocation81_spill] sm:$0xff]  ;;  %v13295_v50 = vld [vmem:[%s19119_s15 + $0xc4] ss:$8 sps:$4 sm:$0xff]  }
 0x4df   : > { %v9227_v47 = vadd.f32 %v9179_v57, %v19561_v59  ;;  %v19573_v30 = vrot.slane %v19572_v7, 1  ;;  %v19575_v61 = vrot.slane %v19574_v56, 1  ;;  %v8976_v40 = vadd.f32 %v8874_v52, %v19563_v54  ;;  %10220 = vmatpush1.bf16.msra.mxu0 %v13290_v11 }
 0x4e0   : > { %v17648_v55 = vmul.f32 0.11111111, %v9522_v14  ;;  %v9233_v9 = vadd.f32 %v9185_v29, %v19576_v8  ;;  %v9425_v57 = vadd.f32 %v9377_v21, %v19561_v59  ;;  %v9467_v2 = vadd.f32 %v9419_v4, %v8835_v58  ;;  %10221 = vmatprep.subr.bf16.mxu0 %v13295_v50 }
 0x4e1   : > { %v8892_v25 = vsel %vm8769_vm1, %v19575_v61, %v19573_v30  ;;  %v9311_v49 = vadd.f32 %v9227_v47, %v8853_v12  ;;  %v9088_v22 = vrot.slane %v19563_v54, 2  ;;  %v9106_v39 = vrot.slane %v19574_v56, 2 }
 0x4e2   : > { %v8982_v18 = vadd.f32 %v8892_v25, %v19574_v56  ;;  %v9318_v29 = vadd.f32 %v9234_v15, %v8874_v52  ;;  %v9432_v47 = vadd.f32 %v9384_v33, %v19563_v54  ;;  %v9473_v30 = vadd.f32 %v9425_v57, %v8853_v12  ;;  %v13293_v15 = vld [vmem:[%s19119_s15 + $0xc0] ss:$8 sps:$4 sm:$0xff]  }
 0x4e3   : > { %v9383_v20 = vadd.f32 %v9311_v49, %v9069_v37  ;;  %v9515_v61 = vadd.f32 %v9467_v2, %v9051_v32  ;;  %v19577_v58 = vrot.slane %v19569_v45, 2  ;;  %v19578_v21 = vrot.slane %v19572_v7, 2  ;;  %v19579_v32 = vld [vmem:[#allocation83_spill] sm:$0xff]  ;;  %10222 = vmatpush1.bf16.msra.mxu0 %v13293_v15 }
 0x4e4   : > { %v9480_v17 = vadd.f32 %v9432_v47, %v8874_v52  ;;  %v9521_v54 = vadd.f32 %v9473_v30, %v9069_v37  ;;  %v19580_v45 = vrot.slane %v19579_v32, 1  ;;  %v19581_v33 = vrot.slane %v19576_v8, 1  ;;  %v13389_v30 = vld [vmem:[%s19117_s13] ss:$8 sps:$4 sm:$0xff]   ;;  %v13301_v15 = vld [vmem:[%s19119_s15 + $0xe4] ss:$8 sps:$4 sm:$0xff]  }
 0x4e5   : > { %v9090_v59 = vsel %vm2492_vm2, %v9088_v22, %v19577_v58  ;;  %v9108_v16 = vsel %vm2492_vm2, %v9106_v39, %v19578_v21  ;;  %v17673_v12 = vmul.f32 0.11111111, %v9515_v61  ;;  %v19582_v49 = vrot.slane %v16938_v60, 1  ;;  %v13391_v22 = vld [vmem:[%s19117_s13 + $0x4] ss:$8 sps:$4 sm:$0xff]  }
 0x4e6   : > { %v9192_v4 = vadd.f32 %v9090_v59, %v8976_v40  ;;  %v9198_v34 = vadd.f32 %v9108_v16, %v8982_v18  ;;  %v9390_v3 = vadd.f32 %v9318_v29, %v9090_v59  ;;  %v8871_v7 = vsel %vm8769_vm1, %v19581_v33, %v19580_v45  ;;  %v13298_v18 = vld [vmem:[%s19119_s15 + $0xd4] ss:$8 sps:$4 sm:$0xff]   ;;  %8129 = vmatprep.subr.bf16.mxu1 %v13391_v22  ;;  %v13296_v58 = vld [vmem:[%s19119_s15 + $0xd0] ss:$8 sps:$4 sm:$0xff]   ;;  %v19587_v22 = vld [vmem:[#allocation84_spill] sm:$0xff] }
 0x4e7   : > { %v19583_v40 = vrot.slane %v16928_v51, 1  ;;  %v9528_v57 = vadd.f32 %v9480_v17, %v9090_v59  ;;  %v8975_v2 = vadd.f32 %v8871_v7, %v19576_v8  ;;  %v17694_v39 = vmul.f32 0.11111111, %v9521_v54  ;;  %10223 = vmatprep.subr.bf16.mxu0 %v13298_v18  ;;  %8130 = vmatpush1.bf16.msra.mxu1 %v13389_v30  ;;  %v13395_v18 = vld [vmem:[%s19117_s13 + $0x10] ss:$8 sps:$4 sm:$0xff]  }
 0x4e8   : > { %v9240_v37 = vadd.f32 %v9192_v4, %v19574_v56  ;;  %v9438_v11 = vadd.f32 %v9390_v3, %v19574_v56  ;;  %v9085_v50 = vrot.slane %v19576_v8, 2  ;;  %v9103_v47 = vrot.slane %v16928_v51, 2  ;;  %10224 = vmatpush1.bf16.msra.mxu0 %v13296_v58 }
 0x4e9   : > { %v8889_v52 = vsel %vm8769_vm1, %v19583_v40, %v19582_v49  ;;  %v17702_v56 = vmul.f32 0.11111111, %v9528_v57  ;;  %v9317_v61 = vadd.f32 %v9233_v9, %v8871_v7  ;;  %v19584_v21 = vrot.slane %v19579_v32, 2  ;;  %v13397_v9 = vld [vmem:[%s19117_s13 + $0x14] ss:$8 sps:$4 sm:$0xff]   ;;  %10225 = vmatprep.subr.bf16.mxu0 %v13301_v15 }
 0x4ea   : > { %v8981_v29 = vadd.f32 %v8889_v52, %v16928_v51  ;;  %v9324_v3 = vadd.f32 %v9240_v37, %v8892_v25  ;;  %v9486_v17 = vadd.f32 %v9438_v11, %v8892_v25  ;;  %v19585_v54 = vrot.slane %v16938_v60, 2  ;;  %v19586_v60 = vld [vmem:[#allocation28_spill] sm:$0xff]  ;;  %8131 = vmatprep.subr.bf16.mxu1 %v13397_v9  ;;  %v19605_v9 = vld [vmem:[#allocation91_spill] sm:$0xff] }
 0x4eb   : > { %v9087_v4 = vsel %vm2492_vm2, %v9085_v50, %v19584_v21  ;;  %v9431_v45 = vadd.f32 %v9383_v20, %v19576_v8  ;;  %v9246_v57 = vadd.f32 %v9198_v34, %v19586_v60  ;;  %v19588_v8 = vrot.slane %v19587_v22, 1  ;;  %v13299_v34 = vld [vmem:[%s19119_s15 + $0xe0] ss:$8 sps:$4 sm:$0xff]   ;;  %8132 = vmatpush1.bf16.msra.mxu1 %v13395_v18 }
 0x4ec   : > { %v9105_v25 = vsel %vm2492_vm2, %v9103_v47, %v19585_v54  ;;  %v9396_v33 = vadd.f32 %v9324_v3, %v9108_v16  ;;  %v9534_v49 = vadd.f32 %v9486_v17, %v9108_v16  ;;  %v9191_v32 = vadd.f32 %v9087_v4, %v8975_v2  ;;  %v12058_v2 = vpop.f32.mrb[144].mxu1  ;;  %v19590_v21 = vld [vmem:[#allocation87_spill] sm:$0xff]  ;;  %10226 = vmatpush1.bf16.msra.mxu0 %v13299_v34 }
 0x4ed   : > { %v9197_v40 = vadd.f32 %v9105_v25, %v8981_v29  ;;  %v9389_v37 = vadd.f32 %v9317_v61, %v9087_v4  ;;  %v9479_v11 = vadd.f32 %v9431_v45, %v8871_v7  ;;  %v19589_v20 = vrot.slane %v19586_v60, 1  ;;  %v12059_v17 = vpop.f32.mrb[145].mxu1  ;;  %v13304_v45 = vld [vmem:[%s19119_s15 + $0xf4] ss:$8 sps:$4 sm:$0xff]   ;;  %v13307_v34 = vld [vmem:[%s19119_s15 + $0x104] ss:$8 sps:$4 sm:$0xff]  }
 0x4ee   : > { %v17731_v47 = vmul.f32 0.11111111, %v9534_v49  ;;  %v9239_v16 = vadd.f32 %v9191_v32, %v16928_v51  ;;  %v9342_v7 = vrot.slane %v19586_v60, 2  ;;  %v9444_v29 = vadd.f32 %v9396_v33, %v19586_v60  ;;  %v12061_v49 = vpop.f32.mrb[146].mxu1  ;;  %10227 = vmatprep.subr.bf16.mxu0 %v13304_v45 }
 0x4ef   : > { %v9272_v50 = vsel %vm8769_vm1, %v19589_v20, %v19588_v8  ;;  %v9437_v30 = vadd.f32 %v9389_v37, %v16928_v51  ;;  %v9527_v3 = vadd.f32 %v9479_v11, %v9087_v4  ;;  %v9245_v54 = vadd.f32 %v9197_v40, %v19590_v21  ;;  %v17752_v4 = vld [vmem:[%s13848_s21 + $0x170] sm:$0xff]  ;;  %v12062_v60 = vpop.f32.mrb[147].mxu1  ;;  %s12544_s21 = smul.u32 6144, %s13779_s28 }
 0x4f0   : > { %v9330_v61 = vadd.f32 %v9272_v50, %v9246_v57  ;;  %v9323_v58 = vadd.f32 %v9239_v16, %v8889_v52  ;;  %v17746_v33 = vadd.f32 %v12059_v17, %v12058_v2  ;;  %v19592_v32 = vrot.slane %v19587_v22, 2  ;;  %v13401_v57 = vld [vmem:[%s19117_s13 + $0x20] ss:$8 sps:$4 sm:$0xff]  }
 0x4f1   : > { %v9485_v15 = vadd.f32 %v9437_v30, %v8889_v52  ;;  %v9492_v11 = vadd.f32 %v9444_v29, %v9272_v50  ;;  %v17758_v20 = vmul.f32 0.11111111, %v9527_v3  ;;  %v17760_v16 = vadd.f32 %v12062_v60, %v12061_v49  ;;  %v19594_v22 = vld [vmem:[#allocation88_spill] sm:$0xff]  ;;  %v13302_v50 = vld [vmem:[%s19119_s15 + $0xf0] ss:$8 sps:$4 sm:$0xff]   ;;  %s19052_s28 = scalar_lea.hbm %s19121_s17, %s12544_s21 }
 0x4f2   : > { %19591 = vst [vmem:[#allocation25_spill] sm:$0xff] %v17746_v33  ;;  %v9344_v51 = vsel %vm2492_vm2, %v9342_v7, %v19592_v32  ;;  %v9395_v8 = vadd.f32 %v9323_v58, %v9105_v25  ;;  %v19595_v2 = vrot.slane %v19594_v22, 1  ;;  %v19596_v7 = vrot.slane %v19590_v21, 1  ;;  %v13403_v52 = vld [vmem:[%s19117_s13 + $0x24] ss:$8 sps:$4 sm:$0xff]   ;;  %10228 = vmatpush1.bf16.msra.mxu0 %v13302_v50  ;;  %v19615_v33 = vld [vmem:[#allocation46_spill] sm:$0xff] }
 0x4f3   : > { %v9402_v37 = vadd.f32 %v9344_v51, %v9330_v61  ;;  %19593 = vst [vmem:[#allocation24_spill] sm:$0xff] %v17760_v16  ;;  %v9533_v18 = vadd.f32 %v9485_v15, %v9105_v25  ;;  %v9540_v30 = vadd.f32 %v9492_v11, %v9344_v51  ;;  %v13406_v61 = vld [vmem:[%s19117_s13 + $0x34] ss:$8 sps:$4 sm:$0xff]   ;;  %v19597_v58 = vrot.slane %v17545_v46, 7  ;;  %8133 = vmatprep.subr.bf16.mxu1 %v13403_v52 }
 0x4f4   : > { %v9269_v17 = vsel %vm8769_vm1, %v19596_v7, %v19595_v2  ;;  %v9339_v25 = vrot.slane %v19590_v21, 2  ;;  %v9443_v32 = vadd.f32 %v9395_v8, %v19590_v21  ;;  %v19600_v15 = vld [vmem:[#allocation89_spill] sm:$0xff]  ;;  %8134 = vmatpush1.bf16.msra.mxu1 %v13401_v57  ;;  %v19606_v59 = vrot.slane %v19605_v9, 1  ;;  %10270 = vmatprep.subr.bf16.mxu0 %v13307_v34 }
 0x4f5   : > { %v9450_v29 = vadd.f32 %v9402_v37, %v19509_v5  ;;  %v9329_v3 = vadd.f32 %v9269_v17, %v9245_v54  ;;  %v17780_v49 = vsel %vm8584_vm0, 0.0, %v19597_v58  ;;  %v19598_v54 = vld [vmem:[#allocation90_spill] sm:$0xff]  ;;  %v19601_v37 = vrot.slane %v19600_v15, 1  ;;  %v19603_v7 = vld [vmem:[#allocation93_spill] sm:$0xff]  ;;  %8135 = vmatprep.subr.bf16.mxu1 %v13406_v61 }
 0x4f6   : > { %v19599_v51 = vrot.slane %v19598_v54, 1  ;;  %v17792_v60 = vmul.f32 0.11111111, %v9533_v18  ;;  %v17795_v45 = vmul.f32 0.11111111, %v9540_v30  ;;  %v19604_v58 = vrot.slane %v19603_v7, 1 }
 0x4f7   : > { %v9498_v2 = vadd.f32 %v9450_v29, %v19514_v31  ;;  %v13404_v8 = vld [vmem:[%s19117_s13 + $0x30] ss:$8 sps:$4 sm:$0xff]   ;;  %v19607_v52 = vrot.slane %v19594_v22, 2  ;;  %v13310_v50 = vld [vmem:[%s19119_s15 + $0x114] ss:$8 sps:$4 sm:$0xff]   ;;  %v9022_v14 = vrot.slane %v19600_v15, 2  ;;  %v9361_v34 = vadd.f32 %v17529_v28, %v19615_v33 }
 0x4f8   : > { %v8808_v11 = vsel %vm8769_vm1, %v19601_v37, %v19599_v51  ;;  %19602 = vst [vmem:[#allocation29_spill] sm:$0xff] %v17795_v45  ;;  %v17802_v21 = vsel %vm8769_vm1, %v19606_v59, %v19604_v58  ;;  %v9491_v51 = vadd.f32 %v9443_v32, %v9269_v17  ;;  %v13305_v59 = vld [vmem:[%s19119_s15 + $0x100] ss:$8 sps:$4 sm:$0xff]   ;;  %v19608_v58 = vld [vmem:[#allocation86_spill] sm:$0xff]  ;;  %v19610_v17 = vld [vmem:[#allocation85_spill] sm:$0xff]  ;;  %v9040_v40 = vrot.slane %v19605_v9, 2  ;;  %8136 = vmatpush1.bf16.msra.mxu1 %v13404_v8 }
 0x4f9   : > { %v9341_v18 = vsel %vm2492_vm2, %v9339_v25, %v19607_v52  ;;  %v8954_v29 = vadd.f32 %v8808_v11, %v19600_v15  ;;  %v8960_v57 = vadd.f32 %v17802_v21, %v19605_v9  ;;  %v9546_v37 = vadd.f32 %v9498_v2, %v19521_v27  ;;  %v19612_v30 = vld [vmem:[#allocation95_spill] sm:$0xff] }
 0x4fa   : > { %v9401_v22 = vadd.f32 %v9341_v18, %v9329_v3  ;;  %v19609_v25 = vrot.slane %v19608_v58, 2  ;;  %v19611_v32 = vrot.slane %v19610_v17, 2  ;;  %v9539_v61 = vadd.f32 %v9491_v51, %v9341_v18  ;;  %v19614_v58 = vld [vmem:[#allocation96_spill] sm:$0xff] }
 0x4fb   : > { %v17830_v2 = vmul.f32 0.11111111, %v9546_v37  ;;  %v13409_v18 = vld [vmem:[%s19117_s13 + $0x44] ss:$8 sps:$4 sm:$0xff]   ;;  %v19616_v51 = vrot.slane %v17545_v46, 7  ;;  %v19621_v28 = vrot.slane %v19603_v7, 2 }
 0x4fc   : > { %v9006_v52 = vsel %vm2492_vm2, %v19611_v32, %v19609_v25  ;;  %v9449_v3 = vadd.f32 %v9401_v22, %v19509_v5  ;;  %v19618_v37 = vld [vmem:[#allocation20_spill] sm:$0xff]  ;;  %v19620_v22 = vrot.slane %v19598_v54, 2  ;;  %v13412_v7 = vld [vmem:[%s19117_s13 + $0x54] ss:$8 sps:$4 sm:$0xff]   ;;  %8137 = vmatprep.subr.bf16.mxu1 %v13409_v18 }
 0x4fd   : > { %v9164_v16 = vadd.f32 %v9006_v52, %v19612_v30  ;;  %19613 = vst [vmem:[#allocation19_spill] sm:$0xff] %v17830_v2  ;;  %v9362_v17 = vadd.f32 %v19614_v58, %v9006_v52  ;;  %v17842_v25 = vsel %vm8584_vm0, %v19616_v51, 0.0  ;;  %v19617_v30 = vld [vmem:[#allocation21_spill] sm:$0xff]  ;;  %v9042_v33 = vsel %vm2492_vm2, %v9040_v40, %v19621_v28  ;;  %v13407_v46 = vld [vmem:[%s19117_s13 + $0x40] ss:$8 sps:$4 sm:$0xff]  }
 0x4fe   : > { %v19619_v32 = vpack.c.bf16 %v19617_v30, %v19618_v37  ;;  %v9024_v52 = vsel %vm2492_vm2, %v9022_v14, %v19620_v22  ;;  %v13308_v51 = vld [vmem:[%s19119_s15 + $0x110] ss:$8 sps:$4 sm:$0xff]   ;;  %v19622_v14 = vpack.c.bf16 %v17203_v44, %v17185_v1  ;;  %v9176_v30 = vadd.f32 %v9042_v33, %v8960_v57  ;;  %v19623_v44 = vld [vmem:[#allocation44_spill] sm:$0xff]  ;;  %v19627_v57 = vld [vmem:[#allocation47_spill] sm:$0xff]  ;;  %8138 = vmatpush1.bf16.msra.mxu1 %v13407_v46 }
 0x4ff   : > { %v9212_v8 = vadd.f32 %v9164_v16, %v19600_v15  ;;  %v9497_v16 = vadd.f32 %v9449_v3, %v19514_v31  ;;  %v9170_v54 = vadd.f32 %v9024_v52, %v8954_v29  ;;  %v9410_v1 = vadd.f32 %v9362_v17, %v19600_v15  ;;  %v19624_v3 = vld [vmem:[#allocation51_spill] sm:$0xff]  ;;  %v13410_v15 = vld [vmem:[%s19117_s13 + $0x50] ss:$8 sps:$4 sm:$0xff]   ;;  %8139 = vmatprep.subr.bf16.mxu1 %v13412_v7  ;;  %v13316_v46 = vld [vmem:[%s19119_s15 + $0x134] ss:$8 sps:$4 sm:$0xff]  }
 0x500   : > { %10230 = vmatmul.mubr.bf16.vlgmr.msra.gmra.mrb[96].mxu0 %v19619_v32  ;;  %v9409_v32 = vadd.f32 %v9361_v34, %v19623_v44  ;;  %v17876_v28 = vmul.f32 0.11111111, %v9539_v61  ;;  %v13311_v34 = vld [vmem:[%s19119_s15 + $0x120] ss:$8 sps:$4 sm:$0xff]   ;;  %v19649_v61 = vld [vmem:[#allocation50_spill] sm:$0xff] }
 0x501   : > { %10271 = vmatpush1.bf16.msra.mxu0 %v13305_v59  ;;  %10239 = vmatprep.mubr.bf16.mxu0 %v19622_v14  ;;  %v13313_v59 = vld [vmem:[%s19119_s15 + $0x124] ss:$8 sps:$4 sm:$0xff]   ;;  %v9296_v37 = vadd.f32 %v9212_v8, %v8808_v11  ;;  %v9545_v22 = vadd.f32 %v9497_v16, %v19521_v27  ;;  %v9218_v29 = vadd.f32 %v9170_v54, %v19605_v9 }
 0x502   : > { %10272 = vmatprep.subr.bf16.mxu0 %v13310_v50  ;;  %v19625_v14 = vld [vmem:[#allocation55_spill] sm:$0xff]  ;;  %v19626_v50 = vld [vmem:[#allocation92_spill] sm:$0xff]  ;;  %v9458_v2 = vadd.f32 %v9410_v1, %v8808_v11  ;;  %v9457_v8 = vadd.f32 %v9409_v32, %v19627_v57  ;;  %v19629_v32 = vld [vmem:[#allocation94_spill] sm:$0xff]  ;;  %8140 = vmatpush1.bf16.msra.mxu1 %v13410_v15  ;;  %v9073_v1 = vrot.slane %v17074_v36, 2 }
 0x503   : > { %v9511_v40 = vadd.f32 %v19625_v14, %v19624_v3  ;;  %v9224_v58 = vadd.f32 %v9176_v30, %v19626_v50  ;;  %v9368_v45 = vadd.f32 %v9296_v37, %v9024_v52  ;;  %v17891_v18 = vmul.f32 0.11111111, %v9545_v22  ;;  %v19628_v30 = vld [vmem:[#allocation49_spill] sm:$0xff]  ;;  %v19634_v57 = vld [vmem:[#allocation56_spill] sm:$0xff] }
 0x504   : > { %v9302_v11 = vadd.f32 %v9218_v29, %v17802_v21  ;;  %v9506_v54 = vadd.f32 %v9458_v2, %v9024_v52  ;;  %v9505_v37 = vadd.f32 %v9457_v8, %v19628_v30  ;;  %v19630_v22 = vrot.slane %v19629_v32, 1  ;;  %v19632_v29 = vld [vmem:[#allocation97_spill] sm:$0xff] }
 0x505   : > { %10273 = vmatpush1.bf16.msra.mxu0 %v13308_v51  ;;  %v9416_v16 = vadd.f32 %v9368_v45, %v19605_v9  ;;  %v17899_v51 = vmul.f32 0.11111111, %v9511_v40  ;;  %v19631_v7 = vrot.slane %v19626_v50, 1  ;;  %v19633_v14 = vrot.slane %v19632_v29, 1  ;;  %v13415_v45 = vld [vmem:[%s19117_s13 + $0x64] ss:$8 sps:$4 sm:$0xff]  }
 0x506   : > { %10274 = vmatprep.subr.bf16.mxu0 %v13313_v59  ;;  %v9374_v44 = vadd.f32 %v9302_v11, %v9042_v33  ;;  %v19635_v17 = vrot.slane %v19634_v57, 1  ;;  %v19636_v2 = vpack.c.bf16 %v17294_v53, %v17281_v63  ;;  %v17920_v40 = vmul.f32 0.11111111, %v9506_v54  ;;  %v13314_v30 = vld [vmem:[%s19119_s15 + $0x130] ss:$8 sps:$4 sm:$0xff]   ;;  %8141 = vmatprep.subr.bf16.mxu1 %v13415_v45 }
 0x507   : > { %v8844_v59 = vsel %vm8769_vm1, %v19631_v7, %v19630_v22  ;;  %v9464_v52 = vadd.f32 %v9416_v16, %v17802_v21  ;;  %v17922_v8 = vmul.f32 0.11111111, %v9505_v37  ;;  %v19638_v63 = vpack.c.bf16 %v17347_v26, %v17342_v43  ;;  %v19639_v43 = vld [vmem:[#allocation52_spill] sm:$0xff] }
 0x508   : > { %v8862_v9 = vsel %vm8769_vm1, %v19635_v17, %v19633_v14  ;;  %10240 = vmatmul.mubr.bf16.gmra.mrb[100].mxu0 %v19636_v2  ;;  %v8966_v11 = vadd.f32 %v8844_v59, %v19626_v50  ;;  %v13413_v17 = vld [vmem:[%s19117_s13 + $0x60] ss:$8 sps:$4 sm:$0xff]   ;;  %v9058_v21 = vrot.slane %v19626_v50, 2  ;;  %v9076_v15 = vrot.slane %v19634_v57, 2 }
 0x509   : > { %19637 = vst [vmem:[#allocation23_spill] sm:$0xff] %v17922_v8  ;;  %10275 = vmatpush1.bf16.msra.mxu0 %v13311_v34  ;;  %10249 = vmatprep.mubr.bf16.mxu0 %v19638_v63  ;;  %v8972_v53 = vadd.f32 %v8862_v9, %v19634_v57  ;;  %v9308_v16 = vadd.f32 %v9224_v58, %v8844_v59  ;;  %v13319_v34 = vld [vmem:[%s19119_s15 + $0x144] ss:$8 sps:$4 sm:$0xff]   ;;  %v9055_v26 = vrot.slane %v19639_v43, 2  ;;  %v19640_v7 = vrot.slane %v19629_v32, 2  ;;  %v19652_v8 = vld [vmem:[#allocation54_spill] sm:$0xff] }
 0x50a   : > { %10276 = vmatprep.subr.bf16.mxu0 %v13316_v46  ;;  %v9512_v54 = vadd.f32 %v9464_v52, %v9042_v33  ;;  %v9422_v22 = vadd.f32 %v9374_v44, %v19626_v50  ;;  %v19641_v58 = vrot.slane %v19632_v29, 2  ;;  %v19642_v2 = vld [vmem:[#allocation43_spill] sm:$0xff]  ;;  %v19644_v33 = vrot.slane %v19639_v43, 1  ;;  %v13418_v32 = vld [vmem:[%s19117_s13 + $0x74] ss:$8 sps:$4 sm:$0xff]   ;;  %8142 = vmatpush1.bf16.msra.mxu1 %v13413_v17 }
 0x50b   : > { %v9060_v14 = vsel %vm2492_vm2, %v9058_v21, %v19640_v7  ;;  %v19643_v63 = vrot.slane %v19642_v2, 1  ;;  %v19645_v37 = vrot.slane %v17077_v10, 1  ;;  %v19646_v50 = vrot.slane %v17074_v36, 1  ;;  %v13416_v7 = vld [vmem:[%s19117_s13 + $0x70] ss:$8 sps:$4 sm:$0xff]   ;;  %8143 = vmatprep.subr.bf16.mxu1 %v13418_v32 }
 0x50c   : > { %v9078_v46 = vsel %vm2492_vm2, %v9076_v15, %v19641_v58  ;;  %v17965_v29 = vmul.f32 0.11111111, %v9512_v54  ;;  %v9182_v45 = vadd.f32 %v9060_v14, %v8966_v11  ;;  %v9380_v15 = vadd.f32 %v9308_v16, %v9060_v14  ;;  %v13322_v17 = vld [vmem:[%s19119_s15 + $0x154] ss:$8 sps:$4 sm:$0xff]   ;;  %v13320_v32 = vld [vmem:[%s19119_s15 + $0x150] ss:$8 sps:$4 sm:$0xff]  }
 0x50d   : > { %v8841_v52 = vsel %vm8769_vm1, %v19644_v33, %v19643_v63  ;;  %v17960_v44 = vsel %vm8769_vm1, %v19646_v50, %v19645_v37  ;;  %v9188_v21 = vadd.f32 %v9078_v46, %v8972_v53  ;;  %10277 = vmatpush1.bf16.msra.mxu0 %v13314_v30  ;;  %v13317_v37 = vld [vmem:[%s19119_s15 + $0x140] ss:$8 sps:$4 sm:$0xff]   ;;  %v9470_v58 = vadd.f32 %v9422_v22, %v8844_v59 }
 0x50e   : > { %v8965_v63 = vadd.f32 %v8841_v52, %v19639_v43  ;;  %v8971_v54 = vadd.f32 %v17960_v44, %v17074_v36  ;;  %v19647_v11 = vrot.slane %v19642_v2, 2  ;;  %10278 = vmatprep.subr.bf16.mxu0 %v13319_v34  ;;  %v9230_v16 = vadd.f32 %v9182_v45, %v19634_v57  ;;  %v19648_v59 = vld [vmem:[#allocation48_spill] sm:$0xff]  ;;  %8144 = vmatpush1.bf16.msra.mxu1 %v13416_v7 }
 0x50f   : > { %v9236_v22 = vadd.f32 %v9188_v21, %v19648_v59  ;;  %v9428_v33 = vadd.f32 %v9380_v15, %v19634_v57  ;;  %v9518_v50 = vadd.f32 %v9470_v58, %v9060_v14  ;;  %v19651_v30 = vpack.c.bf16 %v17421_v19, %v17395_v48 }
 0x510   : > { %v9057_v53 = vsel %vm2492_vm2, %v9055_v26, %v19647_v11  ;;  %v19650_v26 = vld [vmem:[#allocation53_spill] sm:$0xff]  ;;  %v13421_v11 = vld [vmem:[%s19117_s13 + $0x84] ss:$8 sps:$4 sm:$0xff]   ;;  %v9314_v45 = vadd.f32 %v9230_v16, %v8862_v9  ;;  %v9307_v57 = vadd.f32 %v19652_v8, %v8841_v52  ;;  %v9094_v14 = vrot.slane %v19648_v59, 2  ;;  %v19655_v16 = vld [vmem:[#allocation98_spill] sm:$0xff] }
 0x511   : > { %v9181_v2 = vadd.f32 %v9057_v53, %v8965_v63  ;;  %v9301_v34 = vadd.f32 %v19650_v26, %v19649_v61  ;;  %10250 = vmatmul.mubr.bf16.gmra.mrb[104].mxu0 %v19651_v30  ;;  %v9476_v21 = vadd.f32 %v9428_v33, %v8862_v9  ;;  %v13419_v61 = vld [vmem:[%s19117_s13 + $0x80] ss:$8 sps:$4 sm:$0xff]   ;;  %v19653_v48 = vpack.c.bf16 %v17454_v62, %v17423_v38  ;;  %v13424_v62 = vld [vmem:[%s19117_s13 + $0x94] ss:$8 sps:$4 sm:$0xff]  }
 0x512   : > { %10279 = vmatpush1.bf16.msra.mxu0 %v13317_v37  ;;  %v18007_v19 = vmul.f32 0.11111111, %v9518_v50  ;;  %v19654_v9 = vrot.slane %v17077_v10, 2  ;;  %v13325_v37 = vld [vmem:[%s19119_s15 + $0x164] ss:$8 sps:$4 sm:$0xff]   ;;  %v9386_v58 = vadd.f32 %v9314_v45, %v9078_v46  ;;  %v9379_v38 = vadd.f32 %v9307_v57, %v9057_v53  ;;  %8145 = vmatprep.subr.bf16.mxu1 %v13421_v11 }
 0x513   : > { %10259 = vmatprep.mubr.bf16.mxu0 %v19653_v48  ;;  %v9229_v15 = vadd.f32 %v9181_v2, %v17074_v36  ;;  %v9373_v7 = vadd.f32 %v9301_v34, %v19624_v3  ;;  %10280 = vmatprep.subr.bf16.mxu0 %v13322_v17  ;;  %v9524_v63 = vadd.f32 %v9476_v21, %v9078_v46  ;;  %v19656_v33 = vrot.slane %v19655_v16, 1  ;;  %v13323_v57 = vld [vmem:[%s19119_s15 + $0x160] ss:$8 sps:$4 sm:$0xff]  }
 0x514   : > { %v9075_v8 = vsel %vm2492_vm2, %v9073_v1, %v19654_v9  ;;  %v19657_v3 = vrot.slane %v19648_v59, 1  ;;  %v19658_v50 = vrot.slane %v17524_v6, 1  ;;  %v19659_v46 = vrot.slane %v17521_v41, 1  ;;  %8146 = vmatpush1.bf16.msra.mxu1 %v13419_v61 }
 0x515   : > { %v9187_v30 = vadd.f32 %v9075_v8, %v8971_v54  ;;  %v9313_v10 = vadd.f32 %v9229_v15, %v17960_v44  ;;  %v9421_v1 = vadd.f32 %v9373_v7, %v19639_v43  ;;  %v18032_v2 = vmul.f32 0.11111111, %v9524_v63  ;;  %8147 = vmatprep.subr.bf16.mxu1 %v13424_v62 }
 0x516   : > { %v8880_v17 = vsel %vm8769_vm1, %v19657_v3, %v19656_v33  ;;  %v8898_v54 = vsel %vm8769_vm1, %v19659_v46, %v19658_v50  ;;  %v9427_v34 = vadd.f32 %v9379_v38, %v17074_v36  ;;  %v19660_v45 = vrot.slane %v17752_v4, 7  ;;  %10281 = vmatpush1.bf16.msra.mxu0 %v13320_v32  ;;  %v13328_v36 = vld [vmem:[%s19119_s15 + $0x174] ss:$8 sps:$4 sm:$0xff]  }
 0x517   : > { %v9235_v26 = vadd.f32 %v9187_v30, %v17496_v24  ;;  %v8978_v43 = vadd.f32 %v8880_v17, %v19648_v59  ;;  %v9385_v11 = vadd.f32 %v9313_v10, %v9075_v8  ;;  %v9469_v48 = vadd.f32 %v9421_v1, %v8841_v52  ;;  %10282 = vmatprep.subr.bf16.mxu0 %v13325_v37  ;;  %v13422_v52 = vld [vmem:[%s19117_s13 + $0x90] ss:$8 sps:$4 sm:$0xff]  }
 0x518   : > { %v18040_v21 = vsel %vm8584_vm0, 0.0, %v19660_v45  ;;  %v19661_v9 = vrot.slane %v19655_v16, 2  ;;  %v9608_v61 = vpack.c.bf16 %v18032_v2, %v18007_v19  ;;  %v9475_v32 = vadd.f32 %v9427_v34, %v17960_v44  ;;  %8148 = vmatpush1.bf16.msra.mxu1 %v13422_v52 }
 0x519   : > { %v9112_v7 = vrot.slane %v17521_v41, 2  ;;  %v9517_v30 = vadd.f32 %v9469_v48, %v9057_v53  ;;  %v9320_v37 = vadd.f32 %v9236_v22, %v8880_v17  ;;  %v9434_v38 = vadd.f32 %v9386_v58, %v19648_v59 }
 0x51a   : > { %v9096_v15 = vsel %vm2492_vm2, %v9094_v14, %v19661_v9  ;;  %v8984_v14 = vadd.f32 %v8898_v54, %v17521_v41  ;;  %v19662_v10 = vpack.c.bf16 %v17486_v13, %v17472_v42  ;;  %v9523_v1 = vadd.f32 %v9475_v32, %v9075_v8  ;;  %10283 = vmatpush1.bf16.msra.mxu0 %v13323_v57  ;;  %v13326_v42 = vld [vmem:[%s19119_s15 + $0x170] ss:$8 sps:$4 sm:$0xff]  }
 0x51b   : > { %v9194_v63 = vadd.f32 %v9096_v15, %v8978_v43  ;;  %v19663_v16 = vrot.slane %v17508_v0, 1  ;;  %v19664_v33 = vrot.slane %v17496_v24, 1  ;;  %v19665_v53 = vrot.slane %v17842_v25, 1  ;;  %v19667_v13 = vld [vmem:[#allocation65_spill] sm:$0xff]  ;;  %10284 = vmatprep.subr.bf16.mxu0 %v13328_v36  ;;  %v13331_v43 = vld [vmem:[%s19119_s15 + $0x184] ss:$8 sps:$4 sm:$0xff]  }
 0x51c   : > { %10260 = vmatmul.mubr.bf16.gmra.mrb[108].mxu0 %v19662_v10  ;;  %v19666_v62 = vrot.slane %v17780_v49, 1  ;;  %v19668_v59 = vpack.c.bf16 %v17580_v35, %v19667_v13  ;;  %v18080_v8 = vmul.f32 0.11111111, %v9517_v30  ;;  %v19669_v58 = vrot.slane %v17524_v6, 2 }
 0x51d   : > { %v9242_v44 = vadd.f32 %v9194_v63, %v17521_v41  ;;  %v8877_v3 = vsel %vm8769_vm1, %v19664_v33, %v19663_v16  ;;  %v9392_v46 = vadd.f32 %v9320_v37, %v9096_v15  ;;  %v9482_v34 = vadd.f32 %v9434_v38, %v8880_v17 }
 0x51e   : > { %v8895_v22 = vsel %vm8769_vm1, %v19666_v62, %v19665_v53  ;;  %10302 = vmatprep.mubr.bf16.mxu0 %v19668_v59  ;;  %v9114_v50 = vsel %vm2492_vm2, %v9112_v7, %v19669_v58  ;;  %v18088_v45 = vmul.f32 0.11111111, %v9523_v1  ;;  %v8977_v48 = vadd.f32 %v8877_v3, %v17496_v24  ;;  %10285 = vmatpush1.bf16.msra.mxu0 %v13326_v42  ;;  %v19673_v59 = vld [vmem:[#allocation63_spill] sm:$0xff] }
 0x51f   : > { %v9326_v57 = vadd.f32 %v9242_v44, %v8898_v54  ;;  %v8983_v35 = vadd.f32 %v8895_v22, %v17780_v49  ;;  %v9440_v9 = vadd.f32 %v9392_v46, %v17521_v41  ;;  %v9530_v6 = vadd.f32 %v9482_v34, %v9096_v15  ;;  %v13329_v41 = vld [vmem:[%s19119_s15 + $0x180] ss:$8 sps:$4 sm:$0xff]   ;;  %10286 = vmatprep.subr.bf16.mxu0 %v13331_v43 }
 0x520   : > { %v9091_v32 = vrot.slane %v17496_v24, 2  ;;  %v9109_v17 = vrot.slane %v17780_v49, 2  ;;  %v9607_v36 = vpack.c.bf16 %v18088_v45, %v18080_v8  ;;  %v9319_v63 = vadd.f32 %v9235_v26, %v8877_v3 }
 0x521   : > { %v9398_v7 = vadd.f32 %v9326_v57, %v9114_v50  ;;  %v9433_v30 = vadd.f32 %v9385_v11, %v17496_v24  ;;  %v19670_v37 = vrot.slane %v17752_v4, 7  ;;  %v9488_v15 = vadd.f32 %v9440_v9, %v8898_v54  ;;  %v13334_v24 = vld [vmem:[%s19119_s15 + $0x194] ss:$8 sps:$4 sm:$0xff]  }
 0x522   : > { %v19671_v52 = vrot.slane %v17508_v0, 2  ;;  %v19672_v1 = vrot.slane %v17842_v25, 2  ;;  %v9200_v4 = vadd.f32 %v9114_v50, %v8984_v14  ;;  %v9273_v33 = vrot.slane %v18040_v21, 1  ;;  %10287 = vmatpush1.bf16.msra.mxu0 %v13329_v41  ;;  %v13332_v14 = vld [vmem:[%s19119_s15 + $0x190] ss:$8 sps:$4 sm:$0xff]  }
 0x523   : > { %v8681_v38 = vsel %vm8584_vm0, %v19670_v37, 0.0  ;;  %v9481_v16 = vadd.f32 %v9433_v30, %v8877_v3  ;;  %v9536_v54 = vadd.f32 %v9488_v15, %v9114_v50  ;;  %v18114_v53 = vmul.f32 0.11111111, %v9530_v6  ;;  %10288 = vmatprep.subr.bf16.mxu0 %v13334_v24  ;;  %v13337_v50 = vld [vmem:[%s19119_s15 + $0x1a4] ss:$8 sps:$4 sm:$0xff]  }
 0x524   : > { %v9093_v10 = vsel %vm2492_vm2, %v9091_v32, %v19671_v52  ;;  %v9111_v26 = vsel %vm2492_vm2, %v9109_v17, %v19672_v1  ;;  %v9274_v62 = vrot.slane %v8681_v38, 1  ;;  %v9349_v58 = vrot.slane %v19673_v59, 2  ;;  %v13335_v41 = vld [vmem:[%s19119_s15 + $0x1a0] ss:$8 sps:$4 sm:$0xff]   ;;  %v13340_v15 = vld [vmem:[%s19119_s15 + $0x1b4] ss:$8 sps:$4 sm:$0xff]  }
 0x525   : > { %v9193_v11 = vadd.f32 %v9093_v10, %v8977_v48  ;;  %v9391_v44 = vadd.f32 %v9319_v63, %v9093_v10  ;;  %v9199_v0 = vadd.f32 %v9111_v26, %v8983_v35  ;;  %v9529_v13 = vadd.f32 %v9481_v16, %v9093_v10 }
 0x526   : > { %v9346_v46 = vrot.slane %v8681_v38, 2  ;;  %v18122_v3 = vmul.f32 0.11111111, %v9536_v54  ;;  %v19675_v9 = vrot.slane %v19673_v59, 1  ;;  %v9275_v38 = vsel %vm8769_vm1, %v9273_v33, %v9274_v62  ;;  %10289 = vmatpush1.bf16.msra.mxu0 %v13332_v14  ;;  %v13343_v59 = vld [vmem:[%s19119_s15 + $0x1c4] ss:$8 sps:$4 sm:$0xff]  }
 0x527   : > { %v9241_v25 = vadd.f32 %v9193_v11, %v17780_v49  ;;  %v9439_v42 = vadd.f32 %v9391_v44, %v17780_v49  ;;  %v18127_v57 = vmul.f32 0.11111111, %v9529_v13  ;;  %v19674_v49 = vld [vmem:[#allocation62_spill] sm:$0xff]  ;;  %v9247_v63 = vadd.f32 %v9199_v0, %v18040_v21  ;;  %10290 = vmatprep.subr.bf16.mxu0 %v13337_v50  ;;  %v13425_v11 = vld [vmem:[%s19117_s13 + $0xa0] ss:$8 sps:$4 sm:$0xff]  }
 0x528   : > { %v9248_v48 = vadd.f32 %v9200_v4, %v19674_v49  ;;  %v9614_v35 = vpack.c.bf16 %v18122_v3, %v18114_v53  ;;  %v19676_v6 = vrot.slane %v19674_v49, 1  ;;  %v9348_v17 = vrot.slane %v19674_v49, 2  ;;  %v13427_v44 = vld [vmem:[%s19117_s13 + $0xa4] ss:$8 sps:$4 sm:$0xff]   ;;  %v13430_v13 = vld [vmem:[%s19117_s13 + $0xb4] ss:$8 sps:$4 sm:$0xff]  }
 0x529   : > { %v9325_v34 = vadd.f32 %v9241_v25, %v8895_v22  ;;  %v9487_v43 = vadd.f32 %v9439_v42, %v8895_v22  ;;  %v9331_v10 = vadd.f32 %v9275_v38, %v9247_v63  ;;  %v9345_v1 = vrot.slane %v18040_v21, 2  ;;  %8149 = vmatprep.subr.bf16.mxu1 %v13427_v44  ;;  %v13338_v25 = vld [vmem:[%s19119_s15 + $0x1b0] ss:$8 sps:$4 sm:$0xff]   ;;  %v13433_v50 = vld [vmem:[%s19117_s13 + $0xc4] ss:$8 sps:$4 sm:$0xff]  }
 0x52a   : > { %v9278_v32 = vsel %vm8769_vm1, %v19676_v6, %v19675_v9  ;;  %v9350_v52 = vsel %vm2492_vm2, %v9348_v17, %v9349_v58  ;;  %v9446_v4 = vadd.f32 %v9398_v7, %v19674_v49  ;;  %10291 = vmatpush1.bf16.msra.mxu0 %v13335_v41  ;;  %8150 = vmatpush1.bf16.msra.mxu1 %v13425_v11  ;;  %v13341_v9 = vld [vmem:[%s19119_s15 + $0x1c0] ss:$8 sps:$4 sm:$0xff]   ;;  %v13346_v6 = vld [vmem:[%s19119_s15 + $0x1d4] ss:$8 sps:$4 sm:$0xff]   ;;  %v13355_v44 = vld [vmem:[%s19119_s15 + $0x204] ss:$8 sps:$4 sm:$0xff]  }
 0x52b   : > { %v9397_v30 = vadd.f32 %v9325_v34, %v9111_v26  ;;  %v9535_v37 = vadd.f32 %v9487_v43, %v9111_v26  ;;  %v9332_v22 = vadd.f32 %v9278_v32, %v9248_v48  ;;  %v9347_v33 = vsel %vm2492_vm2, %v9345_v1, %v9346_v46  ;;  %10292 = vmatprep.subr.bf16.mxu0 %v13340_v15  ;;  %v13436_v63 = vld [vmem:[%s19117_s13 + $0xd4] ss:$8 sps:$4 sm:$0xff]   ;;  %v13347_v15 = vld [vmem:[%s19119_s15 + $0x1e0] ss:$8 sps:$4 sm:$0xff]   ;;  %v13439_v1 = vld [vmem:[%s19117_s13 + $0xe4] ss:$8 sps:$4 sm:$0xff]  }
 0x52c   : > { %v9494_v62 = vadd.f32 %v9446_v4, %v9278_v32  ;;  %v9403_v7 = vadd.f32 %v9347_v33, %v9331_v10  ;;  %8151 = vmatprep.subr.bf16.mxu1 %v13430_v13  ;;  %v13437_v10 = vld [vmem:[%s19117_s13 + $0xe0] ss:$8 sps:$4 sm:$0xff]   ;;  %v13440_v4 = vld [vmem:[%s19117_s13 + $0xf0] ss:$8 sps:$4 sm:$0xff]   ;;  %v13442_v11 = vld [vmem:[%s19117_s13 + $0xf4] ss:$8 sps:$4 sm:$0xff]  }
 0x52d   : > { %v18148_v24 = vmul.f32 0.11111111, %v9535_v37  ;;  %v9404_v26 = vadd.f32 %v9350_v52, %v9332_v22  ;;  %v9445_v16 = vadd.f32 %v9397_v30, %v18040_v21  ;;  %v13428_v21 = vld [vmem:[%s19117_s13 + $0xb0] ss:$8 sps:$4 sm:$0xff]   ;;  %v13361_v13 = vld [vmem:[%s19119_s15 + $0x224] ss:$8 sps:$4 sm:$0xff]  }
 0x52e   : > { %v9542_v46 = vadd.f32 %v9494_v62, %v9350_v52  ;;  %v9451_v14 = vadd.f32 %v9403_v7, %v19509_v5  ;;  %10293 = vmatpush1.bf16.msra.mxu0 %v13338_v25  ;;  %8152 = vmatpush1.bf16.msra.mxu1 %v13428_v21  ;;  %v13344_v22 = vld [vmem:[%s19119_s15 + $0x1d0] ss:$8 sps:$4 sm:$0xff]   ;;  %v13352_v52 = vld [vmem:[%s19119_s15 + $0x1f4] ss:$8 sps:$4 sm:$0xff]   ;;  %v19678_v7 = vld [vmem:[#allocation64_spill] sm:$0xff]  ;;  %v19680_v21 = vpack.c.bf16 %v17648_v55, %v17626_v23 }
 0x52f   : > { %v9613_v54 = vpack.c.bf16 %v18148_v24, %v18127_v57  ;;  %v9452_v0 = vadd.f32 %v9404_v26, %v19509_v5  ;;  %v9493_v42 = vadd.f32 %v9445_v16, %v9275_v38  ;;  %v13431_v5 = vld [vmem:[%s19117_s13 + $0xc0] ss:$8 sps:$4 sm:$0xff]   ;;  %10294 = vmatprep.subr.bf16.mxu0 %v13343_v59  ;;  %8153 = vmatprep.subr.bf16.mxu1 %v13433_v50  ;;  %v13349_v38 = vld [vmem:[%s19119_s15 + $0x1e4] ss:$8 sps:$4 sm:$0xff]   ;;  %v13350_v26 = vld [vmem:[%s19119_s15 + $0x1f0] ss:$8 sps:$4 sm:$0xff]  }
 0x530   : > { %v18180_v49 = vmul.f32 0.11111111, %v9542_v46  ;;  %v9499_v48 = vadd.f32 %v9451_v14, %v19514_v31  ;;  %v13445_v16 = vld [vmem:[%s19117_s13 + $0x104] ss:$8 sps:$4 sm:$0xff]   ;;  %v19677_v62 = vld [vmem:[#allocation61_spill] sm:$0xff]  ;;  %v19681_v46 = vpack.c.bf16 %v17694_v39, %v17673_v12  ;;  %v19682_v55 = vpack.c.bf16 %v17731_v47, %v17702_v56 }
 0x531   : > { %v9500_v58 = vadd.f32 %v9452_v0, %v19514_v31  ;;  %v9541_v34 = vadd.f32 %v9493_v42, %v9347_v33  ;;  %v13353_v33 = vld [vmem:[%s19119_s15 + $0x200] ss:$8 sps:$4 sm:$0xff]   ;;  %v13358_v0 = vld [vmem:[%s19119_s15 + $0x214] ss:$8 sps:$4 sm:$0xff]   ;;  %v19679_v25 = vpack.c.bf16 %v19677_v62, %v19678_v7  ;;  %v13356_v42 = vld [vmem:[%s19119_s15 + $0x210] ss:$8 sps:$4 sm:$0xff]   ;;  %v19683_v50 = vpack.c.bf16 %v17792_v60, %v17758_v20 }
 0x532   : > { %v9547_v17 = vadd.f32 %v9499_v48, %v19521_v27  ;;  %10295 = vmatpush1.bf16.msra.mxu0 %v13341_v9  ;;  %8154 = vmatpush1.bf16.msra.mxu1 %v13431_v5  ;;  %v13359_v59 = vld [vmem:[%s19119_s15 + $0x220] ss:$8 sps:$4 sm:$0xff]   ;;  %v13362_v23 = vld [vmem:[%s19119_s15 + $0x230] ss:$8 sps:$4 sm:$0xff]   ;;  %v13367_v14 = vld [vmem:[%s19119_s15 + $0x244] ss:$8 sps:$4 sm:$0xff]   ;;  %v19687_v9 = vpack.c.bf16 %v17891_v18, %v17876_v28 }
 0x533   : > { %v9548_v43 = vadd.f32 %v9500_v58, %v19521_v27  ;;  %v18195_v31 = vmul.f32 0.11111111, %v9541_v34  ;;  %v13434_v27 = vld [vmem:[%s19117_s13 + $0xd0] ss:$8 sps:$4 sm:$0xff]   ;;  %10296 = vmatprep.subr.bf16.mxu0 %v13346_v6  ;;  %8155 = vmatprep.subr.bf16.mxu1 %v13436_v63  ;;  %v13364_v58 = vld [vmem:[%s19119_s15 + $0x234] ss:$8 sps:$4 sm:$0xff]   ;;  %v19688_v6 = vpack.c.bf16 %v17965_v29, %v17920_v40 }
 0x534   : > { %v18202_v37 = vmul.f32 0.11111111, %v9547_v17  ;;  %v13365_v12 = vld [vmem:[%s19119_s15 + $0x240] ss:$8 sps:$4 sm:$0xff]   ;;  %v13370_v39 = vld [vmem:[%s19119_s15 + $0x254] ss:$8 sps:$4 sm:$0xff]  }
 0x535   : > { %v18192_v32 = vmul.f32 0.11111111, %v9548_v43  ;;  %v13368_v56 = vld [vmem:[%s19119_s15 + $0x250] ss:$8 sps:$4 sm:$0xff]   ;;  %v19684_v47 = vld [vmem:[#allocation19_spill] sm:$0xff] }
 0x536   : > { %v9619_v41 = vpack.c.bf16 %v18202_v37, %v18195_v31  ;;  %10297 = vmatpush1.bf16.msra.mxu0 %v13344_v22  ;;  %8156 = vmatpush1.bf16.msra.mxu1 %v13434_v27  ;;  %v19685_v34 = vld [vmem:[#allocation29_spill] sm:$0xff]  ;;  %v13373_v48 = vld [vmem:[%s19119_s15 + $0x264] ss:$8 sps:$4 sm:$0xff]   ;;  %v13371_v20 = vld [vmem:[%s19119_s15 + $0x260] ss:$8 sps:$4 sm:$0xff]  }
 0x537   : > { %v9620_v30 = vpack.c.bf16 %v18192_v32, %v18180_v49  ;;  %10298 = vmatprep.subr.bf16.mxu0 %v13349_v38  ;;  %8157 = vmatprep.subr.bf16.mxu1 %v13439_v1  ;;  %v19686_v43 = vpack.c.bf16 %v19684_v47, %v19685_v34  ;;  %v13376_v60 = vld [vmem:[%s19119_s15 + $0x274] ss:$8 sps:$4 sm:$0xff]   ;;  %v13374_v5 = vld [vmem:[%s19119_s15 + $0x270] ss:$8 sps:$4 sm:$0xff]   ;;  %v13379_v17 = vld [vmem:[%s19119_s15 + $0x284] ss:$8 sps:$4 sm:$0xff]  }
 0x538   : > { %v13377_v28 = vld [vmem:[%s19119_s15 + $0x280] ss:$8 sps:$4 sm:$0xff]   ;;  %v13382_v18 = vld [vmem:[%s19119_s15 + $0x294] ss:$8 sps:$4 sm:$0xff]   ;;  %v13380_v40 = vld [vmem:[%s19119_s15 + $0x290] ss:$8 sps:$4 sm:$0xff]  }
 0x539   : > { %v13385_v29 = vld [vmem:[%s19119_s15 + $0x2a4] ss:$8 sps:$4 sm:$0xff]   ;;  %v13383_v63 = vld [vmem:[%s19119_s15 + $0x2a0] ss:$8 sps:$4 sm:$0xff]   ;;  %v13388_v22 = vld [vmem:[%s19119_s15 + $0x2b4] ss:$8 sps:$4 sm:$0xff]  }
 0x53a   : > { %10299 = vmatpush1.bf16.msra.mxu0 %v13347_v15  ;;  %8158 = vmatpush1.bf16.msra.mxu1 %v13437_v10  ;;  %v13386_v27 = vld [vmem:[%s19119_s15 + $0x2b0] ss:$8 sps:$4 sm:$0xff]   ;;  %v13394_v38 = vld [vmem:[%s19119_s15 + $0x2c4] ss:$8 sps:$4 sm:$0xff]   ;;  %v13392_v15 = vld [vmem:[%s19119_s15 + $0x2c0] ss:$8 sps:$4 sm:$0xff]  }
 0x53b   : > { %10300 = vmatprep.subr.bf16.mxu0 %v13352_v52  ;;  %8159 = vmatprep.subr.bf16.mxu1 %v13442_v11  ;;  %v13400_v52 = vld [vmem:[%s19119_s15 + $0x2d4] ss:$8 sps:$4 sm:$0xff]   ;;  %v13398_v10 = vld [vmem:[%s19119_s15 + $0x2d0] ss:$8 sps:$4 sm:$0xff]   ;;  %v18351_v1 = vld [vmem:[%s19116_s12] ss:$0 sm:$0xff] }
 0x53e   : > { %10301 = vmatpush1.bf16.msra.mxu0 %v13350_v26  ;;  %8160 = vmatpush1.bf16.msra.mxu1 %v13440_v4 }
 0x53f   : > { %10343 = vmatprep.subr.bf16.mxu0 %v13355_v44  ;;  %8202 = vmatprep.subr.bf16.mxu1 %v13445_v16  ;;  %v19689_v16 = vld [vmem:[#allocation25_spill] sm:$0xff] }
 0x541   : > { %10303 = vmatmul.mubr.bf16.vlgmr.msra.gmra.mrb[96].mxu0 %v19679_v25 }
 0x542   : > { %10344 = vmatpush1.bf16.msra.mxu0 %v13353_v33  ;;  %10312 = vmatprep.mubr.bf16.mxu0 %v19680_v21  ;;  %v6868_v33 = vadd.f32 %v19689_v16, %v18351_v1 }
 0x543   : > { %10345 = vmatprep.subr.bf16.mxu0 %v13358_v0 }
 0x546   : > { %10346 = vmatpush1.bf16.msra.mxu0 %v13356_v42 }
 0x547   : > { %10347 = vmatprep.subr.bf16.mxu0 %v13361_v13  ;;  %v19690_v13 = vld [vmem:[#allocation24_spill] sm:$0xff] }
 0x549   : > { %10313 = vmatmul.mubr.bf16.gmra.mrb[100].mxu0 %v19681_v46 }
 0x54a   : > { %10348 = vmatpush1.bf16.msra.mxu0 %v13359_v59  ;;  %10322 = vmatprep.mubr.bf16.mxu0 %v19682_v55  ;;  %v6871_v59 = vadd.f32 %v19690_v13, %v18351_v1  ;;  %v19691_v55 = vld [vmem:[#allocation23_spill] sm:$0xff] }
 0x54b   : > { %10349 = vmatprep.subr.bf16.mxu0 %v13364_v58 }
 0x54e   : > { %10350 = vmatpush1.bf16.msra.mxu0 %v13362_v23 }
 0x54f   : > { %10351 = vmatprep.subr.bf16.mxu0 %v13367_v14  ;;  %v19692_v14 = vpack.c.bf16 %v17899_v51, %v19691_v55 }
 0x551   : > { %10323 = vmatmul.mubr.bf16.gmra.mrb[104].mxu0 %v19683_v50 }
 0x552   : > { %10352 = vmatpush1.bf16.msra.mxu0 %v13365_v12  ;;  %10332 = vmatprep.mubr.bf16.mxu0 %v19686_v43 }
 0x553   : > { %10353 = vmatprep.subr.bf16.mxu0 %v13370_v39 }
 0x556   : > { %10354 = vmatpush1.bf16.msra.mxu0 %v13368_v56 }
 0x557   : > { %10355 = vmatprep.subr.bf16.mxu0 %v13373_v48 }
 0x559   : > { %10333 = vmatmul.mubr.bf16.gmra.mrb[108].mxu0 %v19687_v9 }
 0x55a   : > { %10356 = vmatpush1.bf16.msra.mxu0 %v13371_v20  ;;  %11594 = vmatprep.mubr.msk.bf16.mxu0 %vm1910_vm3, %v19688_v6 }
 0x55b   : > { %10357 = vmatprep.subr.bf16.mxu0 %v13376_v60 }
 0x55e   : > { %10358 = vmatpush1.bf16.msra.mxu0 %v13374_v5 }
 0x55f   : > { %10359 = vmatprep.subr.bf16.mxu0 %v13379_v17 }
 0x560   : > { %v12064_v26 = vpop.f32.mrb[148].mxu1  ;;  %v12098_v4 = vpop.f32.mrb[72].mxu0 }
 0x561   : > { %v12065_v11 = vpop.f32.mrb[149].mxu1  ;;  %v12099_v44 = vpop.f32.mrb[73].mxu0 }
 0x562   : > { %10360 = vmatpush1.bf16.msra.mxu0 %v13377_v28  ;;  %v12066_v0 = vadd.f32 %v12065_v11, %v12064_v26  ;;  %v12100_v62 = vadd.f32 %v12099_v44, %v12098_v4  ;;  %v12067_v7 = vpop.f32.mrb[150].mxu1  ;;  %v12101_v25 = vpop.f32.mrb[74].mxu0 }
 0x563   : > { %10361 = vmatprep.subr.bf16.mxu0 %v13382_v18  ;;  %v12068_v42 = vpop.f32.mrb[151].mxu1  ;;  %v12102_v21 = vpop.f32.mrb[75].mxu0 }
 0x564   : > { %v6933_v58 = vadd.f32 %v12100_v62, %v6868_v33  ;;  %v12069_v46 = vadd.f32 %v12068_v42, %v12067_v7  ;;  %v12103_v23 = vadd.f32 %v12102_v21, %v12101_v25  ;;  %v6876_v34 = vadd.f32 %v12066_v0, %v18351_v1 }
 0x566   : > { %10362 = vmatpush1.bf16.msra.mxu0 %v13380_v40  ;;  %v6936_v12 = vadd.f32 %v12103_v23, %v6871_v59  ;;  %v6879_v51 = vadd.f32 %v12069_v46, %v18351_v1 }
 0x567   : > { %10363 = vmatprep.subr.bf16.mxu0 %v13385_v29 }
 0x568   : > { %v12070_v39 = vpop.f32.mrb[152].mxu1  ;;  %v12104_v50 = vpop.f32.mrb[76].mxu0 }
 0x569   : > { %v12071_v56 = vpop.f32.mrb[153].mxu1  ;;  %v12105_v47 = vpop.f32.mrb[77].mxu0 }
 0x56a   : > { %10364 = vmatpush1.bf16.msra.mxu0 %v13383_v63  ;;  %v12072_v43 = vadd.f32 %v12071_v56, %v12070_v39  ;;  %v12106_v48 = vadd.f32 %v12105_v47, %v12104_v50  ;;  %v12073_v20 = vpop.f32.mrb[154].mxu1  ;;  %v12107_v60 = vpop.f32.mrb[78].mxu0 }
 0x56b   : > { %10365 = vmatprep.subr.bf16.mxu0 %v13388_v22  ;;  %v12074_v9 = vpop.f32.mrb[155].mxu1  ;;  %v12108_v5 = vpop.f32.mrb[79].mxu0 }
 0x56c   : > { %v6941_v6 = vadd.f32 %v12106_v48, %v6876_v34  ;;  %v12075_v17 = vadd.f32 %v12074_v9, %v12073_v20  ;;  %v12109_v28 = vadd.f32 %v12108_v5, %v12107_v60  ;;  %v6884_v29 = vadd.f32 %v12072_v43, %v18351_v1 }
 0x56e   : > { %10366 = vmatpush1.bf16.msra.mxu0 %v13386_v27  ;;  %v6944_v19 = vadd.f32 %v12109_v28, %v6879_v51  ;;  %v6887_v8 = vadd.f32 %v12075_v17, %v18351_v1 }
 0x56f   : > { %10367 = vmatprep.subr.bf16.mxu0 %v13394_v38 }
 0x572   : > { %10368 = vmatpush1.bf16.msra.mxu0 %v13392_v15  ;;  %v12076_v2 = vpop.f32.mrb[156].mxu1 }
 0x573   : > { %10369 = vmatprep.subr.bf16.mxu0 %v13400_v52  ;;  %v12077_v18 = vpop.f32.mrb[157].mxu1 }
 0x574   : > { %v12078_v63 = vadd.f32 %v12077_v18, %v12076_v2  ;;  %v12079_v27 = vpop.f32.mrb[158].mxu1 }
 0x575   : > { %v12080_v15 = vpop.f32.mrb[159].mxu1 }
 0x576   : > { %10370 = vmatpush1.bf16.msra.mxu0 %v13398_v10  ;;  %v6892_v11 = vadd.f32 %v12078_v63, %v18351_v1 }
 0x579   : > { %10376 = vmatmul.mubr.bf16.vlgmr.msra.gmra.mrb[96].mxu0 %v19692_v14 }
 0x57a   : > { %11595 = vmatprep.mubr.msk.bf16.mxu0 %vm1910_vm3, %v9608_v61  ;;  %v12110_v61 = vpop.f32.mrb[80].mxu0 }
 0x57b   : > { %v12111_v40 = vpop.f32.mrb[81].mxu0  ;;  %v12138_v10 = vpop.f32.mrb[160].mxu1 }
 0x57c   : > { %v12112_v22 = vadd.f32 %v12111_v40, %v12110_v61  ;;  %v12113_v38 = vpop.f32.mrb[82].mxu0  ;;  %v12139_v4 = vpop.f32.mrb[161].mxu1 }
 0x57d   : > { %v12114_v52 = vpop.f32.mrb[83].mxu0  ;;  %v12140_v16 = vadd.f32 %v12139_v4, %v12138_v10  ;;  %v12141_v0 = vpop.f32.mrb[162].mxu1 }
 0x57e   : > { %v18375_v45 = vadd.f32 %v12112_v22, %v6884_v29  ;;  %v12115_v53 = vadd.f32 %v12114_v52, %v12113_v38 }
 0x57f   : > { %v6998_v32 = vadd.f32 %v12140_v16, %v6933_v58 }
 0x580   : > { %v18380_v3 = vadd.f32 %v12115_v53, %v6887_v8 }
 0x581   : > { %10386 = vmatmul.mubr.bf16.gmra.mrb[100].mxu0 %v9607_v36  ;;  %v12081_v36 = vadd.f32 %v12080_v15, %v12079_v27 }
 0x582   : > { %11596 = vmatprep.mubr.msk.bf16.mxu0 %vm1910_vm3, %v9614_v35  ;;  %v12116_v35 = vpop.f32.mrb[84].mxu0 }
 0x583   : > { %v12117_v26 = vpop.f32.mrb[85].mxu0  ;;  %v6895_v57 = vadd.f32 %v12081_v36, %v18351_v1 }
 0x584   : > { %v12118_v44 = vadd.f32 %v12117_v26, %v12116_v35  ;;  %v12119_v33 = vpop.f32.mrb[86].mxu0 }
 0x585   : > { %v12120_v24 = vpop.f32.mrb[87].mxu0 }
 0x586   : > { %v18388_v62 = vadd.f32 %v12118_v44, %v6892_v11  ;;  %v12121_v7 = vadd.f32 %v12120_v24, %v12119_v33  ;;  %v12264_v21 = vpop.f32.mrb[88].mxu0  ;;  %v13454_v11 = vld [vmem:[%s19117_s13 + $0x134] ss:$8 sps:$4 sm:$0xff]  }
 0x587   : > { %v7062_v59 = vpop.f32.mrb[89].mxu0 }
 0x588   : > { %v7063_v1 = vadd.f32 %v7062_v59, %v6998_v32  ;;  %v12265_v55 = vpop.f32.mrb[90].mxu0 }
 0x589   : > { %10396 = vmatmul.mubr.bf16.gmra.mrb[104].mxu0 %v9613_v54  ;;  %v12142_v54 = vpop.f32.mrb[163].mxu1  ;;  %v7065_v39 = vpop.f32.mrb[91].mxu0 }
 0x58a   : > { %11597 = vmatprep.mubr.msk.bf16.mxu0 %vm1910_vm3, %v9620_v30  ;;  %v12143_v49 = vadd.f32 %v12142_v54, %v12141_v0  ;;  %v18393_v30 = vadd.f32 %v12121_v7, %v6895_v57  ;;  %v12144_v42 = vpop.f32.mrb[164].mxu1  ;;  %v7093_v56 = vmax.f32 %v7063_v1, 0.0 }
 0x58b   : > { %v12145_v13 = vpop.f32.mrb[165].mxu1 }
 0x58c   : > { %v7001_v25 = vadd.f32 %v12143_v49, %v6936_v12  ;;  %v12146_v46 = vadd.f32 %v12145_v13, %v12144_v42  ;;  %v12147_v23 = vpop.f32.mrb[166].mxu1  ;;  %v7101_v31 = vpack.c.bf16 %v7093_v56, %v7093_v56 }
 0x58d   : > { %v12148_v14 = vpop.f32.mrb[167].mxu1  ;;  %v12268_v9 = vpop.f32.mrb[92].mxu0 }
 0x58e   : > { %v7006_v50 = vadd.f32 %v12146_v46, %v6941_v6  ;;  %v12149_v58 = vadd.f32 %v12148_v14, %v12147_v23  ;;  %v7066_v47 = vadd.f32 %v7065_v39, %v7001_v25  ;;  %v7110_v12 = vshrl.u32 %v7101_v31, 16  ;;  %v12150_v60 = vpop.f32.mrb[168].mxu1  ;;  %v7078_v17 = vpop.f32.mrb[93].mxu0 }
 0x58f   : > { %v7113_v48 = vshll.u32 %v7101_v31, 16  ;;  %v12151_v51 = vpop.f32.mrb[169].mxu1  ;;  %v12269_v40 = vpop.f32.mrb[94].mxu0 }
 0x590   : > { %v7071_v34 = vadd.f32 %v12264_v21, %v7006_v50  ;;  %v7009_v37 = vadd.f32 %v12149_v58, %v6944_v19  ;;  %v7112_v2 = vrot.slane %v7110_v12, 6  ;;  %v12153_v18 = vpop.f32.mrb[170].mxu1  ;;  %v12152_v22 = vadd.f32 %v12151_v51, %v12150_v60  ;;  %v7081_v27 = vpop.f32.mrb[95].mxu0 }
 0x591   : > { %10406 = vmatmul.mubr.bf16.gmra.mrb[108].mxu0 %v9619_v41  ;;  %v7094_v41 = vmax.f32 %v7066_v47, 0.0  ;;  %v7115_v61 = vrot.slane %v7113_v48, 7  ;;  %v12154_v19 = vpop.f32.mrb[171].mxu1 }
 0x592   : > { %v7095_v43 = vmax.f32 %v7071_v34, 0.0  ;;  %v7074_v20 = vadd.f32 %v12265_v55, %v7009_v37  ;;  %v12155_v35 = vadd.f32 %v12154_v19, %v12153_v18  ;;  %v7014_v10 = vadd.f32 %v12152_v22, %v18375_v45 }
 0x593   : > { %v7102_v5 = vpack.c.bf16 %v7094_v41, %v7094_v41  ;;  %v7116_v52 = vor.u32 %v7115_v61, %v7112_v2 }
 0x594   : > { %v7103_v28 = vpack.c.bf16 %v7095_v43, %v7095_v43  ;;  %v7096_v6 = vmax.f32 %v7074_v20, 0.0  ;;  %v7079_v54 = vadd.f32 %v7078_v17, %v7014_v10  ;;  %v7017_v32 = vadd.f32 %v12155_v35, %v18380_v3  ;;  %v12156_v25 = vpop.f32.mrb[172].mxu1 }
 0x595   : > { %v7118_v29 = vshrl.u32 %v7102_v5, 16  ;;  %v7121_v63 = vshll.u32 %v7102_v5, 16  ;;  %v7181_v44 = vsel %vm14867_vm7, 0, %v7116_v52  ;;  %v12157_v59 = vpop.f32.mrb[173].mxu1 }
 0x596   : > { %v7126_v38 = vshrl.u32 %v7103_v28, 16  ;;  %v7129_v15 = vshll.u32 %v7103_v28, 16  ;;  %v7104_v8 = vpack.c.bf16 %v7096_v6, %v7096_v6  ;;  %v18400_v0 = vsel %vm14875_vm8, %v7181_v44, 0  ;;  %v12159_v14 = vpop.f32.mrb[174].mxu1 }
 0x597   : > { %v7120_v36 = vrot.slane %v7118_v29, 6  ;;  %v7123_v53 = vrot.slane %v7121_v63, 7  ;;  %v18404_v45 = vshrl.u32 %v18400_v0, 16  ;;  %v7097_v13 = vmax.f32 %v7079_v54, 0.0  ;;  %v12160_v58 = vpop.f32.mrb[175].mxu1 }
 0x598   : > { %v7128_v26 = vrot.slane %v7126_v38, 6  ;;  %v7131_v4 = vrot.slane %v7129_v15, 7  ;;  %v7134_v16 = vshrl.u32 %v7104_v8, 16  ;;  %v7137_v57 = vshll.u32 %v7104_v8, 16 }
 0x599   : > { %v7124_v24 = vor.u32 %v7123_v53, %v7120_v36  ;;  %v18409_v46 = vshll.u32 %v18400_v0, 16  ;;  %v7082_v3 = vadd.f32 %v7081_v27, %v7017_v32  ;;  %v12158_v55 = vadd.f32 %v12157_v59, %v12156_v25  ;;  %v13448_v25 = vld [vmem:[%s19117_s13 + $0x114] ss:$8 sps:$4 sm:$0xff]  }
 0x59a   : > { %v7132_v7 = vor.u32 %v7131_v4, %v7128_v26  ;;  %v7136_v49 = vrot.slane %v7134_v16, 6  ;;  %v7139_v42 = vrot.slane %v7137_v57, 7  ;;  %v7105_v56 = vpack.c.bf16 %v7097_v13, %v7097_v13  ;;  %v13443_v57 = vld [vmem:[%s19117_s13 + $0x100] ss:$8 sps:$4 sm:$0xff]  }
 0x59b   : > { %v7182_v21 = vsel %vm14867_vm7, 0, %v7124_v24  ;;  %v7202_v47 = vrot.slane %v18409_v46, 1  ;;  %v7098_v34 = vmax.f32 %v7082_v3, 0.0  ;;  %v7022_v31 = vadd.f32 %v12158_v55, %v18388_v62 }
 0x59c   : > { %v7183_v1 = vsel %vm14867_vm7, 0, %v7132_v7  ;;  %v18415_v23 = vsel %vm14875_vm8, %v7182_v21, 0  ;;  %v7140_v50 = vor.u32 %v7139_v42, %v7136_v49  ;;  %v12161_v37 = vadd.f32 %v12160_v58, %v12159_v14 }
 0x59d   : > { %v18419_v39 = vsel %vm14875_vm8, %v7183_v1, 0  ;;  %v18424_v41 = vshrl.u32 %v18415_v23, 16  ;;  %v7142_v12 = vshrl.u32 %v7105_v56, 16  ;;  %v7145_v48 = vshll.u32 %v7105_v56, 16 }
 0x59e   : > { %v7184_v43 = vsel %vm14867_vm7, 0, %v7140_v50  ;;  %v7203_v20 = vor.u32 %v7202_v47, %v18404_v45  ;;  %v7106_v5 = vpack.c.bf16 %v7098_v34, %v7098_v34  ;;  %v7087_v51 = vadd.f32 %v12268_v9, %v7022_v31  ;;  %v13446_v34 = vld [vmem:[%s19117_s13 + $0x110] ss:$8 sps:$4 sm:$0xff]  }
 0x59f   : > { %v18431_v60 = vsel %vm14875_vm8, %v7184_v43, 0  ;;  %v7025_v17 = vadd.f32 %v12161_v37, %v18393_v30  ;;  %v7144_v62 = vrot.slane %v7142_v12, 6  ;;  %v7147_v28 = vrot.slane %v7145_v48, 7  ;;  %v13451_v43 = vld [vmem:[%s19117_s13 + $0x124] ss:$8 sps:$4 sm:$0xff]  }
 0x5a0   : > { %v18435_v2 = vshll.u32 %v18415_v23, 16  ;;  %v11362_v61 = vcombine.low %v18400_v0, %v18415_v23  ;;  %v7150_v6 = vshrl.u32 %v7106_v5, 16  ;;  %v7153_v18 = vshll.u32 %v7106_v5, 16 }
 0x5a1   : > { %v7099_v29 = vmax.f32 %v7087_v51, 0.0  ;;  %v7090_v63 = vadd.f32 %v12269_v40, %v7025_v17  ;;  %v7148_v22 = vor.u32 %v7147_v28, %v7144_v62  ;;  %v18441_v27 = vshrl.u32 %v18419_v39, 16 }
 0x5a2   : > { %v7209_v19 = vrot.slane %v18435_v2, 1  ;;  %v18444_v30 = vshll.u32 %v18419_v39, 16  ;;  %v7152_v9 = vrot.slane %v7150_v6, 6  ;;  %v7155_v38 = vrot.slane %v7153_v18, 7 }
 0x5a3   : > { %v7107_v15 = vpack.c.bf16 %v7099_v29, %v7099_v29  ;;  %v7100_v52 = vmax.f32 %v7090_v63, 0.0  ;;  %v7185_v8 = vsel %vm14867_vm7, 0, %v7148_v22  ;;  %v18451_v53 = vshrl.u32 %v18431_v60, 16  ;;  %v13449_v63 = vld [vmem:[%s19117_s13 + $0x120] ss:$8 sps:$4 sm:$0xff]  }
 0x5a4   : > { %v7210_v36 = vor.u32 %v7209_v19, %v18424_v41  ;;  %v7216_v40 = vrot.slane %v18444_v30, 1  ;;  %v18455_v35 = vsel %vm14875_vm8, %v7185_v8, 0  ;;  %v7156_v10 = vor.u32 %v7155_v38, %v7152_v9 }
 0x5a5   : > { %v7158_v26 = vshrl.u32 %v7107_v15, 16  ;;  %v7161_v4 = vshll.u32 %v7107_v15, 16  ;;  %v7108_v44 = vpack.c.bf16 %v7100_v52, %v7100_v52  ;;  %v18462_v54 = vshll.u32 %v18431_v60, 16 }
 0x5a6   : > { %v11363_v16 = vcombine.low %v7203_v20, %v7210_v36  ;;  %v7217_v24 = vor.u32 %v7216_v40, %v18441_v27  ;;  %v7186_v7 = vsel %vm14867_vm7, 0, %v7156_v10  ;;  %v11369_v42 = vcombine.low %v18419_v39, %v18431_v60 }
 0x5a7   : > { %v7160_v49 = vrot.slane %v7158_v26, 6  ;;  %v7163_v32 = vrot.slane %v7161_v4, 7  ;;  %v18473_v21 = vsel %vm14875_vm8, %v7186_v7, 0  ;;  %v7166_v13 = vshrl.u32 %v7108_v44, 16 }
 0x5a8   : > { %v7169_v59 = vshll.u32 %v7108_v44, 16  ;;  %8161 = vmatprep.mubr.bf16.mxu1 %v11363_v16  ;;  %v7223_v1 = vrot.slane %v18462_v54, 1  ;;  %v18477_v55 = vshrl.u32 %v18455_v35, 16  ;;  %v18480_v14 = vshll.u32 %v18455_v35, 16 }
 0x5a9   : > { %v7164_v3 = vor.u32 %v7163_v32, %v7160_v49  ;;  %8162 = vmatmul.mubr.bf16.vlgmr.msra.gmra.mrb[176].mxu1 %v11362_v61  ;;  %v18483_v50 = vshrl.u32 %v18473_v21, 16  ;;  %v7168_v56 = vrot.slane %v7166_v13, 6  ;;  %v18490_v31 = vshll.u32 %v18473_v21, 16 }
 0x5aa   : > { %v7171_v58 = vrot.slane %v7169_v59, 7  ;;  %8203 = vmatpush1.bf16.msra.mxu1 %v13443_v57  ;;  %v7224_v47 = vor.u32 %v7223_v1, %v18451_v53  ;;  %v7230_v12 = vrot.slane %v18480_v14, 1  ;;  %v11376_v48 = vcombine.low %v18455_v35, %v18473_v21  ;;  %v13452_v57 = vld [vmem:[%s19117_s13 + $0x130] ss:$8 sps:$4 sm:$0xff]  }
 0x5ab   : > { %v7187_v37 = vsel %vm14867_vm7, 0, %v7164_v3  ;;  %8204 = vmatprep.subr.bf16.mxu1 %v13448_v25  ;;  %v7269_v20 = vrot.slane %v18404_v45, 1  ;;  %v7237_v62 = vrot.slane %v18490_v31, 1  ;;  %v7270_v18 = vrot.slane %v18409_v46, 2  ;;  %v13457_v25 = vld [vmem:[%s19117_s13 + $0x144] ss:$8 sps:$4 sm:$0xff]  }
 0x5ac   : > { %v18503_v5 = vsel %vm14875_vm8, %v7187_v37, 0  ;;  %v7172_v51 = vor.u32 %v7171_v58, %v7168_v56  ;;  %v11370_v17 = vcombine.low %v7217_v24, %v7224_v47  ;;  %v7231_v28 = vor.u32 %v7230_v12, %v18477_v55 }
 0x5ad   : > { %v18508_v61 = vshrl.u32 %v18503_v5, 16  ;;  %v18511_v6 = vshll.u32 %v18503_v5, 16  ;;  %v7238_v22 = vor.u32 %v7237_v62, %v18483_v50  ;;  %v7272_v19 = vrot.slane %v18424_v41, 1 }
 0x5ae   : > { %v7188_v29 = vsel %vm14867_vm7, 0, %v7172_v51  ;;  %8171 = vmatprep.mubr.bf16.mxu1 %v11370_v17  ;;  %8205 = vmatpush1.bf16.msra.mxu1 %v13446_v34  ;;  %v7273_v9 = vrot.slane %v18435_v2, 2  ;;  %v18530_v52 = vor.u32 %v7270_v18, %v7269_v20  ;;  %v7261_v8 = vrot.slane %v18400_v0, 1  ;;  %v13455_v20 = vld [vmem:[%s19117_s13 + $0x140] ss:$8 sps:$4 sm:$0xff]  }
 0x5af   : > { %v18524_v38 = vsel %vm14875_vm8, %v7188_v29, 0  ;;  %8206 = vmatprep.subr.bf16.mxu1 %v13451_v43  ;;  %v7244_v15 = vrot.slane %v18511_v6, 1  ;;  %v11377_v36 = vcombine.low %v7231_v28, %v7238_v22  ;;  %v7262_v44 = vrot.slane %v18415_v23, 1  ;;  %v13460_v18 = vld [vmem:[%s19117_s13 + $0x154] ss:$8 sps:$4 sm:$0xff]  }
 0x5b0   : > { %v18534_v40 = vshrl.u32 %v18524_v38, 16  ;;  %v18537_v10 = vshll.u32 %v18524_v38, 16  ;;  %v11383_v33 = vcombine.low %v18503_v5, %v18524_v38  ;;  %v18542_v4 = vor.u32 %v7273_v9, %v7272_v19 }
 0x5b1   : > { %8172 = vmatmul.mubr.bf16.gmra.mrb[180].mxu1 %v11369_v42  ;;  %v7245_v26 = vor.u32 %v7244_v15, %v18508_v61  ;;  %v7275_v16 = vrot.slane %v18441_v27, 1  ;;  %v7276_v7 = vrot.slane %v18444_v30, 2  ;;  %v7278_v49 = vrot.slane %v18451_v53, 1 }
 0x5b2   : > { %8207 = vmatpush1.bf16.msra.mxu1 %v13449_v63  ;;  %8181 = vmatprep.mubr.bf16.mxu1 %v11377_v36  ;;  %v7251_v24 = vrot.slane %v18537_v10, 1  ;;  %v7279_v32 = vrot.slane %v18462_v54, 2  ;;  %v11365_v42 = vcombine.low %v18530_v52, %v18542_v4  ;;  %v18558_v13 = vcombine.low %v7261_v8, %v7262_v44 }
 0x5b3   : > { %8208 = vmatprep.subr.bf16.mxu1 %v13454_v11  ;;  %v7263_v59 = vrot.slane %v18419_v39, 1  ;;  %v7264_v1 = vrot.slane %v18431_v60, 1  ;;  %v18563_v56 = vor.u32 %v7276_v7, %v7275_v16  ;;  %v7281_v47 = vrot.slane %v18477_v55, 1 }
 0x5b4   : > { %v7252_v3 = vor.u32 %v7251_v24, %v18534_v40  ;;  %v18565_v58 = vor.u32 %v7279_v32, %v7278_v49  ;;  %v7282_v37 = vrot.slane %v18480_v14, 2  ;;  %v7284_v43 = vrot.slane %v18483_v50, 1  ;;  %v13463_v32 = vld [vmem:[%s19117_s13 + $0x164] ss:$8 sps:$4 sm:$0xff]  }
 0x5b5   : > { %v18568_v34 = vcombine.low %v7263_v59, %v7264_v1  ;;  %v7285_v12 = vrot.slane %v18490_v31, 2  ;;  %v7265_v62 = vrot.slane %v18455_v35, 1  ;;  %v7266_v28 = vrot.slane %v18473_v21, 1 }
 0x5b6   : > { %8209 = vmatpush1.bf16.msra.mxu1 %v13452_v57  ;;  %v11384_v51 = vcombine.low %v7245_v26, %v7252_v3  ;;  %v11372_v17 = vcombine.low %v18563_v56, %v18565_v58  ;;  %v18583_v29 = vor.u32 %v7282_v37, %v7281_v47  ;;  %v7287_v22 = vrot.slane %v18508_v61, 1  ;;  %v13458_v57 = vld [vmem:[%s19117_s13 + $0x150] ss:$8 sps:$4 sm:$0xff]   ;;  %v13505_v58 = vld [vmem:[%s19117_s13 + $0x244] ss:$8 sps:$4 sm:$0xff]  }
 0x5b7   : > { %8210 = vmatprep.subr.bf16.mxu1 %v13457_v25  ;;  %v18585_v63 = vor.u32 %v7285_v12, %v7284_v43  ;;  %v7288_v19 = vrot.slane %v18511_v6, 2  ;;  %v18589_v9 = vcombine.low %v7265_v62, %v7266_v28  ;;  %v7290_v11 = vrot.slane %v18534_v40, 1  ;;  %v13500_v56 = vld [vmem:[%s19117_s13 + $0x230] ss:$8 sps:$4 sm:$0xff]  }
 0x5b8   : > { %v7291_v15 = vrot.slane %v18537_v10, 2  ;;  %v7267_v8 = vrot.slane %v18503_v5, 1  ;;  %v7268_v44 = vrot.slane %v18524_v38, 1  ;;  %v7301_v16 = vrot.slane %v18404_v45, 2 }
 0x5b9   : > { %8182 = vmatmul.mubr.bf16.gmra.mrb[184].mxu1 %v11376_v48  ;;  %v11379_v36 = vcombine.low %v18583_v29, %v18585_v63  ;;  %v18599_v26 = vor.u32 %v7288_v19, %v7287_v22  ;;  %v7302_v7 = vrot.slane %v18409_v46, 3  ;;  %v7304_v48 = vrot.slane %v18424_v41, 2  ;;  %v13506_v29 = vld [vmem:[%s19117_s13 + $0x250] ss:$8 sps:$4 sm:$0xff]   ;;  %v13511_v63 = vld [vmem:[%s19117_s13 + $0x264] ss:$8 sps:$4 sm:$0xff]  }
 0x5ba   : > { %8211 = vmatpush1.bf16.msra.mxu1 %v13455_v20  ;;  %8191 = vmatprep.mubr.bf16.mxu1 %v11384_v51  ;;  %v18606_v24 = vor.u32 %v7291_v15, %v7290_v11  ;;  %v7305_v49 = vrot.slane %v18435_v2, 3  ;;  %v18614_v45 = vcombine.low %v7267_v8, %v7268_v44  ;;  %v7293_v25 = vrot.slane %v18400_v0, 2 }
 0x5bb   : > { %8212 = vmatprep.subr.bf16.mxu1 %v13460_v18  ;;  %v7294_v59 = vrot.slane %v18415_v23, 2  ;;  %v7307_v1 = vrot.slane %v18441_v27, 2  ;;  %v18621_v3 = vor.u32 %v7302_v7, %v7301_v16  ;;  %v7308_v2 = vrot.slane %v18444_v30, 3  ;;  %v13461_v27 = vld [vmem:[%s19117_s13 + $0x160] ss:$8 sps:$4 sm:$0xff]  }
 0x5bc   : > { %v11386_v46 = vcombine.low %v18599_v26, %v18606_v24  ;;  %v18623_v41 = vor.u32 %v7305_v49, %v7304_v48  ;;  %v7310_v37 = vrot.slane %v18451_v53, 2  ;;  %v7311_v43 = vrot.slane %v18462_v54, 3  ;;  %v13466_v53 = vld [vmem:[%s19117_s13 + $0x174] ss:$8 sps:$4 sm:$0xff]   ;;  %v13512_v26 = vld [vmem:[%s19117_s13 + $0x270] ss:$8 sps:$4 sm:$0xff]  }
 0x5bd   : > { %v18626_v47 = vcombine.low %v7293_v25, %v7294_v59  ;;  %v7295_v12 = vrot.slane %v18419_v39, 2  ;;  %v18636_v51 = vor.u32 %v7308_v2, %v7307_v1  ;;  %v7296_v30 = vrot.slane %v18431_v60, 2  ;;  %v13517_v24 = vld [vmem:[%s19117_s13 + $0x284] ss:$8 sps:$4 sm:$0xff]  }
 0x5be   : > { %8213 = vmatpush1.bf16.msra.mxu1 %v13458_v57  ;;  %v11367_v20 = vcombine.low %v18621_v3, %v18623_v41  ;;  %v7313_v62 = vrot.slane %v18477_v55, 2  ;;  %v18643_v54 = vor.u32 %v7311_v43, %v7310_v37  ;;  %v7314_v28 = vrot.slane %v18480_v14, 3  ;;  %v13470_v37 = vld [vmem:[%s19117_s13 + $0x190] ss:$8 sps:$4 sm:$0xff]   ;;  %v13475_v43 = vld [vmem:[%s19117_s13 + $0x1a4] ss:$8 sps:$4 sm:$0xff]  }
 0x5bf   : > { %8214 = vmatprep.subr.bf16.mxu1 %v13463_v32  ;;  %v7316_v18 = vrot.slane %v18483_v50, 2  ;;  %v7317_v22 = vrot.slane %v18490_v31, 3  ;;  %v18648_v19 = vcombine.low %v7295_v12, %v7296_v30  ;;  %v7297_v11 = vrot.slane %v18455_v35, 2  ;;  %v13478_v12 = vld [vmem:[%s19117_s13 + $0x1b4] ss:$8 sps:$4 sm:$0xff]  }
 0x5c0   : > { %v7298_v15 = vrot.slane %v18473_v21, 2  ;;  %v7319_v55 = vrot.slane %v18508_v61, 2  ;;  %v11374_v8 = vcombine.low %v18636_v51, %v18643_v54  ;;  %v18658_v14 = vor.u32 %v7314_v28, %v7313_v62  ;;  %v13464_v61 = vld [vmem:[%s19117_s13 + $0x170] ss:$8 sps:$4 sm:$0xff]   ;;  %v13481_v30 = vld [vmem:[%s19117_s13 + $0x1c4] ss:$8 sps:$4 sm:$0xff]  }
 0x5c1   : > { %8192 = vmatmul.mubr.bf16.gmra.mrb[188].mxu1 %v11383_v33  ;;  %v18660_v50 = vor.u32 %v7317_v22, %v7316_v18  ;;  %v7320_v31 = vrot.slane %v18511_v6, 3  ;;  %v7322_v33 = vrot.slane %v18534_v40, 2  ;;  %v7323_v16 = vrot.slane %v18537_v10, 3  ;;  %v13469_v6 = vld [vmem:[%s19117_s13 + $0x184] ss:$8 sps:$4 sm:$0xff]  }
 0x5c2   : > { %8215 = vmatpush1.bf16.msra.mxu1 %v13461_v27  ;;  %8234 = vmatprep.mubr.bf16.mxu1 %v11365_v42  ;;  %v18669_v44 = vcombine.low %v7297_v11, %v7298_v15  ;;  %v7299_v57 = vrot.slane %v18503_v5, 2  ;;  %v7300_v42 = vrot.slane %v18524_v38, 2  ;;  %v7325_v7 = vrot.slane %v18400_v0, 3  ;;  %v13467_v0 = vld [vmem:[%s19117_s13 + $0x180] ss:$8 sps:$4 sm:$0xff]  }
 0x5c3   : > { %8216 = vmatprep.subr.bf16.mxu1 %v13466_v53  ;;  %v11381_v52 = vcombine.low %v18658_v14, %v18660_v50  ;;  %v18679_v4 = vor.u32 %v7320_v31, %v7319_v55  ;;  %v18683_v48 = vor.u32 %v7323_v16, %v7322_v33  ;;  %v7326_v40 = vrot.slane %v18415_v23, 3  ;;  %v13476_v27 = vld [vmem:[%s19117_s13 + $0x1b0] ss:$8 sps:$4 sm:$0xff]   ;;  %v13479_v62 = vld [vmem:[%s19117_s13 + $0x1c0] ss:$8 sps:$4 sm:$0xff]  }
 0x5c4   : > { %v7327_v10 = vrot.slane %v18419_v39, 3  ;;  %v7328_v49 = vrot.slane %v18431_v60, 3  ;;  %v18688_v32 = vcombine.low %v7299_v57, %v7300_v42  ;;  %v7329_v25 = vrot.slane %v18455_v35, 3  ;;  %v13472_v35 = vld [vmem:[%s19117_s13 + $0x194] ss:$8 sps:$4 sm:$0xff]  }
 0x5c5   : > { %v7330_v59 = vrot.slane %v18473_v21, 3  ;;  %v7331_v1 = vrot.slane %v18503_v5, 3  ;;  %v11388_v23 = vcombine.low %v18679_v4, %v18683_v48  ;;  %v18698_v2 = vcombine.low %v7325_v7, %v7326_v40  ;;  %v13484_v53 = vld [vmem:[%s19117_s13 + $0x1d4] ss:$8 sps:$4 sm:$0xff]   ;;  %v13482_v28 = vld [vmem:[%s19117_s13 + $0x1d0] ss:$8 sps:$4 sm:$0xff]  }
 0x5c6   : > { %8217 = vmatpush1.bf16.msra.mxu1 %v13464_v61  ;;  %v18700_v39 = vcombine.low %v7327_v10, %v7328_v49  ;;  %v7332_v60 = vrot.slane %v18524_v38, 3  ;;  %v13473_v38 = vld [vmem:[%s19117_s13 + $0x1a0] ss:$8 sps:$4 sm:$0xff]   ;;  %v13487_v18 = vld [vmem:[%s19117_s13 + $0x1e4] ss:$8 sps:$4 sm:$0xff]   ;;  %v19695_v4 = vld [vmem:[#allocation57_spill] sm:$0xff] }
 0x5c7   : > { %8218 = vmatprep.subr.bf16.mxu1 %v13469_v6  ;;  %v18706_v21 = vcombine.low %v7329_v25, %v7330_v59  ;;  %v13485_v22 = vld [vmem:[%s19117_s13 + $0x1e0] ss:$8 sps:$4 sm:$0xff]   ;;  %v13490_v11 = vld [vmem:[%s19117_s13 + $0x1f4] ss:$8 sps:$4 sm:$0xff]   ;;  %v13488_v15 = vld [vmem:[%s19117_s13 + $0x1f0] ss:$8 sps:$4 sm:$0xff]  }
 0x5c8   : > { %v18708_v5 = vcombine.low %v7331_v1, %v7332_v60  ;;  %v13493_v55 = vld [vmem:[%s19117_s13 + $0x204] ss:$8 sps:$4 sm:$0xff]   ;;  %v13491_v31 = vld [vmem:[%s19117_s13 + $0x200] ss:$8 sps:$4 sm:$0xff]   ;;  %v13496_v61 = vld [vmem:[%s19117_s13 + $0x214] ss:$8 sps:$4 sm:$0xff]  }
 0x5c9   : > { %v13494_v33 = vld [vmem:[%s19117_s13 + $0x210] ss:$8 sps:$4 sm:$0xff]   ;;  %v13499_v16 = vld [vmem:[%s19117_s13 + $0x224] ss:$8 sps:$4 sm:$0xff]   ;;  %v13497_v57 = vld [vmem:[%s19117_s13 + $0x220] ss:$8 sps:$4 sm:$0xff]  }
 0x5ca   : > { %8219 = vmatpush1.bf16.msra.mxu1 %v13467_v0  ;;  %v13518_v3 = vld [vmem:[%s19117_s13 + $0x290] ss:$8 sps:$4 sm:$0xff]   ;;  %v13523_v41 = vld [vmem:[%s19117_s13 + $0x2a4] ss:$8 sps:$4 sm:$0xff]   ;;  %v13526_v6 = vld [vmem:[%s19117_s13 + $0x2b4] ss:$8 sps:$4 sm:$0xff]  }
 0x5cb   : > { %8220 = vmatprep.subr.bf16.mxu1 %v13472_v35  ;;  %v13524_v42 = vld [vmem:[%s19117_s13 + $0x2b0] ss:$8 sps:$4 sm:$0xff]   ;;  %v13529_v7 = vld [vmem:[%s19117_s13 + $0x2c4] ss:$8 sps:$4 sm:$0xff]   ;;  %v13527_v40 = vld [vmem:[%s19117_s13 + $0x2c0] ss:$8 sps:$4 sm:$0xff]  }
 0x5cc   : > { %v13532_v10 = vld [vmem:[%s19117_s13 + $0x2d4] ss:$8 sps:$4 sm:$0xff]   ;;  %v13530_v49 = vld [vmem:[%s19117_s13 + $0x2d0] ss:$8 sps:$4 sm:$0xff]   ;;  %v13535_v25 = vld [vmem:[%s19117_s13 + $0x2e4] ss:$8 sps:$4 sm:$0xff]  }
 0x5cd   : > { %v13533_v59 = vld [vmem:[%s19117_s13 + $0x2e0] ss:$8 sps:$4 sm:$0xff]   ;;  %v13538_v1 = vld [vmem:[%s19117_s13 + $0x2f4] ss:$8 sps:$4 sm:$0xff]   ;;  %v13536_v0 = vld [vmem:[%s19117_s13 + $0x2f0] ss:$8 sps:$4 sm:$0xff]  }
 0x5ce   : > { %8221 = vmatpush1.bf16.msra.mxu1 %v13470_v37  ;;  %v13541_v60 = vld [vmem:[%s19117_s13 + $0x304] ss:$8 sps:$4 sm:$0xff]   ;;  %v13539_v35 = vld [vmem:[%s19117_s13 + $0x300] ss:$8 sps:$4 sm:$0xff]   ;;  %v13544_v37 = vld [vmem:[%s19117_s13 + $0x314] ss:$8 sps:$4 sm:$0xff]  }
 0x5cf   : > { %8222 = vmatprep.subr.bf16.mxu1 %v13475_v43  ;;  %v13542_v43 = vld [vmem:[%s19117_s13 + $0x310] ss:$8 sps:$4 sm:$0xff]   ;;  %v13553_v54 = vld [vmem:[%s19117_s13 + $0x344] ss:$8 sps:$4 sm:$0xff]  }
 0x5d0   : > { %v13548_v51 = vld [vmem:[%s19117_s13 + $0x330] ss:$8 sps:$4 sm:$0xff]   ;;  %v13559_v50 = vld [vmem:[%s19117_s13 + $0x364] ss:$8 sps:$4 sm:$0xff]  }
 0x5d1   : > { %v13554_v14 = vld [vmem:[%s19117_s13 + $0x350] ss:$8 sps:$4 sm:$0xff]  }
 0x5d2   : > { %8223 = vmatpush1.bf16.msra.mxu1 %v13473_v38  ;;  %v13547_v38 = vld [vmem:[%s19117_s13 + $0x324] ss:$8 sps:$4 sm:$0xff]  }
 0x5d3   : > { %8224 = vmatprep.subr.bf16.mxu1 %v13478_v12  ;;  %v13545_v12 = vld [vmem:[%s19117_s13 + $0x320] ss:$8 sps:$4 sm:$0xff]  }
 0x5d6   : > { %8225 = vmatpush1.bf16.msra.mxu1 %v13476_v27  ;;  %v19696_v27 = vld [vmem:[#allocation58_spill] sm:$0xff] }
 0x5d7   : > { %8226 = vmatprep.subr.bf16.mxu1 %v13481_v30 }
 0x5da   : > { %8227 = vmatpush1.bf16.msra.mxu1 %v13479_v62 }
 0x5db   : > { %8228 = vmatprep.subr.bf16.mxu1 %v13484_v53  ;;  %v13560_v53 = vld [vmem:[%s19117_s13 + $0x370] ss:$8 sps:$4 sm:$0xff]  }
 0x5de   : > { %8229 = vmatpush1.bf16.msra.mxu1 %v13482_v28 }
 0x5df   : > { %8230 = vmatprep.subr.bf16.mxu1 %v13487_v18 }
 0x5e2   : > { %8231 = vmatpush1.bf16.msra.mxu1 %v13485_v22  ;;  %v19697_v22 = vmov 0  }
 0x5e3   : > { %8232 = vmatprep.subr.bf16.mxu1 %v13490_v11 }
 0x5e6   : > { %8233 = vmatpush1.bf16.msra.mxu1 %v13488_v15 }
 0x5e7   : > { %8275 = vmatprep.subr.bf16.mxu1 %v13493_v55 }
 0x5e9   : > { %8235 = vmatmul.mubr.bf16.vlgmr.msra.gmra.mrb[176].mxu1 %v18558_v13  ;;  %v13502_v13 = vld [vmem:[%s19117_s13 + $0x234] ss:$8 sps:$4 sm:$0xff]  }
 0x5ea   : > { %8244 = vmatprep.mubr.bf16.mxu1 %v11372_v17  ;;  %8276 = vmatpush1.bf16.msra.mxu1 %v13491_v31  ;;  %v13503_v17 = vld [vmem:[%s19117_s13 + $0x240] ss:$8 sps:$4 sm:$0xff]  }
 0x5eb   : > { %8277 = vmatprep.subr.bf16.mxu1 %v13496_v61 }
 0x5ee   : > { %8278 = vmatpush1.bf16.msra.mxu1 %v13494_v33 }
 0x5ef   : > { %8279 = vmatprep.subr.bf16.mxu1 %v13499_v16 }
 0x5f1   : > { %8245 = vmatmul.mubr.bf16.gmra.mrb[180].mxu1 %v18568_v34  ;;  %v13508_v34 = vld [vmem:[%s19117_s13 + $0x254] ss:$8 sps:$4 sm:$0xff]  }
 0x5f2   : > { %8254 = vmatprep.mubr.bf16.mxu1 %v11379_v36  ;;  %8280 = vmatpush1.bf16.msra.mxu1 %v13497_v57  ;;  %v13509_v36 = vld [vmem:[%s19117_s13 + $0x260] ss:$8 sps:$4 sm:$0xff]  }
 0x5f3   : > { %8281 = vmatprep.subr.bf16.mxu1 %v13502_v13 }
 0x5f6   : > { %8282 = vmatpush1.bf16.msra.mxu1 %v13500_v56 }
 0x5f7   : > { %8283 = vmatprep.subr.bf16.mxu1 %v13505_v58 }
 0x5f9   : > { %8255 = vmatmul.mubr.bf16.gmra.mrb[184].mxu1 %v18589_v9  ;;  %v13514_v9 = vld [vmem:[%s19117_s13 + $0x274] ss:$8 sps:$4 sm:$0xff]  }
 0x5fa   : > { %8264 = vmatprep.mubr.bf16.mxu1 %v11386_v46  ;;  %8284 = vmatpush1.bf16.msra.mxu1 %v13503_v17  ;;  %v13515_v46 = vld [vmem:[%s19117_s13 + $0x280] ss:$8 sps:$4 sm:$0xff]  }
 0x5fb   : > { %8285 = vmatprep.subr.bf16.mxu1 %v13508_v34 }
 0x5fe   : > { %8286 = vmatpush1.bf16.msra.mxu1 %v13506_v29 }
 0x5ff   : > { %8287 = vmatprep.subr.bf16.mxu1 %v13511_v63 }
 0x601   : > { %8265 = vmatmul.mubr.bf16.gmra.mrb[188].mxu1 %v18614_v45  ;;  %v13520_v45 = vld [vmem:[%s19117_s13 + $0x294] ss:$8 sps:$4 sm:$0xff]  }
 0x602   : > { %8288 = vmatpush1.bf16.msra.mxu1 %v13509_v36  ;;  %8307 = vmatprep.mubr.bf16.mxu1 %v11367_v20  ;;  %v13521_v20 = vld [vmem:[%s19117_s13 + $0x2a0] ss:$8 sps:$4 sm:$0xff]  }
 0x603   : > { %8289 = vmatprep.subr.bf16.mxu1 %v13514_v9 }
 0x606   : > { %8290 = vmatpush1.bf16.msra.mxu1 %v13512_v26 }
 0x607   : > { %8291 = vmatprep.subr.bf16.mxu1 %v13517_v24 }
 0x60a   : > { %8292 = vmatpush1.bf16.msra.mxu1 %v13515_v46 }
 0x60b   : > { %8293 = vmatprep.subr.bf16.mxu1 %v13520_v45 }
 0x60e   : > { %8294 = vmatpush1.bf16.msra.mxu1 %v13518_v3 }
 0x60f   : > { %8295 = vmatprep.subr.bf16.mxu1 %v13523_v41 }
 0x612   : > { %8296 = vmatpush1.bf16.msra.mxu1 %v13521_v20 }
 0x613   : > { %8297 = vmatprep.subr.bf16.mxu1 %v13526_v6 }
 0x616   : > { %8298 = vmatpush1.bf16.msra.mxu1 %v13524_v42 }
 0x617   : > { %8299 = vmatprep.subr.bf16.mxu1 %v13529_v7 }
 0x61a   : > { %8300 = vmatpush1.bf16.msra.mxu1 %v13527_v40 }
 0x61b   : > { %8301 = vmatprep.subr.bf16.mxu1 %v13532_v10 }
 0x61e   : > { %8302 = vmatpush1.bf16.msra.mxu1 %v13530_v49 }
 0x61f   : > { %8303 = vmatprep.subr.bf16.mxu1 %v13535_v25 }
 0x622   : > { %8304 = vmatpush1.bf16.msra.mxu1 %v13533_v59 }
 0x623   : > { %8305 = vmatprep.subr.bf16.mxu1 %v13538_v1 }
 0x626   : > { %8306 = vmatpush1.bf16.msra.mxu1 %v13536_v0 }
 0x627   : > { %8348 = vmatprep.subr.bf16.mxu1 %v13541_v60 }
 0x629   : > { %8308 = vmatmul.mubr.bf16.vlgmr.msra.gmra.mrb[176].mxu1 %v18626_v47  ;;  %v13550_v47 = vld [vmem:[%s19117_s13 + $0x334] ss:$8 sps:$4 sm:$0xff]  }
 0x62a   : > { %8317 = vmatprep.mubr.bf16.mxu1 %v11374_v8  ;;  %8349 = vmatpush1.bf16.msra.mxu1 %v13539_v35  ;;  %v13551_v8 = vld [vmem:[%s19117_s13 + $0x340] ss:$8 sps:$4 sm:$0xff]  }
 0x62b   : > { %8350 = vmatprep.subr.bf16.mxu1 %v13544_v37 }
 0x62e   : > { %8351 = vmatpush1.bf16.msra.mxu1 %v13542_v43 }
 0x62f   : > { %8352 = vmatprep.subr.bf16.mxu1 %v13547_v38 }
 0x631   : > { %8318 = vmatmul.mubr.bf16.gmra.mrb[180].mxu1 %v18648_v19  ;;  %v13556_v19 = vld [vmem:[%s19117_s13 + $0x354] ss:$8 sps:$4 sm:$0xff]  }
 0x632   : > { %8327 = vmatprep.mubr.bf16.mxu1 %v11381_v52  ;;  %8353 = vmatpush1.bf16.msra.mxu1 %v13545_v12  ;;  %v9713_v52 = vld [vmem:[%s19120_s16] sm:$0x3] }
 0x633   : > { %8354 = vmatprep.subr.bf16.mxu1 %v13550_v47  ;;  %v18919_v48 = vrot.slane %v9713_v52, %v19695_v4  ;;  %v18925_v30 = vrot.slane %v9713_v52, %v19696_v27 }
 0x636   : > { %8355 = vmatpush1.bf16.msra.mxu1 %v13548_v51 }
 0x637   : > { %8356 = vmatprep.subr.bf16.mxu1 %v13553_v54 }
 0x639   : > { %8328 = vmatmul.mubr.bf16.gmra.mrb[184].mxu1 %v18669_v44  ;;  %v13557_v44 = vld [vmem:[%s19117_s13 + $0x360] ss:$8 sps:$4 sm:$0xff]  }
 0x63a   : > { %8337 = vmatprep.mubr.bf16.mxu1 %v11388_v23  ;;  %8357 = vmatpush1.bf16.msra.mxu1 %v13551_v8  ;;  %v13562_v23 = vld [vmem:[%s19117_s13 + $0x374] ss:$8 sps:$4 sm:$0xff]  }
 0x63b   : > { %8358 = vmatprep.subr.bf16.mxu1 %v13556_v19 }
 0x63e   : > { %8359 = vmatpush1.bf16.msra.mxu1 %v13554_v14 }
 0x63f   : > { %8360 = vmatprep.subr.bf16.mxu1 %v13559_v50 }
 0x641   : > { %8338 = vmatmul.mubr.bf16.gmra.mrb[188].mxu1 %v18688_v32 }
 0x642   : > { %8361 = vmatpush1.bf16.msra.mxu1 %v13557_v44  ;;  %8380 = vmatprep.mubr.bf16.mxu1 %v19697_v22 }
 0x643   : > { %8362 = vmatprep.subr.bf16.mxu1 %v13562_v23 }
 0x646   : > { %8363 = vmatpush1.bf16.msra.mxu1 %v13560_v53 }
 0x649   : > { %8381 = vmatmul.mubr.bf16.vlgmr.msra.gmra.mrb[176].mxu1 %v18698_v2 }
 0x64a   : > { %8390 = vmatprep.mubr.bf16.mxu1 %v19697_v22 }
 0x64c   : > { %v10377_v62 = vpop.f32.mrb[96].mxu0 }
 0x64d   : > { %v12334_v28 = vadd.f32 %v10377_v62, %v18919_v48  ;;  %v10379_v18 = vpop.f32.mrb[97].mxu0 }
 0x64e   : > { %v12335_v11 = vadd.f32 %v10379_v18, %v18925_v30  ;;  %v10381_v15 = vpop.f32.mrb[98].mxu0 }
 0x64f   : > { %v10416_v55 = vmax.f32 %v12334_v28, 0.0  ;;  %v12336_v31 = vadd.f32 %v10381_v15, %v18919_v48  ;;  %v10383_v61 = vpop.f32.mrb[99].mxu0 }
 0x650   : > { %v10417_v32 = vmax.f32 %v12335_v11, 0.0  ;;  %v12337_v33 = vadd.f32 %v10383_v61, %v18925_v30 }
 0x651   : > { %10521 = vrot.lane.b32.xlu0 %v10416_v55, %s13664_s27  ;;  %v10418_v16 = vmax.f32 %v12336_v31, 0.0  ;;  %8391 = vmatmul.mubr.bf16.gmra.mrb[180].mxu1 %v18700_v39 }
 0x652   : > { %10523 = vrot.lane.b32.xlu1 %v10417_v32, %s13664_s27  ;;  %v10419_v57 = vmax.f32 %v12337_v33, 0.0  ;;  %8400 = vmatprep.mubr.bf16.mxu1 %v19697_v22 }
 0x654   : > { %v10387_v13 = vpop.f32.mrb[100].mxu0 }
 0x655   : > { %10525 = vrot.lane.b32.xlu0 %v10418_v16, %s13664_s27  ;;  %v12338_v56 = vadd.f32 %v10387_v13, %v18919_v48  ;;  %v10389_v58 = vpop.f32.mrb[101].mxu0  ;;  %v7501_v16 = vld [vmem:[%s19118_s14] sm:$0x3] }
 0x656   : > { %10527 = vrot.lane.b32.xlu1 %v10419_v57, %s13664_s27  ;;  %v12339_v17 = vadd.f32 %v10389_v58, %v18925_v30  ;;  %v10391_v34 = vpop.f32.mrb[102].mxu0  ;;  %v19003_v57 = vrot.slane %v7501_v16, %v19695_v4  ;;  %v19006_v13 = vrot.slane %v7501_v16, %v19696_v27 }
 0x657   : > { %v10420_v29 = vmax.f32 %v12338_v56, 0.0  ;;  %v12340_v63 = vadd.f32 %v10391_v34, %v18919_v48  ;;  %v10393_v36 = vpop.f32.mrb[103].mxu0 }
 0x658   : > { %v10421_v9 = vmax.f32 %v12339_v17, 0.0  ;;  %v12341_v2 = vadd.f32 %v10393_v36, %v18925_v30 }
 0x659   : > { %v10422_v26 = vmax.f32 %v12340_v63, 0.0  ;;  %10529 = vrot.lane.b32.xlu0 %v10420_v29, %s13664_s27  ;;  %8401 = vmatmul.mubr.bf16.gmra.mrb[184].mxu1 %v18706_v21 }
 0x65a   : > { %v10423_v24 = vmax.f32 %v12341_v2, 0.0  ;;  %10531 = vrot.lane.b32.xlu1 %v10421_v9, %s13664_s27  ;;  %8410 = vmatprep.mubr.bf16.mxu1 %v19697_v22 }
 0x65c   : > { %v10397_v46 = vpop.f32.mrb[104].mxu0 }
 0x65d   : > { %v12342_v45 = vadd.f32 %v10397_v46, %v18919_v48  ;;  %v10399_v3 = vpop.f32.mrb[105].mxu0  ;;  %10533 = vrot.lane.b32.xlu0 %v10422_v26, %s13664_s27 }
 0x65e   : > { %v12343_v41 = vadd.f32 %v10399_v3, %v18925_v30  ;;  %10535 = vrot.lane.b32.xlu1 %v10423_v24, %s13664_s27  ;;  %v10401_v20 = vpop.f32.mrb[106].mxu0 }
 0x65f   : > { %v10424_v6 = vmax.f32 %v12342_v45, 0.0  ;;  %v12344_v42 = vadd.f32 %v10401_v20, %v18919_v48  ;;  %v10403_v7 = vpop.f32.mrb[107].mxu0 }
 0x660   : > { %v10425_v40 = vmax.f32 %v12343_v41, 0.0  ;;  %v12345_v39 = vadd.f32 %v10403_v7, %v18925_v30 }
 0x661   : > { %v10426_v10 = vmax.f32 %v12344_v42, 0.0  ;;  %10537 = vrot.lane.b32.xlu0 %v10424_v6, %s13664_s27  ;;  %8411 = vmatmul.mubr.bf16.gmra.mrb[188].mxu1 %v18708_v5 }
 0x662   : > { %v10427_v49 = vmax.f32 %v12345_v39, 0.0  ;;  %10539 = vrot.lane.b32.xlu1 %v10425_v40, %s13664_s27 }
 0x664   : > { %v10407_v25 = vpop.f32.mrb[108].mxu0 }
 0x665   : > { %v12346_v59 = vadd.f32 %v10407_v25, %v18919_v48  ;;  %v10409_v1 = vpop.f32.mrb[109].mxu0  ;;  %10541 = vrot.lane.b32.xlu0 %v10426_v10, %s13664_s27 }
 0x666   : > { %v12347_v0 = vadd.f32 %v10409_v1, %v18925_v30  ;;  %10543 = vrot.lane.b32.xlu1 %v10427_v49, %s13664_s27  ;;  %v10411_v60 = vpop.f32.mrb[110].mxu0 }
 0x667   : > { %v10428_v35 = vmax.f32 %v12346_v59, 0.0  ;;  %v12348_v37 = vadd.f32 %v10411_v60, %v18919_v48  ;;  %v10413_v43 = vpop.f32.mrb[111].mxu0 }
 0x668   : > { %v10429_v38 = vmax.f32 %v12347_v0, 0.0  ;;  %v12349_v21 = vadd.f32 %v10413_v43, %v18925_v30 }
 0x669   : > { %v10430_v12 = vmax.f32 %v12348_v37, 0.0  ;;  %10545 = vrot.lane.b32.xlu0 %v10428_v35, %s13664_s27 }
 0x66a   : > { %v10431_v47 = vmax.f32 %v12349_v21, 0.0  ;;  %10547 = vrot.lane.b32.xlu1 %v10429_v38, %s13664_s27 }
 0x66d   : > { %10549 = vrot.lane.b32.xlu0 %v10430_v12, %s13664_s27 }
 0x66e   : > { %10551 = vrot.lane.b32.xlu1 %v10431_v47, %s13664_s27 }
 0x6c3   : > { %v10522_v51 = vpop.permute.xlu0 %10521 }
 0x6c4   : > { %v10524_v54 = vpop.permute.xlu1 %10523 }
 0x6c5   : > { %v10553_v8 = vsel %vm10480_vm9, %v10522_v51, %v10524_v54 }
 0x6c6   : > { %10598 = vst [vmem:[%s15244_s19 + $0x28] sm:$0xff] %v10553_v8 }
 0x6c7   : > { %v10526_v19 = vpop.permute.xlu0 %10525 }
 0x6c8   : > { %v10528_v14 = vpop.permute.xlu1 %10527 }
 0x6c9   : > { %v10554_v50 = vsel %vm10480_vm9, %v10526_v19, %v10528_v14 }
 0x6ca   : > { %10604 = vst [vmem:[%s15244_s19 + $0x58] sm:$0xff] %v10554_v50 }
 0x6cb   : > { %v10530_v52 = vpop.permute.xlu0 %10529 }
 0x6cc   : > { %v10532_v44 = vpop.permute.xlu1 %10531 }
 0x6cd   : > { %v10555_v5 = vsel %vm10480_vm9, %v10530_v52, %v10532_v44 }
 0x6ce   : > { %10610 = vst [vmem:[%s15244_s19 + $0x88] sm:$0xff] %v10555_v5 }
 0x6cf   : > { %v10534_v48 = vpop.permute.xlu0 %10533 }
 0x6d0   : > { %v10536_v23 = vpop.permute.xlu1 %10535 }
 0x6d1   : > { %v10556_v30 = vsel %vm10480_vm9, %v10534_v48, %v10536_v23 }
 0x6d2   : > { %10616 = vst [vmem:[%s15244_s19 + $0xb8] sm:$0xff] %v10556_v30 }
 0x6d3   : > { %v18979_v62 = vpop.permute.xlu0 %10537 }
 0x6d4   : > { %v10540_v53 = vpop.permute.xlu1 %10539 }
 0x6d5   : > { %v10557_v28 = vsel %vm10480_vm9, %v18979_v62, %v10540_v53 }
 0x6d6   : > { %10622 = vst [vmem:[%s15244_s19 + $0xe8] sm:$0xff] %v10557_v28 }
 0x6d7   : > { %v18984_v18 = vpop.permute.xlu0 %10541 }
 0x6d8   : > { %v10544_v22 = vpop.permute.xlu1 %10543 }
 0x6d9   : > { %v10558_v11 = vsel %vm10480_vm9, %v18984_v18, %v10544_v22 }
 0x6da   : > { %10628 = vst [vmem:[%s15244_s19 + $0x118] sm:$0xff] %v10558_v11 }
 0x6db   : > { %v18989_v15 = vpop.permute.xlu0 %10545 }
 0x6dc   : > { %v10548_v55 = vpop.permute.xlu1 %10547 }
 0x6dd   : > { %v10559_v31 = vsel %vm10480_vm9, %v18989_v15, %v10548_v55 }
 0x6de   : > { %10634 = vst [vmem:[%s15244_s19 + $0x148] sm:$0xff] %v10559_v31 }
 0x6df   : > { %v18994_v61 = vpop.permute.xlu0 %10549 }
 0x6e0   : > { %v10552_v32 = vpop.permute.xlu1 %10551 }
 0x6e1   : > { %v10560_v33 = vsel %vm10480_vm9, %v18994_v61, %v10552_v32 }
 0x6e2   : > { %10640 = vst [vmem:[%s15244_s19 + $0x178] sm:$0xff] %v10560_v33 }
 0x71c   : > { %v8382_v56 = vpop.f32.mrb[176].mxu1 }
 0x71d   : > { %v12318_v58 = vadd.f32 %v8382_v56, %v19003_v57  ;;  %v8384_v17 = vpop.f32.mrb[177].mxu1 }
 0x71e   : > { %v12319_v34 = vadd.f32 %v8384_v17, %v19006_v13  ;;  %v8386_v29 = vpop.f32.mrb[178].mxu1 }
 0x71f   : > { %v8421_v63 = vmax.f32 %v12318_v58, 0.0  ;;  %v12320_v36 = vadd.f32 %v8386_v29, %v19003_v57  ;;  %v8388_v9 = vpop.f32.mrb[179].mxu1 }
 0x720   : > { %v8422_v2 = vmax.f32 %v12319_v34, 0.0  ;;  %v12321_v4 = vadd.f32 %v8388_v9, %v19006_v13 }
 0x721   : > { %10596 = vst [vmem:[%s15244_s19 + $0x18] sm:$0xff] %v8421_v63  ;;  %v8423_v26 = vmax.f32 %v12320_v36, 0.0 }
 0x722   : > { %v10585_v27 = vsel %vm10480_vm9, %v8422_v2, %v10522_v51  ;;  %v8424_v24 = vmax.f32 %v12321_v4, 0.0 }
 0x723   : > { %10597 = vst [vmem:[%s15244_s19 + $0x20] sm:$0xff] %v10585_v27  ;;  %10602 = vst [vmem:[%s15244_s19 + $0x48] sm:$0xff] %v8423_v26 }
 0x724   : > { %v10586_v46 = vsel %vm10480_vm9, %v8424_v24, %v10526_v19  ;;  %v8392_v45 = vpop.f32.mrb[180].mxu1 }
 0x725   : > { %10603 = vst [vmem:[%s15244_s19 + $0x50] sm:$0xff] %v10586_v46  ;;  %v12322_v3 = vadd.f32 %v8392_v45, %v19003_v57  ;;  %v8394_v41 = vpop.f32.mrb[181].mxu1 }
 0x726   : > { %v12323_v20 = vadd.f32 %v8394_v41, %v19006_v13  ;;  %v8396_v6 = vpop.f32.mrb[182].mxu1 }
 0x727   : > { %v8425_v42 = vmax.f32 %v12322_v3, 0.0  ;;  %v12324_v7 = vadd.f32 %v8396_v6, %v19003_v57  ;;  %v8398_v40 = vpop.f32.mrb[183].mxu1 }
 0x728   : > { %v8426_v39 = vmax.f32 %v12323_v20, 0.0  ;;  %v12325_v10 = vadd.f32 %v8398_v40, %v19006_v13 }
 0x729   : > { %10608 = vst [vmem:[%s15244_s19 + $0x78] sm:$0xff] %v8425_v42  ;;  %v8427_v49 = vmax.f32 %v12324_v7, 0.0 }
 0x72a   : > { %v10587_v25 = vsel %vm10480_vm9, %v8426_v39, %v10530_v52  ;;  %v8428_v59 = vmax.f32 %v12325_v10, 0.0 }
 0x72b   : > { %10609 = vst [vmem:[%s15244_s19 + $0x80] sm:$0xff] %v10587_v25  ;;  %10614 = vst [vmem:[%s15244_s19 + $0xa8] sm:$0xff] %v8427_v49 }
 0x72c   : > { %v10588_v1 = vsel %vm10480_vm9, %v8428_v59, %v10534_v48  ;;  %v8402_v0 = vpop.f32.mrb[184].mxu1 }
 0x72d   : > { %10615 = vst [vmem:[%s15244_s19 + $0xb0] sm:$0xff] %v10588_v1  ;;  %v12326_v60 = vadd.f32 %v8402_v0, %v19003_v57  ;;  %v8404_v35 = vpop.f32.mrb[185].mxu1 }
 0x72e   : > { %v12327_v37 = vadd.f32 %v8404_v35, %v19006_v13  ;;  %v8406_v43 = vpop.f32.mrb[186].mxu1 }
 0x72f   : > { %v8429_v38 = vmax.f32 %v12326_v60, 0.0  ;;  %v12328_v21 = vadd.f32 %v8406_v43, %v19003_v57  ;;  %v8408_v12 = vpop.f32.mrb[187].mxu1 }
 0x730   : > { %v8430_v47 = vmax.f32 %v12327_v37, 0.0  ;;  %v12329_v51 = vadd.f32 %v8408_v12, %v19006_v13 }
 0x731   : > { %10620 = vst [vmem:[%s15244_s19 + $0xd8] sm:$0xff] %v8429_v38  ;;  %v8431_v54 = vmax.f32 %v12328_v21, 0.0 }
 0x732   : > { %v10589_v8 = vsel %vm10480_vm9, %v8430_v47, %v18979_v62  ;;  %v8432_v19 = vmax.f32 %v12329_v51, 0.0 }
 0x733   : > { %10621 = vst [vmem:[%s15244_s19 + $0xe0] sm:$0xff] %v10589_v8  ;;  %10626 = vst [vmem:[%s15244_s19 + $0x108] sm:$0xff] %v8431_v54 }
 0x734   : > { %v10590_v14 = vsel %vm10480_vm9, %v8432_v19, %v18984_v18  ;;  %v8412_v50 = vpop.f32.mrb[188].mxu1 }
 0x735   : > { %10627 = vst [vmem:[%s15244_s19 + $0x110] sm:$0xff] %v10590_v14  ;;  %v12330_v52 = vadd.f32 %v8412_v50, %v19003_v57  ;;  %v8414_v44 = vpop.f32.mrb[189].mxu1 }
 0x736   : > { %v12331_v5 = vadd.f32 %v8414_v44, %v19006_v13  ;;  %v8416_v48 = vpop.f32.mrb[190].mxu1 }
 0x737   : > { %v8433_v23 = vmax.f32 %v12330_v52, 0.0  ;;  %v12332_v30 = vadd.f32 %v8416_v48, %v19003_v57  ;;  %v8418_v62 = vpop.f32.mrb[191].mxu1 }
 0x738   : > { %v8434_v53 = vmax.f32 %v12331_v5, 0.0  ;;  %v12333_v28 = vadd.f32 %v8418_v62, %v19006_v13 }
 0x739   : > { %10632 = vst [vmem:[%s15244_s19 + $0x138] sm:$0xff] %v8433_v23  ;;  %v8435_v18 = vmax.f32 %v12332_v30, 0.0 }
 0x73a   : > { %v10591_v22 = vsel %vm10480_vm9, %v8434_v53, %v18989_v15  ;;  %v8436_v11 = vmax.f32 %v12333_v28, 0.0 }
 0x73b   : > { %10633 = vst [vmem:[%s15244_s19 + $0x140] sm:$0xff] %v10591_v22  ;;  %10638 = vst [vmem:[%s15244_s19 + $0x168] sm:$0xff] %v8435_v18 }
 0x73c   : > { %v10592_v55 = vsel %vm10480_vm9, %v8436_v11, %v18994_v61 }
 0x73d   : > { %10639 = vst [vmem:[%s15244_s19 + $0x170] sm:$0xff] %v10592_v55 }
 0x73e   : > { %13611 = shalt.err (!%p13608_p3)
}
 0x73f   : > { %s13612_s19 = scalar_lea.hbm %s19052_s28, 6144  ;;  %s13616_s21 = scalar_lea.hbm %s19121_s17, 12288 }
 0x740   : > { %p13613_p4 = scmp.ne.s32.totalorder %s19052_s28, %s13612_s19  ;;  %p13617_p9 = scmp.lt.u32.totalorder %s19052_s28, %s19121_s17 }
 0x741   : > { %p13618_p10 = scmp.lt.u32.totalorder %s13616_s21, %s13612_s19  ;;  %p13620_p12 = scmp.lt.u32.totalorder %s13612_s19, %s19052_s28 }
 0x742   : > { %p13614_p7 = pnand %p13613_p4, %p13796_p5 }
 0x743   : > { %p13619_p11 = por %p13618_p10, %p13617_p9 }
 0x744   : > { %p13615_p8 = pneg %p13614_p7 }
 0x745   : > { %p13621_p13 = por %p13620_p12, %p13619_p11 }
 0x747   : > { %p13622_p0 = pnand %p13621_p13, %p13615_p8 }
 0x749   : > { %13625 = shalt.err (!%p13622_p0)
}
 0x74a   : > { %s13666_s18 = smov 768   ;;  %s13667_s22 = smov 48  }
 0x74b   : > { %12545 = dma.vmem_to_hbm [thread:$0]  (%p13796_p5), %s19056_s20, 6144, %s19052_s28, %s19063_s30, %s13666_s18, %s13666_s18, %s13667_s22  }
 0x74c PF: > { %s19699_s3 = sld [smem:[#allocation7_spill]]  ;;  %s19700_s4 = sld [smem:[#allocation5_spill]] }
 0x752   : > { %p12551_p1 = scmp.ge.s32.totalorder %s19699_s3, 2  ;;  %s10670_s27 = sand.u32 1, %s19700_s4  }
 0x753   : > { %s10671_s19 = scalar_lea.sflag [#allocation3], %s10670_s27 }
 0x754   : > { %p12548_p2 = pnand %p12551_p1, %p13800_p6 }
 0x756   : > { %13643 = dma.done.wait (!%p12548_p2), %s10671_s19, 6144  }
 0x757   : > { %13645 = vsyncadd (!%p12548_p2), %s10671_s19, 4294961152  ;;  %s19702_s27 = sld [smem:[#allocation8_spill]]  ;;  %s19703_s26 = sld [smem:[#allocation6_spill]] }
 0x758   : > { %s19704_s21 = sld [smem:[#allocation9_spill]]  ;;  %s19705_s24 = smov %s13652_s25 }
 0x75d   : > { %p27_p3 = scmp.ge.s32.totalorder %s19702_s27, 4   ;;  %s19706_s25 = smov %s19703_s26 }
 0x75e   : > { %s19707_s26 = smov %s19704_s21 }
 0x75f   :  { %29 = sbr.rel (!%p27_p3) target bundleno = 8 (0x8), region = 123 }
 0x766   :  { %10676 = vsyncpa [#allocation3], 1 }
 0x767   :  { %10678 = vsyncpa [#allocation3 + $0x1], 1 }

</bundles_post_ra>
